<compile_context>
chip_gen: v7x
topology: tpu7x:2x2x1
jax: 0.10.0
libtpu: 0.0.40
codegen_flags: <defaults>
</compile_context>

<pallas_src>
import math

import jax
import jax.numpy as jnp
from jax.experimental import pallas as pl
from jax.experimental.pallas import tpu as pltpu


# ----------------------------------------------------------------------------
# In-kernel helpers (everything stays in VMEM)
# ----------------------------------------------------------------------------
def _zero_border(pad_ref):
    """Zero only the 1-pixel border of a (Hp, Wp, C) pad scratch (4 strips)."""
    Hp, Wp, C = pad_ref.shape
    zrow = jnp.zeros((Wp, C), jnp.float32)
    zcol = jnp.zeros((Hp - 2, 1, C), jnp.float32)
    pad_ref[0, :, :] = zrow
    pad_ref[Hp - 1, :, :] = zrow
    pad_ref[1:Hp - 1, 0:1, :] = zcol
    pad_ref[1:Hp - 1, Wp - 1:Wp, :] = zcol


def _store_interior(pad_ref, y_flat, H, W):
    """Write a flat (H*W, C) value into the interior of a pad scratch."""
    C = y_flat.shape[-1]
    if W % 8 == 0:
        pad_ref[1:H + 1, 1:W + 1, :] = y_flat.reshape(H, W, C)
    else:  # tiny 4x4 decoder maps: per-row stores avoid a sublane repack
        for r in range(H):
            pad_ref[1 + r, 1:W + 1, :] = y_flat[r * W:(r + 1) * W, :]


def _conv3x3(pad_ref, w_ref, b, relu=True):
    """Conv2d(k=3, pad=1): one im2col slab + one MXU dot.  Returns (H*W, Cout)."""
    Hp, Wp, cin = pad_ref.shape
    H, W = Hp - 2, Wp - 2
    cols = []
    for dy in range(3):
        for dx in range(3):
            cols.append(pad_ref[dy:dy + H, dx:dx + W, :].reshape(H * W, cin))
    slab = jnp.concatenate(cols, axis=-1)                       # (H*W, 9*cin)
    y = jnp.dot(slab, w_ref[...], preferred_element_type=jnp.float32) + b
    return jnp.maximum(y, 0.0) if relu else y


def _conv3x3_cat(pad_a_ref, pad_b_ref, w_ref, b):
    """3x3 conv over channel-concat([a, b]) (a=x5u first, b=x3 second, matching
    torch.cat([x5, x3], dim=1)) without materializing the concat."""
    Hp, Wp, ca = pad_a_ref.shape
    cb = pad_b_ref.shape[2]
    H, W = Hp - 2, Wp - 2
    cols = []
    for dy in range(3):
        for dx in range(3):
            cols.append(pad_a_ref[dy:dy + H, dx:dx + W, :].reshape(H * W, ca))
            cols.append(pad_b_ref[dy:dy + H, dx:dx + W, :].reshape(H * W, cb))
    slab = jnp.concatenate(cols, axis=-1)                       # (H*W, 9*(ca+cb))
    y = jnp.dot(slab, w_ref[...], preferred_element_type=jnp.float32) + b
    return jnp.maximum(y, 0.0)


def _maxpool2x2_from_pad(pad_ref, H, W):
    """MaxPool2d(2) as 4 strided loads from a pad-scratch interior."""
    h, w = H // 2, W // 2
    p00 = pad_ref[pl.ds(1, h, stride=2), pl.ds(1, w, stride=2), :]
    p01 = pad_ref[pl.ds(1, h, stride=2), pl.ds(2, w, stride=2), :]
    p10 = pad_ref[pl.ds(2, h, stride=2), pl.ds(1, w, stride=2), :]
    p11 = pad_ref[pl.ds(2, h, stride=2), pl.ds(2, w, stride=2), :]
    return jnp.maximum(jnp.maximum(p00, p01), jnp.maximum(p10, p11))


# ----------------------------------------------------------------------------
# The fused kernel: entire StudentUNet forward for one image per grid step
# ----------------------------------------------------------------------------
def _unet_kernel(x_ref,
                 w_e1a, w_e1b, w_e2a, w_e2b, w_d1a, w_d1b,
                 w_up1, w_d2a, w_d2b, w_upf, b_ref,
                 o_ref,
                 p_a, p_b, p_c, p_d, p_e, p_f):
    H, W = x_ref.shape[1], x_ref.shape[2]
    h2, w2, h4, w4 = H // 2, W // 2, H // 4, W // 4
    OC = w_upf.shape[1] // 4

    # Borders stay zero for the whole step; interiors are always overwritten.
    for p in (p_a, p_b, p_c, p_d, p_e, p_f):
        _zero_border(p)

    def bias(row, n):
        return b_ref[row:row + 1, :n]

    # ---------------- encoder1 (DoubleConv in->32) + pool1 ------------------
    p_a[1:H + 1, 1:W + 1, :] = x_ref[0]
    y = _conv3x3(p_a, w_e1a, bias(0, 32))                       # (H*W, 32)
    _store_interior(p_b, y, H, W)
    x1 = _conv3x3(p_b, w_e1b, bias(1, 32))                      # (H*W, 32)
    _store_interior(p_b, x1, H, W)                              # p_b = pool stage
    x2 = _maxpool2x2_from_pad(p_b, H, W)                        # (h2, w2, 32)

    # ---------------- encoder2 (DoubleConv 32->64) + pool2 ------------------
    p_c[1:h2 + 1, 1:w2 + 1, :] = x2
    y = _conv3x3(p_c, w_e2a, bias(2, 64))                       # (h2*w2, 64)
    _store_interior(p_d, y, h2, w2)
    x3 = _conv3x3(p_d, w_e2b, bias(3, 64))                      # (h2*w2, 64)
    _store_interior(p_d, x3, h2, w2)                            # p_d keeps x3 (skip)
    x4 = _maxpool2x2_from_pad(p_d, h2, w2)                      # (h4, w4, 64)

    # ---------------- decoder1 (DoubleConv 64->32) --------------------------
    p_e[1:h4 + 1, 1:w4 + 1, :] = x4
    y = _conv3x3(p_e, w_d1a, bias(4, 32))                       # (h4*w4, 32)
    _store_interior(p_f, y, h4, w4)
    x5 = _conv3x3(p_f, w_d1b, bias(5, 32))                      # (h4*w4, 32)

    # ---------------- up1: ConvTranspose(32->32, k=2, s=2) ------------------
    # One K=32 x N=128 dot for all 4 phases, then 2*h4 interleaved row stores
    # straight into the padded scratch that decoder2 reads.
    yu = jnp.dot(x5, w_up1[...], preferred_element_type=jnp.float32) + bias(6, 128)
    for i in range(h4):
        for dy in range(2):
            a0 = yu[i * w4:(i + 1) * w4, (2 * dy) * 32:(2 * dy + 1) * 32]
            a1 = yu[i * w4:(i + 1) * w4, (2 * dy + 1) * 32:(2 * dy + 2) * 32]
            row = jnp.stack([a0, a1], axis=1).reshape(2 * w4, 32)
            p_c[1 + 2 * i + dy, 1:1 + 2 * w4, :] = row

    # ---------------- decoder2 (DoubleConv on concat([x5u, x3])) ------------
    y = _conv3x3_cat(p_c, p_d, w_d2a, bias(7, 32))              # (h2*w2, 32)
    _store_interior(p_c, y, h2, w2)
    x7 = _conv3x3(p_c, w_d2b, bias(8, 32))                      # (h2*w2, 32)

    # ---------------- up2 + final 1x1 conv (folded at init), NHWC out -------
    z = jnp.dot(x7, w_upf[...], preferred_element_type=jnp.float32) + bias(9, 4 * OC)
    for i in range(h2):
        for dy in range(2):
            a0 = z[i * w2:(i + 1) * w2, (2 * dy) * OC:(2 * dy + 1) * OC]
            a1 = z[i * w2:(i + 1) * w2, (2 * dy + 1) * OC:(2 * dy + 2) * OC]
            row = jnp.stack([a0, a1], axis=1).reshape(2 * w2, OC)
            o_ref[0, 2 * i + dy, :, :] = row


# ----------------------------------------------------------------------------
# Parameter init (PyTorch-style shapes/bounds) + one-time kernel packing
# ----------------------------------------------------------------------------
def _init_conv2d(key, cout, cin, kh, kw):
    k1, k2 = jax.random.split(key)
    bound = 1.0 / math.sqrt(cin * kh * kw)
    w = jax.random.uniform(k1, (cout, cin, kh, kw), jnp.float32, -bound, bound)
    b = jax.random.uniform(k2, (cout,), jnp.float32, -bound, bound)
    return w, b


def _init_convT2d(key, cin, cout, kh, kw):
    k1, k2 = jax.random.split(key)
    bound = 1.0 / math.sqrt(cout * kh * kw)
    w = jax.random.uniform(k1, (cin, cout, kh, kw), jnp.float32, -bound, bound)
    b = jax.random.uniform(k2, (cout,), jnp.float32, -bound, bound)
    return w, b


def _pack_conv3x3(w):
    """(cout, cin, 3, 3) -> (9*cin, cout); row = (dy*3+dx)*cin + c (tap-major)."""
    cout, cin = w.shape[0], w.shape[1]
    return jnp.transpose(w, (2, 3, 1, 0)).reshape(9 * cin, cout)


def init_student_unet_params(key, in_channels, out_channels):
    ks = jax.random.split(key, 10)
    w_e1a, b_e1a = _init_conv2d(ks[0], 32, in_channels, 3, 3)
    w_e1b, b_e1b = _init_conv2d(ks[1], 32, 32, 3, 3)
    w_e2a, b_e2a = _init_conv2d(ks[2], 64, 32, 3, 3)
    w_e2b, b_e2b = _init_conv2d(ks[3], 64, 64, 3, 3)
    w_d1a, b_d1a = _init_conv2d(ks[4], 32, 64, 3, 3)
    w_d1b, b_d1b = _init_conv2d(ks[5], 32, 32, 3, 3)
    w_up1, b_up1 = _init_convT2d(ks[6], 32, 32, 2, 2)
    w_d2a, b_d2a = _init_conv2d(ks[7], 32, 96, 3, 3)          # concat = [x5u, x3]
    w_d2b, b_d2b = _init_conv2d(ks[8], 32, 32, 3, 3)
    w_up2, b_up2 = _init_convT2d(ks[9], 32, 16, 2, 2)
    w_fin, b_fin = _init_conv2d(jax.random.fold_in(key, 99), out_channels, 16, 1, 1)

    # Fold up2 (ConvTranspose 32->16, k2 s2) with the final 1x1 conv (linear).
    wf = w_fin.reshape(out_channels, 16)                        # (OC, 16)
    wu = jnp.transpose(w_up2, (0, 2, 3, 1))                     # (32, 2, 2, 16)
    w_upf = jnp.einsum('cdeo,ko->cdek', wu, wf).reshape(32, 4 * out_channels)
    b_upf = wf @ b_up2 + b_fin                                  # (OC,)

    def brow(b):
        return jnp.pad(b, (0, 128 - b.shape[0]))

    return {
        "w_e1a": _pack_conv3x3(w_e1a), "w_e1b": _pack_conv3x3(w_e1b),
        "w_e2a": _pack_conv3x3(w_e2a), "w_e2b": _pack_conv3x3(w_e2b),
        "w_d1a": _pack_conv3x3(w_d1a), "w_d1b": _pack_conv3x3(w_d1b),
        # up1: column = (dy*2+dx)*32 + out_channel
        "w_up1": jnp.transpose(w_up1, (0, 2, 3, 1)).reshape(32, 4 * 32),
        "w_d2a": _pack_conv3x3(w_d2a), "w_d2b": _pack_conv3x3(w_d2b),
        "w_upf": w_upf,
        "bias": jnp.stack([
            brow(b_e1a), brow(b_e1b), brow(b_e2a), brow(b_e2b),
            brow(b_d1a), brow(b_d1b), brow(jnp.tile(b_up1, 4)),
            brow(b_d2a), brow(b_d2b), brow(jnp.tile(b_upf, 4)),
        ]),
    }


# ----------------------------------------------------------------------------
# Forward pass (matches StudentUNet.forward)
# ----------------------------------------------------------------------------
_WEIGHT_KEYS = ("w_e1a", "w_e1b", "w_e2a", "w_e2b", "w_d1a", "w_d1b",
                "w_up1", "w_d2a", "w_d2b", "w_upf")


def student_unet_forward(params, x_nchw):
    N, cin, H, W = x_nchw.shape
    # TODO(synk): bilinear-resize fallback (x5/x3 size mismatch) not implemented;
    # unreachable when H, W are divisible by 4, and the final F.interpolate back
    # to (H, W) is an exact identity at these sizes.
    assert H % 4 == 0 and W % 4 == 0, "spatial dims must be divisible by 4"
    out_ch = params["w_upf"].shape[1] // 4

    x = jnp.transpose(x_nchw, (0, 2, 3, 1)).astype(jnp.float32)    # NCHW -> NHWC

    weights = [params[k] for k in _WEIGHT_KEYS]
    bias_pack = params["bias"]

    def const_spec(a):
        nd = a.ndim
        return pl.BlockSpec(a.shape, lambda n, _nd=nd: (0,) * _nd)

    in_specs = [pl.BlockSpec((1, H, W, cin), lambda n: (n, 0, 0, 0))]
    in_specs += [const_spec(a) for a in weights]
    in_specs.append(const_spec(bias_pack))

    scratch_shapes = [
        pltpu.VMEM((H + 2, W + 2, cin), jnp.float32),              # enc1a pad
        pltpu.VMEM((H + 2, W + 2, 32), jnp.float32),               # enc1b pad / pool1
        pltpu.VMEM((H // 2 + 2, W // 2 + 2, 32), jnp.float32),     # enc2a / x5u / dec2b
        pltpu.VMEM((H // 2 + 2, W // 2 + 2, 64), jnp.float32),     # enc2b / x3 skip
        pltpu.VMEM((H // 4 + 2, W // 4 + 2, 64), jnp.float32),     # dec1a pad
        pltpu.VMEM((H // 4 + 2, W // 4 + 2, 32), jnp.float32),     # dec1b pad
    ]

    out = pl.pallas_call(
        _unet_kernel,
        out_shape=jax.ShapeDtypeStruct((N, H, W, out_ch), jnp.float32),
        grid=(N,),
        in_specs=in_specs,
        out_specs=pl.BlockSpec((1, H, W, out_ch), lambda n: (n, 0, 0, 0)),
        scratch_shapes=scratch_shapes,
        compiler_params=pltpu.CompilerParams(dimension_semantics=("parallel",)),
    )(x, *weights, bias_pack)

    return jnp.transpose(out, (0, 3, 1, 2))                        # NHWC -> NCHW


# ----------------------------------------------------------------------------
if __name__ == "__main__":
    key = jax.random.PRNGKey(0)
    in_channels, out_channels = 4, 3
    N, H, W = 2, 16, 16

    pkey, xkey = jax.random.split(key)
    params = init_student_unet_params(pkey, in_channels, out_channels)
    x = jax.random.normal(xkey, (N, in_channels, H, W), jnp.float32)

    fwd = jax.jit(student_unet_forward)
    out = jax.block_until_ready(fwd(params, x))

    assert out.shape == (N, out_channels, H, W), out.shape
    assert bool(jnp.all(jnp.isfinite(out)))
    print("KERNEL_OK")
</pallas_src>

<mosaic_0001>
module attributes {stable_mosaic.version = 11 : i64} {
  func.func @_unet_kernel(%arg0: i32, %arg1: memref<1x16x16x4xf32, #tpu.memory_space<vmem>>, %arg2: memref<36x32xf32, #tpu.memory_space<vmem>>, %arg3: memref<288x32xf32, #tpu.memory_space<vmem>>, %arg4: memref<288x64xf32, #tpu.memory_space<vmem>>, %arg5: memref<576x64xf32, #tpu.memory_space<vmem>>, %arg6: memref<576x32xf32, #tpu.memory_space<vmem>>, %arg7: memref<288x32xf32, #tpu.memory_space<vmem>>, %arg8: memref<32x128xf32, #tpu.memory_space<vmem>>, %arg9: memref<864x32xf32, #tpu.memory_space<vmem>>, %arg10: memref<288x32xf32, #tpu.memory_space<vmem>>, %arg11: memref<32x12xf32, #tpu.memory_space<vmem>>, %arg12: memref<10x128xf32, #tpu.memory_space<vmem>>, %arg13: memref<1x16x16x3xf32, #tpu.memory_space<vmem>>, %arg14: memref<18x18x4xf32, #tpu.memory_space<vmem>>, %arg15: memref<18x18x32xf32, #tpu.memory_space<vmem>>, %arg16: memref<10x10x32xf32, #tpu.memory_space<vmem>>, %arg17: memref<10x10x64xf32, #tpu.memory_space<vmem>>, %arg18: memref<6x6x64xf32, #tpu.memory_space<vmem>>, %arg19: memref<6x6x32xf32, #tpu.memory_space<vmem>>) attributes {dimension_semantics = [#tpu.dimension_semantics<parallel>], iteration_bounds = array<i64: 2>, scalar_prefetch = 0 : i64, scratch_operands = 6 : i64, tpu.core_type = #tpu.core_type<tc>, window_params = [{transform_indices = @transform_0, window_bounds = array<i64: 1, 16, 16, 4>}, {pipeline_mode = #tpu.pipeline_mode<synchronous>, transform_indices = @transform_1, window_bounds = array<i64: 36, 32>}, {pipeline_mode = #tpu.pipeline_mode<synchronous>, transform_indices = @transform_2, window_bounds = array<i64: 288, 32>}, {pipeline_mode = #tpu.pipeline_mode<synchronous>, transform_indices = @transform_3, window_bounds = array<i64: 288, 64>}, {pipeline_mode = #tpu.pipeline_mode<synchronous>, transform_indices = @transform_4, window_bounds = array<i64: 576, 64>}, {pipeline_mode = #tpu.pipeline_mode<synchronous>, transform_indices = @transform_5, window_bounds = array<i64: 576, 32>}, {pipeline_mode = #tpu.pipeline_mode<synchronous>, transform_indices = @transform_6, window_bounds = array<i64: 288, 32>}, {pipeline_mode = #tpu.pipeline_mode<synchronous>, transform_indices = @transform_7, window_bounds = array<i64: 32, 128>}, {pipeline_mode = #tpu.pipeline_mode<synchronous>, transform_indices = @transform_8, window_bounds = array<i64: 864, 32>}, {pipeline_mode = #tpu.pipeline_mode<synchronous>, transform_indices = @transform_9, window_bounds = array<i64: 288, 32>}, {pipeline_mode = #tpu.pipeline_mode<synchronous>, transform_indices = @transform_10, window_bounds = array<i64: 32, 12>}, {pipeline_mode = #tpu.pipeline_mode<synchronous>, transform_indices = @transform_11, window_bounds = array<i64: 10, 128>}, {transform_indices = @transform_12, window_bounds = array<i64: 1, 16, 16, 3>}]} {
    %cst = arith.constant 0.000000e+00 : f32
    %0 = vector.broadcast %cst : f32 to vector<18x4xf32>
    %cst_0 = arith.constant 0.000000e+00 : f32
    %1 = vector.broadcast %cst_0 : f32 to vector<16x1x4xf32>
    %c0 = arith.constant 0 : index
    %c0_1 = arith.constant 0 : index
    %c0_2 = arith.constant 0 : index
    %2 = vector.load %arg14[%c0, %c0_1, %c0_2] : memref<18x18x4xf32, #tpu.memory_space<vmem>>, vector<1x18x4xf32>
    %3 = vector.shape_cast %2 : vector<1x18x4xf32> to vector<18x4xf32>
    %4 = vector.shape_cast %0 : vector<18x4xf32> to vector<1x18x4xf32>
    tpu.vector_store %arg14[%c0, %c0_1, %c0_2], %4 {strides = array<i32>} : memref<18x18x4xf32, #tpu.memory_space<vmem>>, vector<1x18x4xf32>,
    %c17 = arith.constant 17 : index
    %c0_3 = arith.constant 0 : index
    %c0_4 = arith.constant 0 : index
    %5 = vector.load %arg14[%c17, %c0_3, %c0_4] : memref<18x18x4xf32, #tpu.memory_space<vmem>>, vector<1x18x4xf32>
    %6 = vector.shape_cast %5 : vector<1x18x4xf32> to vector<18x4xf32>
    %7 = vector.shape_cast %0 : vector<18x4xf32> to vector<1x18x4xf32>
    tpu.vector_store %arg14[%c17, %c0_3, %c0_4], %7 {strides = array<i32>} : memref<18x18x4xf32, #tpu.memory_space<vmem>>, vector<1x18x4xf32>,
    %c1 = arith.constant 1 : index
    %c0_5 = arith.constant 0 : index
    %c0_6 = arith.constant 0 : index
    %8 = vector.load %arg14[%c1, %c0_5, %c0_6] : memref<18x18x4xf32, #tpu.memory_space<vmem>>, vector<16x1x4xf32>
    tpu.vector_store %arg14[%c1, %c0_5, %c0_6], %1 {strides = array<i32>} : memref<18x18x4xf32, #tpu.memory_space<vmem>>, vector<16x1x4xf32>,
    %c1_7 = arith.constant 1 : index
    %c17_8 = arith.constant 17 : index
    %c0_9 = arith.constant 0 : index
    %9 = vector.load %arg14[%c1_7, %c17_8, %c0_9] : memref<18x18x4xf32, #tpu.memory_space<vmem>>, vector<16x1x4xf32>
    tpu.vector_store %arg14[%c1_7, %c17_8, %c0_9], %1 {strides = array<i32>} : memref<18x18x4xf32, #tpu.memory_space<vmem>>, vector<16x1x4xf32>,
    %cst_10 = arith.constant 0.000000e+00 : f32
    %10 = vector.broadcast %cst_10 : f32 to vector<18x32xf32>
    %cst_11 = arith.constant 0.000000e+00 : f32
    %11 = vector.broadcast %cst_11 : f32 to vector<16x1x32xf32>
    %c0_12 = arith.constant 0 : index
    %c0_13 = arith.constant 0 : index
    %c0_14 = arith.constant 0 : index
    %12 = vector.load %arg15[%c0_12, %c0_13, %c0_14] : memref<18x18x32xf32, #tpu.memory_space<vmem>>, vector<1x18x32xf32>
    %13 = vector.shape_cast %12 : vector<1x18x32xf32> to vector<18x32xf32>
    %14 = vector.shape_cast %10 : vector<18x32xf32> to vector<1x18x32xf32>
    tpu.vector_store %arg15[%c0_12, %c0_13, %c0_14], %14 {strides = array<i32>} : memref<18x18x32xf32, #tpu.memory_space<vmem>>, vector<1x18x32xf32>,
    %c17_15 = arith.constant 17 : index
    %c0_16 = arith.constant 0 : index
    %c0_17 = arith.constant 0 : index
    %15 = vector.load %arg15[%c17_15, %c0_16, %c0_17] : memref<18x18x32xf32, #tpu.memory_space<vmem>>, vector<1x18x32xf32>
    %16 = vector.shape_cast %15 : vector<1x18x32xf32> to vector<18x32xf32>
    %17 = vector.shape_cast %10 : vector<18x32xf32> to vector<1x18x32xf32>
    tpu.vector_store %arg15[%c17_15, %c0_16, %c0_17], %17 {strides = array<i32>} : memref<18x18x32xf32, #tpu.memory_space<vmem>>, vector<1x18x32xf32>,
    %c1_18 = arith.constant 1 : index
    %c0_19 = arith.constant 0 : index
    %c0_20 = arith.constant 0 : index
    %18 = vector.load %arg15[%c1_18, %c0_19, %c0_20] : memref<18x18x32xf32, #tpu.memory_space<vmem>>, vector<16x1x32xf32>
    tpu.vector_store %arg15[%c1_18, %c0_19, %c0_20], %11 {strides = array<i32>} : memref<18x18x32xf32, #tpu.memory_space<vmem>>, vector<16x1x32xf32>,
    %c1_21 = arith.constant 1 : index
    %c17_22 = arith.constant 17 : index
    %c0_23 = arith.constant 0 : index
    %19 = vector.load %arg15[%c1_21, %c17_22, %c0_23] : memref<18x18x32xf32, #tpu.memory_space<vmem>>, vector<16x1x32xf32>
    tpu.vector_store %arg15[%c1_21, %c17_22, %c0_23], %11 {strides = array<i32>} : memref<18x18x32xf32, #tpu.memory_space<vmem>>, vector<16x1x32xf32>,
    %cst_24 = arith.constant 0.000000e+00 : f32
    %20 = vector.broadcast %cst_24 : f32 to vector<10x32xf32>
    %cst_25 = arith.constant 0.000000e+00 : f32
    %21 = vector.broadcast %cst_25 : f32 to vector<8x1x32xf32>
    %c0_26 = arith.constant 0 : index
    %c0_27 = arith.constant 0 : index
    %c0_28 = arith.constant 0 : index
    %22 = vector.load %arg16[%c0_26, %c0_27, %c0_28] : memref<10x10x32xf32, #tpu.memory_space<vmem>>, vector<1x10x32xf32>
    %23 = vector.shape_cast %22 : vector<1x10x32xf32> to vector<10x32xf32>
    %24 = vector.shape_cast %20 : vector<10x32xf32> to vector<1x10x32xf32>
    tpu.vector_store %arg16[%c0_26, %c0_27, %c0_28], %24 {strides = array<i32>} : memref<10x10x32xf32, #tpu.memory_space<vmem>>, vector<1x10x32xf32>,
    %c9 = arith.constant 9 : index
    %c0_29 = arith.constant 0 : index
    %c0_30 = arith.constant 0 : index
    %25 = vector.load %arg16[%c9, %c0_29, %c0_30] : memref<10x10x32xf32, #tpu.memory_space<vmem>>, vector<1x10x32xf32>
    %26 = vector.shape_cast %25 : vector<1x10x32xf32> to vector<10x32xf32>
    %27 = vector.shape_cast %20 : vector<10x32xf32> to vector<1x10x32xf32>
    tpu.vector_store %arg16[%c9, %c0_29, %c0_30], %27 {strides = array<i32>} : memref<10x10x32xf32, #tpu.memory_space<vmem>>, vector<1x10x32xf32>,
    %c1_31 = arith.constant 1 : index
    %c0_32 = arith.constant 0 : index
    %c0_33 = arith.constant 0 : index
    %28 = vector.load %arg16[%c1_31, %c0_32, %c0_33] : memref<10x10x32xf32, #tpu.memory_space<vmem>>, vector<8x1x32xf32>
    tpu.vector_store %arg16[%c1_31, %c0_32, %c0_33], %21 {strides = array<i32>} : memref<10x10x32xf32, #tpu.memory_space<vmem>>, vector<8x1x32xf32>,
    %c1_34 = arith.constant 1 : index
    %c9_35 = arith.constant 9 : index
    %c0_36 = arith.constant 0 : index
    %29 = vector.load %arg16[%c1_34, %c9_35, %c0_36] : memref<10x10x32xf32, #tpu.memory_space<vmem>>, vector<8x1x32xf32>
    tpu.vector_store %arg16[%c1_34, %c9_35, %c0_36], %21 {strides = array<i32>} : memref<10x10x32xf32, #tpu.memory_space<vmem>>, vector<8x1x32xf32>,
    %cst_37 = arith.constant 0.000000e+00 : f32
    %30 = vector.broadcast %cst_37 : f32 to vector<10x64xf32>
    %cst_38 = arith.constant 0.000000e+00 : f32
    %31 = vector.broadcast %cst_38 : f32 to vector<8x1x64xf32>
    %c0_39 = arith.constant 0 : index
    %c0_40 = arith.constant 0 : index
    %c0_41 = arith.constant 0 : index
    %32 = vector.load %arg17[%c0_39, %c0_40, %c0_41] : memref<10x10x64xf32, #tpu.memory_space<vmem>>, vector<1x10x64xf32>
    %33 = vector.shape_cast %32 : vector<1x10x64xf32> to vector<10x64xf32>
    %34 = vector.shape_cast %30 : vector<10x64xf32> to vector<1x10x64xf32>
    tpu.vector_store %arg17[%c0_39, %c0_40, %c0_41], %34 {strides = array<i32>} : memref<10x10x64xf32, #tpu.memory_space<vmem>>, vector<1x10x64xf32>,
    %c9_42 = arith.constant 9 : index
    %c0_43 = arith.constant 0 : index
    %c0_44 = arith.constant 0 : index
    %35 = vector.load %arg17[%c9_42, %c0_43, %c0_44] : memref<10x10x64xf32, #tpu.memory_space<vmem>>, vector<1x10x64xf32>
    %36 = vector.shape_cast %35 : vector<1x10x64xf32> to vector<10x64xf32>
    %37 = vector.shape_cast %30 : vector<10x64xf32> to vector<1x10x64xf32>
    tpu.vector_store %arg17[%c9_42, %c0_43, %c0_44], %37 {strides = array<i32>} : memref<10x10x64xf32, #tpu.memory_space<vmem>>, vector<1x10x64xf32>,
    %c1_45 = arith.constant 1 : index
    %c0_46 = arith.constant 0 : index
    %c0_47 = arith.constant 0 : index
    %38 = vector.load %arg17[%c1_45, %c0_46, %c0_47] : memref<10x10x64xf32, #tpu.memory_space<vmem>>, vector<8x1x64xf32>
    tpu.vector_store %arg17[%c1_45, %c0_46, %c0_47], %31 {strides = array<i32>} : memref<10x10x64xf32, #tpu.memory_space<vmem>>, vector<8x1x64xf32>,
    %c1_48 = arith.constant 1 : index
    %c9_49 = arith.constant 9 : index
    %c0_50 = arith.constant 0 : index
    %39 = vector.load %arg17[%c1_48, %c9_49, %c0_50] : memref<10x10x64xf32, #tpu.memory_space<vmem>>, vector<8x1x64xf32>
    tpu.vector_store %arg17[%c1_48, %c9_49, %c0_50], %31 {strides = array<i32>} : memref<10x10x64xf32, #tpu.memory_space<vmem>>, vector<8x1x64xf32>,
    %cst_51 = arith.constant 0.000000e+00 : f32
    %40 = vector.broadcast %cst_51 : f32 to vector<6x64xf32>
    %cst_52 = arith.constant 0.000000e+00 : f32
    %41 = vector.broadcast %cst_52 : f32 to vector<4x1x64xf32>
    %c0_53 = arith.constant 0 : index
    %c0_54 = arith.constant 0 : index
    %c0_55 = arith.constant 0 : index
    %42 = vector.load %arg18[%c0_53, %c0_54, %c0_55] : memref<6x6x64xf32, #tpu.memory_space<vmem>>, vector<1x6x64xf32>
    %43 = vector.shape_cast %42 : vector<1x6x64xf32> to vector<6x64xf32>
    %44 = vector.shape_cast %40 : vector<6x64xf32> to vector<1x6x64xf32>
    tpu.vector_store %arg18[%c0_53, %c0_54, %c0_55], %44 {strides = array<i32>} : memref<6x6x64xf32, #tpu.memory_space<vmem>>, vector<1x6x64xf32>,
    %c5 = arith.constant 5 : index
    %c0_56 = arith.constant 0 : index
    %c0_57 = arith.constant 0 : index
    %45 = vector.load %arg18[%c5, %c0_56, %c0_57] : memref<6x6x64xf32, #tpu.memory_space<vmem>>, vector<1x6x64xf32>
    %46 = vector.shape_cast %45 : vector<1x6x64xf32> to vector<6x64xf32>
    %47 = vector.shape_cast %40 : vector<6x64xf32> to vector<1x6x64xf32>
    tpu.vector_store %arg18[%c5, %c0_56, %c0_57], %47 {strides = array<i32>} : memref<6x6x64xf32, #tpu.memory_space<vmem>>, vector<1x6x64xf32>,
    %c1_58 = arith.constant 1 : index
    %c0_59 = arith.constant 0 : index
    %c0_60 = arith.constant 0 : index
    %48 = vector.load %arg18[%c1_58, %c0_59, %c0_60] : memref<6x6x64xf32, #tpu.memory_space<vmem>>, vector<4x1x64xf32>
    tpu.vector_store %arg18[%c1_58, %c0_59, %c0_60], %41 {strides = array<i32>} : memref<6x6x64xf32, #tpu.memory_space<vmem>>, vector<4x1x64xf32>,
    %c1_61 = arith.constant 1 : index
    %c5_62 = arith.constant 5 : index
    %c0_63 = arith.constant 0 : index
    %49 = vector.load %arg18[%c1_61, %c5_62, %c0_63] : memref<6x6x64xf32, #tpu.memory_space<vmem>>, vector<4x1x64xf32>
    tpu.vector_store %arg18[%c1_61, %c5_62, %c0_63], %41 {strides = array<i32>} : memref<6x6x64xf32, #tpu.memory_space<vmem>>, vector<4x1x64xf32>,
    %cst_64 = arith.constant 0.000000e+00 : f32
    %50 = vector.broadcast %cst_64 : f32 to vector<6x32xf32>
    %cst_65 = arith.constant 0.000000e+00 : f32
    %51 = vector.broadcast %cst_65 : f32 to vector<4x1x32xf32>
    %c0_66 = arith.constant 0 : index
    %c0_67 = arith.constant 0 : index
    %c0_68 = arith.constant 0 : index
    %52 = vector.load %arg19[%c0_66, %c0_67, %c0_68] : memref<6x6x32xf32, #tpu.memory_space<vmem>>, vector<1x6x32xf32>
    %53 = vector.shape_cast %52 : vector<1x6x32xf32> to vector<6x32xf32>
    %54 = vector.shape_cast %50 : vector<6x32xf32> to vector<1x6x32xf32>
    tpu.vector_store %arg19[%c0_66, %c0_67, %c0_68], %54 {strides = array<i32>} : memref<6x6x32xf32, #tpu.memory_space<vmem>>, vector<1x6x32xf32>,
    %c5_69 = arith.constant 5 : index
    %c0_70 = arith.constant 0 : index
    %c0_71 = arith.constant 0 : index
    %55 = vector.load %arg19[%c5_69, %c0_70, %c0_71] : memref<6x6x32xf32, #tpu.memory_space<vmem>>, vector<1x6x32xf32>
    %56 = vector.shape_cast %55 : vector<1x6x32xf32> to vector<6x32xf32>
    %57 = vector.shape_cast %50 : vector<6x32xf32> to vector<1x6x32xf32>
    tpu.vector_store %arg19[%c5_69, %c0_70, %c0_71], %57 {strides = array<i32>} : memref<6x6x32xf32, #tpu.memory_space<vmem>>, vector<1x6x32xf32>,
    %c1_72 = arith.constant 1 : index
    %c0_73 = arith.constant 0 : index
    %c0_74 = arith.constant 0 : index
    %58 = vector.load %arg19[%c1_72, %c0_73, %c0_74] : memref<6x6x32xf32, #tpu.memory_space<vmem>>, vector<4x1x32xf32>
    tpu.vector_store %arg19[%c1_72, %c0_73, %c0_74], %51 {strides = array<i32>} : memref<6x6x32xf32, #tpu.memory_space<vmem>>, vector<4x1x32xf32>,
    %c1_75 = arith.constant 1 : index
    %c5_76 = arith.constant 5 : index
    %c0_77 = arith.constant 0 : index
    %59 = vector.load %arg19[%c1_75, %c5_76, %c0_77] : memref<6x6x32xf32, #tpu.memory_space<vmem>>, vector<4x1x32xf32>
    tpu.vector_store %arg19[%c1_75, %c5_76, %c0_77], %51 {strides = array<i32>} : memref<6x6x32xf32, #tpu.memory_space<vmem>>, vector<4x1x32xf32>,
    %c0_78 = arith.constant 0 : index
    %c0_79 = arith.constant 0 : index
    %c0_80 = arith.constant 0 : index
    %c0_81 = arith.constant 0 : index
    %60 = vector.load %arg1[%c0_78, %c0_79, %c0_80, %c0_81] : memref<1x16x16x4xf32, #tpu.memory_space<vmem>>, vector<1x16x16x4xf32>
    %61 = vector.shape_cast %60 : vector<1x16x16x4xf32> to vector<16x16x4xf32>
    %c1_82 = arith.constant 1 : index
    %c1_83 = arith.constant 1 : index
    %c0_84 = arith.constant 0 : index
    %62 = vector.load %arg14[%c1_82, %c1_83, %c0_84] : memref<18x18x4xf32, #tpu.memory_space<vmem>>, vector<16x16x4xf32>
    tpu.vector_store %arg14[%c1_82, %c1_83, %c0_84], %61 {strides = array<i32>} : memref<18x18x4xf32, #tpu.memory_space<vmem>>, vector<16x16x4xf32>,
    %c0_85 = arith.constant 0 : index
    %c0_86 = arith.constant 0 : index
    %63 = vector.load %arg12[%c0_85, %c0_86] : memref<10x128xf32, #tpu.memory_space<vmem>>, vector<1x32xf32>
    %c0_87 = arith.constant 0 : index
    %c0_88 = arith.constant 0 : index
    %c0_89 = arith.constant 0 : index
    %64 = vector.load %arg14[%c0_87, %c0_88, %c0_89] : memref<18x18x4xf32, #tpu.memory_space<vmem>>, vector<16x16x4xf32>
    %65 = vector.shape_cast %64 : vector<16x16x4xf32> to vector<256x4xf32>
    %c0_90 = arith.constant 0 : index
    %c1_91 = arith.constant 1 : index
    %c0_92 = arith.constant 0 : index
    %66 = vector.load %arg14[%c0_90, %c1_91, %c0_92] : memref<18x18x4xf32, #tpu.memory_space<vmem>>, vector<16x16x4xf32>
    %67 = vector.shape_cast %66 : vector<16x16x4xf32> to vector<256x4xf32>
    %c0_93 = arith.constant 0 : index
    %c2 = arith.constant 2 : index
    %c0_94 = arith.constant 0 : index
    %68 = vector.load %arg14[%c0_93, %c2, %c0_94] : memref<18x18x4xf32, #tpu.memory_space<vmem>>, vector<16x16x4xf32>
    %69 = vector.shape_cast %68 : vector<16x16x4xf32> to vector<256x4xf32>
    %c1_95 = arith.constant 1 : index
    %c0_96 = arith.constant 0 : index
    %c0_97 = arith.constant 0 : index
    %70 = vector.load %arg14[%c1_95, %c0_96, %c0_97] : memref<18x18x4xf32, #tpu.memory_space<vmem>>, vector<16x16x4xf32>
    %71 = vector.shape_cast %70 : vector<16x16x4xf32> to vector<256x4xf32>
    %c1_98 = arith.constant 1 : index
    %c1_99 = arith.constant 1 : index
    %c0_100 = arith.constant 0 : index
    %72 = vector.load %arg14[%c1_98, %c1_99, %c0_100] : memref<18x18x4xf32, #tpu.memory_space<vmem>>, vector<16x16x4xf32>
    %73 = vector.shape_cast %72 : vector<16x16x4xf32> to vector<256x4xf32>
    %c1_101 = arith.constant 1 : index
    %c2_102 = arith.constant 2 : index
    %c0_103 = arith.constant 0 : index
    %74 = vector.load %arg14[%c1_101, %c2_102, %c0_103] : memref<18x18x4xf32, #tpu.memory_space<vmem>>, vector<16x16x4xf32>
    %75 = vector.shape_cast %74 : vector<16x16x4xf32> to vector<256x4xf32>
    %c2_104 = arith.constant 2 : index
    %c0_105 = arith.constant 0 : index
    %c0_106 = arith.constant 0 : index
    %76 = vector.load %arg14[%c2_104, %c0_105, %c0_106] : memref<18x18x4xf32, #tpu.memory_space<vmem>>, vector<16x16x4xf32>
    %77 = vector.shape_cast %76 : vector<16x16x4xf32> to vector<256x4xf32>
    %c2_107 = arith.constant 2 : index
    %c1_108 = arith.constant 1 : index
    %c0_109 = arith.constant 0 : index
    %78 = vector.load %arg14[%c2_107, %c1_108, %c0_109] : memref<18x18x4xf32, #tpu.memory_space<vmem>>, vector<16x16x4xf32>
    %79 = vector.shape_cast %78 : vector<16x16x4xf32> to vector<256x4xf32>
    %c2_110 = arith.constant 2 : index
    %c2_111 = arith.constant 2 : index
    %c0_112 = arith.constant 0 : index
    %80 = vector.load %arg14[%c2_110, %c2_111, %c0_112] : memref<18x18x4xf32, #tpu.memory_space<vmem>>, vector<16x16x4xf32>
    %81 = vector.shape_cast %80 : vector<16x16x4xf32> to vector<256x4xf32>
    %82 = tpu.concatenate %65, %67, %69, %71, %73, %75, %77, %79, %81 in 1 : vector<256x4xf32>, vector<256x4xf32>, vector<256x4xf32>, vector<256x4xf32>, vector<256x4xf32>, vector<256x4xf32>, vector<256x4xf32>, vector<256x4xf32>, vector<256x4xf32> -> vector<256x36xf32>
    %c0_113 = arith.constant 0 : index
    %c0_114 = arith.constant 0 : index
    %83 = vector.load %arg2[%c0_113, %c0_114] : memref<36x32xf32, #tpu.memory_space<vmem>>, vector<36x32xf32>
    %cst_115 = arith.constant dense<0.000000e+00> : vector<256x32xf32>
    %84 = tpu.matmul %82, %83, %cst_115 {dimension_numbers = #tpu.dot_dimension_numbers<[1], [0], [0], [1], [0, 0, 1, 1], [], []>} : vector<256x36xf32>, vector<36x32xf32>, vector<256x32xf32> -> vector<256x32xf32>
    %85 = vector.broadcast %63 : vector<1x32xf32> to vector<256x32xf32>
    %86 = arith.addf %84, %85 : vector<256x32xf32>
    %cst_116 = arith.constant 0.000000e+00 : f32
    %87 = vector.broadcast %cst_116 : f32 to vector<256x32xf32>
    %88 = arith.maximumf %86, %87 : vector<256x32xf32>
    %89 = vector.shape_cast %88 : vector<256x32xf32> to vector<16x16x32xf32>
    %c1_117 = arith.constant 1 : index
    %c1_118 = arith.constant 1 : index
    %c0_119 = arith.constant 0 : index
    %90 = vector.load %arg15[%c1_117, %c1_118, %c0_119] : memref<18x18x32xf32, #tpu.memory_space<vmem>>, vector<16x16x32xf32>
    tpu.vector_store %arg15[%c1_117, %c1_118, %c0_119], %89 {strides = array<i32>} : memref<18x18x32xf32, #tpu.memory_space<vmem>>, vector<16x16x32xf32>,
    %c1_120 = arith.constant 1 : index
    %c0_121 = arith.constant 0 : index
    %91 = vector.load %arg12[%c1_120, %c0_121] : memref<10x128xf32, #tpu.memory_space<vmem>>, vector<1x32xf32>
    %c0_122 = arith.constant 0 : index
    %c0_123 = arith.constant 0 : index
    %c0_124 = arith.constant 0 : index
    %92 = vector.load %arg15[%c0_122, %c0_123, %c0_124] : memref<18x18x32xf32, #tpu.memory_space<vmem>>, vector<16x16x32xf32>
    %93 = vector.shape_cast %92 : vector<16x16x32xf32> to vector<256x32xf32>
    %c0_125 = arith.constant 0 : index
    %c1_126 = arith.constant 1 : index
    %c0_127 = arith.constant 0 : index
    %94 = vector.load %arg15[%c0_125, %c1_126, %c0_127] : memref<18x18x32xf32, #tpu.memory_space<vmem>>, vector<16x16x32xf32>
    %95 = vector.shape_cast %94 : vector<16x16x32xf32> to vector<256x32xf32>
    %c0_128 = arith.constant 0 : index
    %c2_129 = arith.constant 2 : index
    %c0_130 = arith.constant 0 : index
    %96 = vector.load %arg15[%c0_128, %c2_129, %c0_130] : memref<18x18x32xf32, #tpu.memory_space<vmem>>, vector<16x16x32xf32>
    %97 = vector.shape_cast %96 : vector<16x16x32xf32> to vector<256x32xf32>
    %c1_131 = arith.constant 1 : index
    %c0_132 = arith.constant 0 : index
    %c0_133 = arith.constant 0 : index
    %98 = vector.load %arg15[%c1_131, %c0_132, %c0_133] : memref<18x18x32xf32, #tpu.memory_space<vmem>>, vector<16x16x32xf32>
    %99 = vector.shape_cast %98 : vector<16x16x32xf32> to vector<256x32xf32>
    %c1_134 = arith.constant 1 : index
    %c1_135 = arith.constant 1 : index
    %c0_136 = arith.constant 0 : index
    %100 = vector.load %arg15[%c1_134, %c1_135, %c0_136] : memref<18x18x32xf32, #tpu.memory_space<vmem>>, vector<16x16x32xf32>
    %101 = vector.shape_cast %100 : vector<16x16x32xf32> to vector<256x32xf32>
    %c1_137 = arith.constant 1 : index
    %c2_138 = arith.constant 2 : index
    %c0_139 = arith.constant 0 : index
    %102 = vector.load %arg15[%c1_137, %c2_138, %c0_139] : memref<18x18x32xf32, #tpu.memory_space<vmem>>, vector<16x16x32xf32>
    %103 = vector.shape_cast %102 : vector<16x16x32xf32> to vector<256x32xf32>
    %c2_140 = arith.constant 2 : index
    %c0_141 = arith.constant 0 : index
    %c0_142 = arith.constant 0 : index
    %104 = vector.load %arg15[%c2_140, %c0_141, %c0_142] : memref<18x18x32xf32, #tpu.memory_space<vmem>>, vector<16x16x32xf32>
    %105 = vector.shape_cast %104 : vector<16x16x32xf32> to vector<256x32xf32>
    %c2_143 = arith.constant 2 : index
    %c1_144 = arith.constant 1 : index
    %c0_145 = arith.constant 0 : index
    %106 = vector.load %arg15[%c2_143, %c1_144, %c0_145] : memref<18x18x32xf32, #tpu.memory_space<vmem>>, vector<16x16x32xf32>
    %107 = vector.shape_cast %106 : vector<16x16x32xf32> to vector<256x32xf32>
    %c2_146 = arith.constant 2 : index
    %c2_147 = arith.constant 2 : index
    %c0_148 = arith.constant 0 : index
    %108 = vector.load %arg15[%c2_146, %c2_147, %c0_148] : memref<18x18x32xf32, #tpu.memory_space<vmem>>, vector<16x16x32xf32>
    %109 = vector.shape_cast %108 : vector<16x16x32xf32> to vector<256x32xf32>
    %110 = tpu.concatenate %93, %95, %97, %99, %101, %103, %105, %107, %109 in 1 : vector<256x32xf32>, vector<256x32xf32>, vector<256x32xf32>, vector<256x32xf32>, vector<256x32xf32>, vector<256x32xf32>, vector<256x32xf32>, vector<256x32xf32>, vector<256x32xf32> -> vector<256x288xf32>
    %c0_149 = arith.constant 0 : index
    %c0_150 = arith.constant 0 : index
    %111 = vector.load %arg3[%c0_149, %c0_150] : memref<288x32xf32, #tpu.memory_space<vmem>>, vector<288x32xf32>
    %cst_151 = arith.constant dense<0.000000e+00> : vector<256x32xf32>
    %112 = tpu.matmul %110, %111, %cst_151 {dimension_numbers = #tpu.dot_dimension_numbers<[1], [0], [0], [1], [0, 0, 1, 1], [], []>} : vector<256x288xf32>, vector<288x32xf32>, vector<256x32xf32> -> vector<256x32xf32>
    %113 = vector.broadcast %91 : vector<1x32xf32> to vector<256x32xf32>
    %114 = arith.addf %112, %113 : vector<256x32xf32>
    %cst_152 = arith.constant 0.000000e+00 : f32
    %115 = vector.broadcast %cst_152 : f32 to vector<256x32xf32>
    %116 = arith.maximumf %114, %115 : vector<256x32xf32>
    %117 = vector.shape_cast %116 : vector<256x32xf32> to vector<16x16x32xf32>
    %c1_153 = arith.constant 1 : index
    %c1_154 = arith.constant 1 : index
    %c0_155 = arith.constant 0 : index
    %118 = vector.load %arg15[%c1_153, %c1_154, %c0_155] : memref<18x18x32xf32, #tpu.memory_space<vmem>>, vector<16x16x32xf32>
    tpu.vector_store %arg15[%c1_153, %c1_154, %c0_155], %117 {strides = array<i32>} : memref<18x18x32xf32, #tpu.memory_space<vmem>>, vector<16x16x32xf32>,
    %c1_156 = arith.constant 1 : index
    %c1_157 = arith.constant 1 : index
    %c0_158 = arith.constant 0 : index
    %119 = tpu.strided_load %arg15[%c1_156, %c1_157, %c0_158] {strides = array<i32: 2, 2, 1>} : memref<18x18x32xf32, #tpu.memory_space<vmem>>, vector<8x8x32xf32>
    %c1_159 = arith.constant 1 : index
    %c2_160 = arith.constant 2 : index
    %c0_161 = arith.constant 0 : index
    %120 = tpu.strided_load %arg15[%c1_159, %c2_160, %c0_161] {strides = array<i32: 2, 2, 1>} : memref<18x18x32xf32, #tpu.memory_space<vmem>>, vector<8x8x32xf32>
    %c2_162 = arith.constant 2 : index
    %c1_163 = arith.constant 1 : index
    %c0_164 = arith.constant 0 : index
    %121 = tpu.strided_load %arg15[%c2_162, %c1_163, %c0_164] {strides = array<i32: 2, 2, 1>} : memref<18x18x32xf32, #tpu.memory_space<vmem>>, vector<8x8x32xf32>
    %c2_165 = arith.constant 2 : index
    %c2_166 = arith.constant 2 : index
    %c0_167 = arith.constant 0 : index
    %122 = tpu.strided_load %arg15[%c2_165, %c2_166, %c0_167] {strides = array<i32: 2, 2, 1>} : memref<18x18x32xf32, #tpu.memory_space<vmem>>, vector<8x8x32xf32>
    %123 = arith.maximumf %119, %120 : vector<8x8x32xf32>
    %124 = arith.maximumf %121, %122 : vector<8x8x32xf32>
    %125 = arith.maximumf %123, %124 : vector<8x8x32xf32>
    %c1_168 = arith.constant 1 : index
    %c1_169 = arith.constant 1 : index
    %c0_170 = arith.constant 0 : index
    %126 = vector.load %arg16[%c1_168, %c1_169, %c0_170] : memref<10x10x32xf32, #tpu.memory_space<vmem>>, vector<8x8x32xf32>
    tpu.vector_store %arg16[%c1_168, %c1_169, %c0_170], %125 {strides = array<i32>} : memref<10x10x32xf32, #tpu.memory_space<vmem>>, vector<8x8x32xf32>,
    %c2_171 = arith.constant 2 : index
    %c0_172 = arith.constant 0 : index
    %127 = vector.load %arg12[%c2_171, %c0_172] : memref<10x128xf32, #tpu.memory_space<vmem>>, vector<1x64xf32>
    %c0_173 = arith.constant 0 : index
    %c0_174 = arith.constant 0 : index
    %c0_175 = arith.constant 0 : index
    %128 = vector.load %arg16[%c0_173, %c0_174, %c0_175] : memref<10x10x32xf32, #tpu.memory_space<vmem>>, vector<8x8x32xf32>
    %129 = vector.shape_cast %128 : vector<8x8x32xf32> to vector<64x32xf32>
    %c0_176 = arith.constant 0 : index
    %c1_177 = arith.constant 1 : index
    %c0_178 = arith.constant 0 : index
    %130 = vector.load %arg16[%c0_176, %c1_177, %c0_178] : memref<10x10x32xf32, #tpu.memory_space<vmem>>, vector<8x8x32xf32>
    %131 = vector.shape_cast %130 : vector<8x8x32xf32> to vector<64x32xf32>
    %c0_179 = arith.constant 0 : index
    %c2_180 = arith.constant 2 : index
    %c0_181 = arith.constant 0 : index
    %132 = vector.load %arg16[%c0_179, %c2_180, %c0_181] : memref<10x10x32xf32, #tpu.memory_space<vmem>>, vector<8x8x32xf32>
    %133 = vector.shape_cast %132 : vector<8x8x32xf32> to vector<64x32xf32>
    %c1_182 = arith.constant 1 : index
    %c0_183 = arith.constant 0 : index
    %c0_184 = arith.constant 0 : index
    %134 = vector.load %arg16[%c1_182, %c0_183, %c0_184] : memref<10x10x32xf32, #tpu.memory_space<vmem>>, vector<8x8x32xf32>
    %135 = vector.shape_cast %134 : vector<8x8x32xf32> to vector<64x32xf32>
    %c1_185 = arith.constant 1 : index
    %c1_186 = arith.constant 1 : index
    %c0_187 = arith.constant 0 : index
    %136 = vector.load %arg16[%c1_185, %c1_186, %c0_187] : memref<10x10x32xf32, #tpu.memory_space<vmem>>, vector<8x8x32xf32>
    %137 = vector.shape_cast %136 : vector<8x8x32xf32> to vector<64x32xf32>
    %c1_188 = arith.constant 1 : index
    %c2_189 = arith.constant 2 : index
    %c0_190 = arith.constant 0 : index
    %138 = vector.load %arg16[%c1_188, %c2_189, %c0_190] : memref<10x10x32xf32, #tpu.memory_space<vmem>>, vector<8x8x32xf32>
    %139 = vector.shape_cast %138 : vector<8x8x32xf32> to vector<64x32xf32>
    %c2_191 = arith.constant 2 : index
    %c0_192 = arith.constant 0 : index
    %c0_193 = arith.constant 0 : index
    %140 = vector.load %arg16[%c2_191, %c0_192, %c0_193] : memref<10x10x32xf32, #tpu.memory_space<vmem>>, vector<8x8x32xf32>
    %141 = vector.shape_cast %140 : vector<8x8x32xf32> to vector<64x32xf32>
    %c2_194 = arith.constant 2 : index
    %c1_195 = arith.constant 1 : index
    %c0_196 = arith.constant 0 : index
    %142 = vector.load %arg16[%c2_194, %c1_195, %c0_196] : memref<10x10x32xf32, #tpu.memory_space<vmem>>, vector<8x8x32xf32>
    %143 = vector.shape_cast %142 : vector<8x8x32xf32> to vector<64x32xf32>
    %c2_197 = arith.constant 2 : index
    %c2_198 = arith.constant 2 : index
    %c0_199 = arith.constant 0 : index
    %144 = vector.load %arg16[%c2_197, %c2_198, %c0_199] : memref<10x10x32xf32, #tpu.memory_space<vmem>>, vector<8x8x32xf32>
    %145 = vector.shape_cast %144 : vector<8x8x32xf32> to vector<64x32xf32>
    %146 = tpu.concatenate %129, %131, %133, %135, %137, %139, %141, %143, %145 in 1 : vector<64x32xf32>, vector<64x32xf32>, vector<64x32xf32>, vector<64x32xf32>, vector<64x32xf32>, vector<64x32xf32>, vector<64x32xf32>, vector<64x32xf32>, vector<64x32xf32> -> vector<64x288xf32>
    %c0_200 = arith.constant 0 : index
    %c0_201 = arith.constant 0 : index
    %147 = vector.load %arg4[%c0_200, %c0_201] : memref<288x64xf32, #tpu.memory_space<vmem>>, vector<288x64xf32>
    %cst_202 = arith.constant dense<0.000000e+00> : vector<64x64xf32>
    %148 = tpu.matmul %146, %147, %cst_202 {dimension_numbers = #tpu.dot_dimension_numbers<[1], [0], [0], [1], [0, 0, 1, 1], [], []>} : vector<64x288xf32>, vector<288x64xf32>, vector<64x64xf32> -> vector<64x64xf32>
    %149 = vector.broadcast %127 : vector<1x64xf32> to vector<64x64xf32>
    %150 = arith.addf %148, %149 : vector<64x64xf32>
    %cst_203 = arith.constant 0.000000e+00 : f32
    %151 = vector.broadcast %cst_203 : f32 to vector<64x64xf32>
    %152 = arith.maximumf %150, %151 : vector<64x64xf32>
    %153 = vector.shape_cast %152 : vector<64x64xf32> to vector<8x8x64xf32>
    %c1_204 = arith.constant 1 : index
    %c1_205 = arith.constant 1 : index
    %c0_206 = arith.constant 0 : index
    %154 = vector.load %arg17[%c1_204, %c1_205, %c0_206] : memref<10x10x64xf32, #tpu.memory_space<vmem>>, vector<8x8x64xf32>
    tpu.vector_store %arg17[%c1_204, %c1_205, %c0_206], %153 {strides = array<i32>} : memref<10x10x64xf32, #tpu.memory_space<vmem>>, vector<8x8x64xf32>,
    %c3 = arith.constant 3 : index
    %c0_207 = arith.constant 0 : index
    %155 = vector.load %arg12[%c3, %c0_207] : memref<10x128xf32, #tpu.memory_space<vmem>>, vector<1x64xf32>
    %c0_208 = arith.constant 0 : index
    %c0_209 = arith.constant 0 : index
    %c0_210 = arith.constant 0 : index
    %156 = vector.load %arg17[%c0_208, %c0_209, %c0_210] : memref<10x10x64xf32, #tpu.memory_space<vmem>>, vector<8x8x64xf32>
    %157 = vector.shape_cast %156 : vector<8x8x64xf32> to vector<64x64xf32>
    %c0_211 = arith.constant 0 : index
    %c1_212 = arith.constant 1 : index
    %c0_213 = arith.constant 0 : index
    %158 = vector.load %arg17[%c0_211, %c1_212, %c0_213] : memref<10x10x64xf32, #tpu.memory_space<vmem>>, vector<8x8x64xf32>
    %159 = vector.shape_cast %158 : vector<8x8x64xf32> to vector<64x64xf32>
    %c0_214 = arith.constant 0 : index
    %c2_215 = arith.constant 2 : index
    %c0_216 = arith.constant 0 : index
    %160 = vector.load %arg17[%c0_214, %c2_215, %c0_216] : memref<10x10x64xf32, #tpu.memory_space<vmem>>, vector<8x8x64xf32>
    %161 = vector.shape_cast %160 : vector<8x8x64xf32> to vector<64x64xf32>
    %c1_217 = arith.constant 1 : index
    %c0_218 = arith.constant 0 : index
    %c0_219 = arith.constant 0 : index
    %162 = vector.load %arg17[%c1_217, %c0_218, %c0_219] : memref<10x10x64xf32, #tpu.memory_space<vmem>>, vector<8x8x64xf32>
    %163 = vector.shape_cast %162 : vector<8x8x64xf32> to vector<64x64xf32>
    %c1_220 = arith.constant 1 : index
    %c1_221 = arith.constant 1 : index
    %c0_222 = arith.constant 0 : index
    %164 = vector.load %arg17[%c1_220, %c1_221, %c0_222] : memref<10x10x64xf32, #tpu.memory_space<vmem>>, vector<8x8x64xf32>
    %165 = vector.shape_cast %164 : vector<8x8x64xf32> to vector<64x64xf32>
    %c1_223 = arith.constant 1 : index
    %c2_224 = arith.constant 2 : index
    %c0_225 = arith.constant 0 : index
    %166 = vector.load %arg17[%c1_223, %c2_224, %c0_225] : memref<10x10x64xf32, #tpu.memory_space<vmem>>, vector<8x8x64xf32>
    %167 = vector.shape_cast %166 : vector<8x8x64xf32> to vector<64x64xf32>
    %c2_226 = arith.constant 2 : index
    %c0_227 = arith.constant 0 : index
    %c0_228 = arith.constant 0 : index
    %168 = vector.load %arg17[%c2_226, %c0_227, %c0_228] : memref<10x10x64xf32, #tpu.memory_space<vmem>>, vector<8x8x64xf32>
    %169 = vector.shape_cast %168 : vector<8x8x64xf32> to vector<64x64xf32>
    %c2_229 = arith.constant 2 : index
    %c1_230 = arith.constant 1 : index
    %c0_231 = arith.constant 0 : index
    %170 = vector.load %arg17[%c2_229, %c1_230, %c0_231] : memref<10x10x64xf32, #tpu.memory_space<vmem>>, vector<8x8x64xf32>
    %171 = vector.shape_cast %170 : vector<8x8x64xf32> to vector<64x64xf32>
    %c2_232 = arith.constant 2 : index
    %c2_233 = arith.constant 2 : index
    %c0_234 = arith.constant 0 : index
    %172 = vector.load %arg17[%c2_232, %c2_233, %c0_234] : memref<10x10x64xf32, #tpu.memory_space<vmem>>, vector<8x8x64xf32>
    %173 = vector.shape_cast %172 : vector<8x8x64xf32> to vector<64x64xf32>
    %174 = tpu.concatenate %157, %159, %161, %163, %165, %167, %169, %171, %173 in 1 : vector<64x64xf32>, vector<64x64xf32>, vector<64x64xf32>, vector<64x64xf32>, vector<64x64xf32>, vector<64x64xf32>, vector<64x64xf32>, vector<64x64xf32>, vector<64x64xf32> -> vector<64x576xf32>
    %c0_235 = arith.constant 0 : index
    %c0_236 = arith.constant 0 : index
    %175 = vector.load %arg5[%c0_235, %c0_236] : memref<576x64xf32, #tpu.memory_space<vmem>>, vector<576x64xf32>
    %cst_237 = arith.constant dense<0.000000e+00> : vector<64x64xf32>
    %176 = tpu.matmul %174, %175, %cst_237 {dimension_numbers = #tpu.dot_dimension_numbers<[1], [0], [0], [1], [0, 0, 1, 1], [], []>} : vector<64x576xf32>, vector<576x64xf32>, vector<64x64xf32> -> vector<64x64xf32>
    %177 = vector.broadcast %155 : vector<1x64xf32> to vector<64x64xf32>
    %178 = arith.addf %176, %177 : vector<64x64xf32>
    %cst_238 = arith.constant 0.000000e+00 : f32
    %179 = vector.broadcast %cst_238 : f32 to vector<64x64xf32>
    %180 = arith.maximumf %178, %179 : vector<64x64xf32>
    %181 = vector.shape_cast %180 : vector<64x64xf32> to vector<8x8x64xf32>
    %c1_239 = arith.constant 1 : index
    %c1_240 = arith.constant 1 : index
    %c0_241 = arith.constant 0 : index
    %182 = vector.load %arg17[%c1_239, %c1_240, %c0_241] : memref<10x10x64xf32, #tpu.memory_space<vmem>>, vector<8x8x64xf32>
    tpu.vector_store %arg17[%c1_239, %c1_240, %c0_241], %181 {strides = array<i32>} : memref<10x10x64xf32, #tpu.memory_space<vmem>>, vector<8x8x64xf32>,
    %c1_242 = arith.constant 1 : index
    %c1_243 = arith.constant 1 : index
    %c0_244 = arith.constant 0 : index
    %183 = tpu.strided_load %arg17[%c1_242, %c1_243, %c0_244] {strides = array<i32: 2, 2, 1>} : memref<10x10x64xf32, #tpu.memory_space<vmem>>, vector<4x4x64xf32>
    %c1_245 = arith.constant 1 : index
    %c2_246 = arith.constant 2 : index
    %c0_247 = arith.constant 0 : index
    %184 = tpu.strided_load %arg17[%c1_245, %c2_246, %c0_247] {strides = array<i32: 2, 2, 1>} : memref<10x10x64xf32, #tpu.memory_space<vmem>>, vector<4x4x64xf32>
    %c2_248 = arith.constant 2 : index
    %c1_249 = arith.constant 1 : index
    %c0_250 = arith.constant 0 : index
    %185 = tpu.strided_load %arg17[%c2_248, %c1_249, %c0_250] {strides = array<i32: 2, 2, 1>} : memref<10x10x64xf32, #tpu.memory_space<vmem>>, vector<4x4x64xf32>
    %c2_251 = arith.constant 2 : index
    %c2_252 = arith.constant 2 : index
    %c0_253 = arith.constant 0 : index
    %186 = tpu.strided_load %arg17[%c2_251, %c2_252, %c0_253] {strides = array<i32: 2, 2, 1>} : memref<10x10x64xf32, #tpu.memory_space<vmem>>, vector<4x4x64xf32>
    %187 = arith.maximumf %183, %184 : vector<4x4x64xf32>
    %188 = arith.maximumf %185, %186 : vector<4x4x64xf32>
    %189 = arith.maximumf %187, %188 : vector<4x4x64xf32>
    %c1_254 = arith.constant 1 : index
    %c1_255 = arith.constant 1 : index
    %c0_256 = arith.constant 0 : index
    %190 = vector.load %arg18[%c1_254, %c1_255, %c0_256] : memref<6x6x64xf32, #tpu.memory_space<vmem>>, vector<4x4x64xf32>
    tpu.vector_store %arg18[%c1_254, %c1_255, %c0_256], %189 {strides = array<i32>} : memref<6x6x64xf32, #tpu.memory_space<vmem>>, vector<4x4x64xf32>,
    %c4 = arith.constant 4 : index
    %c0_257 = arith.constant 0 : index
    %191 = vector.load %arg12[%c4, %c0_257] : memref<10x128xf32, #tpu.memory_space<vmem>>, vector<1x32xf32>
    %c0_258 = arith.constant 0 : index
    %c0_259 = arith.constant 0 : index
    %c0_260 = arith.constant 0 : index
    %192 = vector.load %arg18[%c0_258, %c0_259, %c0_260] : memref<6x6x64xf32, #tpu.memory_space<vmem>>, vector<4x4x64xf32>
    %193 = vector.shape_cast %192 : vector<4x4x64xf32> to vector<16x64xf32>
    %c0_261 = arith.constant 0 : index
    %c1_262 = arith.constant 1 : index
    %c0_263 = arith.constant 0 : index
    %194 = vector.load %arg18[%c0_261, %c1_262, %c0_263] : memref<6x6x64xf32, #tpu.memory_space<vmem>>, vector<4x4x64xf32>
    %195 = vector.shape_cast %194 : vector<4x4x64xf32> to vector<16x64xf32>
    %c0_264 = arith.constant 0 : index
    %c2_265 = arith.constant 2 : index
    %c0_266 = arith.constant 0 : index
    %196 = vector.load %arg18[%c0_264, %c2_265, %c0_266] : memref<6x6x64xf32, #tpu.memory_space<vmem>>, vector<4x4x64xf32>
    %197 = vector.shape_cast %196 : vector<4x4x64xf32> to vector<16x64xf32>
    %c1_267 = arith.constant 1 : index
    %c0_268 = arith.constant 0 : index
    %c0_269 = arith.constant 0 : index
    %198 = vector.load %arg18[%c1_267, %c0_268, %c0_269] : memref<6x6x64xf32, #tpu.memory_space<vmem>>, vector<4x4x64xf32>
    %199 = vector.shape_cast %198 : vector<4x4x64xf32> to vector<16x64xf32>
    %c1_270 = arith.constant 1 : index
    %c1_271 = arith.constant 1 : index
    %c0_272 = arith.constant 0 : index
    %200 = vector.load %arg18[%c1_270, %c1_271, %c0_272] : memref<6x6x64xf32, #tpu.memory_space<vmem>>, vector<4x4x64xf32>
    %201 = vector.shape_cast %200 : vector<4x4x64xf32> to vector<16x64xf32>
    %c1_273 = arith.constant 1 : index
    %c2_274 = arith.constant 2 : index
    %c0_275 = arith.constant 0 : index
    %202 = vector.load %arg18[%c1_273, %c2_274, %c0_275] : memref<6x6x64xf32, #tpu.memory_space<vmem>>, vector<4x4x64xf32>
    %203 = vector.shape_cast %202 : vector<4x4x64xf32> to vector<16x64xf32>
    %c2_276 = arith.constant 2 : index
    %c0_277 = arith.constant 0 : index
    %c0_278 = arith.constant 0 : index
    %204 = vector.load %arg18[%c2_276, %c0_277, %c0_278] : memref<6x6x64xf32, #tpu.memory_space<vmem>>, vector<4x4x64xf32>
    %205 = vector.shape_cast %204 : vector<4x4x64xf32> to vector<16x64xf32>
    %c2_279 = arith.constant 2 : index
    %c1_280 = arith.constant 1 : index
    %c0_281 = arith.constant 0 : index
    %206 = vector.load %arg18[%c2_279, %c1_280, %c0_281] : memref<6x6x64xf32, #tpu.memory_space<vmem>>, vector<4x4x64xf32>
    %207 = vector.shape_cast %206 : vector<4x4x64xf32> to vector<16x64xf32>
    %c2_282 = arith.constant 2 : index
    %c2_283 = arith.constant 2 : index
    %c0_284 = arith.constant 0 : index
    %208 = vector.load %arg18[%c2_282, %c2_283, %c0_284] : memref<6x6x64xf32, #tpu.memory_space<vmem>>, vector<4x4x64xf32>
    %209 = vector.shape_cast %208 : vector<4x4x64xf32> to vector<16x64xf32>
    %210 = tpu.concatenate %193, %195, %197, %199, %201, %203, %205, %207, %209 in 1 : vector<16x64xf32>, vector<16x64xf32>, vector<16x64xf32>, vector<16x64xf32>, vector<16x64xf32>, vector<16x64xf32>, vector<16x64xf32>, vector<16x64xf32>, vector<16x64xf32> -> vector<16x576xf32>
    %c0_285 = arith.constant 0 : index
    %c0_286 = arith.constant 0 : index
    %211 = vector.load %arg6[%c0_285, %c0_286] : memref<576x32xf32, #tpu.memory_space<vmem>>, vector<576x32xf32>
    %cst_287 = arith.constant dense<0.000000e+00> : vector<16x32xf32>
    %212 = tpu.matmul %210, %211, %cst_287 {dimension_numbers = #tpu.dot_dimension_numbers<[1], [0], [0], [1], [0, 0, 1, 1], [], []>} : vector<16x576xf32>, vector<576x32xf32>, vector<16x32xf32> -> vector<16x32xf32>
    %213 = vector.broadcast %191 : vector<1x32xf32> to vector<16x32xf32>
    %214 = arith.addf %212, %213 : vector<16x32xf32>
    %cst_288 = arith.constant 0.000000e+00 : f32
    %215 = vector.broadcast %cst_288 : f32 to vector<16x32xf32>
    %216 = arith.maximumf %214, %215 : vector<16x32xf32>
    %217 = vector.extract_strided_slice %216 {offsets = [0, 0], sizes = [4, 32], strides = [1, 1]} : vector<16x32xf32> to vector<4x32xf32>
    %c1_289 = arith.constant 1 : index
    %c1_290 = arith.constant 1 : index
    %c0_291 = arith.constant 0 : index
    %218 = vector.load %arg19[%c1_289, %c1_290, %c0_291] : memref<6x6x32xf32, #tpu.memory_space<vmem>>, vector<1x4x32xf32>
    %219 = vector.shape_cast %218 : vector<1x4x32xf32> to vector<4x32xf32>
    %220 = vector.shape_cast %217 : vector<4x32xf32> to vector<1x4x32xf32>
    tpu.vector_store %arg19[%c1_289, %c1_290, %c0_291], %220 {strides = array<i32>} : memref<6x6x32xf32, #tpu.memory_space<vmem>>, vector<1x4x32xf32>,
    %221 = vector.extract_strided_slice %216 {offsets = [4, 0], sizes = [4, 32], strides = [1, 1]} : vector<16x32xf32> to vector<4x32xf32>
    %c2_292 = arith.constant 2 : index
    %c1_293 = arith.constant 1 : index
    %c0_294 = arith.constant 0 : index
    %222 = vector.load %arg19[%c2_292, %c1_293, %c0_294] : memref<6x6x32xf32, #tpu.memory_space<vmem>>, vector<1x4x32xf32>
    %223 = vector.shape_cast %222 : vector<1x4x32xf32> to vector<4x32xf32>
    %224 = vector.shape_cast %221 : vector<4x32xf32> to vector<1x4x32xf32>
    tpu.vector_store %arg19[%c2_292, %c1_293, %c0_294], %224 {strides = array<i32>} : memref<6x6x32xf32, #tpu.memory_space<vmem>>, vector<1x4x32xf32>,
    %225 = vector.extract_strided_slice %216 {offsets = [8, 0], sizes = [4, 32], strides = [1, 1]} : vector<16x32xf32> to vector<4x32xf32>
    %c3_295 = arith.constant 3 : index
    %c1_296 = arith.constant 1 : index
    %c0_297 = arith.constant 0 : index
    %226 = vector.load %arg19[%c3_295, %c1_296, %c0_297] : memref<6x6x32xf32, #tpu.memory_space<vmem>>, vector<1x4x32xf32>
    %227 = vector.shape_cast %226 : vector<1x4x32xf32> to vector<4x32xf32>
    %228 = vector.shape_cast %225 : vector<4x32xf32> to vector<1x4x32xf32>
    tpu.vector_store %arg19[%c3_295, %c1_296, %c0_297], %228 {strides = array<i32>} : memref<6x6x32xf32, #tpu.memory_space<vmem>>, vector<1x4x32xf32>,
    %229 = vector.extract_strided_slice %216 {offsets = [12, 0], sizes = [4, 32], strides = [1, 1]} : vector<16x32xf32> to vector<4x32xf32>
    %c4_298 = arith.constant 4 : index
    %c1_299 = arith.constant 1 : index
    %c0_300 = arith.constant 0 : index
    %230 = vector.load %arg19[%c4_298, %c1_299, %c0_300] : memref<6x6x32xf32, #tpu.memory_space<vmem>>, vector<1x4x32xf32>
    %231 = vector.shape_cast %230 : vector<1x4x32xf32> to vector<4x32xf32>
    %232 = vector.shape_cast %229 : vector<4x32xf32> to vector<1x4x32xf32>
    tpu.vector_store %arg19[%c4_298, %c1_299, %c0_300], %232 {strides = array<i32>} : memref<6x6x32xf32, #tpu.memory_space<vmem>>, vector<1x4x32xf32>,
    %c5_301 = arith.constant 5 : index
    %c0_302 = arith.constant 0 : index
    %233 = vector.load %arg12[%c5_301, %c0_302] : memref<10x128xf32, #tpu.memory_space<vmem>>, vector<1x32xf32>
    %c0_303 = arith.constant 0 : index
    %c0_304 = arith.constant 0 : index
    %c0_305 = arith.constant 0 : index
    %234 = vector.load %arg19[%c0_303, %c0_304, %c0_305] : memref<6x6x32xf32, #tpu.memory_space<vmem>>, vector<4x4x32xf32>
    %235 = vector.shape_cast %234 : vector<4x4x32xf32> to vector<16x32xf32>
    %c0_306 = arith.constant 0 : index
    %c1_307 = arith.constant 1 : index
    %c0_308 = arith.constant 0 : index
    %236 = vector.load %arg19[%c0_306, %c1_307, %c0_308] : memref<6x6x32xf32, #tpu.memory_space<vmem>>, vector<4x4x32xf32>
    %237 = vector.shape_cast %236 : vector<4x4x32xf32> to vector<16x32xf32>
    %c0_309 = arith.constant 0 : index
    %c2_310 = arith.constant 2 : index
    %c0_311 = arith.constant 0 : index
    %238 = vector.load %arg19[%c0_309, %c2_310, %c0_311] : memref<6x6x32xf32, #tpu.memory_space<vmem>>, vector<4x4x32xf32>
    %239 = vector.shape_cast %238 : vector<4x4x32xf32> to vector<16x32xf32>
    %c1_312 = arith.constant 1 : index
    %c0_313 = arith.constant 0 : index
    %c0_314 = arith.constant 0 : index
    %240 = vector.load %arg19[%c1_312, %c0_313, %c0_314] : memref<6x6x32xf32, #tpu.memory_space<vmem>>, vector<4x4x32xf32>
    %241 = vector.shape_cast %240 : vector<4x4x32xf32> to vector<16x32xf32>
    %c1_315 = arith.constant 1 : index
    %c1_316 = arith.constant 1 : index
    %c0_317 = arith.constant 0 : index
    %242 = vector.load %arg19[%c1_315, %c1_316, %c0_317] : memref<6x6x32xf32, #tpu.memory_space<vmem>>, vector<4x4x32xf32>
    %243 = vector.shape_cast %242 : vector<4x4x32xf32> to vector<16x32xf32>
    %c1_318 = arith.constant 1 : index
    %c2_319 = arith.constant 2 : index
    %c0_320 = arith.constant 0 : index
    %244 = vector.load %arg19[%c1_318, %c2_319, %c0_320] : memref<6x6x32xf32, #tpu.memory_space<vmem>>, vector<4x4x32xf32>
    %245 = vector.shape_cast %244 : vector<4x4x32xf32> to vector<16x32xf32>
    %c2_321 = arith.constant 2 : index
    %c0_322 = arith.constant 0 : index
    %c0_323 = arith.constant 0 : index
    %246 = vector.load %arg19[%c2_321, %c0_322, %c0_323] : memref<6x6x32xf32, #tpu.memory_space<vmem>>, vector<4x4x32xf32>
    %247 = vector.shape_cast %246 : vector<4x4x32xf32> to vector<16x32xf32>
    %c2_324 = arith.constant 2 : index
    %c1_325 = arith.constant 1 : index
    %c0_326 = arith.constant 0 : index
    %248 = vector.load %arg19[%c2_324, %c1_325, %c0_326] : memref<6x6x32xf32, #tpu.memory_space<vmem>>, vector<4x4x32xf32>
    %249 = vector.shape_cast %248 : vector<4x4x32xf32> to vector<16x32xf32>
    %c2_327 = arith.constant 2 : index
    %c2_328 = arith.constant 2 : index
    %c0_329 = arith.constant 0 : index
    %250 = vector.load %arg19[%c2_327, %c2_328, %c0_329] : memref<6x6x32xf32, #tpu.memory_space<vmem>>, vector<4x4x32xf32>
    %251 = vector.shape_cast %250 : vector<4x4x32xf32> to vector<16x32xf32>
    %252 = tpu.concatenate %235, %237, %239, %241, %243, %245, %247, %249, %251 in 1 : vector<16x32xf32>, vector<16x32xf32>, vector<16x32xf32>, vector<16x32xf32>, vector<16x32xf32>, vector<16x32xf32>, vector<16x32xf32>, vector<16x32xf32>, vector<16x32xf32> -> vector<16x288xf32>
    %c0_330 = arith.constant 0 : index
    %c0_331 = arith.constant 0 : index
    %253 = vector.load %arg7[%c0_330, %c0_331] : memref<288x32xf32, #tpu.memory_space<vmem>>, vector<288x32xf32>
    %cst_332 = arith.constant dense<0.000000e+00> : vector<16x32xf32>
    %254 = tpu.matmul %252, %253, %cst_332 {dimension_numbers = #tpu.dot_dimension_numbers<[1], [0], [0], [1], [0, 0, 1, 1], [], []>} : vector<16x288xf32>, vector<288x32xf32>, vector<16x32xf32> -> vector<16x32xf32>
    %255 = vector.broadcast %233 : vector<1x32xf32> to vector<16x32xf32>
    %256 = arith.addf %254, %255 : vector<16x32xf32>
    %cst_333 = arith.constant 0.000000e+00 : f32
    %257 = vector.broadcast %cst_333 : f32 to vector<16x32xf32>
    %258 = arith.maximumf %256, %257 : vector<16x32xf32>
    %c0_334 = arith.constant 0 : index
    %c0_335 = arith.constant 0 : index
    %259 = vector.load %arg8[%c0_334, %c0_335] : memref<32x128xf32, #tpu.memory_space<vmem>>, vector<32x128xf32>
    %cst_336 = arith.constant dense<0.000000e+00> : vector<16x128xf32>
    %260 = tpu.matmul %258, %259, %cst_336 {dimension_numbers = #tpu.dot_dimension_numbers<[1], [0], [0], [1], [0, 0, 1, 1], [], []>} : vector<16x32xf32>, vector<32x128xf32>, vector<16x128xf32> -> vector<16x128xf32>
    %c6 = arith.constant 6 : index
    %c0_337 = arith.constant 0 : index
    %261 = vector.load %arg12[%c6, %c0_337] : memref<10x128xf32, #tpu.memory_space<vmem>>, vector<1x128xf32>
    %262 = vector.broadcast %261 : vector<1x128xf32> to vector<16x128xf32>
    %263 = arith.addf %260, %262 : vector<16x128xf32>
    %264 = vector.extract_strided_slice %263 {offsets = [0, 0], sizes = [4, 32], strides = [1, 1]} : vector<16x128xf32> to vector<4x32xf32>
    %265 = vector.extract_strided_slice %263 {offsets = [0, 32], sizes = [4, 32], strides = [1, 1]} : vector<16x128xf32> to vector<4x32xf32>
    %266 = vector.shape_cast %264 : vector<4x32xf32> to vector<4x1x32xf32>
    %267 = vector.shape_cast %265 : vector<4x32xf32> to vector<4x1x32xf32>
    %268 = tpu.concatenate %266, %267 in 1 : vector<4x1x32xf32>, vector<4x1x32xf32> -> vector<4x2x32xf32>
    %269 = vector.shape_cast %268 : vector<4x2x32xf32> to vector<8x32xf32>
    %c1_338 = arith.constant 1 : index
    %c1_339 = arith.constant 1 : index
    %c0_340 = arith.constant 0 : index
    %270 = vector.load %arg16[%c1_338, %c1_339, %c0_340] : memref<10x10x32xf32, #tpu.memory_space<vmem>>, vector<1x8x32xf32>
    %271 = vector.shape_cast %270 : vector<1x8x32xf32> to vector<8x32xf32>
    %272 = vector.shape_cast %269 : vector<8x32xf32> to vector<1x8x32xf32>
    tpu.vector_store %arg16[%c1_338, %c1_339, %c0_340], %272 {strides = array<i32>} : memref<10x10x32xf32, #tpu.memory_space<vmem>>, vector<1x8x32xf32>,
    %273 = vector.extract_strided_slice %263 {offsets = [0, 64], sizes = [4, 32], strides = [1, 1]} : vector<16x128xf32> to vector<4x32xf32>
    %274 = vector.extract_strided_slice %263 {offsets = [0, 96], sizes = [4, 32], strides = [1, 1]} : vector<16x128xf32> to vector<4x32xf32>
    %275 = vector.shape_cast %273 : vector<4x32xf32> to vector<4x1x32xf32>
    %276 = vector.shape_cast %274 : vector<4x32xf32> to vector<4x1x32xf32>
    %277 = tpu.concatenate %275, %276 in 1 : vector<4x1x32xf32>, vector<4x1x32xf32> -> vector<4x2x32xf32>
    %278 = vector.shape_cast %277 : vector<4x2x32xf32> to vector<8x32xf32>
    %c2_341 = arith.constant 2 : index
    %c1_342 = arith.constant 1 : index
    %c0_343 = arith.constant 0 : index
    %279 = vector.load %arg16[%c2_341, %c1_342, %c0_343] : memref<10x10x32xf32, #tpu.memory_space<vmem>>, vector<1x8x32xf32>
    %280 = vector.shape_cast %279 : vector<1x8x32xf32> to vector<8x32xf32>
    %281 = vector.shape_cast %278 : vector<8x32xf32> to vector<1x8x32xf32>
    tpu.vector_store %arg16[%c2_341, %c1_342, %c0_343], %281 {strides = array<i32>} : memref<10x10x32xf32, #tpu.memory_space<vmem>>, vector<1x8x32xf32>,
    %282 = vector.extract_strided_slice %263 {offsets = [4, 0], sizes = [4, 32], strides = [1, 1]} : vector<16x128xf32> to vector<4x32xf32>
    %283 = vector.extract_strided_slice %263 {offsets = [4, 32], sizes = [4, 32], strides = [1, 1]} : vector<16x128xf32> to vector<4x32xf32>
    %284 = vector.shape_cast %282 : vector<4x32xf32> to vector<4x1x32xf32>
    %285 = vector.shape_cast %283 : vector<4x32xf32> to vector<4x1x32xf32>
    %286 = tpu.concatenate %284, %285 in 1 : vector<4x1x32xf32>, vector<4x1x32xf32> -> vector<4x2x32xf32>
    %287 = vector.shape_cast %286 : vector<4x2x32xf32> to vector<8x32xf32>
    %c3_344 = arith.constant 3 : index
    %c1_345 = arith.constant 1 : index
    %c0_346 = arith.constant 0 : index
    %288 = vector.load %arg16[%c3_344, %c1_345, %c0_346] : memref<10x10x32xf32, #tpu.memory_space<vmem>>, vector<1x8x32xf32>
    %289 = vector.shape_cast %288 : vector<1x8x32xf32> to vector<8x32xf32>
    %290 = vector.shape_cast %287 : vector<8x32xf32> to vector<1x8x32xf32>
    tpu.vector_store %arg16[%c3_344, %c1_345, %c0_346], %290 {strides = array<i32>} : memref<10x10x32xf32, #tpu.memory_space<vmem>>, vector<1x8x32xf32>,
    %291 = vector.extract_strided_slice %263 {offsets = [4, 64], sizes = [4, 32], strides = [1, 1]} : vector<16x128xf32> to vector<4x32xf32>
    %292 = vector.extract_strided_slice %263 {offsets = [4, 96], sizes = [4, 32], strides = [1, 1]} : vector<16x128xf32> to vector<4x32xf32>
    %293 = vector.shape_cast %291 : vector<4x32xf32> to vector<4x1x32xf32>
    %294 = vector.shape_cast %292 : vector<4x32xf32> to vector<4x1x32xf32>
    %295 = tpu.concatenate %293, %294 in 1 : vector<4x1x32xf32>, vector<4x1x32xf32> -> vector<4x2x32xf32>
    %296 = vector.shape_cast %295 : vector<4x2x32xf32> to vector<8x32xf32>
    %c4_347 = arith.constant 4 : index
    %c1_348 = arith.constant 1 : index
    %c0_349 = arith.constant 0 : index
    %297 = vector.load %arg16[%c4_347, %c1_348, %c0_349] : memref<10x10x32xf32, #tpu.memory_space<vmem>>, vector<1x8x32xf32>
    %298 = vector.shape_cast %297 : vector<1x8x32xf32> to vector<8x32xf32>
    %299 = vector.shape_cast %296 : vector<8x32xf32> to vector<1x8x32xf32>
    tpu.vector_store %arg16[%c4_347, %c1_348, %c0_349], %299 {strides = array<i32>} : memref<10x10x32xf32, #tpu.memory_space<vmem>>, vector<1x8x32xf32>,
    %300 = vector.extract_strided_slice %263 {offsets = [8, 0], sizes = [4, 32], strides = [1, 1]} : vector<16x128xf32> to vector<4x32xf32>
    %301 = vector.extract_strided_slice %263 {offsets = [8, 32], sizes = [4, 32], strides = [1, 1]} : vector<16x128xf32> to vector<4x32xf32>
    %302 = vector.shape_cast %300 : vector<4x32xf32> to vector<4x1x32xf32>
    %303 = vector.shape_cast %301 : vector<4x32xf32> to vector<4x1x32xf32>
    %304 = tpu.concatenate %302, %303 in 1 : vector<4x1x32xf32>, vector<4x1x32xf32> -> vector<4x2x32xf32>
    %305 = vector.shape_cast %304 : vector<4x2x32xf32> to vector<8x32xf32>
    %c5_350 = arith.constant 5 : index
    %c1_351 = arith.constant 1 : index
    %c0_352 = arith.constant 0 : index
    %306 = vector.load %arg16[%c5_350, %c1_351, %c0_352] : memref<10x10x32xf32, #tpu.memory_space<vmem>>, vector<1x8x32xf32>
    %307 = vector.shape_cast %306 : vector<1x8x32xf32> to vector<8x32xf32>
    %308 = vector.shape_cast %305 : vector<8x32xf32> to vector<1x8x32xf32>
    tpu.vector_store %arg16[%c5_350, %c1_351, %c0_352], %308 {strides = array<i32>} : memref<10x10x32xf32, #tpu.memory_space<vmem>>, vector<1x8x32xf32>,
    %309 = vector.extract_strided_slice %263 {offsets = [8, 64], sizes = [4, 32], strides = [1, 1]} : vector<16x128xf32> to vector<4x32xf32>
    %310 = vector.extract_strided_slice %263 {offsets = [8, 96], sizes = [4, 32], strides = [1, 1]} : vector<16x128xf32> to vector<4x32xf32>
    %311 = vector.shape_cast %309 : vector<4x32xf32> to vector<4x1x32xf32>
    %312 = vector.shape_cast %310 : vector<4x32xf32> to vector<4x1x32xf32>
    %313 = tpu.concatenate %311, %312 in 1 : vector<4x1x32xf32>, vector<4x1x32xf32> -> vector<4x2x32xf32>
    %314 = vector.shape_cast %313 : vector<4x2x32xf32> to vector<8x32xf32>
    %c6_353 = arith.constant 6 : index
    %c1_354 = arith.constant 1 : index
    %c0_355 = arith.constant 0 : index
    %315 = vector.load %arg16[%c6_353, %c1_354, %c0_355] : memref<10x10x32xf32, #tpu.memory_space<vmem>>, vector<1x8x32xf32>
    %316 = vector.shape_cast %315 : vector<1x8x32xf32> to vector<8x32xf32>
    %317 = vector.shape_cast %314 : vector<8x32xf32> to vector<1x8x32xf32>
    tpu.vector_store %arg16[%c6_353, %c1_354, %c0_355], %317 {strides = array<i32>} : memref<10x10x32xf32, #tpu.memory_space<vmem>>, vector<1x8x32xf32>,
    %318 = vector.extract_strided_slice %263 {offsets = [12, 0], sizes = [4, 32], strides = [1, 1]} : vector<16x128xf32> to vector<4x32xf32>
    %319 = vector.extract_strided_slice %263 {offsets = [12, 32], sizes = [4, 32], strides = [1, 1]} : vector<16x128xf32> to vector<4x32xf32>
    %320 = vector.shape_cast %318 : vector<4x32xf32> to vector<4x1x32xf32>
    %321 = vector.shape_cast %319 : vector<4x32xf32> to vector<4x1x32xf32>
    %322 = tpu.concatenate %320, %321 in 1 : vector<4x1x32xf32>, vector<4x1x32xf32> -> vector<4x2x32xf32>
    %323 = vector.shape_cast %322 : vector<4x2x32xf32> to vector<8x32xf32>
    %c7 = arith.constant 7 : index
    %c1_356 = arith.constant 1 : index
    %c0_357 = arith.constant 0 : index
    %324 = vector.load %arg16[%c7, %c1_356, %c0_357] : memref<10x10x32xf32, #tpu.memory_space<vmem>>, vector<1x8x32xf32>
    %325 = vector.shape_cast %324 : vector<1x8x32xf32> to vector<8x32xf32>
    %326 = vector.shape_cast %323 : vector<8x32xf32> to vector<1x8x32xf32>
    tpu.vector_store %arg16[%c7, %c1_356, %c0_357], %326 {strides = array<i32>} : memref<10x10x32xf32, #tpu.memory_space<vmem>>, vector<1x8x32xf32>,
    %327 = vector.extract_strided_slice %263 {offsets = [12, 64], sizes = [4, 32], strides = [1, 1]} : vector<16x128xf32> to vector<4x32xf32>
    %328 = vector.extract_strided_slice %263 {offsets = [12, 96], sizes = [4, 32], strides = [1, 1]} : vector<16x128xf32> to vector<4x32xf32>
    %329 = vector.shape_cast %327 : vector<4x32xf32> to vector<4x1x32xf32>
    %330 = vector.shape_cast %328 : vector<4x32xf32> to vector<4x1x32xf32>
    %331 = tpu.concatenate %329, %330 in 1 : vector<4x1x32xf32>, vector<4x1x32xf32> -> vector<4x2x32xf32>
    %332 = vector.shape_cast %331 : vector<4x2x32xf32> to vector<8x32xf32>
    %c8 = arith.constant 8 : index
    %c1_358 = arith.constant 1 : index
    %c0_359 = arith.constant 0 : index
    %333 = vector.load %arg16[%c8, %c1_358, %c0_359] : memref<10x10x32xf32, #tpu.memory_space<vmem>>, vector<1x8x32xf32>
    %334 = vector.shape_cast %333 : vector<1x8x32xf32> to vector<8x32xf32>
    %335 = vector.shape_cast %332 : vector<8x32xf32> to vector<1x8x32xf32>
    tpu.vector_store %arg16[%c8, %c1_358, %c0_359], %335 {strides = array<i32>} : memref<10x10x32xf32, #tpu.memory_space<vmem>>, vector<1x8x32xf32>,
    %c7_360 = arith.constant 7 : index
    %c0_361 = arith.constant 0 : index
    %336 = vector.load %arg12[%c7_360, %c0_361] : memref<10x128xf32, #tpu.memory_space<vmem>>, vector<1x32xf32>
    %c0_362 = arith.constant 0 : index
    %c0_363 = arith.constant 0 : index
    %c0_364 = arith.constant 0 : index
    %337 = vector.load %arg16[%c0_362, %c0_363, %c0_364] : memref<10x10x32xf32, #tpu.memory_space<vmem>>, vector<8x8x32xf32>
    %338 = vector.shape_cast %337 : vector<8x8x32xf32> to vector<64x32xf32>
    %c0_365 = arith.constant 0 : index
    %c0_366 = arith.constant 0 : index
    %c0_367 = arith.constant 0 : index
    %339 = vector.load %arg17[%c0_365, %c0_366, %c0_367] : memref<10x10x64xf32, #tpu.memory_space<vmem>>, vector<8x8x64xf32>
    %340 = vector.shape_cast %339 : vector<8x8x64xf32> to vector<64x64xf32>
    %c0_368 = arith.constant 0 : index
    %c1_369 = arith.constant 1 : index
    %c0_370 = arith.constant 0 : index
    %341 = vector.load %arg16[%c0_368, %c1_369, %c0_370] : memref<10x10x32xf32, #tpu.memory_space<vmem>>, vector<8x8x32xf32>
    %342 = vector.shape_cast %341 : vector<8x8x32xf32> to vector<64x32xf32>
    %c0_371 = arith.constant 0 : index
    %c1_372 = arith.constant 1 : index
    %c0_373 = arith.constant 0 : index
    %343 = vector.load %arg17[%c0_371, %c1_372, %c0_373] : memref<10x10x64xf32, #tpu.memory_space<vmem>>, vector<8x8x64xf32>
    %344 = vector.shape_cast %343 : vector<8x8x64xf32> to vector<64x64xf32>
    %c0_374 = arith.constant 0 : index
    %c2_375 = arith.constant 2 : index
    %c0_376 = arith.constant 0 : index
    %345 = vector.load %arg16[%c0_374, %c2_375, %c0_376] : memref<10x10x32xf32, #tpu.memory_space<vmem>>, vector<8x8x32xf32>
    %346 = vector.shape_cast %345 : vector<8x8x32xf32> to vector<64x32xf32>
    %c0_377 = arith.constant 0 : index
    %c2_378 = arith.constant 2 : index
    %c0_379 = arith.constant 0 : index
    %347 = vector.load %arg17[%c0_377, %c2_378, %c0_379] : memref<10x10x64xf32, #tpu.memory_space<vmem>>, vector<8x8x64xf32>
    %348 = vector.shape_cast %347 : vector<8x8x64xf32> to vector<64x64xf32>
    %c1_380 = arith.constant 1 : index
    %c0_381 = arith.constant 0 : index
    %c0_382 = arith.constant 0 : index
    %349 = vector.load %arg16[%c1_380, %c0_381, %c0_382] : memref<10x10x32xf32, #tpu.memory_space<vmem>>, vector<8x8x32xf32>
    %350 = vector.shape_cast %349 : vector<8x8x32xf32> to vector<64x32xf32>
    %c1_383 = arith.constant 1 : index
    %c0_384 = arith.constant 0 : index
    %c0_385 = arith.constant 0 : index
    %351 = vector.load %arg17[%c1_383, %c0_384, %c0_385] : memref<10x10x64xf32, #tpu.memory_space<vmem>>, vector<8x8x64xf32>
    %352 = vector.shape_cast %351 : vector<8x8x64xf32> to vector<64x64xf32>
    %c1_386 = arith.constant 1 : index
    %c1_387 = arith.constant 1 : index
    %c0_388 = arith.constant 0 : index
    %353 = vector.load %arg16[%c1_386, %c1_387, %c0_388] : memref<10x10x32xf32, #tpu.memory_space<vmem>>, vector<8x8x32xf32>
    %354 = vector.shape_cast %353 : vector<8x8x32xf32> to vector<64x32xf32>
    %c1_389 = arith.constant 1 : index
    %c1_390 = arith.constant 1 : index
    %c0_391 = arith.constant 0 : index
    %355 = vector.load %arg17[%c1_389, %c1_390, %c0_391] : memref<10x10x64xf32, #tpu.memory_space<vmem>>, vector<8x8x64xf32>
    %356 = vector.shape_cast %355 : vector<8x8x64xf32> to vector<64x64xf32>
    %c1_392 = arith.constant 1 : index
    %c2_393 = arith.constant 2 : index
    %c0_394 = arith.constant 0 : index
    %357 = vector.load %arg16[%c1_392, %c2_393, %c0_394] : memref<10x10x32xf32, #tpu.memory_space<vmem>>, vector<8x8x32xf32>
    %358 = vector.shape_cast %357 : vector<8x8x32xf32> to vector<64x32xf32>
    %c1_395 = arith.constant 1 : index
    %c2_396 = arith.constant 2 : index
    %c0_397 = arith.constant 0 : index
    %359 = vector.load %arg17[%c1_395, %c2_396, %c0_397] : memref<10x10x64xf32, #tpu.memory_space<vmem>>, vector<8x8x64xf32>
    %360 = vector.shape_cast %359 : vector<8x8x64xf32> to vector<64x64xf32>
    %c2_398 = arith.constant 2 : index
    %c0_399 = arith.constant 0 : index
    %c0_400 = arith.constant 0 : index
    %361 = vector.load %arg16[%c2_398, %c0_399, %c0_400] : memref<10x10x32xf32, #tpu.memory_space<vmem>>, vector<8x8x32xf32>
    %362 = vector.shape_cast %361 : vector<8x8x32xf32> to vector<64x32xf32>
    %c2_401 = arith.constant 2 : index
    %c0_402 = arith.constant 0 : index
    %c0_403 = arith.constant 0 : index
    %363 = vector.load %arg17[%c2_401, %c0_402, %c0_403] : memref<10x10x64xf32, #tpu.memory_space<vmem>>, vector<8x8x64xf32>
    %364 = vector.shape_cast %363 : vector<8x8x64xf32> to vector<64x64xf32>
    %c2_404 = arith.constant 2 : index
    %c1_405 = arith.constant 1 : index
    %c0_406 = arith.constant 0 : index
    %365 = vector.load %arg16[%c2_404, %c1_405, %c0_406] : memref<10x10x32xf32, #tpu.memory_space<vmem>>, vector<8x8x32xf32>
    %366 = vector.shape_cast %365 : vector<8x8x32xf32> to vector<64x32xf32>
    %c2_407 = arith.constant 2 : index
    %c1_408 = arith.constant 1 : index
    %c0_409 = arith.constant 0 : index
    %367 = vector.load %arg17[%c2_407, %c1_408, %c0_409] : memref<10x10x64xf32, #tpu.memory_space<vmem>>, vector<8x8x64xf32>
    %368 = vector.shape_cast %367 : vector<8x8x64xf32> to vector<64x64xf32>
    %c2_410 = arith.constant 2 : index
    %c2_411 = arith.constant 2 : index
    %c0_412 = arith.constant 0 : index
    %369 = vector.load %arg16[%c2_410, %c2_411, %c0_412] : memref<10x10x32xf32, #tpu.memory_space<vmem>>, vector<8x8x32xf32>
    %370 = vector.shape_cast %369 : vector<8x8x32xf32> to vector<64x32xf32>
    %c2_413 = arith.constant 2 : index
    %c2_414 = arith.constant 2 : index
    %c0_415 = arith.constant 0 : index
    %371 = vector.load %arg17[%c2_413, %c2_414, %c0_415] : memref<10x10x64xf32, #tpu.memory_space<vmem>>, vector<8x8x64xf32>
    %372 = vector.shape_cast %371 : vector<8x8x64xf32> to vector<64x64xf32>
    %373 = tpu.concatenate %338, %340, %342, %344, %346, %348, %350, %352, %354, %356, %358, %360, %362, %364, %366, %368 in 1 : vector<64x32xf32>, vector<64x64xf32>, vector<64x32xf32>, vector<64x64xf32>, vector<64x32xf32>, vector<64x64xf32>, vector<64x32xf32>, vector<64x64xf32>, vector<64x32xf32>, vector<64x64xf32>, vector<64x32xf32>, vector<64x64xf32>, vector<64x32xf32>, vector<64x64xf32>, vector<64x32xf32>, vector<64x64xf32> -> vector<64x768xf32>
    %374 = tpu.concatenate %370, %372 in 1 : vector<64x32xf32>, vector<64x64xf32> -> vector<64x96xf32>
    %375 = tpu.concatenate %373, %374 in 1 : vector<64x768xf32>, vector<64x96xf32> -> vector<64x864xf32>
    %c0_416 = arith.constant 0 : index
    %c0_417 = arith.constant 0 : index
    %376 = vector.load %arg9[%c0_416, %c0_417] : memref<864x32xf32, #tpu.memory_space<vmem>>, vector<864x32xf32>
    %cst_418 = arith.constant dense<0.000000e+00> : vector<64x32xf32>
    %377 = tpu.matmul %375, %376, %cst_418 {dimension_numbers = #tpu.dot_dimension_numbers<[1], [0], [0], [1], [0, 0, 1, 1], [], []>} : vector<64x864xf32>, vector<864x32xf32>, vector<64x32xf32> -> vector<64x32xf32>
    %378 = vector.broadcast %336 : vector<1x32xf32> to vector<64x32xf32>
    %379 = arith.addf %377, %378 : vector<64x32xf32>
    %cst_419 = arith.constant 0.000000e+00 : f32
    %380 = vector.broadcast %cst_419 : f32 to vector<64x32xf32>
    %381 = arith.maximumf %379, %380 : vector<64x32xf32>
    %382 = vector.shape_cast %381 : vector<64x32xf32> to vector<8x8x32xf32>
    %c1_420 = arith.constant 1 : index
    %c1_421 = arith.constant 1 : index
    %c0_422 = arith.constant 0 : index
    %383 = vector.load %arg16[%c1_420, %c1_421, %c0_422] : memref<10x10x32xf32, #tpu.memory_space<vmem>>, vector<8x8x32xf32>
    tpu.vector_store %arg16[%c1_420, %c1_421, %c0_422], %382 {strides = array<i32>} : memref<10x10x32xf32, #tpu.memory_space<vmem>>, vector<8x8x32xf32>,
    %c8_423 = arith.constant 8 : index
    %c0_424 = arith.constant 0 : index
    %384 = vector.load %arg12[%c8_423, %c0_424] : memref<10x128xf32, #tpu.memory_space<vmem>>, vector<1x32xf32>
    %c0_425 = arith.constant 0 : index
    %c0_426 = arith.constant 0 : index
    %c0_427 = arith.constant 0 : index
    %385 = vector.load %arg16[%c0_425, %c0_426, %c0_427] : memref<10x10x32xf32, #tpu.memory_space<vmem>>, vector<8x8x32xf32>
    %386 = vector.shape_cast %385 : vector<8x8x32xf32> to vector<64x32xf32>
    %c0_428 = arith.constant 0 : index
    %c1_429 = arith.constant 1 : index
    %c0_430 = arith.constant 0 : index
    %387 = vector.load %arg16[%c0_428, %c1_429, %c0_430] : memref<10x10x32xf32, #tpu.memory_space<vmem>>, vector<8x8x32xf32>
    %388 = vector.shape_cast %387 : vector<8x8x32xf32> to vector<64x32xf32>
    %c0_431 = arith.constant 0 : index
    %c2_432 = arith.constant 2 : index
    %c0_433 = arith.constant 0 : index
    %389 = vector.load %arg16[%c0_431, %c2_432, %c0_433] : memref<10x10x32xf32, #tpu.memory_space<vmem>>, vector<8x8x32xf32>
    %390 = vector.shape_cast %389 : vector<8x8x32xf32> to vector<64x32xf32>
    %c1_434 = arith.constant 1 : index
    %c0_435 = arith.constant 0 : index
    %c0_436 = arith.constant 0 : index
    %391 = vector.load %arg16[%c1_434, %c0_435, %c0_436] : memref<10x10x32xf32, #tpu.memory_space<vmem>>, vector<8x8x32xf32>
    %392 = vector.shape_cast %391 : vector<8x8x32xf32> to vector<64x32xf32>
    %c1_437 = arith.constant 1 : index
    %c1_438 = arith.constant 1 : index
    %c0_439 = arith.constant 0 : index
    %393 = vector.load %arg16[%c1_437, %c1_438, %c0_439] : memref<10x10x32xf32, #tpu.memory_space<vmem>>, vector<8x8x32xf32>
    %394 = vector.shape_cast %393 : vector<8x8x32xf32> to vector<64x32xf32>
    %c1_440 = arith.constant 1 : index
    %c2_441 = arith.constant 2 : index
    %c0_442 = arith.constant 0 : index
    %395 = vector.load %arg16[%c1_440, %c2_441, %c0_442] : memref<10x10x32xf32, #tpu.memory_space<vmem>>, vector<8x8x32xf32>
    %396 = vector.shape_cast %395 : vector<8x8x32xf32> to vector<64x32xf32>
    %c2_443 = arith.constant 2 : index
    %c0_444 = arith.constant 0 : index
    %c0_445 = arith.constant 0 : index
    %397 = vector.load %arg16[%c2_443, %c0_444, %c0_445] : memref<10x10x32xf32, #tpu.memory_space<vmem>>, vector<8x8x32xf32>
    %398 = vector.shape_cast %397 : vector<8x8x32xf32> to vector<64x32xf32>
    %c2_446 = arith.constant 2 : index
    %c1_447 = arith.constant 1 : index
    %c0_448 = arith.constant 0 : index
    %399 = vector.load %arg16[%c2_446, %c1_447, %c0_448] : memref<10x10x32xf32, #tpu.memory_space<vmem>>, vector<8x8x32xf32>
    %400 = vector.shape_cast %399 : vector<8x8x32xf32> to vector<64x32xf32>
    %c2_449 = arith.constant 2 : index
    %c2_450 = arith.constant 2 : index
    %c0_451 = arith.constant 0 : index
    %401 = vector.load %arg16[%c2_449, %c2_450, %c0_451] : memref<10x10x32xf32, #tpu.memory_space<vmem>>, vector<8x8x32xf32>
    %402 = vector.shape_cast %401 : vector<8x8x32xf32> to vector<64x32xf32>
    %403 = tpu.concatenate %386, %388, %390, %392, %394, %396, %398, %400, %402 in 1 : vector<64x32xf32>, vector<64x32xf32>, vector<64x32xf32>, vector<64x32xf32>, vector<64x32xf32>, vector<64x32xf32>, vector<64x32xf32>, vector<64x32xf32>, vector<64x32xf32> -> vector<64x288xf32>
    %c0_452 = arith.constant 0 : index
    %c0_453 = arith.constant 0 : index
    %404 = vector.load %arg10[%c0_452, %c0_453] : memref<288x32xf32, #tpu.memory_space<vmem>>, vector<288x32xf32>
    %cst_454 = arith.constant dense<0.000000e+00> : vector<64x32xf32>
    %405 = tpu.matmul %403, %404, %cst_454 {dimension_numbers = #tpu.dot_dimension_numbers<[1], [0], [0], [1], [0, 0, 1, 1], [], []>} : vector<64x288xf32>, vector<288x32xf32>, vector<64x32xf32> -> vector<64x32xf32>
    %406 = vector.broadcast %384 : vector<1x32xf32> to vector<64x32xf32>
    %407 = arith.addf %405, %406 : vector<64x32xf32>
    %cst_455 = arith.constant 0.000000e+00 : f32
    %408 = vector.broadcast %cst_455 : f32 to vector<64x32xf32>
    %409 = arith.maximumf %407, %408 : vector<64x32xf32>
    %c0_456 = arith.constant 0 : index
    %c0_457 = arith.constant 0 : index
    %410 = vector.load %arg11[%c0_456, %c0_457] : memref<32x12xf32, #tpu.memory_space<vmem>>, vector<32x12xf32>
    %cst_458 = arith.constant dense<0.000000e+00> : vector<64x12xf32>
    %411 = tpu.matmul %409, %410, %cst_458 {dimension_numbers = #tpu.dot_dimension_numbers<[1], [0], [0], [1], [0, 0, 1, 1], [], []>} : vector<64x32xf32>, vector<32x12xf32>, vector<64x12xf32> -> vector<64x12xf32>
    %c9_459 = arith.constant 9 : index
    %c0_460 = arith.constant 0 : index
    %412 = vector.load %arg12[%c9_459, %c0_460] : memref<10x128xf32, #tpu.memory_space<vmem>>, vector<1x12xf32>
    %413 = vector.broadcast %412 : vector<1x12xf32> to vector<64x12xf32>
    %414 = arith.addf %411, %413 : vector<64x12xf32>
    %415 = vector.extract_strided_slice %414 {offsets = [0, 0], sizes = [8, 3], strides = [1, 1]} : vector<64x12xf32> to vector<8x3xf32>
    %416 = vector.extract_strided_slice %414 {offsets = [0, 3], sizes = [8, 3], strides = [1, 1]} : vector<64x12xf32> to vector<8x3xf32>
    %417 = vector.shape_cast %415 : vector<8x3xf32> to vector<8x1x3xf32>
    %418 = vector.shape_cast %416 : vector<8x3xf32> to vector<8x1x3xf32>
    %419 = tpu.concatenate %417, %418 in 1 : vector<8x1x3xf32>, vector<8x1x3xf32> -> vector<8x2x3xf32>
    %420 = vector.shape_cast %419 : vector<8x2x3xf32> to vector<16x3xf32>
    %c0_461 = arith.constant 0 : index
    %c0_462 = arith.constant 0 : index
    %c0_463 = arith.constant 0 : index
    %c0_464 = arith.constant 0 : index
    %421 = vector.load %arg13[%c0_461, %c0_462, %c0_463, %c0_464] : memref<1x16x16x3xf32, #tpu.memory_space<vmem>>, vector<1x1x16x3xf32>
    %422 = vector.shape_cast %421 : vector<1x1x16x3xf32> to vector<16x3xf32>
    %423 = vector.shape_cast %420 : vector<16x3xf32> to vector<1x1x16x3xf32>
    tpu.vector_store %arg13[%c0_461, %c0_462, %c0_463, %c0_464], %423 {strides = array<i32>} : memref<1x16x16x3xf32, #tpu.memory_space<vmem>>, vector<1x1x16x3xf32>,
    %424 = vector.extract_strided_slice %414 {offsets = [0, 6], sizes = [8, 3], strides = [1, 1]} : vector<64x12xf32> to vector<8x3xf32>
    %425 = vector.extract_strided_slice %414 {offsets = [0, 9], sizes = [8, 3], strides = [1, 1]} : vector<64x12xf32> to vector<8x3xf32>
    %426 = vector.shape_cast %424 : vector<8x3xf32> to vector<8x1x3xf32>
    %427 = vector.shape_cast %425 : vector<8x3xf32> to vector<8x1x3xf32>
    %428 = tpu.concatenate %426, %427 in 1 : vector<8x1x3xf32>, vector<8x1x3xf32> -> vector<8x2x3xf32>
    %429 = vector.shape_cast %428 : vector<8x2x3xf32> to vector<16x3xf32>
    %c0_465 = arith.constant 0 : index
    %c1_466 = arith.constant 1 : index
    %c0_467 = arith.constant 0 : index
    %c0_468 = arith.constant 0 : index
    %430 = vector.load %arg13[%c0_465, %c1_466, %c0_467, %c0_468] : memref<1x16x16x3xf32, #tpu.memory_space<vmem>>, vector<1x1x16x3xf32>
    %431 = vector.shape_cast %430 : vector<1x1x16x3xf32> to vector<16x3xf32>
    %432 = vector.shape_cast %429 : vector<16x3xf32> to vector<1x1x16x3xf32>
    tpu.vector_store %arg13[%c0_465, %c1_466, %c0_467, %c0_468], %432 {strides = array<i32>} : memref<1x16x16x3xf32, #tpu.memory_space<vmem>>, vector<1x1x16x3xf32>,
    %433 = vector.extract_strided_slice %414 {offsets = [8, 0], sizes = [8, 3], strides = [1, 1]} : vector<64x12xf32> to vector<8x3xf32>
    %434 = vector.extract_strided_slice %414 {offsets = [8, 3], sizes = [8, 3], strides = [1, 1]} : vector<64x12xf32> to vector<8x3xf32>
    %435 = vector.shape_cast %433 : vector<8x3xf32> to vector<8x1x3xf32>
    %436 = vector.shape_cast %434 : vector<8x3xf32> to vector<8x1x3xf32>
    %437 = tpu.concatenate %435, %436 in 1 : vector<8x1x3xf32>, vector<8x1x3xf32> -> vector<8x2x3xf32>
    %438 = vector.shape_cast %437 : vector<8x2x3xf32> to vector<16x3xf32>
    %c0_469 = arith.constant 0 : index
    %c2_470 = arith.constant 2 : index
    %c0_471 = arith.constant 0 : index
    %c0_472 = arith.constant 0 : index
    %439 = vector.load %arg13[%c0_469, %c2_470, %c0_471, %c0_472] : memref<1x16x16x3xf32, #tpu.memory_space<vmem>>, vector<1x1x16x3xf32>
    %440 = vector.shape_cast %439 : vector<1x1x16x3xf32> to vector<16x3xf32>
    %441 = vector.shape_cast %438 : vector<16x3xf32> to vector<1x1x16x3xf32>
    tpu.vector_store %arg13[%c0_469, %c2_470, %c0_471, %c0_472], %441 {strides = array<i32>} : memref<1x16x16x3xf32, #tpu.memory_space<vmem>>, vector<1x1x16x3xf32>,
    %442 = vector.extract_strided_slice %414 {offsets = [8, 6], sizes = [8, 3], strides = [1, 1]} : vector<64x12xf32> to vector<8x3xf32>
    %443 = vector.extract_strided_slice %414 {offsets = [8, 9], sizes = [8, 3], strides = [1, 1]} : vector<64x12xf32> to vector<8x3xf32>
    %444 = vector.shape_cast %442 : vector<8x3xf32> to vector<8x1x3xf32>
    %445 = vector.shape_cast %443 : vector<8x3xf32> to vector<8x1x3xf32>
    %446 = tpu.concatenate %444, %445 in 1 : vector<8x1x3xf32>, vector<8x1x3xf32> -> vector<8x2x3xf32>
    %447 = vector.shape_cast %446 : vector<8x2x3xf32> to vector<16x3xf32>
    %c0_473 = arith.constant 0 : index
    %c3_474 = arith.constant 3 : index
    %c0_475 = arith.constant 0 : index
    %c0_476 = arith.constant 0 : index
    %448 = vector.load %arg13[%c0_473, %c3_474, %c0_475, %c0_476] : memref<1x16x16x3xf32, #tpu.memory_space<vmem>>, vector<1x1x16x3xf32>
    %449 = vector.shape_cast %448 : vector<1x1x16x3xf32> to vector<16x3xf32>
    %450 = vector.shape_cast %447 : vector<16x3xf32> to vector<1x1x16x3xf32>
    tpu.vector_store %arg13[%c0_473, %c3_474, %c0_475, %c0_476], %450 {strides = array<i32>} : memref<1x16x16x3xf32, #tpu.memory_space<vmem>>, vector<1x1x16x3xf32>,
    %451 = vector.extract_strided_slice %414 {offsets = [16, 0], sizes = [8, 3], strides = [1, 1]} : vector<64x12xf32> to vector<8x3xf32>
    %452 = vector.extract_strided_slice %414 {offsets = [16, 3], sizes = [8, 3], strides = [1, 1]} : vector<64x12xf32> to vector<8x3xf32>
    %453 = vector.shape_cast %451 : vector<8x3xf32> to vector<8x1x3xf32>
    %454 = vector.shape_cast %452 : vector<8x3xf32> to vector<8x1x3xf32>
    %455 = tpu.concatenate %453, %454 in 1 : vector<8x1x3xf32>, vector<8x1x3xf32> -> vector<8x2x3xf32>
    %456 = vector.shape_cast %455 : vector<8x2x3xf32> to vector<16x3xf32>
    %c0_477 = arith.constant 0 : index
    %c4_478 = arith.constant 4 : index
    %c0_479 = arith.constant 0 : index
    %c0_480 = arith.constant 0 : index
    %457 = vector.load %arg13[%c0_477, %c4_478, %c0_479, %c0_480] : memref<1x16x16x3xf32, #tpu.memory_space<vmem>>, vector<1x1x16x3xf32>
    %458 = vector.shape_cast %457 : vector<1x1x16x3xf32> to vector<16x3xf32>
    %459 = vector.shape_cast %456 : vector<16x3xf32> to vector<1x1x16x3xf32>
    tpu.vector_store %arg13[%c0_477, %c4_478, %c0_479, %c0_480], %459 {strides = array<i32>} : memref<1x16x16x3xf32, #tpu.memory_space<vmem>>, vector<1x1x16x3xf32>,
    %460 = vector.extract_strided_slice %414 {offsets = [16, 6], sizes = [8, 3], strides = [1, 1]} : vector<64x12xf32> to vector<8x3xf32>
    %461 = vector.extract_strided_slice %414 {offsets = [16, 9], sizes = [8, 3], strides = [1, 1]} : vector<64x12xf32> to vector<8x3xf32>
    %462 = vector.shape_cast %460 : vector<8x3xf32> to vector<8x1x3xf32>
    %463 = vector.shape_cast %461 : vector<8x3xf32> to vector<8x1x3xf32>
    %464 = tpu.concatenate %462, %463 in 1 : vector<8x1x3xf32>, vector<8x1x3xf32> -> vector<8x2x3xf32>
    %465 = vector.shape_cast %464 : vector<8x2x3xf32> to vector<16x3xf32>
    %c0_481 = arith.constant 0 : index
    %c5_482 = arith.constant 5 : index
    %c0_483 = arith.constant 0 : index
    %c0_484 = arith.constant 0 : index
    %466 = vector.load %arg13[%c0_481, %c5_482, %c0_483, %c0_484] : memref<1x16x16x3xf32, #tpu.memory_space<vmem>>, vector<1x1x16x3xf32>
    %467 = vector.shape_cast %466 : vector<1x1x16x3xf32> to vector<16x3xf32>
    %468 = vector.shape_cast %465 : vector<16x3xf32> to vector<1x1x16x3xf32>
    tpu.vector_store %arg13[%c0_481, %c5_482, %c0_483, %c0_484], %468 {strides = array<i32>} : memref<1x16x16x3xf32, #tpu.memory_space<vmem>>, vector<1x1x16x3xf32>,
    %469 = vector.extract_strided_slice %414 {offsets = [24, 0], sizes = [8, 3], strides = [1, 1]} : vector<64x12xf32> to vector<8x3xf32>
    %470 = vector.extract_strided_slice %414 {offsets = [24, 3], sizes = [8, 3], strides = [1, 1]} : vector<64x12xf32> to vector<8x3xf32>
    %471 = vector.shape_cast %469 : vector<8x3xf32> to vector<8x1x3xf32>
    %472 = vector.shape_cast %470 : vector<8x3xf32> to vector<8x1x3xf32>
    %473 = tpu.concatenate %471, %472 in 1 : vector<8x1x3xf32>, vector<8x1x3xf32> -> vector<8x2x3xf32>
    %474 = vector.shape_cast %473 : vector<8x2x3xf32> to vector<16x3xf32>
    %c0_485 = arith.constant 0 : index
    %c6_486 = arith.constant 6 : index
    %c0_487 = arith.constant 0 : index
    %c0_488 = arith.constant 0 : index
    %475 = vector.load %arg13[%c0_485, %c6_486, %c0_487, %c0_488] : memref<1x16x16x3xf32, #tpu.memory_space<vmem>>, vector<1x1x16x3xf32>
    %476 = vector.shape_cast %475 : vector<1x1x16x3xf32> to vector<16x3xf32>
    %477 = vector.shape_cast %474 : vector<16x3xf32> to vector<1x1x16x3xf32>
    tpu.vector_store %arg13[%c0_485, %c6_486, %c0_487, %c0_488], %477 {strides = array<i32>} : memref<1x16x16x3xf32, #tpu.memory_space<vmem>>, vector<1x1x16x3xf32>,
    %478 = vector.extract_strided_slice %414 {offsets = [24, 6], sizes = [8, 3], strides = [1, 1]} : vector<64x12xf32> to vector<8x3xf32>
    %479 = vector.extract_strided_slice %414 {offsets = [24, 9], sizes = [8, 3], strides = [1, 1]} : vector<64x12xf32> to vector<8x3xf32>
    %480 = vector.shape_cast %478 : vector<8x3xf32> to vector<8x1x3xf32>
    %481 = vector.shape_cast %479 : vector<8x3xf32> to vector<8x1x3xf32>
    %482 = tpu.concatenate %480, %481 in 1 : vector<8x1x3xf32>, vector<8x1x3xf32> -> vector<8x2x3xf32>
    %483 = vector.shape_cast %482 : vector<8x2x3xf32> to vector<16x3xf32>
    %c0_489 = arith.constant 0 : index
    %c7_490 = arith.constant 7 : index
    %c0_491 = arith.constant 0 : index
    %c0_492 = arith.constant 0 : index
    %484 = vector.load %arg13[%c0_489, %c7_490, %c0_491, %c0_492] : memref<1x16x16x3xf32, #tpu.memory_space<vmem>>, vector<1x1x16x3xf32>
    %485 = vector.shape_cast %484 : vector<1x1x16x3xf32> to vector<16x3xf32>
    %486 = vector.shape_cast %483 : vector<16x3xf32> to vector<1x1x16x3xf32>
    tpu.vector_store %arg13[%c0_489, %c7_490, %c0_491, %c0_492], %486 {strides = array<i32>} : memref<1x16x16x3xf32, #tpu.memory_space<vmem>>, vector<1x1x16x3xf32>,
    %487 = vector.extract_strided_slice %414 {offsets = [32, 0], sizes = [8, 3], strides = [1, 1]} : vector<64x12xf32> to vector<8x3xf32>
    %488 = vector.extract_strided_slice %414 {offsets = [32, 3], sizes = [8, 3], strides = [1, 1]} : vector<64x12xf32> to vector<8x3xf32>
    %489 = vector.shape_cast %487 : vector<8x3xf32> to vector<8x1x3xf32>
    %490 = vector.shape_cast %488 : vector<8x3xf32> to vector<8x1x3xf32>
    %491 = tpu.concatenate %489, %490 in 1 : vector<8x1x3xf32>, vector<8x1x3xf32> -> vector<8x2x3xf32>
    %492 = vector.shape_cast %491 : vector<8x2x3xf32> to vector<16x3xf32>
    %c0_493 = arith.constant 0 : index
    %c8_494 = arith.constant 8 : index
    %c0_495 = arith.constant 0 : index
    %c0_496 = arith.constant 0 : index
    %493 = vector.load %arg13[%c0_493, %c8_494, %c0_495, %c0_496] : memref<1x16x16x3xf32, #tpu.memory_space<vmem>>, vector<1x1x16x3xf32>
    %494 = vector.shape_cast %493 : vector<1x1x16x3xf32> to vector<16x3xf32>
    %495 = vector.shape_cast %492 : vector<16x3xf32> to vector<1x1x16x3xf32>
    tpu.vector_store %arg13[%c0_493, %c8_494, %c0_495, %c0_496], %495 {strides = array<i32>} : memref<1x16x16x3xf32, #tpu.memory_space<vmem>>, vector<1x1x16x3xf32>,
    %496 = vector.extract_strided_slice %414 {offsets = [32, 6], sizes = [8, 3], strides = [1, 1]} : vector<64x12xf32> to vector<8x3xf32>
    %497 = vector.extract_strided_slice %414 {offsets = [32, 9], sizes = [8, 3], strides = [1, 1]} : vector<64x12xf32> to vector<8x3xf32>
    %498 = vector.shape_cast %496 : vector<8x3xf32> to vector<8x1x3xf32>
    %499 = vector.shape_cast %497 : vector<8x3xf32> to vector<8x1x3xf32>
    %500 = tpu.concatenate %498, %499 in 1 : vector<8x1x3xf32>, vector<8x1x3xf32> -> vector<8x2x3xf32>
    %501 = vector.shape_cast %500 : vector<8x2x3xf32> to vector<16x3xf32>
    %c0_497 = arith.constant 0 : index
    %c9_498 = arith.constant 9 : index
    %c0_499 = arith.constant 0 : index
    %c0_500 = arith.constant 0 : index
    %502 = vector.load %arg13[%c0_497, %c9_498, %c0_499, %c0_500] : memref<1x16x16x3xf32, #tpu.memory_space<vmem>>, vector<1x1x16x3xf32>
    %503 = vector.shape_cast %502 : vector<1x1x16x3xf32> to vector<16x3xf32>
    %504 = vector.shape_cast %501 : vector<16x3xf32> to vector<1x1x16x3xf32>
    tpu.vector_store %arg13[%c0_497, %c9_498, %c0_499, %c0_500], %504 {strides = array<i32>} : memref<1x16x16x3xf32, #tpu.memory_space<vmem>>, vector<1x1x16x3xf32>,
    %505 = vector.extract_strided_slice %414 {offsets = [40, 0], sizes = [8, 3], strides = [1, 1]} : vector<64x12xf32> to vector<8x3xf32>
    %506 = vector.extract_strided_slice %414 {offsets = [40, 3], sizes = [8, 3], strides = [1, 1]} : vector<64x12xf32> to vector<8x3xf32>
    %507 = vector.shape_cast %505 : vector<8x3xf32> to vector<8x1x3xf32>
    %508 = vector.shape_cast %506 : vector<8x3xf32> to vector<8x1x3xf32>
    %509 = tpu.concatenate %507, %508 in 1 : vector<8x1x3xf32>, vector<8x1x3xf32> -> vector<8x2x3xf32>
    %510 = vector.shape_cast %509 : vector<8x2x3xf32> to vector<16x3xf32>
    %c0_501 = arith.constant 0 : index
    %c10 = arith.constant 10 : index
    %c0_502 = arith.constant 0 : index
    %c0_503 = arith.constant 0 : index
    %511 = vector.load %arg13[%c0_501, %c10, %c0_502, %c0_503] : memref<1x16x16x3xf32, #tpu.memory_space<vmem>>, vector<1x1x16x3xf32>
    %512 = vector.shape_cast %511 : vector<1x1x16x3xf32> to vector<16x3xf32>
    %513 = vector.shape_cast %510 : vector<16x3xf32> to vector<1x1x16x3xf32>
    tpu.vector_store %arg13[%c0_501, %c10, %c0_502, %c0_503], %513 {strides = array<i32>} : memref<1x16x16x3xf32, #tpu.memory_space<vmem>>, vector<1x1x16x3xf32>,
    %514 = vector.extract_strided_slice %414 {offsets = [40, 6], sizes = [8, 3], strides = [1, 1]} : vector<64x12xf32> to vector<8x3xf32>
    %515 = vector.extract_strided_slice %414 {offsets = [40, 9], sizes = [8, 3], strides = [1, 1]} : vector<64x12xf32> to vector<8x3xf32>
    %516 = vector.shape_cast %514 : vector<8x3xf32> to vector<8x1x3xf32>
    %517 = vector.shape_cast %515 : vector<8x3xf32> to vector<8x1x3xf32>
    %518 = tpu.concatenate %516, %517 in 1 : vector<8x1x3xf32>, vector<8x1x3xf32> -> vector<8x2x3xf32>
    %519 = vector.shape_cast %518 : vector<8x2x3xf32> to vector<16x3xf32>
    %c0_504 = arith.constant 0 : index
    %c11 = arith.constant 11 : index
    %c0_505 = arith.constant 0 : index
    %c0_506 = arith.constant 0 : index
    %520 = vector.load %arg13[%c0_504, %c11, %c0_505, %c0_506] : memref<1x16x16x3xf32, #tpu.memory_space<vmem>>, vector<1x1x16x3xf32>
    %521 = vector.shape_cast %520 : vector<1x1x16x3xf32> to vector<16x3xf32>
    %522 = vector.shape_cast %519 : vector<16x3xf32> to vector<1x1x16x3xf32>
    tpu.vector_store %arg13[%c0_504, %c11, %c0_505, %c0_506], %522 {strides = array<i32>} : memref<1x16x16x3xf32, #tpu.memory_space<vmem>>, vector<1x1x16x3xf32>,
    %523 = vector.extract_strided_slice %414 {offsets = [48, 0], sizes = [8, 3], strides = [1, 1]} : vector<64x12xf32> to vector<8x3xf32>
    %524 = vector.extract_strided_slice %414 {offsets = [48, 3], sizes = [8, 3], strides = [1, 1]} : vector<64x12xf32> to vector<8x3xf32>
    %525 = vector.shape_cast %523 : vector<8x3xf32> to vector<8x1x3xf32>
    %526 = vector.shape_cast %524 : vector<8x3xf32> to vector<8x1x3xf32>
    %527 = tpu.concatenate %525, %526 in 1 : vector<8x1x3xf32>, vector<8x1x3xf32> -> vector<8x2x3xf32>
    %528 = vector.shape_cast %527 : vector<8x2x3xf32> to vector<16x3xf32>
    %c0_507 = arith.constant 0 : index
    %c12 = arith.constant 12 : index
    %c0_508 = arith.constant 0 : index
    %c0_509 = arith.constant 0 : index
    %529 = vector.load %arg13[%c0_507, %c12, %c0_508, %c0_509] : memref<1x16x16x3xf32, #tpu.memory_space<vmem>>, vector<1x1x16x3xf32>
    %530 = vector.shape_cast %529 : vector<1x1x16x3xf32> to vector<16x3xf32>
    %531 = vector.shape_cast %528 : vector<16x3xf32> to vector<1x1x16x3xf32>
    tpu.vector_store %arg13[%c0_507, %c12, %c0_508, %c0_509], %531 {strides = array<i32>} : memref<1x16x16x3xf32, #tpu.memory_space<vmem>>, vector<1x1x16x3xf32>,
    %532 = vector.extract_strided_slice %414 {offsets = [48, 6], sizes = [8, 3], strides = [1, 1]} : vector<64x12xf32> to vector<8x3xf32>
    %533 = vector.extract_strided_slice %414 {offsets = [48, 9], sizes = [8, 3], strides = [1, 1]} : vector<64x12xf32> to vector<8x3xf32>
    %534 = vector.shape_cast %532 : vector<8x3xf32> to vector<8x1x3xf32>
    %535 = vector.shape_cast %533 : vector<8x3xf32> to vector<8x1x3xf32>
    %536 = tpu.concatenate %534, %535 in 1 : vector<8x1x3xf32>, vector<8x1x3xf32> -> vector<8x2x3xf32>
    %537 = vector.shape_cast %536 : vector<8x2x3xf32> to vector<16x3xf32>
    %c0_510 = arith.constant 0 : index
    %c13 = arith.constant 13 : index
    %c0_511 = arith.constant 0 : index
    %c0_512 = arith.constant 0 : index
    %538 = vector.load %arg13[%c0_510, %c13, %c0_511, %c0_512] : memref<1x16x16x3xf32, #tpu.memory_space<vmem>>, vector<1x1x16x3xf32>
    %539 = vector.shape_cast %538 : vector<1x1x16x3xf32> to vector<16x3xf32>
    %540 = vector.shape_cast %537 : vector<16x3xf32> to vector<1x1x16x3xf32>
    tpu.vector_store %arg13[%c0_510, %c13, %c0_511, %c0_512], %540 {strides = array<i32>} : memref<1x16x16x3xf32, #tpu.memory_space<vmem>>, vector<1x1x16x3xf32>,
    %541 = vector.extract_strided_slice %414 {offsets = [56, 0], sizes = [8, 3], strides = [1, 1]} : vector<64x12xf32> to vector<8x3xf32>
    %542 = vector.extract_strided_slice %414 {offsets = [56, 3], sizes = [8, 3], strides = [1, 1]} : vector<64x12xf32> to vector<8x3xf32>
    %543 = vector.shape_cast %541 : vector<8x3xf32> to vector<8x1x3xf32>
    %544 = vector.shape_cast %542 : vector<8x3xf32> to vector<8x1x3xf32>
    %545 = tpu.concatenate %543, %544 in 1 : vector<8x1x3xf32>, vector<8x1x3xf32> -> vector<8x2x3xf32>
    %546 = vector.shape_cast %545 : vector<8x2x3xf32> to vector<16x3xf32>
    %c0_513 = arith.constant 0 : index
    %c14 = arith.constant 14 : index
    %c0_514 = arith.constant 0 : index
    %c0_515 = arith.constant 0 : index
    %547 = vector.load %arg13[%c0_513, %c14, %c0_514, %c0_515] : memref<1x16x16x3xf32, #tpu.memory_space<vmem>>, vector<1x1x16x3xf32>
    %548 = vector.shape_cast %547 : vector<1x1x16x3xf32> to vector<16x3xf32>
    %549 = vector.shape_cast %546 : vector<16x3xf32> to vector<1x1x16x3xf32>
    tpu.vector_store %arg13[%c0_513, %c14, %c0_514, %c0_515], %549 {strides = array<i32>} : memref<1x16x16x3xf32, #tpu.memory_space<vmem>>, vector<1x1x16x3xf32>,
    %550 = vector.extract_strided_slice %414 {offsets = [56, 6], sizes = [8, 3], strides = [1, 1]} : vector<64x12xf32> to vector<8x3xf32>
    %551 = vector.extract_strided_slice %414 {offsets = [56, 9], sizes = [8, 3], strides = [1, 1]} : vector<64x12xf32> to vector<8x3xf32>
    %552 = vector.shape_cast %550 : vector<8x3xf32> to vector<8x1x3xf32>
    %553 = vector.shape_cast %551 : vector<8x3xf32> to vector<8x1x3xf32>
    %554 = tpu.concatenate %552, %553 in 1 : vector<8x1x3xf32>, vector<8x1x3xf32> -> vector<8x2x3xf32>
    %555 = vector.shape_cast %554 : vector<8x2x3xf32> to vector<16x3xf32>
    %c0_516 = arith.constant 0 : index
    %c15 = arith.constant 15 : index
    %c0_517 = arith.constant 0 : index
    %c0_518 = arith.constant 0 : index
    %556 = vector.load %arg13[%c0_516, %c15, %c0_517, %c0_518] : memref<1x16x16x3xf32, #tpu.memory_space<vmem>>, vector<1x1x16x3xf32>
    %557 = vector.shape_cast %556 : vector<1x1x16x3xf32> to vector<16x3xf32>
    %558 = vector.shape_cast %555 : vector<16x3xf32> to vector<1x1x16x3xf32>
    tpu.vector_store %arg13[%c0_516, %c15, %c0_517, %c0_518], %558 {strides = array<i32>} : memref<1x16x16x3xf32, #tpu.memory_space<vmem>>, vector<1x1x16x3xf32>,
    return
  }
  func.func @transform_0(%arg0: i32) -> (i32, i32, i32, i32) {
    %c0_i32 = arith.constant 0 : i32
    %c0_i32_0 = arith.constant 0 : i32
    %c0_i32_1 = arith.constant 0 : i32
    %c0_i32_2 = arith.constant 0 : i32
    return %arg0, %c0_i32, %c0_i32_0, %c0_i32_1 : i32, i32, i32, i32
  }
  func.func @transform_1(%arg0: i32) -> (i32, i32) {
    %c0_i32 = arith.constant 0 : i32
    %c0_i32_0 = arith.constant 0 : i32
    %c0_i32_1 = arith.constant 0 : i32
    return %c0_i32, %c0_i32_0 : i32, i32
  }
  func.func @transform_2(%arg0: i32) -> (i32, i32) {
    %c0_i32 = arith.constant 0 : i32
    %c0_i32_0 = arith.constant 0 : i32
    %c0_i32_1 = arith.constant 0 : i32
    return %c0_i32, %c0_i32_0 : i32, i32
  }
  func.func @transform_3(%arg0: i32) -> (i32, i32) {
    %c0_i32 = arith.constant 0 : i32
    %c0_i32_0 = arith.constant 0 : i32
    %c0_i32_1 = arith.constant 0 : i32
    return %c0_i32, %c0_i32_0 : i32, i32
  }
  func.func @transform_4(%arg0: i32) -> (i32, i32) {
    %c0_i32 = arith.constant 0 : i32
    %c0_i32_0 = arith.constant 0 : i32
    %c0_i32_1 = arith.constant 0 : i32
    return %c0_i32, %c0_i32_0 : i32, i32
  }
  func.func @transform_5(%arg0: i32) -> (i32, i32) {
    %c0_i32 = arith.constant 0 : i32
    %c0_i32_0 = arith.constant 0 : i32
    %c0_i32_1 = arith.constant 0 : i32
    return %c0_i32, %c0_i32_0 : i32, i32
  }
  func.func @transform_6(%arg0: i32) -> (i32, i32) {
    %c0_i32 = arith.constant 0 : i32
    %c0_i32_0 = arith.constant 0 : i32
    %c0_i32_1 = arith.constant 0 : i32
    return %c0_i32, %c0_i32_0 : i32, i32
  }
  func.func @transform_7(%arg0: i32) -> (i32, i32) {
    %c0_i32 = arith.constant 0 : i32
    %c0_i32_0 = arith.constant 0 : i32
    %c0_i32_1 = arith.constant 0 : i32
    return %c0_i32, %c0_i32_0 : i32, i32
  }
  func.func @transform_8(%arg0: i32) -> (i32, i32) {
    %c0_i32 = arith.constant 0 : i32
    %c0_i32_0 = arith.constant 0 : i32
    %c0_i32_1 = arith.constant 0 : i32
    return %c0_i32, %c0_i32_0 : i32, i32
  }
  func.func @transform_9(%arg0: i32) -> (i32, i32) {
    %c0_i32 = arith.constant 0 : i32
    %c0_i32_0 = arith.constant 0 : i32
    %c0_i32_1 = arith.constant 0 : i32
    return %c0_i32, %c0_i32_0 : i32, i32
  }
  func.func @transform_10(%arg0: i32) -> (i32, i32) {
    %c0_i32 = arith.constant 0 : i32
    %c0_i32_0 = arith.constant 0 : i32
    %c0_i32_1 = arith.constant 0 : i32
    return %c0_i32, %c0_i32_0 : i32, i32
  }
  func.func @transform_11(%arg0: i32) -> (i32, i32) {
    %c0_i32 = arith.constant 0 : i32
    %c0_i32_0 = arith.constant 0 : i32
    %c0_i32_1 = arith.constant 0 : i32
    return %c0_i32, %c0_i32_0 : i32, i32
  }
  func.func @transform_12(%arg0: i32) -> (i32, i32, i32, i32) {
    %c0_i32 = arith.constant 0 : i32
    %c0_i32_0 = arith.constant 0 : i32
    %c0_i32_1 = arith.constant 0 : i32
    %c0_i32_2 = arith.constant 0 : i32
    return %arg0, %c0_i32, %c0_i32_0, %c0_i32_1 : i32, i32, i32, i32
  }
}

</mosaic_0001>

<bundles_post_ra>
// kernel: student_unet_forward.1
= control target key start
LH: loop header
LB: loop body
LE: loop exit
PB: predicated region body
PF: predicated region fallthrough
CT: control target
= control target key end

     0   :  { %s13502_s21 = smov 0   ;;  %s19098_s0 = inlined_call_operand.vmem [shape: f32[2,16,16,4], index: 0, kind: input, shape index: {}]   ;;  %s19099_s1 = inlined_call_operand.vmem [shape: f32[36,32], index: 1, kind: input, shape index: {}]   ;;  %s19100_s2 = inlined_call_operand.vmem [shape: f32[288,32], index: 2, kind: input, shape index: {}]   ;;  %s19101_s3 = inlined_call_operand.vmem [shape: f32[288,64], index: 3, kind: input, shape index: {}]   ;;  %s19102_s4 = inlined_call_operand.vmem [shape: f32[576,64], index: 4, kind: input, shape index: {}]   ;;  %s19103_s5 = inlined_call_operand.vmem [shape: f32[576,32], index: 5, kind: input, shape index: {}]   ;;  %s19104_s6 = inlined_call_operand.vmem [shape: f32[288,32], index: 6, kind: input, shape index: {}]   ;;  %s19105_s7 = inlined_call_operand.vmem [shape: f32[32,128], index: 7, kind: input, shape index: {}]   ;;  %s19106_s8 = inlined_call_operand.vmem [shape: f32[864,32], index: 8, kind: input, shape index: {}]   ;;  %s19107_s9 = inlined_call_operand.vmem [shape: f32[288,32], index: 9, kind: input, shape index: {}]   ;;  %s19108_s10 = inlined_call_operand.vmem [shape: f32[32,12], index: 10, kind: input, shape index: {}]   ;;  %s19109_s11 = inlined_call_operand.vmem [shape: f32[10,128], index: 11, kind: input, shape index: {}]   ;;  %s19110_s12 = inlined_call_operand.vmem [shape: f32[2,16,16,3], index: 12, kind: output, shape index: {}]  }
   0x1 LB: > { %s10660_s22 = sadd.s32 4294967295, %s13419_s21   ;;  %p10664_p0 = scmp.ge.s32.totalorder %s13419_s21, 1  ;;  %s13419_s21 = sphi %s13502_s21, %s22_s21  }
   0x2   : > { %p362_p1 = scmp.lt.s32.totalorder %s13419_s21, 3 }
   0x4   : > { %p363_p2 = pnand %p10664_p0, %p362_p1 }
   0x6   : > { %366 = sbr.rel (%p363_p2) target bundleno = 4547 (0x11c3), region = 68 }
   0xd   : > { %vm414_vm0 = vcmask 31744   ;;  %vm417_vm1 = vcmask 25600   ;;  %vm424_vm2 = vcmask 24576   ;;  %v13421_v0 = vmov 0.0   ;;  %p13522_p3 = scmp.lt.s32.totalorder %s10660_s22, 1  ;;  %s13422_s28 = smov 8  }
   0xe   : > { %415 = vst.msk [vmem:[#allocation2] sm:$0xff] %vm414_vm0, %v13421_v0  ;;  %416 = vst.msk [vmem:[#allocation2 + $0x8] sm:$0xff] %vm414_vm0, %v13421_v0  ;;  %s13423_s29 = smov 4   ;;  %s13424_s30 = smov 12   ;;  %v2213_v24 = vld [vmem:[%s19099_s1] sm:$0xff]  ;;  %v2214_v25 = vld [vmem:[%s19099_s1 + $0x8] sm:$0xff] }
   0xf   : > { %420 = vst.msk [vmem:[#allocation2 + $0x198] sm:$0xff] %vm414_vm0, %v13421_v0  ;;  %421 = vst.msk [vmem:[#allocation2 + $0x1a0] sm:$0xff] %vm414_vm0, %v13421_v0  ;;  %s19172_s22 = smov (!%p13522_p3, %s10660_s22), 1  ;;  %s13425_s13 = smov 16   ;;  %v11776_v26 = vpack.c.bf16 %v2214_v25, %v2213_v24  ;;  %vm457_vm3 = vcmask 261120   ;;  %v2215_v27 = vld [vmem:[%s19099_s1 + $0x10] sm:$0xff] }
  0x10   : > { %418 = vst.msk [vmem:[#allocation2 + $0x10] sm:$0x3] %vm417_vm1, %v13421_v0  ;;  %422 = vst.msk [vmem:[#allocation2 + $0x1a8] sm:$0x3] %vm417_vm1, %v13421_v0  ;;  %s10822_s24 = sshll.u32 %s19172_s22, 8  ;;  %s13426_s14 = smov 20  }
  0x11   : > { %425 = vst.msk [vmem:[#allocation2 + $0x18] sm:$0x1] %vm424_vm2, %v13421_v0  ;;  %426 = vst.msk [vmem:[#allocation2 + $0x30] sm:$0x1] %vm424_vm2, %v13421_v0  ;;  %s13602_s27 = scalar_lea.vmem %s19098_s0, %s10822_s24  ;;  %s13427_s19 = smov 24   ;;  %11777 = vmatprep.subr.bf16.mxu0 %v11776_v26  ;;  %v2216_v28 = vld [vmem:[%s19099_s1 + $0x18] sm:$0xff] }
  0x12   : > { %427 = vst.msk [vmem:[#allocation2 + $0x48] sm:$0x1] %vm424_vm2, %v13421_v0  ;;  %428 = vst.msk [vmem:[#allocation2 + $0x60] sm:$0x1] %vm424_vm2, %v13421_v0  ;;  %v573_v1 = vld [vmem:[%s13602_s27] sm:$0xff]  ;;  %v574_v2 = vld [vmem:[%s13602_s27 + $0x8] sm:$0xff]  ;;  %11779 = vmatpush3.bf16.msra.mxu0 %v11776_v26  ;;  %v11780_v31 = vpack.c.bf16 %v2216_v28, %v2215_v27 }
  0x13   : > { %429 = vst.msk [vmem:[#allocation2 + $0x78] sm:$0x1] %vm424_vm2, %v13421_v0  ;;  %430 = vst.msk [vmem:[#allocation2 + $0x90] sm:$0x1] %vm424_vm2, %v13421_v0  ;;  %v575_v3 = vld [vmem:[%s13602_s27 + $0x10] sm:$0xff]  ;;  %v576_v8 = vld [vmem:[%s13602_s27 + $0x18] sm:$0xff] }
  0x14   : > { %431 = vst.msk [vmem:[#allocation2 + $0xa8] sm:$0x1] %vm424_vm2, %v13421_v0  ;;  %432 = vst.msk [vmem:[#allocation2 + $0xc0] sm:$0x1] %vm424_vm2, %v13421_v0  ;;  %v577_v9 = vld [vmem:[%s13602_s27 + $0x20] sm:$0xff]  ;;  %v578_v10 = vld [vmem:[%s13602_s27 + $0x28] sm:$0xff]  ;;  %11781 = vmatprep.subr.bf16.mxu0 %v11780_v31 }
  0x15   : > { %433 = vst.msk [vmem:[#allocation2 + $0xd8] sm:$0x1] %vm424_vm2, %v13421_v0  ;;  %434 = vst.msk [vmem:[#allocation2 + $0xf0] sm:$0x1] %vm424_vm2, %v13421_v0  ;;  %v702_v4 = vld [vmem:[#allocation2 + $0x2] sm:$0xff]  ;;  %v579_v11 = vld [vmem:[%s13602_s27 + $0x30] sm:$0xff] }
  0x16   : > { %435 = vst.msk [vmem:[#allocation2 + $0x108] sm:$0x1] %vm424_vm2, %v13421_v0  ;;  %436 = vst.msk [vmem:[#allocation2 + $0x120] sm:$0x1] %vm424_vm2, %v13421_v0  ;;  %v670_v5 = vld [vmem:[#allocation2 + $0x1] sm:$0xff]  ;;  %1087 = vrot.lane.b32.xlu1 %v702_v4, %s13422_s28  ;;  %v580_v12 = vld [vmem:[%s13602_s27 + $0x38] sm:$0xff]  ;;  %11783 = vmatpush3.bf16.msra.mxu0 %v11780_v31 }
  0x17   : > { %437 = vst.msk [vmem:[#allocation2 + $0x138] sm:$0x1] %vm424_vm2, %v13421_v0  ;;  %438 = vst.msk [vmem:[#allocation2 + $0x150] sm:$0x1] %vm424_vm2, %v13421_v0  ;;  %v703_v6 = vld [vmem:[#allocation2 + $0xa] sm:$0xff]  ;;  %959 = vrot.lane.b32.xlu0 %v670_v5, %s13423_s29  ;;  %v581_v13 = vld [vmem:[%s13602_s27 + $0x40] sm:$0xff] }
  0x18   : > { %439 = vst.msk [vmem:[#allocation2 + $0x168] sm:$0x1] %vm424_vm2, %v13421_v0  ;;  %440 = vst.msk [vmem:[#allocation2 + $0x180] sm:$0x1] %vm424_vm2, %v13421_v0  ;;  %v671_v7 = vld [vmem:[#allocation2 + $0x9] sm:$0xff]  ;;  %v584_v21 = vld [vmem:[%s13602_s27 + $0x58] sm:$0xff] }
  0x19   : > { %441 = vst.msk [vmem:[#allocation2 + $0x29] sm:$0x1] %vm424_vm2, %v13421_v0  ;;  %442 = vst.msk [vmem:[#allocation2 + $0x41] sm:$0x1] %vm424_vm2, %v13421_v0  ;;  %v582_v14 = vld [vmem:[%s13602_s27 + $0x48] sm:$0xff]  ;;  %v583_v20 = vld [vmem:[%s13602_s27 + $0x50] sm:$0xff] }
  0x1a   : > { %443 = vst.msk [vmem:[#allocation2 + $0x59] sm:$0x1] %vm424_vm2, %v13421_v0  ;;  %444 = vst.msk [vmem:[#allocation2 + $0x71] sm:$0x1] %vm424_vm2, %v13421_v0  ;;  %1089 = vrot.lane.b32.xlu1 %v703_v6, %s13422_s28  ;;  %s13428_s15 = smov 28   ;;  %vm2319_vm4 = vcmask 1043456  }
  0x1b   : > { %445 = vst.msk [vmem:[#allocation2 + $0x89] sm:$0x1] %vm424_vm2, %v13421_v0  ;;  %446 = vst.msk [vmem:[#allocation2 + $0xa1] sm:$0x1] %vm424_vm2, %v13421_v0  ;;  %961 = vrot.lane.b32.xlu0 %v671_v7, %s13423_s29  ;;  %v2217_v32 = vld [vmem:[%s19099_s1 + $0x20] sm:$0xf] }
  0x1c   : > { %447 = vst.msk [vmem:[#allocation2 + $0xb9] sm:$0x1] %vm424_vm2, %v13421_v0  ;;  %448 = vst.msk [vmem:[#allocation2 + $0xd1] sm:$0x1] %vm424_vm2, %v13421_v0  ;;  %11505 = vmatprep.subr.msk.mxu0 %vm2319_vm4, %v2217_v32  ;;  %s13429_s18 = smov 32   ;;  %v585_v35 = vld [vmem:[%s13602_s27 + $0x60] sm:$0xff] }
  0x1d   : > { %449 = vst.msk [vmem:[#allocation2 + $0xe9] sm:$0x1] %vm424_vm2, %v13421_v0  ;;  %450 = vst.msk [vmem:[#allocation2 + $0x101] sm:$0x1] %vm424_vm2, %v13421_v0  ;;  %11506 = vmatpush3.msk.msra.mxu0 %vm2319_vm4, %v2217_v32  ;;  %v586_v36 = vld [vmem:[%s13602_s27 + $0x68] sm:$0xff]  ;;  %v587_v44 = vld [vmem:[%s13602_s27 + $0x70] sm:$0xff] }
  0x1e   : > { %451 = vst.msk [vmem:[#allocation2 + $0x119] sm:$0x1] %vm424_vm2, %v13421_v0  ;;  %452 = vst.msk [vmem:[#allocation2 + $0x131] sm:$0x1] %vm424_vm2, %v13421_v0  ;;  %v588_v45 = vld [vmem:[%s13602_s27 + $0x78] sm:$0xff]  ;;  %v589_v52 = vld [vmem:[%s13602_s27 + $0x80] sm:$0xff] }
  0x1f   : > { %453 = vst.msk [vmem:[#allocation2 + $0x149] sm:$0x1] %vm424_vm2, %v13421_v0  ;;  %454 = vst.msk [vmem:[#allocation2 + $0x161] sm:$0x1] %vm424_vm2, %v13421_v0  ;;  %v590_v53 = vld [vmem:[%s13602_s27 + $0x88] sm:$0xff]  ;;  %vm1983_vm5 = vcmask 64512  }
  0x20   : > { %455 = vst.msk [vmem:[#allocation2 + $0x179] sm:$0x1] %vm424_vm2, %v13421_v0  ;;  %456 = vst.msk [vmem:[#allocation2 + $0x191] sm:$0x1] %vm424_vm2, %v13421_v0  ;;  %vm2016_vm6 = vcmask 97280   ;;  %vm2049_vm7 = vcmask 130048  }
  0x21   : > { %605 = vst.msk [vmem:[#allocation2 + $0x19] sm:$0xff] %vm414_vm0, %v573_v1  ;;  %606 = vst.msk [vmem:[#allocation2 + $0x21] sm:$0xff] %vm414_vm0, %v574_v2  ;;  %vm2082_vm8 = vcmask 162816   ;;  %vm2115_vm9 = vcmask 195584   ;;  %v639_v31 = vld [vmem:[#allocation2 + $0x8] sm:$0xff]  ;;  %vm2148_vm10 = vcmask 228352  }
  0x22   : > { %607 = vst.msk [vmem:[#allocation2 + $0x31] sm:$0xff] %vm414_vm0, %v575_v3  ;;  %608 = vst.msk [vmem:[#allocation2 + $0x39] sm:$0xff] %vm414_vm0, %v576_v8  ;;  %vm2222_vm11 = vcmask 293888   ;;  %vm467_vm12 = vcmask 253952   ;;  %vm460_vm13 = vcmask 254976   ;;  %vm522_vm14 = vcmask 523264  }
  0x23   : > { %609 = vst.msk [vmem:[#allocation2 + $0x49] sm:$0xff] %vm414_vm0, %v577_v9  ;;  %610 = vst.msk [vmem:[#allocation2 + $0x51] sm:$0xff] %vm414_vm0, %v578_v10  ;;  %vm3734_vm15 = vcmask 785408   ;;  %vm524_vm1 = vcmask 517120   ;;  %vm547_vm2 = vcmask 521216   ;;  %vm5922_vm4 = vcmask 519168  }
  0x24   : > { %611 = vst.msk [vmem:[#allocation2 + $0x61] sm:$0xff] %vm414_vm0, %v579_v11  ;;  %612 = vst.msk [vmem:[#allocation2 + $0x69] sm:$0xff] %vm414_vm0, %v580_v12  ;;  %v591_v11 = vld [vmem:[%s13602_s27 + $0x90] sm:$0xff]  ;;  %v592_v12 = vld [vmem:[%s13602_s27 + $0x98] sm:$0xff]  ;;  %s13436_s25 = smov 122  }
  0x25   : > { %613 = vst.msk [vmem:[#allocation2 + $0x79] sm:$0xff] %vm414_vm0, %v581_v13  ;;  %614 = vst.msk [vmem:[#allocation2 + $0x81] sm:$0xff] %vm414_vm0, %v582_v14 }
  0x26   : > { %615 = vst.msk [vmem:[#allocation2 + $0x91] sm:$0xff] %vm414_vm0, %v583_v20  ;;  %616 = vst.msk [vmem:[#allocation2 + $0x99] sm:$0xff] %vm414_vm0, %v584_v21 }
  0x27   : > { %458 = vst.msk [vmem:[#allocation3] sm:$0xff] %vm457_vm3, %v13421_v0  ;;  %459 = vst.msk [vmem:[#allocation3 + $0x8] sm:$0xff] %vm457_vm3, %v13421_v0 }
  0x28   : > { %v13628_v15 = vld [vmem:[#allocation2 + $0x20] sm:$0xff]  ;;  %v13630_v16 = vld [vmem:[#allocation2 + $0x18] sm:$0xff]  ;;  %463 = vst.msk [vmem:[#allocation3 + $0x198] sm:$0xff] %vm457_vm3, %v13421_v0  ;;  %464 = vst.msk [vmem:[#allocation3 + $0x1a0] sm:$0xff] %vm457_vm3, %v13421_v0 }
  0x29   : > { %1217 = vrot.lane.b32.xlu1 %v13628_v15, %s13424_s30  ;;  %1215 = vrot.lane.b32.xlu0 %v13630_v16, %s13424_s30  ;;  %v766_v17 = vld [vmem:[#allocation2 + $0x19] sm:$0xff]  ;;  %v767_v18 = vld [vmem:[#allocation2 + $0x21] sm:$0xff]  ;;  %v13646_v23 = vld [vmem:[#allocation2 + $0x30] sm:$0xff]  ;;  %500 = vst.msk [vmem:[#allocation4] sm:$0xff] %vm457_vm3, %v13421_v0 }
  0x2a   : > { %v798_v19 = vld [vmem:[#allocation2 + $0x1a] sm:$0xff]  ;;  %v799_v22 = vld [vmem:[#allocation2 + $0x22] sm:$0xff]  ;;  %503 = vst.msk [vmem:[#allocation4 + $0x90] sm:$0xff] %vm457_vm3, %v13421_v0  ;;  %v863_v30 = vld [vmem:[#allocation2 + $0x31] sm:$0xff] }
  0x2b   : > { %v13678_v29 = vld [vmem:[#allocation2 + $0x38] sm:$0xff]  ;;  %617 = vst.msk [vmem:[#allocation2 + $0xa9] sm:$0xff] %vm414_vm0, %v585_v35  ;;  %618 = vst.msk [vmem:[#allocation2 + $0xb1] sm:$0xff] %vm414_vm0, %v586_v36  ;;  %v13699_v38 = vld [vmem:[#allocation2 + $0x48] sm:$0xff] }
  0x2c   : > { %v864_v33 = vld [vmem:[#allocation2 + $0x39] sm:$0xff]  ;;  %v13701_v39 = vld [vmem:[#allocation2 + $0x50] sm:$0xff]  ;;  %619 = vst.msk [vmem:[#allocation2 + $0xc1] sm:$0xff] %vm414_vm0, %v587_v44  ;;  %620 = vst.msk [vmem:[#allocation2 + $0xc9] sm:$0xff] %vm414_vm0, %v588_v45 }
  0x2d   : > { %1343 = vrot.lane.b32.xlu0 %v766_v17, %s13425_s13  ;;  %963 = vrot.lane.b32.xlu1 %v766_v17, %s13423_s29  ;;  %v895_v34 = vld [vmem:[#allocation2 + $0x32] sm:$0xff]  ;;  %v896_v37 = vld [vmem:[#allocation2 + $0x3a] sm:$0xff]  ;;  %v865_v40 = vld [vmem:[#allocation2 + $0x49] sm:$0xff]  ;;  %621 = vst.msk [vmem:[#allocation2 + $0xd9] sm:$0xff] %vm414_vm0, %v589_v52 }
  0x2e   : > { %v866_v41 = vld [vmem:[#allocation2 + $0x51] sm:$0xff]  ;;  %v13727_v46 = vld [vmem:[#allocation2 + $0x60] sm:$0xff]  ;;  %v13729_v47 = vld [vmem:[#allocation2 + $0x68] sm:$0xff]  ;;  %622 = vst.msk [vmem:[#allocation2 + $0xe1] sm:$0xff] %vm414_vm0, %v590_v53 }
  0x2f   : > { %v897_v42 = vld [vmem:[#allocation2 + $0x4a] sm:$0xff]  ;;  %v898_v43 = vld [vmem:[#allocation2 + $0x52] sm:$0xff]  ;;  %v867_v48 = vld [vmem:[#allocation2 + $0x61] sm:$0xff]  ;;  %623 = vst.msk [vmem:[#allocation2 + $0xf1] sm:$0xff] %vm414_vm0, %v591_v11 }
  0x30   : > { %v868_v49 = vld [vmem:[#allocation2 + $0x69] sm:$0xff]  ;;  %v13755_v54 = vld [vmem:[#allocation2 + $0x78] sm:$0xff]  ;;  %v13757_v55 = vld [vmem:[#allocation2 + $0x80] sm:$0xff]  ;;  %624 = vst.msk [vmem:[#allocation2 + $0xf9] sm:$0xff] %vm414_vm0, %v592_v12 }
  0x31   : > { %1345 = vrot.lane.b32.xlu0 %v767_v18, %s13425_s13  ;;  %1471 = vrot.lane.b32.xlu1 %v798_v19, %s13426_s14  ;;  %v899_v50 = vld [vmem:[#allocation2 + $0x62] sm:$0xff]  ;;  %v900_v51 = vld [vmem:[#allocation2 + $0x6a] sm:$0xff]  ;;  %v13763_v58 = vld [vmem:[#allocation2 + $0x79] sm:$0xff]  ;;  %469 = vst.msk [vmem:[#allocation3 + $0x30] sm:$0x1] %vm467_vm12, %v13421_v0 }
  0x32   : > { %v13765_v59 = vld [vmem:[#allocation2 + $0x81] sm:$0xff]  ;;  %v13823_v25 = vld [vmem:[#allocation2 + $0x91] sm:$0xff]  ;;  %v13825_v26 = vld [vmem:[#allocation2 + $0x99] sm:$0xff]  ;;  %468 = vst.msk [vmem:[#allocation3 + $0x18] sm:$0x1] %vm467_vm12, %v13421_v0 }
  0x33   : > { %v13773_v62 = vld [vmem:[#allocation2 + $0x7a] sm:$0xff]  ;;  %v13780_v2 = vld [vmem:[#allocation2 + $0x82] sm:$0xff]  ;;  %v13835_v35 = vld [vmem:[#allocation2 + $0x92] sm:$0xff]  ;;  %470 = vst.msk [vmem:[#allocation3 + $0x48] sm:$0x1] %vm467_vm12, %v13421_v0 }
  0x34   : > { %v638_v17 = vld [vmem:[#allocation2] sm:$0xff]  ;;  %471 = vst.msk [vmem:[#allocation3 + $0x60] sm:$0x1] %vm467_vm12, %v13421_v0  ;;  %472 = vst.msk [vmem:[#allocation3 + $0x78] sm:$0x1] %vm467_vm12, %v13421_v0 }
  0x35   : > { %965 = vrot.lane.b32.xlu0 %v767_v18, %s13423_s29  ;;  %1091 = vrot.lane.b32.xlu1 %v798_v19, %s13422_s28  ;;  %v13813_v18 = vld [vmem:[#allocation2 + $0x90] sm:$0xff]  ;;  %v13815_v19 = vld [vmem:[#allocation2 + $0x98] sm:$0xff]  ;;  %473 = vst.msk [vmem:[#allocation3 + $0x90] sm:$0x1] %vm467_vm12, %v13421_v0  ;;  %474 = vst.msk [vmem:[#allocation3 + $0xa8] sm:$0x1] %vm467_vm12, %v13421_v0 }
  0x36   : > { %v13847_v44 = vld [vmem:[#allocation2 + $0x9a] sm:$0xff]  ;;  %475 = vst.msk [vmem:[#allocation3 + $0xc0] sm:$0x1] %vm467_vm12, %v13421_v0  ;;  %476 = vst.msk [vmem:[#allocation3 + $0xd8] sm:$0x1] %vm467_vm12, %v13421_v0 }
  0x37   : > { %477 = vst.msk [vmem:[#allocation3 + $0xf0] sm:$0x1] %vm467_vm12, %v13421_v0  ;;  %478 = vst.msk [vmem:[#allocation3 + $0x108] sm:$0x1] %vm467_vm12, %v13421_v0 }
  0x38   : > { %479 = vst.msk [vmem:[#allocation3 + $0x120] sm:$0x1] %vm467_vm12, %v13421_v0  ;;  %480 = vst.msk [vmem:[#allocation3 + $0x138] sm:$0x1] %vm467_vm12, %v13421_v0 }
  0x39   : > { %1473 = vrot.lane.b32.xlu0 %v799_v22, %s13426_s14  ;;  %1599 = vrot.lane.b32.xlu1 %v13646_v23, %s13427_s19  ;;  %481 = vst.msk [vmem:[#allocation3 + $0x150] sm:$0x1] %vm467_vm12, %v13421_v0  ;;  %482 = vst.msk [vmem:[#allocation3 + $0x168] sm:$0x1] %vm467_vm12, %v13421_v0 }
  0x3a   : > { %483 = vst.msk [vmem:[#allocation3 + $0x180] sm:$0x1] %vm467_vm12, %v13421_v0  ;;  %484 = vst.msk [vmem:[#allocation3 + $0x29] sm:$0x1] %vm467_vm12, %v13421_v0 }
  0x3b   : > { %485 = vst.msk [vmem:[#allocation3 + $0x41] sm:$0x1] %vm467_vm12, %v13421_v0  ;;  %486 = vst.msk [vmem:[#allocation3 + $0x59] sm:$0x1] %vm467_vm12, %v13421_v0 }
  0x3c   : > { %487 = vst.msk [vmem:[#allocation3 + $0x71] sm:$0x1] %vm467_vm12, %v13421_v0  ;;  %488 = vst.msk [vmem:[#allocation3 + $0x89] sm:$0x1] %vm467_vm12, %v13421_v0 }
  0x3d   : > { %1093 = vrot.lane.b32.xlu0 %v799_v22, %s13422_s28  ;;  %1219 = vrot.lane.b32.xlu1 %v13646_v23, %s13424_s30  ;;  %489 = vst.msk [vmem:[#allocation3 + $0xa1] sm:$0x1] %vm467_vm12, %v13421_v0  ;;  %490 = vst.msk [vmem:[#allocation3 + $0xb9] sm:$0x1] %vm467_vm12, %v13421_v0 }
  0x3e   : > { %491 = vst.msk [vmem:[#allocation3 + $0xd1] sm:$0x1] %vm467_vm12, %v13421_v0  ;;  %492 = vst.msk [vmem:[#allocation3 + $0xe9] sm:$0x1] %vm467_vm12, %v13421_v0 }
  0x3f   : > { %493 = vst.msk [vmem:[#allocation3 + $0x101] sm:$0x1] %vm467_vm12, %v13421_v0  ;;  %494 = vst.msk [vmem:[#allocation3 + $0x119] sm:$0x1] %vm467_vm12, %v13421_v0 }
  0x40   : > { %495 = vst.msk [vmem:[#allocation3 + $0x131] sm:$0x1] %vm467_vm12, %v13421_v0  ;;  %496 = vst.msk [vmem:[#allocation3 + $0x149] sm:$0x1] %vm467_vm12, %v13421_v0 }
  0x41   : > { %1601 = vrot.lane.b32.xlu0 %v13678_v29, %s13427_s19  ;;  %1727 = vrot.lane.b32.xlu1 %v863_v30, %s13428_s15  ;;  %497 = vst.msk [vmem:[#allocation3 + $0x161] sm:$0x1] %vm467_vm12, %v13421_v0  ;;  %498 = vst.msk [vmem:[#allocation3 + $0x179] sm:$0x1] %vm467_vm12, %v13421_v0 }
  0x42   : > { %499 = vst.msk [vmem:[#allocation3 + $0x191] sm:$0x1] %vm467_vm12, %v13421_v0  ;;  %506 = vst.msk [vmem:[#allocation4 + $0x10] sm:$0x1] %vm467_vm12, %v13421_v0 }
  0x43   : > { %507 = vst.msk [vmem:[#allocation4 + $0x20] sm:$0x1] %vm467_vm12, %v13421_v0  ;;  %508 = vst.msk [vmem:[#allocation4 + $0x30] sm:$0x1] %vm467_vm12, %v13421_v0 }
  0x44   : > { %509 = vst.msk [vmem:[#allocation4 + $0x40] sm:$0x1] %vm467_vm12, %v13421_v0  ;;  %510 = vst.msk [vmem:[#allocation4 + $0x50] sm:$0x1] %vm467_vm12, %v13421_v0 }
  0x45   : > { %1221 = vrot.lane.b32.xlu0 %v13678_v29, %s13424_s30  ;;  %1347 = vrot.lane.b32.xlu1 %v863_v30, %s13425_s13  ;;  %511 = vst.msk [vmem:[#allocation4 + $0x60] sm:$0x1] %vm467_vm12, %v13421_v0  ;;  %512 = vst.msk [vmem:[#allocation4 + $0x70] sm:$0x1] %vm467_vm12, %v13421_v0 }
  0x46   : > { %513 = vst.msk [vmem:[#allocation4 + $0x80] sm:$0x1] %vm467_vm12, %v13421_v0  ;;  %514 = vst.msk [vmem:[#allocation4 + $0x19] sm:$0x1] %vm467_vm12, %v13421_v0 }
  0x47   : > { %515 = vst.msk [vmem:[#allocation4 + $0x29] sm:$0x1] %vm467_vm12, %v13421_v0  ;;  %516 = vst.msk [vmem:[#allocation4 + $0x39] sm:$0x1] %vm467_vm12, %v13421_v0 }
  0x48   : > { %517 = vst.msk [vmem:[#allocation4 + $0x49] sm:$0x1] %vm467_vm12, %v13421_v0  ;;  %518 = vst.msk [vmem:[#allocation4 + $0x59] sm:$0x1] %vm467_vm12, %v13421_v0 }
  0x49   : > { %1729 = vrot.lane.b32.xlu0 %v864_v33, %s13428_s15  ;;  %1855 = vrot.lane.b32.xlu1 %v895_v34, %s13429_s18  ;;  %519 = vst.msk [vmem:[#allocation4 + $0x69] sm:$0x1] %vm467_vm12, %v13421_v0  ;;  %520 = vst.msk [vmem:[#allocation4 + $0x79] sm:$0x1] %vm467_vm12, %v13421_v0 }
  0x4a   : > { %521 = vst.msk [vmem:[#allocation4 + $0x89] sm:$0x1] %vm467_vm12, %v13421_v0  ;;  %565 = vst.msk [vmem:[#allocation7 + $0x8] sm:$0x1] %vm467_vm12, %v13421_v0 }
  0x4b   : > { %566 = vst.msk [vmem:[#allocation7 + $0x10] sm:$0x1] %vm467_vm12, %v13421_v0  ;;  %567 = vst.msk [vmem:[#allocation7 + $0x18] sm:$0x1] %vm467_vm12, %v13421_v0 }
  0x4c   : > { %568 = vst.msk [vmem:[#allocation7 + $0x20] sm:$0x1] %vm467_vm12, %v13421_v0  ;;  %569 = vst.msk [vmem:[#allocation7 + $0xd] sm:$0x1] %vm467_vm12, %v13421_v0 }
  0x4d   : > { %1349 = vrot.lane.b32.xlu0 %v864_v33, %s13425_s13  ;;  %1475 = vrot.lane.b32.xlu1 %v895_v34, %s13426_s14  ;;  %570 = vst.msk [vmem:[#allocation7 + $0x15] sm:$0x1] %vm467_vm12, %v13421_v0  ;;  %571 = vst.msk [vmem:[#allocation7 + $0x1d] sm:$0x1] %vm467_vm12, %v13421_v0 }
  0x4e   : > { %572 = vst.msk [vmem:[#allocation7 + $0x25] sm:$0x1] %vm467_vm12, %v13421_v0 }
  0x4f   : > { %461 = vst.msk [vmem:[#allocation3 + $0x10] sm:$0x3] %vm460_vm13, %v13421_v0  ;;  %465 = vst.msk [vmem:[#allocation3 + $0x1a8] sm:$0x3] %vm460_vm13, %v13421_v0 }
  0x50   : > { %501 = vst.msk [vmem:[#allocation4 + $0x8] sm:$0x3] %vm460_vm13, %v13421_v0  ;;  %504 = vst.msk [vmem:[#allocation4 + $0x98] sm:$0x3] %vm460_vm13, %v13421_v0 }
  0x51   : > { %1857 = vrot.lane.b32.xlu0 %v896_v37, %s13429_s18  ;;  %1477 = vrot.lane.b32.xlu1 %v896_v37, %s13426_s14  ;;  %523 = vst.msk [vmem:[#allocation5] sm:$0xff] %vm522_vm14, %v13421_v0  ;;  %527 = vst.msk [vmem:[#allocation5 + $0x90] sm:$0xff] %vm522_vm14, %v13421_v0 }
  0x52   : > { %525 = vst.msk [vmem:[#allocation5 + $0x8] sm:$0x3] %vm524_vm1, %v13421_v0  ;;  %528 = vst.msk [vmem:[#allocation5 + $0x98] sm:$0x3] %vm524_vm1, %v13421_v0 }
  0x53   : > { %548 = vst.msk [vmem:[#allocation6] sm:$0x3f] %vm547_vm2, %v13421_v0  ;;  %550 = vst.msk [vmem:[#allocation6 + $0x28] sm:$0x3f] %vm547_vm2, %v13421_v0 }
  0x55   : > { %1603 = vrot.lane.b32.xlu0 %v13699_v38, %s13427_s19  ;;  %1605 = vrot.lane.b32.xlu1 %v13701_v39, %s13427_s19 }
  0x59   : > { %1731 = vrot.lane.b32.xlu0 %v865_v40, %s13428_s15  ;;  %1733 = vrot.lane.b32.xlu1 %v866_v41, %s13428_s15 }
  0x5d   : > { %1859 = vrot.lane.b32.xlu0 %v897_v42, %s13429_s18  ;;  %967 = vrot.lane.b32.xlu1 %v863_v30, %s13423_s29 }
  0x61   : > { %1861 = vrot.lane.b32.xlu0 %v898_v43, %s13429_s18  ;;  %969 = vrot.lane.b32.xlu1 %v864_v33, %s13423_s29 }
  0x65   : > { %1095 = vrot.lane.b32.xlu0 %v895_v34, %s13422_s28  ;;  %1097 = vrot.lane.b32.xlu1 %v896_v37, %s13422_s28 }
  0x69   : > { %1223 = vrot.lane.b32.xlu0 %v13699_v38, %s13424_s30  ;;  %1225 = vrot.lane.b32.xlu1 %v13701_v39, %s13424_s30 }
  0x6d   : > { %1351 = vrot.lane.b32.xlu0 %v865_v40, %s13425_s13  ;;  %1353 = vrot.lane.b32.xlu1 %v866_v41, %s13425_s13 }
  0x71   : > { %1479 = vrot.lane.b32.xlu0 %v897_v42, %s13426_s14  ;;  %1481 = vrot.lane.b32.xlu1 %v898_v43, %s13426_s14 }
  0x75   : > { %1607 = vrot.lane.b32.xlu0 %v13727_v46, %s13427_s19  ;;  %1609 = vrot.lane.b32.xlu1 %v13729_v47, %s13427_s19 }
  0x79   : > { %1735 = vrot.lane.b32.xlu0 %v867_v48, %s13428_s15  ;;  %1737 = vrot.lane.b32.xlu1 %v868_v49, %s13428_s15 }
  0x7d   : > { %1863 = vrot.lane.b32.xlu0 %v899_v50, %s13429_s18  ;;  %971 = vrot.lane.b32.xlu1 %v865_v40, %s13423_s29 }
  0x81   : > { %1865 = vrot.lane.b32.xlu0 %v900_v51, %s13429_s18  ;;  %973 = vrot.lane.b32.xlu1 %v866_v41, %s13423_s29 }
  0x85   : > { %1099 = vrot.lane.b32.xlu0 %v897_v42, %s13422_s28  ;;  %1101 = vrot.lane.b32.xlu1 %v898_v43, %s13422_s28 }
  0x88   : > { %v1088_v56 = vpop.permute.xlu1 %1087 }
  0x89   : > { %1227 = vrot.lane.b32.xlu0 %v13727_v46, %s13424_s30  ;;  %1229 = vrot.lane.b32.xlu1 %v13729_v47, %s13424_s30  ;;  %v960_v57 = vpop.permute.xlu0 %959 }
  0x8a   : > { %v1951_v20 = vsel %vm414_vm0, %v638_v17, %v960_v57 }
  0x8b   : > { %v1984_v24 = vsel %vm1983_vm5, %v1951_v20, %v1088_v56  ;;  %v13903_v20 = vld [vmem:[#allocation2 + $0xa8] sm:$0xff] }
  0x8c   : > { %v13767_v60 = vpop.permute.xlu1 %1089 }
  0x8d   : > { %1355 = vrot.lane.b32.xlu0 %v867_v48, %s13425_s13  ;;  %1357 = vrot.lane.b32.xlu1 %v868_v49, %s13425_s13  ;;  %v962_v61 = vpop.permute.xlu0 %961 }
  0x8e   : > { %v1952_v36 = vsel %vm414_vm0, %v639_v31, %v962_v61  ;;  %v13916_v31 = vld [vmem:[#allocation2 + $0xb1] sm:$0xff] }
  0x8f   : > { %v1985_v43 = vsel %vm1983_vm5, %v1952_v36, %v13767_v60 }
  0x91   : > { %1483 = vrot.lane.b32.xlu0 %v899_v50, %s13426_s14  ;;  %1485 = vrot.lane.b32.xlu1 %v900_v51, %s13426_s14 }
  0x95   : > { %1611 = vrot.lane.b32.xlu0 %v13755_v54, %s13427_s19  ;;  %1613 = vrot.lane.b32.xlu1 %v13757_v55, %s13427_s19 }
  0x99   : > { %1739 = vrot.lane.b32.xlu0 %v13763_v58, %s13428_s15  ;;  %1741 = vrot.lane.b32.xlu1 %v13765_v59, %s13428_s15 }
  0x9b   : > { %v13775_v63 = vpop.permute.xlu1 %1217  ;;  %v1216_v1 = vpop.permute.xlu0 %1215 }
  0x9c   : > { %v2017_v27 = vsel %vm2016_vm6, %v1984_v24, %v1216_v1  ;;  %v2018_v45 = vsel %vm2016_vm6, %v1985_v43, %v13775_v63 }
  0x9d   : > { %1867 = vrot.lane.b32.xlu0 %v13773_v62, %s13429_s18  ;;  %975 = vrot.lane.b32.xlu1 %v867_v48, %s13423_s29 }
  0x9f   : > { %v1344_v3 = vpop.permute.xlu0 %1343  ;;  %v13782_v4 = vpop.permute.xlu1 %963 }
  0xa0   : > { %v2050_v32 = vsel %vm2049_vm7, %v2017_v27, %v1344_v3  ;;  %v1953_v61 = vsel %vm414_vm0, %v13630_v16, %v13782_v4 }
  0xa1   : > { %1869 = vrot.lane.b32.xlu0 %v13780_v2, %s13429_s18  ;;  %977 = vrot.lane.b32.xlu1 %v868_v49, %s13423_s29 }
  0xa3   : > { %v1346_v5 = vpop.permute.xlu0 %1345  ;;  %v1472_v6 = vpop.permute.xlu1 %1471 }
  0xa4   : > { %v2083_v33 = vsel %vm2082_vm8, %v2050_v32, %v1472_v6  ;;  %v594_v6 = vld [vmem:[%s13602_s27 + $0xa8] sm:$0xff] }
  0xa5   : > { %1103 = vrot.lane.b32.xlu0 %v899_v50, %s13422_s28  ;;  %1105 = vrot.lane.b32.xlu1 %v900_v51, %s13422_s28  ;;  %v2051_v50 = vsel %vm2049_vm7, %v2018_v45, %v1346_v5  ;;  %v593_v5 = vld [vmem:[%s13602_s27 + $0xa0] sm:$0xff]  ;;  %626 = vst.msk [vmem:[#allocation2 + $0x111] sm:$0xff] %vm414_vm0, %v594_v6 }
  0xa6   : > { %625 = vst.msk [vmem:[#allocation2 + $0x109] sm:$0xff] %vm414_vm0, %v593_v5 }
  0xa7   : > { %v13789_v7 = vpop.permute.xlu0 %965  ;;  %v13791_v8 = vpop.permute.xlu1 %1091 }
  0xa8   : > { %v1954_v16 = vsel %vm414_vm0, %v13628_v15, %v13789_v7 }
  0xa9   : > { %1231 = vrot.lane.b32.xlu0 %v13755_v54, %s13424_s30  ;;  %1233 = vrot.lane.b32.xlu1 %v13757_v55, %s13424_s30 }
  0xab   : > { %v1474_v9 = vpop.permute.xlu0 %1473  ;;  %v1600_v10 = vpop.permute.xlu1 %1599 }
  0xac   : > { %v2116_v34 = vsel %vm2115_vm9, %v2083_v33, %v1600_v10  ;;  %v2084_v51 = vsel %vm2082_vm8, %v2051_v50, %v1474_v9 }
  0xad   : > { %1359 = vrot.lane.b32.xlu0 %v13763_v58, %s13425_s13  ;;  %1361 = vrot.lane.b32.xlu1 %v13765_v59, %s13425_s13 }
  0xaf   : > { %v13805_v13 = vpop.permute.xlu0 %1093  ;;  %v13807_v14 = vpop.permute.xlu1 %1219 }
  0xb1   : > { %1487 = vrot.lane.b32.xlu0 %v13773_v62, %s13426_s14  ;;  %1489 = vrot.lane.b32.xlu1 %v13780_v2, %s13426_s14 }
  0xb3   : > { %v1602_v21 = vpop.permute.xlu0 %1601  ;;  %v1728_v22 = vpop.permute.xlu1 %1727 }
  0xb4   : > { %v2149_v37 = vsel %vm2148_vm10, %v2116_v34, %v1728_v22  ;;  %v2117_v52 = vsel %vm2115_vm9, %v2084_v51, %v1602_v21  ;;  %v13905_v21 = vld [vmem:[#allocation2 + $0xb0] sm:$0xff] }
  0xb5   : > { %1615 = vrot.lane.b32.xlu0 %v13813_v18, %s13427_s19  ;;  %1617 = vrot.lane.b32.xlu1 %v13815_v19, %s13427_s19  ;;  %v13922_v34 = vld [vmem:[#allocation2 + $0xaa] sm:$0xff] }
  0xb7   : > { %v1222_v28 = vpop.permute.xlu0 %1221  ;;  %v1348_v30 = vpop.permute.xlu1 %1347 }
  0xb9   : > { %1743 = vrot.lane.b32.xlu0 %v13823_v25, %s13428_s15  ;;  %1745 = vrot.lane.b32.xlu1 %v13825_v26, %s13428_s15 }
  0xbb   : > { %v1730_v40 = vpop.permute.xlu0 %1729  ;;  %v1856_v41 = vpop.permute.xlu1 %1855 }
  0xbc   : > { %v2181_v42 = vsel %vm457_vm3, %v2149_v37, %v1856_v41  ;;  %v2150_v53 = vsel %vm2148_vm10, %v2117_v52, %v1730_v40  ;;  %v13928_v40 = vld [vmem:[#allocation2 + $0xb2] sm:$0xff] }
  0xbd   : > { %1871 = vrot.lane.b32.xlu0 %v13835_v35, %s13429_s18  ;;  %979 = vrot.lane.b32.xlu1 %v13763_v58, %s13423_s29 }
  0xbe   : > { %11507 = vmatprep.mubr.msk.f32.mxu0 %vm2222_vm11, %v2181_v42 }
  0xbf   : > { %v1350_v48 = vpop.permute.xlu0 %1349  ;;  %v1476_v49 = vpop.permute.xlu1 %1475 }
  0xc1   : > { %1873 = vrot.lane.b32.xlu0 %v13847_v44, %s13429_s18  ;;  %981 = vrot.lane.b32.xlu1 %v13765_v59, %s13423_s29 }
  0xc3   : > { %v1858_v56 = vpop.permute.xlu0 %1857  ;;  %v1478_v57 = vpop.permute.xlu1 %1477 }
  0xc4   : > { %v2182_v58 = vsel %vm457_vm3, %v2150_v53, %v1858_v56  ;;  %v596_v56 = vld [vmem:[%s13602_s27 + $0xb8] sm:$0xff] }
  0xc5   : > { %1107 = vrot.lane.b32.xlu0 %v13773_v62, %s13422_s28  ;;  %1109 = vrot.lane.b32.xlu1 %v13780_v2, %s13422_s28  ;;  %v1986_v62 = vsel %vm1983_vm5, %v1953_v61, %v13791_v8  ;;  %v1987_v8 = vsel %vm1983_vm5, %v1954_v16, %v13805_v13  ;;  %628 = vst.msk [vmem:[#allocation2 + $0x129] sm:$0xff] %vm414_vm0, %v596_v56  ;;  %v13973_v16 = vld [vmem:[#allocation2 + $0xc8] sm:$0xff] }
  0xc6   : > { %11508 = vmatmul.mubr.msk.f32.vlgmr.msra.gmra.mrb[0].mxu0 %vm2222_vm11, %v2182_v58  ;;  %v2019_v63 = vsel %vm2016_vm6, %v1986_v62, %v13807_v14  ;;  %v2020_v15 = vsel %vm2016_vm6, %v1987_v8, %v1222_v28 }
  0xc7   : > { %v1604_v60 = vpop.permute.xlu0 %1603  ;;  %v1606_v59 = vpop.permute.xlu1 %1605  ;;  %v2052_v3 = vsel %vm2049_vm7, %v2019_v63, %v1348_v30  ;;  %v2053_v12 = vsel %vm2049_vm7, %v2020_v15, %v1350_v48  ;;  %v13914_v30 = vld [vmem:[#allocation2 + $0xa9] sm:$0xff] }
  0xc8   : > { %v2085_v4 = vsel %vm2082_vm8, %v2052_v3, %v1476_v49  ;;  %v2086_v17 = vsel %vm2082_vm8, %v2053_v12, %v1478_v57  ;;  %v13971_v3 = vld [vmem:[#allocation2 + $0xc0] sm:$0xff]  ;;  %v13984_v15 = vld [vmem:[#allocation2 + $0xc9] sm:$0xff] }
  0xc9   : > { %1235 = vrot.lane.b32.xlu0 %v13813_v18, %s13424_s30  ;;  %1237 = vrot.lane.b32.xlu1 %v13815_v19, %s13424_s30  ;;  %v2118_v9 = vsel %vm2115_vm9, %v2085_v4, %v1604_v60  ;;  %v2119_v13 = vsel %vm2115_vm9, %v2086_v17, %v1606_v59  ;;  %v13996_v17 = vld [vmem:[#allocation2 + $0xca] sm:$0xff] }
  0xcb   : > { %v1732_v1 = vpop.permute.xlu0 %1731  ;;  %v1734_v2 = vpop.permute.xlu1 %1733 }
  0xcc   : > { %v2151_v7 = vsel %vm2148_vm10, %v2118_v9, %v1732_v1  ;;  %v2152_v22 = vsel %vm2148_vm10, %v2119_v13, %v1734_v2  ;;  %v13982_v9 = vld [vmem:[#allocation2 + $0xc1] sm:$0xff] }
  0xcd   : > { %1363 = vrot.lane.b32.xlu0 %v13823_v25, %s13425_s13  ;;  %1365 = vrot.lane.b32.xlu1 %v13825_v26, %s13425_s13 }
  0xcf   : > { %v1860_v10 = vpop.permute.xlu0 %1859  ;;  %v968_v11 = vpop.permute.xlu1 %967 }
  0xd0   : > { %v2183_v14 = vsel %vm457_vm3, %v2151_v7, %v1860_v10  ;;  %v1955_v49 = vsel %vm414_vm0, %v13646_v23, %v968_v11  ;;  %v595_v23 = vld [vmem:[%s13602_s27 + $0xb0] sm:$0xff]  ;;  %v13990_v11 = vld [vmem:[#allocation2 + $0xc2] sm:$0xff] }
  0xd1   : > { %1491 = vrot.lane.b32.xlu0 %v13835_v35, %s13426_s14  ;;  %1493 = vrot.lane.b32.xlu1 %v13847_v44, %s13426_s14  ;;  %627 = vst.msk [vmem:[#allocation2 + $0x121] sm:$0xff] %vm414_vm0, %v595_v23 }
  0xd2   : > { %11510 = vmatprep.mubr.msk.f32.mxu0 %vm2222_vm11, %v2183_v14 }
  0xd3   : > { %v1862_v24 = vpop.permute.xlu0 %1861  ;;  %v970_v27 = vpop.permute.xlu1 %969 }
  0xd4   : > { %v2184_v28 = vsel %vm457_vm3, %v2152_v22, %v1862_v24  ;;  %v1956_v52 = vsel %vm414_vm0, %v13678_v29, %v970_v27 }
  0xd5   : > { %1619 = vrot.lane.b32.xlu0 %v13903_v20, %s13427_s19  ;;  %1621 = vrot.lane.b32.xlu1 %v13905_v21, %s13427_s19 }
  0xd6   : > { %11511 = vmatmul.mubr.msk.f32.gmra.mrb[2].mxu0 %vm2222_vm11, %v2184_v28 }
  0xd7   : > { %v1096_v32 = vpop.permute.xlu0 %1095  ;;  %v1098_v33 = vpop.permute.xlu1 %1097 }
  0xd8   : > { %v1989_v57 = vsel %vm1983_vm5, %v1956_v52, %v1098_v33  ;;  %v14043_v52 = vld [vmem:[#allocation2 + $0xe0] sm:$0xff] }
  0xd9   : > { %1747 = vrot.lane.b32.xlu0 %v13914_v30, %s13428_s15  ;;  %1749 = vrot.lane.b32.xlu1 %v13916_v31, %s13428_s15 }
  0xdb   : > { %v1224_v36 = vpop.permute.xlu0 %1223  ;;  %v1226_v37 = vpop.permute.xlu1 %1225 }
  0xdc   : > { %v2022_v29 = vsel %vm2016_vm6, %v1989_v57, %v1226_v37 }
  0xdd   : > { %1875 = vrot.lane.b32.xlu0 %v13922_v34, %s13429_s18  ;;  %983 = vrot.lane.b32.xlu1 %v13823_v25, %s13423_s29 }
  0xdf   : > { %v1352_v41 = vpop.permute.xlu0 %1351  ;;  %v1354_v42 = vpop.permute.xlu1 %1353 }
  0xe0   : > { %v2055_v62 = vsel %vm2049_vm7, %v2022_v29, %v1354_v42  ;;  %v598_v42 = vld [vmem:[%s13602_s27 + $0xc8] sm:$0xff] }
  0xe1   : > { %1877 = vrot.lane.b32.xlu0 %v13928_v40, %s13429_s18  ;;  %985 = vrot.lane.b32.xlu1 %v13825_v26, %s13423_s29  ;;  %v1988_v26 = vsel %vm1983_vm5, %v1955_v49, %v1096_v32  ;;  %630 = vst.msk [vmem:[#allocation2 + $0x141] sm:$0xff] %vm414_vm0, %v598_v42  ;;  %v14056_v29 = vld [vmem:[#allocation2 + $0xe1] sm:$0xff] }
  0xe3   : > { %v1480_v43 = vpop.permute.xlu0 %1479  ;;  %v1482_v45 = vpop.permute.xlu1 %1481 }
  0xe4   : > { %v2088_v1 = vsel %vm2082_vm8, %v2055_v62, %v1482_v45 }
  0xe5   : > { %1111 = vrot.lane.b32.xlu0 %v13835_v35, %s13422_s28  ;;  %1113 = vrot.lane.b32.xlu1 %v13847_v44, %s13422_s28  ;;  %v2021_v35 = vsel %vm2016_vm6, %v1988_v26, %v1224_v36 }
  0xe6   : > { %v2054_v44 = vsel %vm2049_vm7, %v2021_v35, %v1352_v41 }
  0xe7   : > { %v1608_v25 = vpop.permute.xlu0 %1607  ;;  %v1610_v48 = vpop.permute.xlu1 %1609  ;;  %v2087_v53 = vsel %vm2082_vm8, %v2054_v44, %v1480_v43  ;;  %v14041_v44 = vld [vmem:[#allocation2 + $0xd8] sm:$0xff] }
  0xe8   : > { %v2120_v58 = vsel %vm2115_vm9, %v2087_v53, %v1608_v25  ;;  %v2121_v2 = vsel %vm2115_vm9, %v2088_v1, %v1610_v48  ;;  %v14076_v1 = vld [vmem:[#allocation2 + $0xe2] sm:$0xff] }
  0xe9   : > { %1239 = vrot.lane.b32.xlu0 %v13903_v20, %s13424_s30  ;;  %1241 = vrot.lane.b32.xlu1 %v13905_v21, %s13424_s30 }
  0xeb   : > { %v1736_v50 = vpop.permute.xlu0 %1735  ;;  %v1738_v51 = vpop.permute.xlu1 %1737 }
  0xec   : > { %v2153_v60 = vsel %vm2148_vm10, %v2120_v58, %v1736_v50  ;;  %v2154_v4 = vsel %vm2148_vm10, %v2121_v2, %v1738_v51  ;;  %v14054_v58 = vld [vmem:[#allocation2 + $0xd9] sm:$0xff] }
  0xed   : > { %1367 = vrot.lane.b32.xlu0 %v13914_v30, %s13425_s13  ;;  %1369 = vrot.lane.b32.xlu1 %v13916_v31, %s13425_s13 }
  0xef   : > { %v1864_v59 = vpop.permute.xlu0 %1863  ;;  %v972_v61 = vpop.permute.xlu1 %971 }
  0xf0   : > { %v2185_v63 = vsel %vm457_vm3, %v2153_v60, %v1864_v59  ;;  %v1957_v32 = vsel %vm414_vm0, %v13699_v38, %v972_v61  ;;  %v597_v38 = vld [vmem:[%s13602_s27 + $0xc0] sm:$0xff] }
  0xf1   : > { %1495 = vrot.lane.b32.xlu0 %v13922_v34, %s13426_s14  ;;  %1497 = vrot.lane.b32.xlu1 %v13928_v40, %s13426_s14  ;;  %629 = vst.msk [vmem:[#allocation2 + $0x139] sm:$0xff] %vm414_vm0, %v597_v38  ;;  %v14066_v61 = vld [vmem:[#allocation2 + $0xda] sm:$0xff] }
  0xf2   : > { %11513 = vmatprep.mubr.msk.f32.mxu0 %vm2222_vm11, %v2185_v63 }
  0xf3   : > { %v1866_v5 = vpop.permute.xlu0 %1865  ;;  %v974_v6 = vpop.permute.xlu1 %973 }
  0xf4   : > { %v2186_v8 = vsel %vm457_vm3, %v2154_v4, %v1866_v5 }
  0xf5   : > { %1623 = vrot.lane.b32.xlu0 %v13971_v3, %s13427_s19  ;;  %1625 = vrot.lane.b32.xlu1 %v13973_v16, %s13427_s19 }
  0xf6   : > { %11514 = vmatmul.mubr.msk.f32.gmra.mrb[4].mxu0 %vm2222_vm11, %v2186_v8 }
  0xf7   : > { %v1100_v7 = vpop.permute.xlu0 %1099  ;;  %v1102_v10 = vpop.permute.xlu1 %1101 }
  0xf9   : > { %1751 = vrot.lane.b32.xlu0 %v13982_v9, %s13428_s15  ;;  %1753 = vrot.lane.b32.xlu1 %v13984_v15, %s13428_s15 }
  0xfb   : > { %v1228_v12 = vpop.permute.xlu0 %1227  ;;  %v1230_v14 = vpop.permute.xlu1 %1229 }
  0xfd   : > { %1879 = vrot.lane.b32.xlu0 %v13990_v11, %s13429_s18  ;;  %987 = vrot.lane.b32.xlu1 %v13914_v30, %s13423_s29 }
  0xff   : > { %v1356_v13 = vpop.permute.xlu0 %1355  ;;  %v1358_v22 = vpop.permute.xlu1 %1357 }
 0x101   : > { %1881 = vrot.lane.b32.xlu0 %v13996_v17, %s13429_s18  ;;  %989 = vrot.lane.b32.xlu1 %v13916_v31, %s13423_s29  ;;  %v1990_v31 = vsel %vm1983_vm5, %v1957_v32, %v1100_v7 }
 0x102   : > { %v2023_v33 = vsel %vm2016_vm6, %v1990_v31, %v1228_v12 }
 0x103   : > { %v1484_v24 = vpop.permute.xlu0 %1483  ;;  %v1486_v27 = vpop.permute.xlu1 %1485  ;;  %v2056_v37 = vsel %vm2049_vm7, %v2023_v33, %v1356_v13  ;;  %v599_v13 = vld [vmem:[%s13602_s27 + $0xd0] sm:$0xff] }
 0x104   : > { %v2089_v41 = vsel %vm2082_vm8, %v2056_v37, %v1484_v24  ;;  %631 = vst.msk [vmem:[#allocation2 + $0x151] sm:$0xff] %vm414_vm0, %v599_v13  ;;  %v14245_v37 = vld [vmem:[#allocation2 + $0xf0] sm:$0xff] }
 0x105   : > { %1115 = vrot.lane.b32.xlu0 %v13922_v34, %s13422_s28  ;;  %1117 = vrot.lane.b32.xlu1 %v13928_v40, %s13422_s28  ;;  %v1958_v40 = vsel %vm414_vm0, %v13701_v39, %v974_v6 }
 0x106   : > { %v1991_v43 = vsel %vm1983_vm5, %v1958_v40, %v1102_v10  ;;  %v14247_v40 = vld [vmem:[#allocation2 + $0xf8] sm:$0xff] }
 0x107   : > { %v1612_v28 = vpop.permute.xlu0 %1611  ;;  %v1614_v30 = vpop.permute.xlu1 %1613  ;;  %v2024_v39 = vsel %vm2016_vm6, %v1991_v43, %v1230_v14 }
 0x108   : > { %v2122_v45 = vsel %vm2115_vm9, %v2089_v41, %v1612_v28  ;;  %v2057_v26 = vsel %vm2049_vm7, %v2024_v39, %v1358_v22  ;;  %v600_v22 = vld [vmem:[%s13602_s27 + $0xd8] sm:$0xff] }
 0x109   : > { %1243 = vrot.lane.b32.xlu0 %v13971_v3, %s13424_s30  ;;  %1245 = vrot.lane.b32.xlu1 %v13973_v16, %s13424_s30  ;;  %v2090_v50 = vsel %vm2082_vm8, %v2057_v26, %v1486_v27  ;;  %632 = vst.msk [vmem:[#allocation2 + $0x159] sm:$0xff] %vm414_vm0, %v600_v22  ;;  %v14258_v39 = vld [vmem:[#allocation2 + $0xf9] sm:$0xff] }
 0x10a   : > { %v2123_v51 = vsel %vm2115_vm9, %v2090_v50, %v1614_v30  ;;  %v14270_v50 = vld [vmem:[#allocation2 + $0xfa] sm:$0xff] }
 0x10b   : > { %v1740_v34 = vpop.permute.xlu0 %1739  ;;  %v1742_v36 = vpop.permute.xlu1 %1741 }
 0x10c   : > { %v2155_v25 = vsel %vm2148_vm10, %v2122_v45, %v1740_v34  ;;  %v2156_v53 = vsel %vm2148_vm10, %v2123_v51, %v1742_v36  ;;  %v14256_v45 = vld [vmem:[#allocation2 + $0xf1] sm:$0xff] }
 0x10d   : > { %1371 = vrot.lane.b32.xlu0 %v13982_v9, %s13425_s13  ;;  %1373 = vrot.lane.b32.xlu1 %v13984_v15, %s13425_s13 }
 0x10f   : > { %v1868_v48 = vpop.permute.xlu0 %1867  ;;  %v14030_v49 = vpop.permute.xlu1 %975 }
 0x110   : > { %v2187_v35 = vsel %vm457_vm3, %v2155_v25, %v1868_v48  ;;  %v1959_v7 = vsel %vm414_vm0, %v13727_v46, %v14030_v49  ;;  %v14264_v49 = vld [vmem:[#allocation2 + $0xf2] sm:$0xff] }
 0x111   : > { %1499 = vrot.lane.b32.xlu0 %v13990_v11, %s13426_s14  ;;  %1501 = vrot.lane.b32.xlu1 %v13996_v17, %s13426_s14 }
 0x112   : > { %11516 = vmatprep.mubr.msk.f32.mxu0 %vm2222_vm11, %v2187_v35 }
 0x113   : > { %v1870_v23 = vpop.permute.xlu0 %1869  ;;  %v14046_v56 = vpop.permute.xlu1 %977 }
 0x114   : > { %v2188_v57 = vsel %vm457_vm3, %v2156_v53, %v1870_v23  ;;  %v1960_v46 = vsel %vm414_vm0, %v13729_v47, %v14046_v56 }
 0x115   : > { %1627 = vrot.lane.b32.xlu0 %v14041_v44, %s13427_s19  ;;  %1629 = vrot.lane.b32.xlu1 %v14043_v52, %s13427_s19 }
 0x116   : > { %11517 = vmatmul.mubr.msk.f32.gmra.mrb[6].mxu0 %vm2222_vm11, %v2188_v57 }
 0x117   : > { %v14058_v60 = vpop.permute.xlu0 %1103  ;;  %v14060_v59 = vpop.permute.xlu1 %1105 }
 0x118   : > { %v1993_v24 = vsel %vm1983_vm5, %v1960_v46, %v14060_v59  ;;  %v14315_v46 = vld [vmem:[#allocation2 + $0x110] sm:$0xff] }
 0x119   : > { %1755 = vrot.lane.b32.xlu0 %v14054_v58, %s13428_s15  ;;  %1757 = vrot.lane.b32.xlu1 %v14056_v29, %s13428_s15 }
 0x11b   : > { %v14068_v62 = vpop.permute.xlu0 %1231  ;;  %v14070_v63 = vpop.permute.xlu1 %1233 }
 0x11c   : > { %v2026_v47 = vsel %vm2016_vm6, %v1993_v24, %v14070_v63 }
 0x11d   : > { %1883 = vrot.lane.b32.xlu0 %v14066_v61, %s13429_s18  ;;  %991 = vrot.lane.b32.xlu1 %v13982_v9, %s13423_s29 }
 0x11f   : > { %v1360_v2 = vpop.permute.xlu0 %1359  ;;  %v1362_v4 = vpop.permute.xlu1 %1361 }
 0x120   : > { %v2059_v31 = vsel %vm2049_vm7, %v2026_v47, %v1362_v4  ;;  %v602_v4 = vld [vmem:[%s13602_s27 + $0xe8] sm:$0xff]  ;;  %v14326_v47 = vld [vmem:[#allocation2 + $0x111] sm:$0xff] }
 0x121   : > { %1885 = vrot.lane.b32.xlu0 %v14076_v1, %s13429_s18  ;;  %993 = vrot.lane.b32.xlu1 %v13984_v15, %s13423_s29  ;;  %v1992_v15 = vsel %vm1983_vm5, %v1959_v7, %v14058_v60  ;;  %634 = vst.msk [vmem:[#allocation2 + $0x171] sm:$0xff] %vm414_vm0, %v602_v4 }
 0x122   : > { %v2025_v10 = vsel %vm2016_vm6, %v1992_v15, %v14068_v62 }
 0x123   : > { %v1488_v5 = vpop.permute.xlu0 %1487  ;;  %v1490_v6 = vpop.permute.xlu1 %1489  ;;  %v2058_v14 = vsel %vm2049_vm7, %v2025_v10, %v1360_v2 }
 0x124   : > { %v2092_v34 = vsel %vm2082_vm8, %v2059_v31, %v1490_v6 }
 0x125   : > { %1119 = vrot.lane.b32.xlu0 %v13990_v11, %s13422_s28  ;;  %1121 = vrot.lane.b32.xlu1 %v13996_v17, %s13422_s28  ;;  %v2091_v17 = vsel %vm2082_vm8, %v2058_v14, %v1488_v5  ;;  %v14313_v14 = vld [vmem:[#allocation2 + $0x108] sm:$0xff] }
 0x127   : > { %v1616_v8 = vpop.permute.xlu0 %1615  ;;  %v1618_v9 = vpop.permute.xlu1 %1617 }
 0x128   : > { %v2124_v27 = vsel %vm2115_vm9, %v2091_v17, %v1616_v8  ;;  %v2125_v36 = vsel %vm2115_vm9, %v2092_v34, %v1618_v9  ;;  %v14338_v34 = vld [vmem:[#allocation2 + $0x112] sm:$0xff] }
 0x129   : > { %1247 = vrot.lane.b32.xlu0 %v14041_v44, %s13424_s30  ;;  %1249 = vrot.lane.b32.xlu1 %v14043_v52, %s13424_s30 }
 0x12b   : > { %v1744_v11 = vpop.permute.xlu0 %1743  ;;  %v1746_v12 = vpop.permute.xlu1 %1745 }
 0x12c   : > { %v2157_v28 = vsel %vm2148_vm10, %v2124_v27, %v1744_v11  ;;  %v2158_v41 = vsel %vm2148_vm10, %v2125_v36, %v1746_v12  ;;  %v14324_v27 = vld [vmem:[#allocation2 + $0x109] sm:$0xff] }
 0x12d   : > { %1375 = vrot.lane.b32.xlu0 %v14054_v58, %s13425_s13  ;;  %1377 = vrot.lane.b32.xlu1 %v14056_v29, %s13425_s13 }
 0x12f   : > { %v1872_v30 = vpop.permute.xlu0 %1871  ;;  %v980_v32 = vpop.permute.xlu1 %979 }
 0x130   : > { %v2189_v33 = vsel %vm457_vm3, %v2157_v28, %v1872_v30  ;;  %v1961_v60 = vsel %vm414_vm0, %v13755_v54, %v980_v32  ;;  %v601_v54 = vld [vmem:[%s13602_s27 + $0xe0] sm:$0xff]  ;;  %v14332_v32 = vld [vmem:[#allocation2 + $0x10a] sm:$0xff] }
 0x131   : > { %1503 = vrot.lane.b32.xlu0 %v14066_v61, %s13426_s14  ;;  %1505 = vrot.lane.b32.xlu1 %v14076_v1, %s13426_s14  ;;  %633 = vst.msk [vmem:[#allocation2 + $0x169] sm:$0xff] %vm414_vm0, %v601_v54 }
 0x132   : > { %11519 = vmatprep.mubr.msk.f32.mxu0 %vm2222_vm11, %v2189_v33 }
 0x133   : > { %v1874_v38 = vpop.permute.xlu0 %1873  ;;  %v982_v42 = vpop.permute.xlu1 %981 }
 0x134   : > { %v2190_v43 = vsel %vm457_vm3, %v2158_v41, %v1874_v38 }
 0x135   : > { %1631 = vrot.lane.b32.xlu0 %v14245_v37, %s13427_s19  ;;  %1633 = vrot.lane.b32.xlu1 %v14247_v40, %s13427_s19 }
 0x136   : > { %11520 = vmatmul.mubr.msk.f32.gmra.mrb[8].mxu0 %vm2222_vm11, %v2190_v43 }
 0x137   : > { %v1108_v25 = vpop.permute.xlu0 %1107  ;;  %v1110_v48 = vpop.permute.xlu1 %1109 }
 0x139   : > { %1759 = vrot.lane.b32.xlu0 %v14256_v45, %s13428_s15  ;;  %1761 = vrot.lane.b32.xlu1 %v14258_v39, %s13428_s15 }
 0x13b   : > { %v1236_v26 = vpop.permute.xlu0 %1235  ;;  %v1238_v35 = vpop.permute.xlu1 %1237 }
 0x13d   : > { %1887 = vrot.lane.b32.xlu0 %v14264_v49, %s13429_s18  ;;  %995 = vrot.lane.b32.xlu1 %v14054_v58, %s13423_s29 }
 0x13f   : > { %v1364_v51 = vpop.permute.xlu0 %1363  ;;  %v1366_v53 = vpop.permute.xlu1 %1365 }
 0x141   : > { %1889 = vrot.lane.b32.xlu0 %v14270_v50, %s13429_s18  ;;  %997 = vrot.lane.b32.xlu1 %v14056_v29, %s13423_s29  ;;  %v1994_v29 = vsel %vm1983_vm5, %v1961_v60, %v1108_v25 }
 0x142   : > { %v2027_v59 = vsel %vm2016_vm6, %v1994_v29, %v1236_v26 }
 0x143   : > { %v1492_v23 = vpop.permute.xlu0 %1491  ;;  %v1494_v56 = vpop.permute.xlu1 %1493  ;;  %v2060_v63 = vsel %vm2049_vm7, %v2027_v59, %v1364_v51 }
 0x144   : > { %v2093_v2 = vsel %vm2082_vm8, %v2060_v63, %v1492_v23  ;;  %v14381_v63 = vld [vmem:[#allocation2 + $0x120] sm:$0xff] }
 0x145   : > { %1123 = vrot.lane.b32.xlu0 %v14066_v61, %s13422_s28  ;;  %1125 = vrot.lane.b32.xlu1 %v14076_v1, %s13422_s28  ;;  %v1962_v1 = vsel %vm414_vm0, %v13757_v55, %v982_v42 }
 0x146   : > { %v1995_v5 = vsel %vm1983_vm5, %v1962_v1, %v1110_v48  ;;  %v14383_v1 = vld [vmem:[#allocation2 + $0x128] sm:$0xff] }
 0x147   : > { %v1620_v57 = vpop.permute.xlu0 %1619  ;;  %v1622_v58 = vpop.permute.xlu1 %1621  ;;  %v2028_v55 = vsel %vm2016_vm6, %v1995_v5, %v1238_v35 }
 0x148   : > { %v2126_v6 = vsel %vm2115_vm9, %v2093_v2, %v1620_v57  ;;  %v2061_v15 = vsel %vm2049_vm7, %v2028_v55, %v1366_v53  ;;  %v604_v53 = vld [vmem:[%s13602_s27 + $0xf8] sm:$0xff]  ;;  %v14394_v55 = vld [vmem:[#allocation2 + $0x129] sm:$0xff] }
 0x149   : > { %1251 = vrot.lane.b32.xlu0 %v14245_v37, %s13424_s30  ;;  %1253 = vrot.lane.b32.xlu1 %v14247_v40, %s13424_s30  ;;  %v2094_v11 = vsel %vm2082_vm8, %v2061_v15, %v1494_v56  ;;  %636 = vst.msk [vmem:[#allocation2 + $0x189] sm:$0xff] %vm414_vm0, %v604_v53  ;;  %v14453_v53 = vld [vmem:[#allocation2 + $0x139] sm:$0xff] }
 0x14a   : > { %v2127_v12 = vsel %vm2115_vm9, %v2094_v11, %v1622_v58  ;;  %v14406_v11 = vld [vmem:[#allocation2 + $0x12a] sm:$0xff] }
 0x14b   : > { %v1748_v61 = vpop.permute.xlu0 %1747  ;;  %v1750_v62 = vpop.permute.xlu1 %1749 }
 0x14c   : > { %v2159_v8 = vsel %vm2148_vm10, %v2126_v6, %v1748_v61  ;;  %v2160_v17 = vsel %vm2148_vm10, %v2127_v12, %v1750_v62  ;;  %v14392_v6 = vld [vmem:[#allocation2 + $0x121] sm:$0xff] }
 0x14d   : > { %1379 = vrot.lane.b32.xlu0 %v14256_v45, %s13425_s13  ;;  %1381 = vrot.lane.b32.xlu1 %v14258_v39, %s13425_s13 }
 0x14f   : > { %v1876_v9 = vpop.permute.xlu0 %1875  ;;  %v984_v7 = vpop.permute.xlu1 %983 }
 0x150   : > { %v2191_v10 = vsel %vm457_vm3, %v2159_v8, %v1876_v9  ;;  %v1963_v25 = vsel %vm414_vm0, %v13813_v18, %v984_v7  ;;  %v603_v18 = vld [vmem:[%s13602_s27 + $0xf0] sm:$0xff]  ;;  %v14400_v7 = vld [vmem:[#allocation2 + $0x122] sm:$0xff]  ;;  %s13435_s27 = smov 125  }
 0x151   : > { %1507 = vrot.lane.b32.xlu0 %v14264_v49, %s13426_s14  ;;  %1509 = vrot.lane.b32.xlu1 %v14270_v50, %s13426_s14  ;;  %635 = vst.msk [vmem:[#allocation2 + $0x181] sm:$0xff] %vm414_vm0, %v603_v18 }
 0x152   : > { %11522 = vmatprep.mubr.msk.f32.mxu0 %vm2222_vm11, %v2191_v10 }
 0x153   : > { %v1878_v13 = vpop.permute.xlu0 %1877  ;;  %v986_v22 = vpop.permute.xlu1 %985 }
 0x154   : > { %v2192_v24 = vsel %vm457_vm3, %v2160_v17, %v1878_v13 }
 0x155   : > { %1635 = vrot.lane.b32.xlu0 %v14313_v14, %s13427_s19  ;;  %1637 = vrot.lane.b32.xlu1 %v14315_v46, %s13427_s19 }
 0x156   : > { %11523 = vmatmul.mubr.msk.f32.gmra.mrb[10].mxu0 %vm2222_vm11, %v2192_v24 }
 0x157   : > { %v1112_v28 = vpop.permute.xlu0 %1111  ;;  %v1114_v30 = vpop.permute.xlu1 %1113 }
 0x159   : > { %1763 = vrot.lane.b32.xlu0 %v14324_v27, %s13428_s15  ;;  %1765 = vrot.lane.b32.xlu1 %v14326_v47, %s13428_s15 }
 0x15b   : > { %v1240_v31 = vpop.permute.xlu0 %1239  ;;  %v1242_v33 = vpop.permute.xlu1 %1241 }
 0x15d   : > { %1891 = vrot.lane.b32.xlu0 %v14332_v32, %s13429_s18  ;;  %999 = vrot.lane.b32.xlu1 %v14256_v45, %s13423_s29 }
 0x15f   : > { %v1368_v36 = vpop.permute.xlu0 %1367  ;;  %v1370_v41 = vpop.permute.xlu1 %1369 }
 0x161   : > { %1893 = vrot.lane.b32.xlu0 %v14338_v34, %s13429_s18  ;;  %1001 = vrot.lane.b32.xlu1 %v14258_v39, %s13423_s29  ;;  %v1996_v39 = vsel %vm1983_vm5, %v1963_v25, %v1112_v28 }
 0x162   : > { %v2029_v48 = vsel %vm2016_vm6, %v1996_v39, %v1240_v31 }
 0x163   : > { %v1496_v38 = vpop.permute.xlu0 %1495  ;;  %v1498_v42 = vpop.permute.xlu1 %1497  ;;  %v2062_v35 = vsel %vm2049_vm7, %v2029_v48, %v1368_v36 }
 0x164   : > { %v2095_v51 = vsel %vm2082_vm8, %v2062_v35, %v1496_v38 }
 0x165   : > { %1127 = vrot.lane.b32.xlu0 %v14264_v49, %s13422_s28  ;;  %1129 = vrot.lane.b32.xlu1 %v14270_v50, %s13422_s28  ;;  %v1964_v50 = vsel %vm414_vm0, %v13815_v19, %v986_v22 }
 0x166   : > { %v1997_v23 = vsel %vm1983_vm5, %v1964_v50, %v1114_v30 }
 0x167   : > { %v1624_v43 = vpop.permute.xlu0 %1623  ;;  %v1626_v45 = vpop.permute.xlu1 %1625  ;;  %v2030_v19 = vsel %vm2016_vm6, %v1997_v23, %v1242_v33  ;;  %v14455_v23 = vld [vmem:[#allocation2 + $0x141] sm:$0xff] }
 0x168   : > { %v2128_v56 = vsel %vm2115_vm9, %v2095_v51, %v1624_v43  ;;  %v2063_v29 = vsel %vm2049_vm7, %v2030_v19, %v1370_v41 }
 0x169   : > { %1255 = vrot.lane.b32.xlu0 %v14313_v14, %s13424_s30  ;;  %1257 = vrot.lane.b32.xlu1 %v14315_v46, %s13424_s30  ;;  %v2096_v61 = vsel %vm2082_vm8, %v2063_v29, %v1498_v42 }
 0x16a   : > { %v2129_v62 = vsel %vm2115_vm9, %v2096_v61, %v1626_v45 }
 0x16b   : > { %v1752_v49 = vpop.permute.xlu0 %1751  ;;  %v1754_v26 = vpop.permute.xlu1 %1753 }
 0x16c   : > { %v2161_v57 = vsel %vm2148_vm10, %v2128_v56, %v1752_v49  ;;  %v2162_v2 = vsel %vm2148_vm10, %v2129_v62, %v1754_v26  ;;  %v14445_v49 = vld [vmem:[#allocation2 + $0x138] sm:$0xff]  ;;  %v854_v26 = vld [vmem:[#allocation2 + $0x140] sm:$0xff] }
 0x16d   : > { %1383 = vrot.lane.b32.xlu0 %v14324_v27, %s13425_s13  ;;  %1385 = vrot.lane.b32.xlu1 %v14326_v47, %s13425_s13 }
 0x16f   : > { %v1880_v58 = vpop.permute.xlu0 %1879  ;;  %v988_v60 = vpop.permute.xlu1 %987 }
 0x170   : > { %v2193_v59 = vsel %vm457_vm3, %v2161_v57, %v1880_v58  ;;  %v1965_v28 = vsel %vm414_vm0, %v13903_v20, %v988_v60  ;;  %v14460_v57 = vld [vmem:[%s19109_s11] ss:$0 sm:$0xff] }
 0x171   : > { %1511 = vrot.lane.b32.xlu0 %v14332_v32, %s13426_s14  ;;  %1513 = vrot.lane.b32.xlu1 %v14338_v34, %s13426_s14 }
 0x172   : > { %11525 = vmatprep.mubr.msk.f32.mxu0 %vm2222_vm11, %v2193_v59  ;;  %v14467_v59 = vld [vmem:[#allocation2 + $0x13a] sm:$0xff] }
 0x173   : > { %v1882_v54 = vpop.permute.xlu0 %1881  ;;  %v990_v4 = vpop.permute.xlu1 %989 }
 0x174   : > { %v2194_v5 = vsel %vm457_vm3, %v2162_v2, %v1882_v54 }
 0x175   : > { %1639 = vrot.lane.b32.xlu0 %v14381_v63, %s13427_s19  ;;  %1641 = vrot.lane.b32.xlu1 %v14383_v1, %s13427_s19 }
 0x176   : > { %11526 = vmatmul.mubr.msk.f32.gmra.mrb[12].mxu0 %vm2222_vm11, %v2194_v5  ;;  %v14475_v5 = vld [vmem:[#allocation2 + $0x142] sm:$0xff] }
 0x177   : > { %v1116_v8 = vpop.permute.xlu0 %1115  ;;  %v1118_v9 = vpop.permute.xlu1 %1117 }
 0x179   : > { %1767 = vrot.lane.b32.xlu0 %v14392_v6, %s13428_s15  ;;  %1769 = vrot.lane.b32.xlu1 %v14394_v55, %s13428_s15 }
 0x17b   : > { %v1244_v15 = vpop.permute.xlu0 %1243  ;;  %v1246_v10 = vpop.permute.xlu1 %1245 }
 0x17d   : > { %1895 = vrot.lane.b32.xlu0 %v14400_v7, %s13429_s18  ;;  %1003 = vrot.lane.b32.xlu1 %v14324_v27, %s13423_s29 }
 0x17f   : > { %v1372_v12 = vpop.permute.xlu0 %1371  ;;  %v1374_v17 = vpop.permute.xlu1 %1373 }
 0x181   : > { %1897 = vrot.lane.b32.xlu0 %v14406_v11, %s13429_s18  ;;  %1005 = vrot.lane.b32.xlu1 %v14326_v47, %s13423_s29  ;;  %v1998_v47 = vsel %vm1983_vm5, %v1965_v28, %v1116_v8 }
 0x182   : > { %v2031_v30 = vsel %vm2016_vm6, %v1998_v47, %v1244_v15 }
 0x183   : > { %v1500_v13 = vpop.permute.xlu0 %1499  ;;  %v1502_v22 = vpop.permute.xlu1 %1501  ;;  %v2064_v33 = vsel %vm2049_vm7, %v2031_v30, %v1372_v12 }
 0x184   : > { %v2097_v36 = vsel %vm2082_vm8, %v2064_v33, %v1500_v13 }
 0x185   : > { %1131 = vrot.lane.b32.xlu0 %v14332_v32, %s13422_s28  ;;  %1133 = vrot.lane.b32.xlu1 %v14338_v34, %s13422_s28  ;;  %v1966_v34 = vsel %vm414_vm0, %v13905_v21, %v990_v4 }
 0x186   : > { %v1999_v20 = vsel %vm1983_vm5, %v1966_v34, %v1118_v9 }
 0x187   : > { %v1628_v24 = vpop.permute.xlu0 %1627  ;;  %v1630_v27 = vpop.permute.xlu1 %1629  ;;  %v2032_v38 = vsel %vm2016_vm6, %v1999_v20, %v1246_v10 }
 0x188   : > { %v2130_v41 = vsel %vm2115_vm9, %v2097_v36, %v1628_v24  ;;  %v2065_v21 = vsel %vm2049_vm7, %v2032_v38, %v1374_v17 }
 0x189   : > { %1259 = vrot.lane.b32.xlu0 %v14381_v63, %s13424_s30  ;;  %1261 = vrot.lane.b32.xlu1 %v14383_v1, %s13424_s30  ;;  %v2098_v39 = vsel %vm2082_vm8, %v2065_v21, %v1502_v22  ;;  %v855_v21 = vld [vmem:[#allocation2 + $0x150] sm:$0xff] }
 0x18a   : > { %v2131_v48 = vsel %vm2115_vm9, %v2098_v39, %v1630_v27 }
 0x18b   : > { %v1756_v31 = vpop.permute.xlu0 %1755  ;;  %v1758_v32 = vpop.permute.xlu1 %1757 }
 0x18c   : > { %v2163_v42 = vsel %vm2148_vm10, %v2130_v41, %v1756_v31  ;;  %v2164_v35 = vsel %vm2148_vm10, %v2131_v48, %v1758_v32 }
 0x18d   : > { %1387 = vrot.lane.b32.xlu0 %v14392_v6, %s13425_s13  ;;  %1389 = vrot.lane.b32.xlu1 %v14394_v55, %s13425_s13 }
 0x18f   : > { %v1884_v43 = vpop.permute.xlu0 %1883  ;;  %v992_v45 = vpop.permute.xlu1 %991 }
 0x190   : > { %v2195_v25 = vsel %vm457_vm3, %v2163_v42, %v1884_v43  ;;  %v1967_v17 = vsel %vm414_vm0, %v13971_v3, %v992_v45 }
 0x191   : > { %1515 = vrot.lane.b32.xlu0 %v14400_v7, %s13426_s14  ;;  %1517 = vrot.lane.b32.xlu1 %v14406_v11, %s13426_s14 }
 0x192   : > { %11528 = vmatprep.mubr.msk.f32.mxu0 %vm2222_vm11, %v2195_v25  ;;  %v856_v25 = vld [vmem:[#allocation2 + $0x158] sm:$0xff] }
 0x193   : > { %v1886_v50 = vpop.permute.xlu0 %1885  ;;  %v994_v51 = vpop.permute.xlu1 %993 }
 0x194   : > { %v2196_v18 = vsel %vm457_vm3, %v2164_v35, %v1886_v50  ;;  %v1968_v30 = vsel %vm414_vm0, %v13973_v16, %v994_v51  ;;  %v14523_v50 = vld [vmem:[#allocation2 + $0x151] sm:$0xff]  ;;  %v14525_v51 = vld [vmem:[#allocation2 + $0x159] sm:$0xff] }
 0x195   : > { %1643 = vrot.lane.b32.xlu0 %v14445_v49, %s13427_s19  ;;  %1645 = vrot.lane.b32.xlu1 %v854_v26, %s13427_s19 }
 0x196   : > { %11529 = vmatmul.mubr.msk.f32.gmra.mrb[14].mxu0 %vm2222_vm11, %v2196_v18 }
 0x197   : > { %v1120_v56 = vpop.permute.xlu0 %1119  ;;  %v1122_v19 = vpop.permute.xlu1 %1121 }
 0x198   : > { %v2001_v33 = vsel %vm1983_vm5, %v1968_v30, %v1122_v19  ;;  %v14531_v19 = vld [vmem:[#allocation2 + $0x152] sm:$0xff] }
 0x199   : > { %v11509_v58 = vpop.f32.mrb[0].mxu0  ;;  %1771 = vrot.lane.b32.xlu0 %v14453_v53, %s13428_s15  ;;  %1773 = vrot.lane.b32.xlu1 %v14455_v23, %s13428_s15 }
 0x19a   : > { %v2395_v60 = vadd.f32 %v11509_v58, %v14460_v57  ;;  %v2389_v29 = vpop.f32.mrb[1].mxu0 }
 0x19b   : > { %v2390_v61 = vadd.f32 %v14460_v57, %v2389_v29  ;;  %v1248_v62 = vpop.permute.xlu0 %1247  ;;  %v1250_v2 = vpop.permute.xlu1 %1249  ;;  %v14537_v29 = vld [vmem:[#allocation2 + $0x15a] sm:$0xff] }
 0x19c   : > { %v2549_v54 = vmax.f32 %v2395_v60, 0.0  ;;  %v2034_v36 = vsel %vm2016_vm6, %v2001_v33, %v1250_v2  ;;  %v858_v33 = vld [vmem:[#allocation2 + $0x170] sm:$0xff] }
 0x19d   : > { %v2548_v4 = vmax.f32 %v2390_v61, 0.0  ;;  %1899 = vrot.lane.b32.xlu0 %v14467_v59, %s13429_s18  ;;  %1007 = vrot.lane.b32.xlu1 %v14392_v6, %s13423_s29 }
 0x19e   : > { %2581 = vst.msk [vmem:[#allocation3 + $0x21] sm:$0xff] %vm457_vm3, %v2549_v54 }
 0x19f   : > { %2580 = vst.msk [vmem:[#allocation3 + $0x19] sm:$0xff] %vm457_vm3, %v2548_v4  ;;  %v1376_v8 = vpop.permute.xlu0 %1375  ;;  %v1378_v9 = vpop.permute.xlu1 %1377 }
 0x1a0   : > { %v2067_v38 = vsel %vm2049_vm7, %v2034_v36, %v1378_v9 }
 0x1a1   : > { %1901 = vrot.lane.b32.xlu0 %v14475_v5, %s13429_s18  ;;  %1009 = vrot.lane.b32.xlu1 %v14394_v55, %s13423_s29  ;;  %v2000_v55 = vsel %vm1983_vm5, %v1967_v17, %v1120_v56 }
 0x1a3   : > { %v1504_v15 = vpop.permute.xlu0 %1503  ;;  %v1506_v10 = vpop.permute.xlu1 %1505 }
 0x1a4   : > { %v2100_v43 = vsel %vm2082_vm8, %v2067_v38, %v1506_v10  ;;  %v14587_v38 = vld [vmem:[#allocation2 + $0x171] sm:$0xff] }
 0x1a5   : > { %1135 = vrot.lane.b32.xlu0 %v14400_v7, %s13422_s28  ;;  %1137 = vrot.lane.b32.xlu1 %v14406_v11, %s13422_s28  ;;  %v2033_v7 = vsel %vm2016_vm6, %v2000_v55, %v1248_v62 }
 0x1a6   : > { %v2066_v47 = vsel %vm2049_vm7, %v2033_v7, %v1376_v8 }
 0x1a7   : > { %v1632_v6 = vpop.permute.xlu0 %1631  ;;  %v1634_v12 = vpop.permute.xlu1 %1633  ;;  %v2099_v31 = vsel %vm2082_vm8, %v2066_v47, %v1504_v15 }
 0x1a8   : > { %v2132_v34 = vsel %vm2115_vm9, %v2099_v31, %v1632_v6  ;;  %v2133_v45 = vsel %vm2115_vm9, %v2100_v43, %v1634_v12 }
 0x1a9   : > { %v11512_v13 = vpop.f32.mrb[2].mxu0  ;;  %1263 = vrot.lane.b32.xlu0 %v14445_v49, %s13424_s30  ;;  %1265 = vrot.lane.b32.xlu1 %v854_v26, %s13424_s30 }
 0x1aa   : > { %v2405_v22 = vadd.f32 %v11512_v13, %v14460_v57  ;;  %v2399_v24 = vpop.f32.mrb[3].mxu0 }
 0x1ab   : > { %v2400_v11 = vadd.f32 %v14460_v57, %v2399_v24  ;;  %v1760_v27 = vpop.permute.xlu0 %1759  ;;  %v1762_v28 = vpop.permute.xlu1 %1761 }
 0x1ac   : > { %v2551_v3 = vmax.f32 %v2405_v22, 0.0  ;;  %v2165_v16 = vsel %vm2148_vm10, %v2132_v34, %v1760_v27  ;;  %v2166_v39 = vsel %vm2148_vm10, %v2133_v45, %v1762_v28  ;;  %v14595_v45 = vld [vmem:[#allocation2 + $0x16a] sm:$0xff] }
 0x1ad   : > { %v2550_v32 = vmax.f32 %v2400_v11, 0.0  ;;  %1391 = vrot.lane.b32.xlu0 %v14453_v53, %s13425_s13  ;;  %1393 = vrot.lane.b32.xlu1 %v14455_v23, %s13425_s13 }
 0x1ae   : > { %2583 = vst.msk [vmem:[#allocation3 + $0x39] sm:$0xff] %vm457_vm3, %v2551_v3 }
 0x1af   : > { %2582 = vst.msk [vmem:[#allocation3 + $0x31] sm:$0xff] %vm457_vm3, %v2550_v32  ;;  %v1888_v20 = vpop.permute.xlu0 %1887  ;;  %v996_v41 = vpop.permute.xlu1 %995  ;;  %v857_v32 = vld [vmem:[#allocation2 + $0x168] sm:$0xff] }
 0x1b0   : > { %v2197_v42 = vsel %vm457_vm3, %v2165_v16, %v1888_v20  ;;  %v1969_v8 = vsel %vm414_vm0, %v14041_v44, %v996_v41  ;;  %v14585_v41 = vld [vmem:[#allocation2 + $0x169] sm:$0xff] }
 0x1b1   : > { %1519 = vrot.lane.b32.xlu0 %v14467_v59, %s13426_s14  ;;  %1521 = vrot.lane.b32.xlu1 %v14475_v5, %s13426_s14 }
 0x1b2   : > { %11531 = vmatprep.mubr.msk.f32.mxu0 %vm2222_vm11, %v2197_v42 }
 0x1b3   : > { %v1890_v48 = vpop.permute.xlu0 %1889  ;;  %v998_v26 = vpop.permute.xlu1 %997 }
 0x1b4   : > { %v2198_v35 = vsel %vm457_vm3, %v2166_v39, %v1890_v48  ;;  %v1970_v44 = vsel %vm414_vm0, %v14043_v52, %v998_v26  ;;  %v3863_v39 = vld [vmem:[%s19100_s2] sm:$0xff]  ;;  %v3864_v48 = vld [vmem:[%s19100_s2 + $0x8] sm:$0xff] }
 0x1b5   : > { %1647 = vrot.lane.b32.xlu0 %v855_v21, %s13427_s19  ;;  %1649 = vrot.lane.b32.xlu1 %v856_v25, %s13427_s19  ;;  %v11785_v26 = vpack.c.bf16 %v3864_v48, %v3863_v39 }
 0x1b6   : > { %11532 = vmatmul.mubr.msk.f32.gmra.mrb[16].mxu0 %vm2222_vm11, %v2198_v35  ;;  %v14607_v35 = vld [vmem:[#allocation2 + $0x172] sm:$0xff] }
 0x1b7   : > { %v1124_v18 = vpop.permute.xlu0 %1123  ;;  %v1126_v56 = vpop.permute.xlu1 %1125 }
 0x1b8   : > { %v2003_v24 = vsel %vm1983_vm5, %v1970_v44, %v1126_v56 }
 0x1b9   : > { %1775 = vrot.lane.b32.xlu0 %v14523_v50, %s13428_s15  ;;  %1777 = vrot.lane.b32.xlu1 %v14525_v51, %s13428_s15 }
 0x1bb   : > { %v1252_v58 = vpop.permute.xlu0 %1251  ;;  %v1254_v60 = vpop.permute.xlu1 %1253 }
 0x1bc   : > { %v2036_v11 = vsel %vm2016_vm6, %v2003_v24, %v1254_v60  ;;  %v3865_v60 = vld [vmem:[%s19100_s2 + $0x10] sm:$0xff] }
 0x1bd   : > { %1903 = vrot.lane.b32.xlu0 %v14531_v19, %s13429_s18  ;;  %1011 = vrot.lane.b32.xlu1 %v14453_v53, %s13423_s29 }
 0x1bf   : > { %v1380_v61 = vpop.permute.xlu0 %1379  ;;  %v1382_v62 = vpop.permute.xlu1 %1381 }
 0x1c0   : > { %v2069_v47 = vsel %vm2049_vm7, %v2036_v11, %v1382_v62 }
 0x1c1   : > { %1905 = vrot.lane.b32.xlu0 %v14537_v29, %s13429_s18  ;;  %1013 = vrot.lane.b32.xlu1 %v14455_v23, %s13423_s29  ;;  %v2002_v23 = vsel %vm1983_vm5, %v1969_v8, %v1124_v18  ;;  %v13430_v18 = vmov 0.0|0.0  }
 0x1c2   : > { %11784 = vmatprep.subr.bf16.mxu1 %v13430_v18 }
 0x1c3   : > { %v1508_v2 = vpop.permute.xlu0 %1507  ;;  %v1510_v54 = vpop.permute.xlu1 %1509  ;;  %11786 = vmatpush1.bf16.msra.mxu1 %v11785_v26  ;;  %v3875_v26 = vld [vmem:[%s19100_s2 + $0x60] sm:$0xff] }
 0x1c4   : > { %v2102_v30 = vsel %vm2082_vm8, %v2069_v47, %v1510_v54  ;;  %11787 = vmatprep.subr.bf16.mxu1 %v13430_v18  ;;  %v3867_v54 = vld [vmem:[%s19100_s2 + $0x20] sm:$0xff] }
 0x1c5   : > { %1139 = vrot.lane.b32.xlu0 %v14467_v59, %s13422_s28  ;;  %1141 = vrot.lane.b32.xlu1 %v14475_v5, %s13422_s28  ;;  %v2035_v59 = vsel %vm2016_vm6, %v2002_v23, %v1252_v58  ;;  %v3870_v23 = vld [vmem:[%s19100_s2 + $0x38] sm:$0xff] }
 0x1c6   : > { %v2068_v17 = vsel %vm2049_vm7, %v2035_v59, %v1380_v61  ;;  %v3866_v61 = vld [vmem:[%s19100_s2 + $0x18] sm:$0xff] }
 0x1c7   : > { %v1636_v4 = vpop.permute.xlu0 %1635  ;;  %v1638_v53 = vpop.permute.xlu1 %1637  ;;  %v2101_v55 = vsel %vm2082_vm8, %v2068_v17, %v1508_v2 }
 0x1c8   : > { %v2134_v7 = vsel %vm2115_vm9, %v2101_v55, %v1636_v4  ;;  %v2135_v31 = vsel %vm2115_vm9, %v2102_v30, %v1638_v53  ;;  %v3868_v4 = vld [vmem:[%s19100_s2 + $0x28] sm:$0xff]  ;;  %v3871_v55 = vld [vmem:[%s19100_s2 + $0x40] sm:$0xff] }
 0x1c9   : > { %v11515_v9 = vpop.f32.mrb[4].mxu0  ;;  %1267 = vrot.lane.b32.xlu0 %v855_v21, %s13424_s30  ;;  %1269 = vrot.lane.b32.xlu1 %v856_v25, %s13424_s30 }
 0x1ca   : > { %v2415_v15 = vadd.f32 %v11515_v9, %v14460_v57  ;;  %v2409_v10 = vpop.f32.mrb[5].mxu0  ;;  %v3869_v9 = vld [vmem:[%s19100_s2 + $0x30] sm:$0xff] }
 0x1cb   : > { %v2410_v6 = vadd.f32 %v14460_v57, %v2409_v10  ;;  %v1764_v5 = vpop.permute.xlu0 %1763  ;;  %v1766_v12 = vpop.permute.xlu1 %1765 }
 0x1cc   : > { %v2553_v13 = vmax.f32 %v2415_v15, 0.0  ;;  %v2167_v52 = vsel %vm2148_vm10, %v2134_v7, %v1764_v5  ;;  %v2168_v34 = vsel %vm2148_vm10, %v2135_v31, %v1766_v12 }
 0x1cd   : > { %v2552_v22 = vmax.f32 %v2410_v6, 0.0  ;;  %1395 = vrot.lane.b32.xlu0 %v14523_v50, %s13425_s13  ;;  %1397 = vrot.lane.b32.xlu1 %v14525_v51, %s13425_s13 }
 0x1ce   : > { %2585 = vst.msk [vmem:[#allocation3 + $0x51] sm:$0xff] %vm457_vm3, %v2553_v13 }
 0x1cf   : > { %2584 = vst.msk [vmem:[#allocation3 + $0x49] sm:$0xff] %vm457_vm3, %v2552_v22  ;;  %v1892_v27 = vpop.permute.xlu0 %1891  ;;  %v1000_v28 = vpop.permute.xlu1 %999  ;;  %v3872_v22 = vld [vmem:[%s19100_s2 + $0x48] sm:$0xff] }
 0x1d0   : > { %v2199_v3 = vsel %vm457_vm3, %v2167_v52, %v1892_v27  ;;  %v11797_v52 = vpack.c.bf16 %v3872_v22, %v3871_v55  ;;  %v3885_v55 = vld [vmem:[%s19100_s2 + $0xb0] sm:$0xff]  ;;  %v3886_v22 = vld [vmem:[%s19100_s2 + $0xb8] sm:$0xff] }
 0x1d1   : > { %1523 = vrot.lane.b32.xlu0 %v14531_v19, %s13426_s14  ;;  %1525 = vrot.lane.b32.xlu1 %v14537_v29, %s13426_s14 }
 0x1d2   : > { %11534 = vmatprep.mubr.msk.f32.mxu0 %vm2222_vm11, %v2199_v3 }
 0x1d3   : > { %v1894_v36 = vpop.permute.xlu0 %1893  ;;  %v14579_v16 = vpop.permute.xlu1 %1001 }
 0x1d4   : > { %v2200_v20 = vsel %vm457_vm3, %v2168_v34, %v1894_v36  ;;  %v1972_v24 = vsel %vm414_vm0, %v14247_v40, %v14579_v16  ;;  %v3874_v34 = vld [vmem:[%s19100_s2 + $0x58] sm:$0xff] }
 0x1d5   : > { %1651 = vrot.lane.b32.xlu0 %v857_v32, %s13427_s19  ;;  %1653 = vrot.lane.b32.xlu1 %v858_v33, %s13427_s19 }
 0x1d6   : > { %11535 = vmatmul.mubr.msk.f32.gmra.mrb[18].mxu0 %vm2222_vm11, %v2200_v20 }
 0x1d7   : > { %v1128_v42 = vpop.permute.xlu0 %1127  ;;  %v14589_v43 = vpop.permute.xlu1 %1129 }
 0x1d8   : > { %v2005_v27 = vsel %vm1983_vm5, %v1972_v24, %v14589_v43  ;;  %v860_v43 = vld [vmem:[#allocation2 + $0x188] sm:$0xff] }
 0x1d9   : > { %1779 = vrot.lane.b32.xlu0 %v14585_v41, %s13428_s15  ;;  %1781 = vrot.lane.b32.xlu1 %v14587_v38, %s13428_s15 }
 0x1db   : > { %v1256_v21 = vpop.permute.xlu0 %1255  ;;  %v1258_v25 = vpop.permute.xlu1 %1257 }
 0x1dc   : > { %v2038_v47 = vsel %vm2016_vm6, %v2005_v27, %v1258_v25 }
 0x1dd   : > { %1907 = vrot.lane.b32.xlu0 %v14595_v45, %s13429_s18  ;;  %1015 = vrot.lane.b32.xlu1 %v14523_v50, %s13423_s29  ;;  %v11788_v50 = vpack.c.bf16 %v3866_v61, %v3865_v60  ;;  %v14702_v60 = vld [vmem:[#allocation2 + $0x181] sm:$0xff]  ;;  %v14704_v61 = vld [vmem:[#allocation2 + $0x189] sm:$0xff] }
 0x1df   : > { %v1384_v56 = vpop.permute.xlu0 %1383  ;;  %v1386_v58 = vpop.permute.xlu1 %1385  ;;  %11789 = vmatpush1.bf16.msra.mxu1 %v11788_v50 }
 0x1e0   : > { %11790 = vmatprep.subr.bf16.mxu1 %v13430_v18  ;;  %v2071_v31 = vsel %vm2049_vm7, %v2038_v47, %v1386_v58 }
 0x1e1   : > { %1909 = vrot.lane.b32.xlu0 %v14607_v35, %s13429_s18  ;;  %1017 = vrot.lane.b32.xlu1 %v14525_v51, %s13423_s29  ;;  %v11791_v51 = vpack.c.bf16 %v3868_v4, %v3867_v54  ;;  %v3878_v54 = vld [vmem:[%s19100_s2 + $0x78] sm:$0xff] }
 0x1e3   : > { %v1512_v62 = vpop.permute.xlu0 %1511  ;;  %v1514_v2 = vpop.permute.xlu1 %1513  ;;  %11792 = vmatpush1.bf16.msra.mxu1 %v11791_v51  ;;  %v14719_v51 = vld [vmem:[#allocation2 + $0x182] sm:$0xff] }
 0x1e4   : > { %11793 = vmatprep.subr.bf16.mxu1 %v13430_v18  ;;  %v2104_v36 = vsel %vm2082_vm8, %v2071_v31, %v1514_v2  ;;  %v3877_v2 = vld [vmem:[%s19100_s2 + $0x70] sm:$0xff]  ;;  %v3888_v31 = vld [vmem:[%s19100_s2 + $0xc8] sm:$0xff] }
 0x1e5   : > { %1143 = vrot.lane.b32.xlu0 %v14531_v19, %s13422_s28  ;;  %1145 = vrot.lane.b32.xlu1 %v14537_v29, %s13422_s28  ;;  %v1971_v19 = vsel %vm414_vm0, %v14245_v37, %v1000_v28  ;;  %v11794_v29 = vpack.c.bf16 %v3870_v23, %v3869_v9  ;;  %v11806_v4 = vpack.c.bf16 %v3878_v54, %v3877_v2  ;;  %v3879_v9 = vld [vmem:[%s19100_s2 + $0x80] sm:$0xff]  ;;  %v3880_v23 = vld [vmem:[%s19100_s2 + $0x88] sm:$0xff] }
 0x1e6   : > { %v2004_v10 = vsel %vm1983_vm5, %v1971_v19, %v1128_v42  ;;  %v859_v42 = vld [vmem:[#allocation2 + $0x180] sm:$0xff]  ;;  %v11809_v19 = vpack.c.bf16 %v3880_v23, %v3879_v9  ;;  %v3898_v2 = vld [vmem:[%s19100_s2 + $0x118] sm:$0xff] }
 0x1e7   : > { %v1640_v53 = vpop.permute.xlu0 %1639  ;;  %v1642_v8 = vpop.permute.xlu1 %1641  ;;  %v2037_v5 = vsel %vm2016_vm6, %v2004_v10, %v1256_v21  ;;  %11795 = vmatpush1.bf16.msra.mxu1 %v11794_v29 }
 0x1e8   : > { %v2070_v37 = vsel %vm2049_vm7, %v2037_v5, %v1384_v56  ;;  %11796 = vmatprep.subr.bf16.mxu1 %v13430_v18  ;;  %v2137_v20 = vsel %vm2115_vm9, %v2104_v36, %v1642_v8  ;;  %v3876_v56 = vld [vmem:[%s19100_s2 + $0x68] sm:$0xff] }
 0x1e9   : > { %v11518_v15 = vpop.f32.mrb[6].mxu0  ;;  %1271 = vrot.lane.b32.xlu0 %v857_v32, %s13424_s30  ;;  %1273 = vrot.lane.b32.xlu1 %v858_v33, %s13424_s30  ;;  %v2103_v7 = vsel %vm2082_vm8, %v2070_v37, %v1512_v62  ;;  %v3873_v33 = vld [vmem:[%s19100_s2 + $0x50] sm:$0xff]  ;;  %v11803_v58 = vpack.c.bf16 %v3876_v56, %v3875_v26 }
 0x1ea   : > { %v2425_v59 = vadd.f32 %v11518_v15, %v14460_v57  ;;  %v2419_v6 = vpop.f32.mrb[7].mxu0  ;;  %v2136_v28 = vsel %vm2115_vm9, %v2103_v7, %v1640_v53  ;;  %v11800_v16 = vpack.c.bf16 %v3874_v34, %v3873_v33  ;;  %v14734_v15 = vld [vmem:[#allocation2 + $0x18a] sm:$0xff] }
 0x1eb   : > { %v2420_v12 = vadd.f32 %v14460_v57, %v2419_v6  ;;  %v1768_v17 = vpop.permute.xlu0 %1767  ;;  %v1770_v13 = vpop.permute.xlu1 %1769  ;;  %11798 = vmatpush1.bf16.msra.mxu1 %v11797_v52  ;;  %v3882_v6 = vld [vmem:[%s19100_s2 + $0x98] sm:$0xff] }
 0x1ec   : > { %v2555_v44 = vmax.f32 %v2425_v59, 0.0  ;;  %v2169_v40 = vsel %vm2148_vm10, %v2136_v28, %v1768_v17  ;;  %11799 = vmatprep.subr.bf16.mxu1 %v13430_v18  ;;  %v2170_v21 = vsel %vm2148_vm10, %v2137_v20, %v1770_v13  ;;  %v3881_v59 = vld [vmem:[%s19100_s2 + $0x90] sm:$0xff]  ;;  %v3883_v17 = vld [vmem:[%s19100_s2 + $0xa0] sm:$0xff]  ;;  %v3884_v13 = vld [vmem:[%s19100_s2 + $0xa8] sm:$0xff] }
 0x1ed   : > { %v2554_v11 = vmax.f32 %v2420_v12, 0.0  ;;  %1399 = vrot.lane.b32.xlu0 %v14585_v41, %s13425_s13  ;;  %1401 = vrot.lane.b32.xlu1 %v14587_v38, %s13425_s13  ;;  %v3896_v20 = vld [vmem:[%s19100_s2 + $0x108] sm:$0xff] }
 0x1ee   : > { %2587 = vst.msk [vmem:[#allocation3 + $0x69] sm:$0xff] %vm457_vm3, %v2555_v44 }
 0x1ef   : > { %2586 = vst.msk [vmem:[#allocation3 + $0x61] sm:$0xff] %vm457_vm3, %v2554_v11  ;;  %v1896_v3 = vpop.permute.xlu0 %1895  ;;  %v14670_v30 = vpop.permute.xlu1 %1003  ;;  %11801 = vmatpush1.bf16.msra.mxu1 %v11800_v16  ;;  %v3895_v16 = vld [vmem:[%s19100_s2 + $0x100] sm:$0xff] }
 0x1f0   : > { %v2201_v32 = vsel %vm457_vm3, %v2169_v40, %v1896_v3  ;;  %11802 = vmatprep.subr.bf16.mxu1 %v13430_v18 }
 0x1f1   : > { %1527 = vrot.lane.b32.xlu0 %v14595_v45, %s13426_s14  ;;  %1529 = vrot.lane.b32.xlu1 %v14607_v35, %s13426_s14 }
 0x1f2   : > { %11537 = vmatprep.mubr.msk.f32.mxu0 %vm2222_vm11, %v2201_v32 }
 0x1f3   : > { %v1898_v25 = vpop.permute.xlu0 %1897  ;;  %v14689_v39 = vpop.permute.xlu1 %1005  ;;  %11804 = vmatpush1.bf16.msra.mxu1 %v11803_v58  ;;  %v3889_v58 = vld [vmem:[%s19100_s2 + $0xd0] sm:$0xff] }
 0x1f4   : > { %v2202_v48 = vsel %vm457_vm3, %v2170_v21, %v1898_v25  ;;  %11805 = vmatprep.subr.bf16.mxu1 %v13430_v18  ;;  %v1974_v32 = vsel %vm414_vm0, %v14315_v46, %v14689_v39 }
 0x1f5   : > { %1655 = vrot.lane.b32.xlu0 %v859_v42, %s13427_s19  ;;  %1657 = vrot.lane.b32.xlu1 %v860_v43, %s13427_s19 }
 0x1f6   : > { %11538 = vmatmul.mubr.msk.f32.gmra.mrb[20].mxu0 %vm2222_vm11, %v2202_v48 }
 0x1f7   : > { %v1132_v50 = vpop.permute.xlu0 %1131  ;;  %v14706_v62 = vpop.permute.xlu1 %1133  ;;  %11807 = vmatpush1.bf16.msra.mxu1 %v11806_v4  ;;  %v861_v4 = vld [vmem:[#allocation2 + $0x198] sm:$0xff] }
 0x1f8   : > { %11808 = vmatprep.subr.bf16.mxu1 %v13430_v18  ;;  %v2007_v46 = vsel %vm1983_vm5, %v1974_v32, %v14706_v62  ;;  %v3897_v62 = vld [vmem:[%s19100_s2 + $0x110] sm:$0xff]  ;;  %v2678_v32 = vld [vmem:[#allocation3 + $0xa] sm:$0xff] }
 0x1f9   : > { %1783 = vrot.lane.b32.xlu0 %v14702_v60, %s13428_s15  ;;  %1785 = vrot.lane.b32.xlu1 %v14704_v61, %s13428_s15 }
 0x1fb   : > { %v1260_v53 = vpop.permute.xlu0 %1259  ;;  %v14721_v8 = vpop.permute.xlu1 %1261  ;;  %11810 = vmatpush1.bf16.msra.mxu1 %v11809_v19 }
 0x1fc   : > { %11811 = vmatprep.subr.bf16.mxu1 %v13430_v18  ;;  %v2040_v21 = vsel %vm2016_vm6, %v2007_v46, %v14721_v8 }
 0x1fd   : > { %1911 = vrot.lane.b32.xlu0 %v14719_v51, %s13429_s18  ;;  %1019 = vrot.lane.b32.xlu1 %v14585_v41, %s13423_s29  ;;  %v11812_v41 = vpack.c.bf16 %v3882_v6, %v3881_v59  ;;  %v893_v59 = vld [vmem:[#allocation2 + $0x199] sm:$0xff]  ;;  %v894_v6 = vld [vmem:[#allocation2 + $0x1a1] sm:$0xff] }
 0x1ff   : > { %v1388_v29 = vpop.permute.xlu0 %1387  ;;  %v1390_v10 = vpop.permute.xlu1 %1389  ;;  %11813 = vmatpush1.bf16.msra.mxu1 %v11812_v41 }
 0x200   : > { %11814 = vmatprep.subr.bf16.mxu1 %v13430_v18  ;;  %v2073_v26 = vsel %vm2049_vm7, %v2040_v21, %v1390_v10  ;;  %v14882_v21 = vld [vmem:[#allocation3 + $0x32] sm:$0xff] }
 0x201   : > { %1913 = vrot.lane.b32.xlu0 %v14734_v15, %s13429_s18  ;;  %1021 = vrot.lane.b32.xlu1 %v14587_v38, %s13423_s29  ;;  %v11815_v38 = vpack.c.bf16 %v3884_v13, %v3883_v17  ;;  %v3894_v17 = vld [vmem:[%s19100_s2 + $0xf8] sm:$0xff] }
 0x203   : > { %v1516_v5 = vpop.permute.xlu0 %1515  ;;  %v1518_v12 = vpop.permute.xlu1 %1517  ;;  %11816 = vmatpush1.bf16.msra.mxu1 %v11815_v38  ;;  %v926_v38 = vld [vmem:[#allocation2 + $0x1a2] sm:$0xff] }
 0x204   : > { %11817 = vmatprep.subr.bf16.mxu1 %v13430_v18 }
 0x205   : > { %1147 = vrot.lane.b32.xlu0 %v14595_v45, %s13422_s28  ;;  %1149 = vrot.lane.b32.xlu1 %v14607_v35, %s13422_s28  ;;  %v1973_v45 = vsel %vm414_vm0, %v14313_v14, %v14670_v30  ;;  %v11818_v35 = vpack.c.bf16 %v3886_v22, %v3885_v55  ;;  %v3887_v30 = vld [vmem:[%s19100_s2 + $0xc0] sm:$0xff]  ;;  %v2645_v55 = vld [vmem:[#allocation3 + $0x1] sm:$0xff] }
 0x206   : > { %v2006_v7 = vsel %vm1983_vm5, %v1973_v45, %v1132_v50  ;;  %v11821_v36 = vpack.c.bf16 %v3888_v31, %v3887_v30  ;;  %v2773_v22 = vld [vmem:[#allocation3 + $0x1a] sm:$0xff]  ;;  %v2677_v45 = vld [vmem:[#allocation3 + $0x2] sm:$0xff] }
 0x207   : > { %v1644_v37 = vpop.permute.xlu0 %1643  ;;  %v1646_v44 = vpop.permute.xlu1 %1645  ;;  %v2039_v27 = vsel %vm2016_vm6, %v2006_v7, %v1260_v53  ;;  %11819 = vmatpush1.bf16.msra.mxu1 %v11818_v35  ;;  %v862_v53 = vld [vmem:[#allocation2 + $0x1a0] sm:$0xff] }
 0x208   : > { %v2072_v14 = vsel %vm2049_vm7, %v2039_v27, %v1388_v29  ;;  %11820 = vmatprep.subr.bf16.mxu1 %v13430_v18  ;;  %v3892_v29 = vld [vmem:[%s19100_s2 + $0xe8] sm:$0xff] }
 0x209   : > { %v11521_v24 = vpop.f32.mrb[8].mxu0  ;;  %1275 = vrot.lane.b32.xlu0 %v859_v42, %s13424_s30  ;;  %1277 = vrot.lane.b32.xlu1 %v860_v43, %s13424_s30  ;;  %v2105_v33 = vsel %vm2082_vm8, %v2072_v14, %v1516_v5  ;;  %v11832_v43 = vpack.c.bf16 %v3896_v20, %v3895_v16  ;;  %v14864_v27 = vld [vmem:[#allocation3 + $0x31] sm:$0xff] }
 0x20a   : > { %v2435_v11 = vadd.f32 %v11521_v24, %v14460_v57  ;;  %v2429_v52 = vpop.f32.mrb[9].mxu0  ;;  %v2138_v42 = vsel %vm2115_vm9, %v2105_v33, %v1644_v37  ;;  %v14859_v24 = vld [vmem:[#allocation3 + $0x30] sm:$0xff]  ;;  %v14872_v33 = vld [vmem:[#allocation3 + $0x38] sm:$0xff] }
 0x20b   : > { %v2430_v28 = vadd.f32 %v14460_v57, %v2429_v52  ;;  %v1772_v47 = vpop.permute.xlu0 %1771  ;;  %v1774_v40 = vpop.permute.xlu1 %1773  ;;  %11822 = vmatpush1.bf16.msra.mxu1 %v11821_v36  ;;  %11833 = vmatprep.subr.bf16.mxu0 %v11832_v43  ;;  %v12285_v52 = vpack.i.bf16 %v2677_v45, %v14859_v24  ;;  %v2710_v36 = vld [vmem:[#allocation3 + $0x20] sm:$0xff]  ;;  %v12300_v46 = vpack.i.bf16 %v2678_v32, %v14872_v33 }
 0x20c   : > { %v2557_v3 = vmax.f32 %v2435_v11, 0.0  ;;  %v2171_v25 = vsel %vm2148_vm10, %v2138_v42, %v1772_v47  ;;  %11823 = vmatprep.subr.bf16.mxu1 %v13430_v18  ;;  %11835 = vmatpush3.bf16.msra.mxu0 %v11832_v43  ;;  %v12280_v11 = vpack.i.bf16 %v2645_v55, %v2773_v22  ;;  %v14866_v47 = vld [vmem:[#allocation3 + $0x22] sm:$0xff] }
 0x20d   : > { %v2556_v34 = vmax.f32 %v2430_v28, 0.0  ;;  %1403 = vrot.lane.b32.xlu0 %v14702_v60, %s13425_s13  ;;  %1405 = vrot.lane.b32.xlu1 %v14704_v61, %s13425_s13  ;;  %v3890_v60 = vld [vmem:[%s19100_s2 + $0xd8] sm:$0xff]  ;;  %v2106_v61 = vsel %vm2082_vm8, %v2073_v26, %v1518_v12  ;;  %v3893_v12 = vld [vmem:[%s19100_s2 + $0xf0] sm:$0xff] }
 0x20e   : > { %2589 = vst.msk [vmem:[#allocation3 + $0x81] sm:$0xff] %vm457_vm3, %v2557_v3  ;;  %v11824_v50 = vpack.c.bf16 %v3890_v60, %v3889_v58  ;;  %v2139_v54 = vsel %vm2115_vm9, %v2106_v61, %v1646_v44  ;;  %v11830_v13 = vpack.c.bf16 %v3894_v17, %v3893_v12  ;;  %v2646_v28 = vld [vmem:[#allocation3 + $0x9] sm:$0xff]  ;;  %v14891_v60 = vld [vmem:[#allocation3 + $0x19] sm:$0xff] }
 0x20f   : > { %2588 = vst.msk [vmem:[#allocation3 + $0x79] sm:$0xff] %vm457_vm3, %v2556_v34  ;;  %v1900_v39 = vpop.permute.xlu0 %1899  ;;  %v14804_v48 = vpop.permute.xlu1 %1007  ;;  %v2172_v8 = vsel %vm2148_vm10, %v2139_v54, %v1774_v40  ;;  %v2709_v40 = vld [vmem:[#allocation3 + $0x18] sm:$0xff]  ;;  %v12295_v31 = vpack.i.bf16 %v2646_v28, %v14866_v47  ;;  %v14880_v43 = vld [vmem:[#allocation3 + $0x48] sm:$0xff] }
 0x210   : > { %v2203_v56 = vsel %vm457_vm3, %v2171_v25, %v1900_v39  ;;  %11825 = vmatpush1.bf16.msra.mxu1 %v11824_v50  ;;  %v12290_v30 = vpack.i.bf16 %v2709_v40, %v14864_v27  ;;  %v14874_v34 = vld [vmem:[#allocation3 + $0x39] sm:$0xff]  ;;  %v1975_v25 = vsel %vm414_vm0, %v14381_v63, %v14804_v48  ;;  %v12315_v63 = vpack.i.bf16 %v2773_v22, %v14880_v43 }
 0x211   : > { %1531 = vrot.lane.b32.xlu0 %v14719_v51, %s13426_s14  ;;  %1533 = vrot.lane.b32.xlu1 %v14734_v15, %s13426_s14  ;;  %v11836_v51 = vpack.c.bf16 %v3898_v2, %v3897_v62  ;;  %v3891_v15 = vld [vmem:[%s19100_s2 + $0xe0] sm:$0xff]  ;;  %v12305_v42 = vpack.i.bf16 %v2710_v36, %v14874_v34  ;;  %v12310_v48 = vpack.i.bf16 %v14891_v60, %v14882_v21  ;;  %s18865_s14 = scalar_lea.vmem %s19110_s12, %s10822_s24 }
 0x212   : > { %11540 = vmatprep.mubr.msk.f32.mxu0 %vm2222_vm11, %v2203_v56  ;;  %11826 = vmatprep.subr.bf16.mxu1 %v13430_v18  ;;  %v11827_v10 = vpack.c.bf16 %v3892_v29, %v3891_v15  ;;  %v14954_v36 = vld [vmem:[#allocation3 + $0x69] sm:$0xff] }
 0x213   : > { %v1902_v9 = vpop.permute.xlu0 %1901  ;;  %v14829_v23 = vpop.permute.xlu1 %1009  ;;  %11837 = vmatprep.subr.bf16.mxu0 %v11836_v51 }
 0x214   : > { %v2204_v19 = vsel %vm457_vm3, %v2172_v8, %v1902_v9  ;;  %11839 = vmatpush3.bf16.msra.mxu0 %v11836_v51  ;;  %11828 = vmatpush1.bf16.msra.mxu1 %v11827_v10  ;;  %v1976_v51 = vsel %vm414_vm0, %v14383_v1, %v14829_v23  ;;  %v14913_v10 = vld [vmem:[#allocation3 + $0x21] sm:$0xff] }
 0x215   : > { %1659 = vrot.lane.b32.xlu0 %v861_v4, %s13427_s19  ;;  %1661 = vrot.lane.b32.xlu1 %v862_v53, %s13427_s19  ;;  %s13431_s19 = smov 64   ;;  %v14899_v53 = vld [vmem:[#allocation3 + $0x3a] sm:$0xff] }
 0x216   : > { %11541 = vmatmul.mubr.msk.f32.gmra.mrb[22].mxu0 %vm2222_vm11, %v2204_v19  ;;  %11829 = vmatprep.subr.bf16.mxu1 %v13430_v18  ;;  %v925_v18 = vld [vmem:[#allocation2 + $0x19a] sm:$0xff] }
 0x217   : > { %v1136_v41 = vpop.permute.xlu0 %1135  ;;  %v14842_v5 = vpop.permute.xlu1 %1137  ;;  %v14907_v19 = vld [vmem:[#allocation3 + $0x49] sm:$0xff] }
 0x218   : > { %11831 = vmatpush1.bf16.msra.mxu1 %v11830_v13  ;;  %v2008_v26 = vsel %vm1983_vm5, %v1975_v25, %v1136_v41  ;;  %v2009_v15 = vsel %vm1983_vm5, %v1976_v51, %v14842_v5  ;;  %v12325_v41 = vpack.i.bf16 %v14913_v10, %v14899_v53  ;;  %v12320_v17 = vpack.i.bf16 %v14859_v24, %v14907_v19  ;;  %v2841_v13 = vld [vmem:[#allocation3 + $0x51] sm:$0xff]  ;;  %v2813_v51 = vld [vmem:[#allocation3 + $0x80] sm:$0xff] }
 0x219   : > { %1787 = vrot.lane.b32.xlu0 %v893_v59, %s13428_s15  ;;  %1789 = vrot.lane.b32.xlu1 %v894_v6, %s13428_s15  ;;  %s13432_s15 = smov 96   ;;  %v12335_v45 = vpack.i.bf16 %v14872_v33, %v2841_v13  ;;  %v14960_v25 = vld [vmem:[#allocation3 + $0x78] sm:$0xff] }
 0x21b   : > { %v1264_v37 = vpop.permute.xlu0 %1263  ;;  %v14857_v44 = vpop.permute.xlu1 %1265 }
 0x21c   : > { %v2041_v61 = vsel %vm2016_vm6, %v2008_v26, %v1264_v37  ;;  %v2042_v1 = vsel %vm2016_vm6, %v2009_v15, %v14857_v44 }
 0x21d   : > { %1915 = vrot.lane.b32.xlu0 %v925_v18, %s13429_s18  ;;  %1917 = vrot.lane.b32.xlu1 %v926_v38, %s13429_s18  ;;  %v2809_v38 = vld [vmem:[#allocation3 + $0x50] sm:$0xff] }
 0x21f   : > { %v1392_v35 = vpop.permute.xlu0 %1391  ;;  %v1394_v7 = vpop.permute.xlu1 %1393 }
 0x220   : > { %v2074_v54 = vsel %vm2049_vm7, %v2041_v61, %v1392_v35  ;;  %v2075_v5 = vsel %vm2049_vm7, %v2042_v1, %v1394_v7  ;;  %v12330_v35 = vpack.i.bf16 %v14866_v47, %v2809_v38  ;;  %v2810_v7 = vld [vmem:[#allocation3 + $0x60] sm:$0xff] }
 0x221   : > { %12281 = vrot.lane.b32.xlu0 %v12280_v11, %s13429_s18  ;;  %12286 = vrot.lane.b32.xlu1 %v12285_v52, %s13431_s19  ;;  %v14938_v11 = vld [vmem:[#allocation3 + $0x4a] sm:$0xff]  ;;  %v12345_v40 = vpack.i.bf16 %v14882_v21, %v2810_v7  ;;  %v14947_v47 = vld [vmem:[#allocation3 + $0x61] sm:$0xff]  ;;  %v14973_v61 = vld [vmem:[#allocation3 + $0x79] sm:$0xff] }
 0x222   : > { %v12350_v33 = vpack.i.bf16 %v14880_v43, %v14947_v47  ;;  %v12375_v26 = vpack.i.bf16 %v14938_v11, %v14960_v25 }
 0x223   : > { %v1520_v14 = vpop.permute.xlu0 %1519  ;;  %v1522_v3 = vpop.permute.xlu1 %1521 }
 0x224   : > { %v2107_v8 = vsel %vm2082_vm8, %v2074_v54, %v1520_v14  ;;  %v2108_v18 = vsel %vm2082_vm8, %v2075_v5, %v1522_v3  ;;  %v12340_v14 = vpack.i.bf16 %v14864_v27, %v14938_v11  ;;  %v14944_v3 = vld [vmem:[#allocation3 + $0x52] sm:$0xff]  ;;  %v2811_v27 = vld [vmem:[#allocation3 + $0x68] sm:$0xff] }
 0x225   : > { %12291 = vrot.lane.b32.xlu0 %v12290_v30, %s13432_s15  ;;  %12296 = vrot.lane.b32.xlu1 %v12295_v31, %s13429_s18  ;;  %v12355_v32 = vpack.i.bf16 %v14874_v34, %v14944_v3  ;;  %v14963_v34 = vld [vmem:[#allocation3 + $0x62] sm:$0xff] }
 0x227   : > { %v1648_v16 = vpop.permute.xlu0 %1647  ;;  %v1650_v20 = vpop.permute.xlu1 %1649 }
 0x228   : > { %v2140_v29 = vsel %vm2115_vm9, %v2107_v8, %v1648_v16  ;;  %v2141_v37 = vsel %vm2115_vm9, %v2108_v18, %v1650_v20 }
 0x229   : > { %v11524_v39 = vpop.f32.mrb[10].mxu0  ;;  %12301 = vrot.lane.b32.xlu0 %v12300_v46, %s13431_s19  ;;  %12306 = vrot.lane.b32.xlu1 %v12305_v42, %s13432_s15  ;;  %v12365_v46 = vpack.i.bf16 %v2809_v38, %v14954_v36  ;;  %v12360_v42 = vpack.i.bf16 %v14899_v53, %v2811_v27 }
 0x22a   : > { %v2445_v56 = vadd.f32 %v11524_v39, %v14460_v57  ;;  %v2439_v58 = vpop.f32.mrb[11].mxu0 }
 0x22b   : > { %v2440_v50 = vadd.f32 %v14460_v57, %v2439_v58  ;;  %v1776_v62 = vpop.permute.xlu0 %1775  ;;  %v1778_v2 = vpop.permute.xlu1 %1777  ;;  %v14970_v58 = vld [vmem:[#allocation3 + $0x6a] sm:$0xff] }
 0x22c   : > { %v2559_v4 = vmax.f32 %v2445_v56, 0.0  ;;  %v2173_v23 = vsel %vm2148_vm10, %v2140_v29, %v1776_v62  ;;  %v2174_v44 = vsel %vm2148_vm10, %v2141_v37, %v1778_v2  ;;  %v12370_v56 = vpack.i.bf16 %v14907_v19, %v14963_v34 }
 0x22d   : > { %v2558_v9 = vmax.f32 %v2440_v50, 0.0  ;;  %12316 = vrot.lane.b32.xlu1 %v12315_v63, %s13431_s19  ;;  %12311 = vrot.lane.b32.xlu0 %v12310_v48, %s13429_s18  ;;  %v12385_v2 = vpack.i.bf16 %v2841_v13, %v14970_v58  ;;  %v12380_v63 = vpack.i.bf16 %v2810_v7, %v14973_v61  ;;  %v14978_v48 = vld [vmem:[#allocation3 + $0x81] sm:$0xff] }
 0x22e   : > { %2591 = vst.msk [vmem:[#allocation3 + $0x99] sm:$0xff] %vm457_vm3, %v2559_v4 }
 0x22f   : > { %2590 = vst.msk [vmem:[#allocation3 + $0x91] sm:$0xff] %vm457_vm3, %v2558_v9  ;;  %v1904_v59 = vpop.permute.xlu0 %1903  ;;  %v1012_v6 = vpop.permute.xlu1 %1011 }
 0x230   : > { %v2205_v12 = vsel %vm457_vm3, %v2173_v23, %v1904_v59  ;;  %v1977_v54 = vsel %vm414_vm0, %v14445_v49, %v1012_v6  ;;  %v12395_v59 = vpack.i.bf16 %v2811_v27, %v14978_v48 }
 0x231   : > { %11543 = vmatprep.mubr.msk.f32.mxu0 %vm2222_vm11, %v2205_v12  ;;  %12326 = vrot.lane.b32.xlu1 %v12325_v41, %s13429_s18  ;;  %v12390_v41 = vpack.i.bf16 %v14944_v3, %v2813_v51  ;;  %v13406_v12 = vld [vmem:[#allocation2 + $0x140] sm:$0xff] }
 0x232   : > { %12321 = vrot.lane.b32.xlu0 %v12320_v17, %s13432_s15 }
 0x233   : > { %v1906_v55 = vpop.permute.xlu0 %1905  ;;  %v14931_v22 = vpop.permute.xlu1 %1013 }
 0x234   : > { %v2206_v24 = vsel %vm457_vm3, %v2174_v44, %v1906_v55  ;;  %v1978_v17 = vsel %vm414_vm0, %v13406_v12, %v14931_v22 }
 0x235   : > { %11544 = vmatmul.mubr.msk.f32.gmra.mrb[24].mxu0 %vm2222_vm11, %v2206_v24  ;;  %12336 = vrot.lane.b32.xlu1 %v12335_v45, %s13432_s15 }
 0x236   : > { %12331 = vrot.lane.b32.xlu0 %v12330_v35, %s13431_s19  ;;  %v2814_v5 = vld [vmem:[#allocation3 + $0x90] sm:$0xff] }
 0x237   : > { %v1140_v52 = vpop.permute.xlu0 %1139  ;;  %v1142_v28 = vpop.permute.xlu1 %1141  ;;  %v12405_v24 = vpack.i.bf16 %v14963_v34, %v2814_v5 }
 0x238   : > { %v2010_v8 = vsel %vm1983_vm5, %v1977_v54, %v1140_v52  ;;  %v2011_v38 = vsel %vm1983_vm5, %v1978_v17, %v1142_v28  ;;  %v15009_v28 = vld [vmem:[#allocation3 + $0x82] sm:$0xff] }
 0x239   : > { %12346 = vrot.lane.b32.xlu1 %v12345_v40, %s13431_s19 }
 0x23a   : > { %12341 = vrot.lane.b32.xlu0 %v12340_v14, %s13429_s18  ;;  %v2846_v14 = vld [vmem:[#allocation3 + $0x91] sm:$0xff] }
 0x23b   : > { %v1268_v30 = vpop.permute.xlu0 %1267  ;;  %v1270_v31 = vpop.permute.xlu1 %1269 }
 0x23c   : > { %v2043_v15 = vsel %vm2016_vm6, %v2010_v8, %v1268_v30  ;;  %v2044_v44 = vsel %vm2016_vm6, %v2011_v38, %v1270_v31 }
 0x23d   : > { %12356 = vrot.lane.b32.xlu1 %v12355_v32, %s13429_s18 }
 0x23e   : > { %12351 = vrot.lane.b32.xlu0 %v12350_v33, %s13432_s15 }
 0x23f   : > { %v1396_v16 = vpop.permute.xlu0 %1395  ;;  %v1398_v20 = vpop.permute.xlu1 %1397 }
 0x240   : > { %v2076_v49 = vsel %vm2049_vm7, %v2043_v15, %v1396_v16  ;;  %v2077_v35 = vsel %vm2049_vm7, %v2044_v44, %v1398_v20  ;;  %v12410_v16 = vpack.i.bf16 %v14960_v25, %v2846_v14  ;;  %v15021_v20 = vld [vmem:[#allocation3 + $0x99] sm:$0xff] }
 0x241   : > { %12366 = vrot.lane.b32.xlu1 %v12365_v46, %s13432_s15  ;;  %v2815_v46 = vld [vmem:[#allocation3 + $0x98] sm:$0xff] }
 0x242   : > { %12361 = vrot.lane.b32.xlu0 %v12360_v42, %s13431_s19  ;;  %v15031_v25 = vld [vmem:[#allocation3 + $0x92] sm:$0xff] }
 0x243   : > { %v1524_v43 = vpop.permute.xlu0 %1523  ;;  %v1526_v39 = vpop.permute.xlu1 %1525 }
 0x244   : > { %v2109_v13 = vsel %vm2082_vm8, %v2076_v49, %v1524_v43  ;;  %v2110_v40 = vsel %vm2082_vm8, %v2077_v35, %v1526_v39  ;;  %v12425_v39 = vpack.i.bf16 %v2813_v51, %v15021_v20  ;;  %v13409_v35 = vld [vmem:[#allocation2 + $0x158] sm:$0xff] }
 0x245   : > { %12376 = vrot.lane.b32.xlu1 %v12375_v26, %s13431_s19  ;;  %v12420_v26 = vpack.i.bf16 %v14970_v58, %v2815_v46 }
 0x246   : > { %12371 = vrot.lane.b32.xlu0 %v12370_v56, %s13429_s18 }
 0x247   : > { %v1652_v50 = vpop.permute.xlu0 %1651  ;;  %v1654_v62 = vpop.permute.xlu1 %1653 }
 0x248   : > { %v2142_v37 = vsel %vm2115_vm9, %v2109_v13, %v1652_v50  ;;  %v2143_v30 = vsel %vm2115_vm9, %v2110_v40, %v1654_v62  ;;  %v15066_v13 = vld [vmem:[%s19109_s11] ss:$0 sm:$0xff] }
 0x249   : > { %v11527_v4 = vpop.f32.mrb[12].mxu0  ;;  %12386 = vrot.lane.b32.xlu1 %v12385_v2, %s13429_s18  ;;  %v12430_v2 = vpack.i.bf16 %v14973_v61, %v15031_v25 }
 0x24a   : > { %v2455_v9 = vadd.f32 %v11527_v4, %v14460_v57  ;;  %v2449_v19 = vpop.f32.mrb[13].mxu0  ;;  %12381 = vrot.lane.b32.xlu0 %v12380_v63, %s13432_s15  ;;  %v15038_v63 = vld [vmem:[#allocation3 + $0x9a] sm:$0xff] }
 0x24b   : > { %v2450_v29 = vadd.f32 %v14460_v57, %v2449_v19  ;;  %v1780_v1 = vpop.permute.xlu0 %1779  ;;  %v1782_v23 = vpop.permute.xlu1 %1781  ;;  %v14995_v57 = vld [vmem:[#allocation3 + $0x7a] sm:$0xff]  ;;  %v12445_v8 = vpack.i.bf16 %v14978_v48, %v15038_v63 }
 0x24c   : > { %v2561_v6 = vmax.f32 %v2455_v9, 0.0  ;;  %v2175_v55 = vsel %vm2148_vm10, %v2142_v37, %v1780_v1  ;;  %v12400_v52 = vpack.i.bf16 %v14947_v47, %v14995_v57  ;;  %v2176_v31 = vsel %vm2148_vm10, %v2143_v30, %v1782_v23 }
 0x24d   : > { %v2560_v18 = vmax.f32 %v2450_v29, 0.0  ;;  %12396 = vrot.lane.b32.xlu1 %v12395_v59, %s13432_s15  ;;  %v12415_v47 = vpack.i.bf16 %v14954_v36, %v15009_v28 }
 0x24e   : > { %2593 = vst.msk [vmem:[#allocation3 + $0xb1] sm:$0xff] %vm457_vm3, %v2561_v6  ;;  %12391 = vrot.lane.b32.xlu0 %v12390_v41, %s13431_s19  ;;  %v13407_v41 = vld [vmem:[#allocation2 + $0x150] sm:$0xff] }
 0x24f   : > { %2592 = vst.msk [vmem:[#allocation3 + $0xa9] sm:$0xff] %vm457_vm3, %v2560_v18  ;;  %v1908_v22 = vpop.permute.xlu0 %1907  ;;  %v1016_v45 = vpop.permute.xlu1 %1015 }
 0x250   : > { %v2207_v7 = vsel %vm457_vm3, %v2175_v55, %v1908_v22 }
 0x251   : > { %11546 = vmatprep.mubr.msk.f32.mxu0 %vm2222_vm11, %v2207_v7  ;;  %12406 = vrot.lane.b32.xlu1 %v12405_v24, %s13431_s19 }
 0x252   : > { %12401 = vrot.lane.b32.xlu0 %v12400_v52, %s13429_s18 }
 0x253   : > { %v1910_v32 = vpop.permute.xlu0 %1909  ;;  %v1018_v33 = vpop.permute.xlu1 %1017 }
 0x254   : > { %v2208_v27 = vsel %vm457_vm3, %v2176_v31, %v1910_v32  ;;  %v1980_v7 = vsel %vm414_vm0, %v13409_v35, %v1018_v33 }
 0x255   : > { %11547 = vmatmul.mubr.msk.f32.gmra.mrb[26].mxu0 %vm2222_vm11, %v2208_v27  ;;  %12416 = vrot.lane.b32.xlu1 %v12415_v47, %s13429_s18  ;;  %v15047_v19 = vld [vmem:[#allocation3 + $0xb1] sm:$0xff] }
 0x256   : > { %12411 = vrot.lane.b32.xlu0 %v12410_v16, %s13432_s15  ;;  %v15028_v36 = vld [vmem:[#allocation3 + $0xa8] sm:$0xff]  ;;  %v15050_v61 = vld [vmem:[#allocation3 + $0xb0] sm:$0xff]  ;;  %v12455_v1 = vpack.i.bf16 %v2815_v46, %v15047_v19 }
 0x257   : > { %v1144_v42 = vpop.permute.xlu0 %1143  ;;  %v1146_v43 = vpop.permute.xlu1 %1145  ;;  %v12435_v62 = vpack.i.bf16 %v14995_v57, %v15028_v36  ;;  %v15041_v54 = vld [vmem:[#allocation3 + $0xa9] sm:$0xff]  ;;  %v12450_v23 = vpack.i.bf16 %v15009_v28, %v15050_v61 }
 0x258   : > { %v12440_v9 = vpack.i.bf16 %v2814_v5, %v15041_v54  ;;  %v15057_v48 = vld [vmem:[#allocation3 + $0xaa] sm:$0xff]  ;;  %v1979_v5 = vsel %vm414_vm0, %v13407_v41, %v1016_v45 }
 0x259   : > { %12426 = vrot.lane.b32.xlu1 %v12425_v39, %s13432_s15  ;;  %v12460_v6 = vpack.i.bf16 %v2846_v14, %v15057_v48  ;;  %v2012_v17 = vsel %vm1983_vm5, %v1979_v5, %v1144_v42  ;;  %v2013_v14 = vsel %vm1983_vm5, %v1980_v7, %v1146_v43 }
 0x25a   : > { %12421 = vrot.lane.b32.xlu0 %v12420_v26, %s13431_s19 }
 0x25b   : > { %v1272_v56 = vpop.permute.xlu0 %1271  ;;  %v1274_v50 = vpop.permute.xlu1 %1273 }
 0x25c   : > { %v2045_v37 = vsel %vm2016_vm6, %v2012_v17, %v1272_v56  ;;  %v2046_v31 = vsel %vm2016_vm6, %v2013_v14, %v1274_v50 }
 0x25d   : > { %12436 = vrot.lane.b32.xlu1 %v12435_v62, %s13431_s19 }
 0x25e   : > { %12431 = vrot.lane.b32.xlu0 %v12430_v2, %s13429_s18 }
 0x25f   : > { %v1400_v4 = vpop.permute.xlu0 %1399  ;;  %v1402_v51 = vpop.permute.xlu1 %1401 }
 0x260   : > { %v2078_v45 = vsel %vm2049_vm7, %v2045_v37, %v1400_v4  ;;  %v2079_v16 = vsel %vm2049_vm7, %v2046_v31, %v1402_v51 }
 0x261   : > { %12446 = vrot.lane.b32.xlu1 %v12445_v8, %s13429_s18 }
 0x262   : > { %12441 = vrot.lane.b32.xlu0 %v12440_v9, %s13432_s15  ;;  %v15097_v9 = vld [vmem:[#allocation3 + $0xb2] sm:$0xff] }
 0x263   : > { %v1528_v15 = vpop.permute.xlu0 %1527  ;;  %v1530_v29 = vpop.permute.xlu1 %1529 }
 0x264   : > { %v2111_v52 = vsel %vm2082_vm8, %v2078_v45, %v1528_v15  ;;  %v2112_v46 = vsel %vm2082_vm8, %v2079_v16, %v1530_v29 }
 0x265   : > { %12456 = vrot.lane.b32.xlu1 %v12455_v1, %s13432_s15 }
 0x266   : > { %12451 = vrot.lane.b32.xlu0 %v12450_v23, %s13431_s19  ;;  %v12475_v23 = vpack.i.bf16 %v15021_v20, %v15097_v9 }
 0x267   : > { %v1656_v59 = vpop.permute.xlu0 %1655  ;;  %v1658_v49 = vpop.permute.xlu1 %1657 }
 0x268   : > { %v2144_v30 = vsel %vm2115_vm9, %v2111_v52, %v1656_v59  ;;  %v2145_v42 = vsel %vm2115_vm9, %v2112_v46, %v1658_v49 }
 0x269   : > { %v11530_v12 = vpop.f32.mrb[14].mxu0 }
 0x26a   : > { %v2465_v18 = vadd.f32 %v15066_v13, %v11530_v12  ;;  %v2459_v38 = vpop.f32.mrb[15].mxu0  ;;  %12461 = vrot.lane.b32.xlu0 %v12460_v6, %s13429_s18 }
 0x26b   : > { %v2460_v44 = vadd.f32 %v15066_v13, %v2459_v38  ;;  %v1784_v55 = vpop.permute.xlu0 %1783  ;;  %v1786_v22 = vpop.permute.xlu1 %1785  ;;  %v669_v38 = vld [vmem:[#allocation2 + $0x170] sm:$0xff] }
 0x26c   : > { %v2563_v24 = vmax.f32 %v2465_v18, 0.0  ;;  %v2177_v32 = vsel %vm2148_vm10, %v2144_v30, %v1784_v55  ;;  %v2178_v43 = vsel %vm2148_vm10, %v2145_v42, %v1786_v22  ;;  %v668_v18 = vld [vmem:[#allocation2 + $0x168] sm:$0xff] }
 0x26d   : > { %v2562_v40 = vmax.f32 %v2460_v44, 0.0 }
 0x26e   : > { %2595 = vst.msk [vmem:[#allocation3 + $0xc9] sm:$0xff] %vm457_vm3, %v2563_v24 }
 0x26f   : > { %2594 = vst.msk [vmem:[#allocation3 + $0xc1] sm:$0xff] %vm457_vm3, %v2562_v40  ;;  %v1912_v47 = vpop.permute.xlu0 %1911  ;;  %v1020_v27 = vpop.permute.xlu1 %1019 }
 0x270   : > { %v2209_v33 = vsel %vm457_vm3, %v2177_v32, %v1912_v47  ;;  %v1981_v55 = vsel %vm414_vm0, %v668_v18, %v1020_v27 }
 0x271   : > { %11549 = vmatprep.mubr.msk.f32.mxu0 %vm2222_vm11, %v2209_v33 }
 0x273   : > { %v1914_v39 = vpop.permute.xlu0 %1913  ;;  %v1022_v26 = vpop.permute.xlu1 %1021 }
 0x274   : > { %v2210_v56 = vsel %vm457_vm3, %v2178_v43, %v1914_v39  ;;  %v1982_v22 = vsel %vm414_vm0, %v669_v38, %v1022_v26  ;;  %vm530_vm0 = vcmask 516096  }
 0x275   : > { %11550 = vmatmul.mubr.msk.f32.gmra.mrb[28].mxu0 %vm2222_vm11, %v2210_v56  ;;  %v15107_v49 = vld [vmem:[#allocation3 + $0xc9] sm:$0xff]  ;;  %531 = vst.msk [vmem:[#allocation5 + $0x10] sm:$0x1] %vm530_vm0, %v13421_v0  ;;  %532 = vst.msk [vmem:[#allocation5 + $0x20] sm:$0x1] %vm530_vm0, %v13421_v0 }
 0x276   : > { %v15089_v50 = vld [vmem:[#allocation3 + $0xc0] sm:$0xff]  ;;  %v15099_v15 = vld [vmem:[#allocation3 + $0xc8] sm:$0xff]  ;;  %v12485_v5 = vpack.i.bf16 %v15050_v61, %v15107_v49  ;;  %533 = vst.msk [vmem:[#allocation5 + $0x30] sm:$0x1] %vm530_vm0, %v13421_v0  ;;  %534 = vst.msk [vmem:[#allocation5 + $0x40] sm:$0x1] %vm530_vm0, %v13421_v0 }
 0x277   : > { %v15091_v62 = vld [vmem:[#allocation3 + $0xc1] sm:$0xff]  ;;  %v1148_v2 = vpop.permute.xlu0 %1147  ;;  %v1150_v4 = vpop.permute.xlu1 %1149  ;;  %v12465_v51 = vpack.i.bf16 %v15031_v25, %v15089_v50  ;;  %v12480_v59 = vpack.i.bf16 %v15038_v63, %v15099_v15  ;;  %535 = vst.msk [vmem:[#allocation5 + $0x50] sm:$0x1] %vm530_vm0, %v13421_v0  ;;  %536 = vst.msk [vmem:[#allocation5 + $0x60] sm:$0x1] %vm530_vm0, %v13421_v0 }
 0x278   : > { %v12470_v8 = vpack.i.bf16 %v15028_v36, %v15091_v62  ;;  %v15109_v6 = vld [vmem:[#allocation3 + $0xc2] sm:$0xff]  ;;  %v2014_v61 = vsel %vm1983_vm5, %v1981_v55, %v1148_v2  ;;  %v2015_v24 = vsel %vm1983_vm5, %v1982_v22, %v1150_v4  ;;  %537 = vst.msk [vmem:[#allocation5 + $0x70] sm:$0x1] %vm530_vm0, %v13421_v0  ;;  %538 = vst.msk [vmem:[#allocation5 + $0x80] sm:$0x1] %vm530_vm0, %v13421_v0  ;;  %vm560_vm5 = vcmask 259072  }
 0x279   : > { %12466 = vrot.lane.b32.xlu1 %v12465_v51, %s13431_s19  ;;  %v12490_v12 = vpack.i.bf16 %v15041_v54, %v15109_v6  ;;  %539 = vst.msk [vmem:[#allocation5 + $0x19] sm:$0x1] %vm530_vm0, %v13421_v0  ;;  %540 = vst.msk [vmem:[#allocation5 + $0x29] sm:$0x1] %vm530_vm0, %v13421_v0 }
 0x27a   : > { %12471 = vrot.lane.b32.xlu0 %v12470_v8, %s13432_s15  ;;  %541 = vst.msk [vmem:[#allocation5 + $0x39] sm:$0x1] %vm530_vm0, %v13421_v0  ;;  %542 = vst.msk [vmem:[#allocation5 + $0x49] sm:$0x1] %vm530_vm0, %v13421_v0 }
 0x27b   : > { %v1276_v29 = vpop.permute.xlu0 %1275  ;;  %v1278_v1 = vpop.permute.xlu1 %1277  ;;  %543 = vst.msk [vmem:[#allocation5 + $0x59] sm:$0x1] %vm530_vm0, %v13421_v0  ;;  %544 = vst.msk [vmem:[#allocation5 + $0x69] sm:$0x1] %vm530_vm0, %v13421_v0 }
 0x27c   : > { %v2047_v7 = vsel %vm2016_vm6, %v2014_v61, %v1276_v29  ;;  %v2048_v52 = vsel %vm2016_vm6, %v2015_v24, %v1278_v1  ;;  %v2613_v29 = vld [vmem:[#allocation3] sm:$0xff]  ;;  %v2614_v24 = vld [vmem:[#allocation3 + $0x8] sm:$0xff]  ;;  %545 = vst.msk [vmem:[#allocation5 + $0x79] sm:$0x1] %vm530_vm0, %v13421_v0  ;;  %546 = vst.msk [vmem:[#allocation5 + $0x89] sm:$0x1] %vm530_vm0, %v13421_v0 }
 0x27d   : > { %12476 = vrot.lane.b32.xlu1 %v12475_v23, %s13429_s18  ;;  %552 = vst.msk [vmem:[#allocation6 + $0x8] sm:$0x1] %vm530_vm0, %v13421_v0  ;;  %553 = vst.msk [vmem:[#allocation6 + $0x10] sm:$0x1] %vm530_vm0, %v13421_v0  ;;  %vm6366_vm6 = vcmask 257024  }
 0x27e   : > { %12481 = vrot.lane.b32.xlu0 %v12480_v59, %s13431_s19  ;;  %554 = vst.msk [vmem:[#allocation6 + $0x18] sm:$0x1] %vm530_vm0, %v13421_v0  ;;  %555 = vst.msk [vmem:[#allocation6 + $0x20] sm:$0x1] %vm530_vm0, %v13421_v0 }
 0x27f   : > { %v1404_v36 = vpop.permute.xlu0 %1403  ;;  %v1406_v41 = vpop.permute.xlu1 %1405  ;;  %556 = vst.msk [vmem:[#allocation6 + $0xd] sm:$0x1] %vm530_vm0, %v13421_v0  ;;  %557 = vst.msk [vmem:[#allocation6 + $0x15] sm:$0x1] %vm530_vm0, %v13421_v0 }
 0x280   : > { %v2080_v31 = vsel %vm2049_vm7, %v2047_v7, %v1404_v36  ;;  %v2081_v32 = vsel %vm2049_vm7, %v2048_v52, %v1406_v41  ;;  %558 = vst.msk [vmem:[#allocation6 + $0x1d] sm:$0x1] %vm530_vm0, %v13421_v0  ;;  %559 = vst.msk [vmem:[#allocation6 + $0x25] sm:$0x1] %vm530_vm0, %v13421_v0  ;;  %vm6369_vm7 = vcmask 261124  }
 0x281   : > { %12486 = vrot.lane.b32.xlu1 %v12485_v5, %s13432_s15  ;;  %563 = vst.msk [vmem:[#allocation7 + $0x28] sm:$0x3f] %vm560_vm5, %v13421_v0  ;;  %561 = vst.msk [vmem:[#allocation7] sm:$0x3f] %vm560_vm5, %v13421_v0  ;;  %v6536_v0 = vld [vmem:[%s19104_s6 + $0x90] sm:$0xff] }
 0x282   : > { %12491 = vrot.lane.b32.xlu0 %v12490_v12, %s13429_s18 }
 0x283   : > { %v1532_v20 = vpop.permute.xlu0 %1531  ;;  %v1534_v17 = vpop.permute.xlu1 %1533 }
 0x284   : > { %v2113_v27 = vsel %vm2082_vm8, %v2080_v31, %v1532_v20  ;;  %v2114_v16 = vsel %vm2082_vm8, %v2081_v32, %v1534_v17  ;;  %vm6861_vm8 = vcmask 1040384  }
 0x287   : > { %v1660_v37 = vpop.permute.xlu0 %1659  ;;  %v1662_v44 = vpop.permute.xlu1 %1661 }
 0x288   : > { %v2146_v46 = vsel %vm2115_vm9, %v2113_v27, %v1660_v37  ;;  %v2147_v42 = vsel %vm2115_vm9, %v2114_v16, %v1662_v44  ;;  %v15158_v44 = vld [vmem:[#allocation3 + $0xca] sm:$0xff] }
 0x289   : > { %v11533_v45 = vpop.f32.mrb[16].mxu0  ;;  %v12505_v7 = vpack.i.bf16 %v15047_v19, %v15158_v44 }
 0x28a   : > { %v2475_v54 = vadd.f32 %v15066_v13, %v11533_v45  ;;  %v2469_v35 = vpop.f32.mrb[17].mxu0 }
 0x28b   : > { %v2470_v40 = vadd.f32 %v15066_v13, %v2469_v35  ;;  %v1788_v14 = vpop.permute.xlu0 %1787  ;;  %v1790_v30 = vpop.permute.xlu1 %1789 }
 0x28c   : > { %v2565_v47 = vmax.f32 %v2475_v54, 0.0  ;;  %v2179_v43 = vsel %vm2148_vm10, %v2146_v46, %v1788_v14  ;;  %v2180_v39 = vsel %vm2148_vm10, %v2147_v42, %v1790_v30 }
 0x28d   : > { %v2564_v33 = vmax.f32 %v2470_v40, 0.0 }
 0x28e   : > { %2597 = vst.msk [vmem:[#allocation3 + $0xe1] sm:$0xff] %vm457_vm3, %v2565_v47 }
 0x28f   : > { %2596 = vst.msk [vmem:[#allocation3 + $0xd9] sm:$0xff] %vm457_vm3, %v2564_v33  ;;  %v1916_v26 = vpop.permute.xlu0 %1915  ;;  %v1918_v56 = vpop.permute.xlu1 %1917 }
 0x290   : > { %v2211_v2 = vsel %vm457_vm3, %v2179_v43, %v1916_v26  ;;  %v2212_v4 = vsel %vm457_vm3, %v2180_v39, %v1918_v56  ;;  %v2743_v56 = vld [vmem:[#allocation3 + $0x31] sm:$0xff] }
 0x291   : > { %11552 = vmatprep.mubr.msk.f32.mxu0 %vm2222_vm11, %v2211_v2 }
 0x292   : > { %11553 = vmatmul.mubr.msk.f32.gmra.mrb[30].mxu0 %vm2222_vm11, %v2212_v4 }
 0x293   : > { %v12282_v51 = vpop.permute.xlu0 %12281  ;;  %11563 = vmatprep.mubr.msk.f32.mxu0 %vm457_vm3, %v14882_v21  ;;  %v12287_v8 = vpop.permute.xlu1 %12286 }
 0x294   : > { %v12284_v1 = vunpack.i.h.bf16 %v12282_v51  ;;  %v12283_v23 = vunpack.i.l.bf16 %v12282_v51  ;;  %v12289_v59 = vunpack.i.h.bf16 %v12287_v8  ;;  %v12288_v36 = vunpack.i.l.bf16 %v12287_v8 }
 0x295   : > { %v15176_v31 = vld [vmem:[#allocation3 + $0xe1] sm:$0xff] }
 0x296   : > { %11564 = vmatmul.mubr.msk.f32.vlgmr.msra.gmra.mrb[32].mxu0 %vm457_vm3, %v14899_v53  ;;  %v15145_v41 = vld [vmem:[#allocation3 + $0xd8] sm:$0xff]  ;;  %v3767_v12 = vsel %vm457_vm3, %v14891_v60, %v12283_v23  ;;  %v3670_v20 = vsel %vm457_vm3, %v2613_v29, %v12284_v1  ;;  %v15160_v55 = vld [vmem:[#allocation3 + $0xe0] sm:$0xff]  ;;  %v12515_v42 = vpack.i.bf16 %v15099_v15, %v15176_v31 }
 0x297   : > { %v15147_v5 = vld [vmem:[#allocation3 + $0xd9] sm:$0xff]  ;;  %11566 = vmatprep.mubr.msk.f32.mxu0 %vm457_vm3, %v14938_v11  ;;  %v12292_v21 = vpop.permute.xlu0 %12291  ;;  %v12297_v17 = vpop.permute.xlu1 %12296  ;;  %v12495_v18 = vpack.i.bf16 %v15057_v48, %v15145_v41  ;;  %v3799_v11 = vsel %vm522_vm14, %v3767_v12, %v12288_v36  ;;  %v3702_v45 = vsel %vm522_vm14, %v3670_v20, %v12289_v59  ;;  %v12510_v52 = vpack.i.bf16 %v15097_v9, %v15160_v55 }
 0x298   : > { %v12500_v53 = vpack.i.bf16 %v15089_v50, %v15147_v5  ;;  %v12294_v38 = vunpack.i.h.bf16 %v12292_v21  ;;  %v12293_v37 = vunpack.i.l.bf16 %v12292_v21  ;;  %v12299_v60 = vunpack.i.h.bf16 %v12297_v17  ;;  %v15178_v32 = vld [vmem:[#allocation3 + $0xda] sm:$0xff] }
 0x299   : > { %v12298_v22 = vunpack.i.l.bf16 %v12297_v17  ;;  %12496 = vrot.lane.b32.xlu1 %v12495_v18, %s13431_s19  ;;  %v2615_v15 = vld [vmem:[#allocation3 + $0x18] sm:$0xff] }
 0x29a   : > { %12501 = vrot.lane.b32.xlu0 %v12500_v53, %s13432_s15  ;;  %11567 = vmatmul.mubr.msk.f32.gmra.mrb[34].mxu0 %vm457_vm3, %v14944_v3  ;;  %v3831_v50 = vsel %vm3734_vm15, %v3799_v11, %v12293_v37  ;;  %v3735_v61 = vsel %vm3734_vm15, %v3702_v45, %v12294_v38  ;;  %v3671_v19 = vsel %vm457_vm3, %v2614_v24, %v12299_v60  ;;  %v2616_v37 = vld [vmem:[#allocation3 + $0x20] sm:$0xff] }
 0x29b   : > { %11569 = vmatprep.mubr.msk.f32.mxu0 %vm457_vm3, %v14963_v34  ;;  %v12302_v54 = vpop.permute.xlu0 %12301  ;;  %v12307_v35 = vpop.permute.xlu1 %12306  ;;  %4063 = vmatprep.mubr.f32.mxu1 %v3831_v50  ;;  %v3768_v34 = vsel %vm457_vm3, %v14913_v10, %v12298_v22  ;;  %v12520_v10 = vpack.i.bf16 %v15091_v62, %v15178_v32 }
 0x29c   : > { %v12304_v40 = vunpack.i.h.bf16 %v12302_v54  ;;  %v12303_v14 = vunpack.i.l.bf16 %v12302_v54  ;;  %v12309_v3 = vunpack.i.h.bf16 %v12307_v35  ;;  %v12308_v30 = vunpack.i.l.bf16 %v12307_v35  ;;  %4064 = vmatmul.mubr.f32.vlgmr.msra.gmra.mrb[0].mxu1 %v3735_v61 }
 0x29d   : > { %12506 = vrot.lane.b32.xlu1 %v12505_v7, %s13429_s18 }
 0x29e   : > { %12511 = vrot.lane.b32.xlu0 %v12510_v52, %s13431_s19  ;;  %11570 = vmatmul.mubr.msk.f32.gmra.mrb[36].mxu0 %vm457_vm3, %v14970_v58  ;;  %v3800_v47 = vsel %vm522_vm14, %v3768_v34, %v12303_v14  ;;  %v3703_v27 = vsel %vm522_vm14, %v3671_v19, %v12304_v40  ;;  %v2745_v34 = vld [vmem:[#allocation3 + $0x49] sm:$0xff] }
 0x29f   : > { %11572 = vmatprep.mubr.msk.f32.mxu0 %vm457_vm3, %v14995_v57  ;;  %v12317_v16 = vpop.permute.xlu1 %12316  ;;  %v12312_v33 = vpop.permute.xlu0 %12311  ;;  %v3832_v46 = vsel %vm3734_vm15, %v3800_v47, %v12308_v30  ;;  %v3736_v43 = vsel %vm3734_vm15, %v3703_v27, %v12309_v3  ;;  %v2617_v19 = vld [vmem:[#allocation3 + $0x30] sm:$0xff] }
 0x2a0   : > { %v12314_v58 = vunpack.i.h.bf16 %v12312_v33  ;;  %v12313_v39 = vunpack.i.l.bf16 %v12312_v33  ;;  %4068 = vmatprep.mubr.f32.mxu1 %v3832_v46  ;;  %v12319_v57 = vunpack.i.h.bf16 %v12317_v16  ;;  %v12318_v26 = vunpack.i.l.bf16 %v12317_v16 }
 0x2a1   : > { %12516 = vrot.lane.b32.xlu1 %v12515_v42, %s13432_s15  ;;  %4069 = vmatmul.mubr.f32.gmra.mrb[2].mxu1 %v3736_v43 }
 0x2a2   : > { %12521 = vrot.lane.b32.xlu0 %v12520_v10, %s13429_s18  ;;  %11573 = vmatmul.mubr.msk.f32.gmra.mrb[38].mxu0 %vm457_vm3, %v15009_v28  ;;  %v3769_v2 = vsel %vm457_vm3, %v2743_v56, %v12313_v39  ;;  %v3672_v4 = vsel %vm457_vm3, %v2615_v15, %v12314_v58  ;;  %v15233_v10 = vld [vmem:[#allocation3 + $0xe2] sm:$0xff] }
 0x2a3   : > { %11575 = vmatprep.mubr.msk.f32.mxu0 %vm457_vm3, %v15031_v25  ;;  %v12327_v62 = vpop.permute.xlu1 %12326  ;;  %v3801_v28 = vsel %vm522_vm14, %v3769_v2, %v12318_v26  ;;  %v3704_v59 = vsel %vm522_vm14, %v3672_v4, %v12319_v57 }
 0x2a4   : > { %v12322_v51 = vpop.permute.xlu0 %12321  ;;  %v12329_v1 = vunpack.i.h.bf16 %v12327_v62  ;;  %v12328_v23 = vunpack.i.l.bf16 %v12327_v62 }
 0x2a5   : > { %v12324_v8 = vunpack.i.h.bf16 %v12322_v51  ;;  %v12323_v29 = vunpack.i.l.bf16 %v12322_v51 }
 0x2a6   : > { %11576 = vmatmul.mubr.msk.f32.gmra.mrb[40].mxu0 %vm457_vm3, %v15038_v63  ;;  %v2744_v63 = vld [vmem:[#allocation3 + $0x39] sm:$0xff]  ;;  %v3673_v11 = vsel %vm457_vm3, %v2616_v37, %v12329_v1 }
 0x2a7   : > { %11578 = vmatprep.mubr.msk.f32.mxu0 %vm457_vm3, %v15057_v48  ;;  %v12337_v25 = vpop.permute.xlu1 %12336  ;;  %v3833_v36 = vsel %vm3734_vm15, %v3801_v28, %v12323_v29  ;;  %v3737_v12 = vsel %vm3734_vm15, %v3704_v59, %v12324_v8  ;;  %v3770_v48 = vsel %vm457_vm3, %v2744_v63, %v12328_v23  ;;  %v2746_v29 = vld [vmem:[#allocation3 + $0x51] sm:$0xff] }
 0x2a8   : > { %v12338_v20 = vunpack.i.l.bf16 %v12337_v25  ;;  %v12332_v21 = vpop.permute.xlu0 %12331  ;;  %4073 = vmatprep.mubr.f32.mxu1 %v3833_v36  ;;  %v12339_v17 = vunpack.i.h.bf16 %v12337_v25  ;;  %v2618_v1 = vld [vmem:[#allocation3 + $0x38] sm:$0xff] }
 0x2a9   : > { %v12334_v18 = vunpack.i.h.bf16 %v12332_v21  ;;  %v12333_v53 = vunpack.i.l.bf16 %v12332_v21  ;;  %v11536_v38 = vpop.f32.mrb[18].mxu0  ;;  %4074 = vmatmul.mubr.f32.gmra.mrb[4].mxu1 %v3737_v12 }
 0x2aa   : > { %v2485_v60 = vadd.f32 %v15066_v13, %v11536_v38  ;;  %v2479_v22 = vpop.f32.mrb[19].mxu0  ;;  %11579 = vmatmul.mubr.msk.f32.gmra.mrb[42].mxu0 %vm457_vm3, %v15097_v9 }
 0x2ab   : > { %v2480_v45 = vadd.f32 %v15066_v13, %v2479_v22  ;;  %11581 = vmatprep.mubr.msk.f32.mxu0 %vm457_vm3, %v15109_v6  ;;  %v12347_v50 = vpop.permute.xlu1 %12346  ;;  %v3802_v61 = vsel %vm522_vm14, %v3770_v48, %v12333_v53  ;;  %v3705_v24 = vsel %vm522_vm14, %v3673_v11, %v12334_v18  ;;  %v2747_v11 = vld [vmem:[#allocation3 + $0x61] sm:$0xff] }
 0x2ac   : > { %v2567_v54 = vmax.f32 %v2485_v60, 0.0  ;;  %v12342_v35 = vpop.permute.xlu0 %12341  ;;  %v3834_v7 = vsel %vm3734_vm15, %v3802_v61, %v12338_v20  ;;  %v3738_v14 = vsel %vm3734_vm15, %v3705_v24, %v12339_v17  ;;  %v12349_v3 = vunpack.i.h.bf16 %v12347_v50 }
 0x2ad   : > { %v2566_v52 = vmax.f32 %v2480_v45, 0.0  ;;  %v12344_v9 = vunpack.i.h.bf16 %v12342_v35  ;;  %v12343_v40 = vunpack.i.l.bf16 %v12342_v35  ;;  %4078 = vmatprep.mubr.f32.mxu1 %v3834_v7  ;;  %v12348_v30 = vunpack.i.l.bf16 %v12347_v50  ;;  %v2619_v45 = vld [vmem:[#allocation3 + $0x48] sm:$0xff] }
 0x2ae   : > { %2599 = vst.msk [vmem:[#allocation3 + $0xf9] sm:$0xff] %vm457_vm3, %v2567_v54  ;;  %4079 = vmatmul.mubr.f32.gmra.mrb[6].mxu1 %v3738_v14  ;;  %11582 = vmatmul.mubr.msk.f32.gmra.mrb[44].mxu0 %vm457_vm3, %v15158_v44  ;;  %v12535_v61 = vpack.i.bf16 %v15107_v49, %v15233_v10 }
 0x2af   : > { %2598 = vst.msk [vmem:[#allocation3 + $0xf1] sm:$0xff] %vm457_vm3, %v2566_v52  ;;  %11584 = vmatprep.mubr.msk.f32.mxu0 %vm457_vm3, %v15178_v32  ;;  %v12357_v47 = vpop.permute.xlu1 %12356  ;;  %v3771_v27 = vsel %vm457_vm3, %v2745_v34, %v12343_v40  ;;  %v3674_v16 = vsel %vm457_vm3, %v2617_v19, %v12344_v9 }
 0x2b0   : > { %v12352_v33 = vpop.permute.xlu0 %12351  ;;  %v12359_v43 = vunpack.i.h.bf16 %v12357_v47  ;;  %v12358_v58 = vunpack.i.l.bf16 %v12357_v47  ;;  %v3803_v39 = vsel %vm522_vm14, %v3771_v27, %v12348_v30  ;;  %v3706_v57 = vsel %vm522_vm14, %v3674_v16, %v12349_v3 }
 0x2b1   : > { %v12354_v46 = vunpack.i.h.bf16 %v12352_v33  ;;  %v12353_v42 = vunpack.i.l.bf16 %v12352_v33 }
 0x2b2   : > { %11585 = vmatmul.mubr.msk.f32.gmra.mrb[46].mxu0 %vm457_vm3, %v15233_v10  ;;  %v3772_v25 = vsel %vm457_vm3, %v2746_v29, %v12358_v58  ;;  %v3675_v36 = vsel %vm457_vm3, %v2618_v1, %v12359_v43  ;;  %v2748_v58 = vld [vmem:[#allocation3 + $0x69] sm:$0xff] }
 0x2b3   : > { %v12367_v26 = vpop.permute.xlu1 %12366  ;;  %v3835_v56 = vsel %vm3734_vm15, %v3803_v39, %v12353_v42  ;;  %v3739_v15 = vsel %vm3734_vm15, %v3706_v57, %v12354_v46  ;;  %v2620_v39 = vld [vmem:[#allocation3 + $0x50] sm:$0xff] }
 0x2b4   : > { %v12369_v62 = vunpack.i.h.bf16 %v12367_v26  ;;  %v12368_v2 = vunpack.i.l.bf16 %v12367_v26  ;;  %v12362_v4 = vpop.permute.xlu0 %12361  ;;  %4083 = vmatprep.mubr.f32.mxu1 %v3835_v56 }
 0x2b5   : > { %v12364_v51 = vunpack.i.h.bf16 %v12362_v4  ;;  %v12363_v8 = vunpack.i.l.bf16 %v12362_v4  ;;  %4084 = vmatmul.mubr.f32.gmra.mrb[8].mxu1 %v3739_v15  ;;  %v15251_v12 = vld [vmem:[#allocation3 + $0xfa] sm:$0xff] }
 0x2b6   : > { %v15241_v23 = vld [vmem:[#allocation3 + $0xf2] sm:$0xff] }
 0x2b7   : > { %v15243_v28 = vld [vmem:[#allocation3 + $0xf0] sm:$0xff]  ;;  %11587 = vmatprep.mubr.msk.f32.mxu0 %vm457_vm3, %v15241_v23  ;;  %v12377_v20 = vpop.permute.xlu1 %12376  ;;  %v3804_v18 = vsel %vm522_vm14, %v3772_v25, %v12363_v8  ;;  %v3707_v53 = vsel %vm522_vm14, %v3675_v36, %v12364_v51  ;;  %v15263_v60 = vld [vmem:[#allocation3 + $0xf8] sm:$0xff]  ;;  %v12550_v47 = vpack.i.bf16 %v15147_v5, %v15241_v23  ;;  %v2621_v36 = vld [vmem:[#allocation3 + $0x60] sm:$0xff] }
 0x2b8   : > { %v15245_v59 = vld [vmem:[#allocation3 + $0xf1] sm:$0xff]  ;;  %v12525_v21 = vpack.i.bf16 %v15109_v6, %v15243_v28  ;;  %11588 = vmatmul.mubr.msk.f32.gmra.mrb[48].mxu0 %vm457_vm3, %v15251_v12  ;;  %v12372_v38 = vpop.permute.xlu0 %12371  ;;  %v3836_v63 = vsel %vm3734_vm15, %v3804_v18, %v12368_v2  ;;  %v3740_v37 = vsel %vm3734_vm15, %v3707_v53, %v12369_v62  ;;  %v12379_v6 = vunpack.i.h.bf16 %v12377_v20  ;;  %v15273_v52 = vld [vmem:[#allocation3 + $0xf9] sm:$0xff] }
 0x2b9   : > { %v12530_v17 = vpack.i.bf16 %v15145_v41, %v15245_v59  ;;  %v12374_v22 = vunpack.i.h.bf16 %v12372_v38  ;;  %v12373_v48 = vunpack.i.l.bf16 %v12372_v38  ;;  %v12378_v41 = vunpack.i.l.bf16 %v12377_v20  ;;  %4088 = vmatprep.mubr.f32.mxu1 %v3836_v63  ;;  %v2749_v25 = vld [vmem:[#allocation3 + $0x79] sm:$0xff] }
 0x2ba   : > { %12526 = vrot.lane.b32.xlu1 %v12525_v21, %s13431_s19  ;;  %4089 = vmatmul.mubr.f32.gmra.mrb[10].mxu1 %v3740_v37  ;;  %v12540_v24 = vpack.i.bf16 %v15158_v44, %v15263_v60  ;;  %v12545_v19 = vpack.i.bf16 %v15160_v55, %v15273_v52 }
 0x2bb   : > { %12531 = vrot.lane.b32.xlu0 %v12530_v17, %s13432_s15  ;;  %v12387_v50 = vpop.permute.xlu1 %12386  ;;  %v3773_v54 = vsel %vm457_vm3, %v2747_v11, %v12373_v48  ;;  %v3676_v35 = vsel %vm457_vm3, %v2619_v45, %v12374_v22 }
 0x2bc   : > { %v12382_v7 = vpop.permute.xlu0 %12381  ;;  %v12389_v14 = vunpack.i.h.bf16 %v12387_v50  ;;  %v12388_v3 = vunpack.i.l.bf16 %v12387_v50  ;;  %v3805_v49 = vsel %vm522_vm14, %v3773_v54, %v12378_v41  ;;  %v3708_v30 = vsel %vm522_vm14, %v3676_v35, %v12379_v6 }
 0x2bd   : > { %v12384_v9 = vunpack.i.h.bf16 %v12382_v7  ;;  %v12383_v40 = vunpack.i.l.bf16 %v12382_v7 }
 0x2be   : > { %12536 = vrot.lane.b32.xlu1 %v12535_v61, %s13429_s18  ;;  %v3774_v55 = vsel %vm457_vm3, %v2748_v58, %v12388_v3  ;;  %v3677_v57 = vsel %vm457_vm3, %v2620_v39, %v12389_v14 }
 0x2bf   : > { %12541 = vrot.lane.b32.xlu0 %v12540_v24, %s13431_s19  ;;  %v12397_v44 = vpop.permute.xlu1 %12396  ;;  %v3837_v34 = vsel %vm3734_vm15, %v3805_v49, %v12383_v40  ;;  %v3741_v27 = vsel %vm3734_vm15, %v3708_v30, %v12384_v9  ;;  %v2750_v49 = vld [vmem:[#allocation3 + $0x81] sm:$0xff] }
 0x2c0   : > { %v12399_v16 = vunpack.i.h.bf16 %v12397_v44  ;;  %v12398_v33 = vunpack.i.l.bf16 %v12397_v44  ;;  %v12392_v46 = vpop.permute.xlu0 %12391  ;;  %4093 = vmatprep.mubr.f32.mxu1 %v3837_v34  ;;  %v2622_v30 = vld [vmem:[#allocation3 + $0x68] sm:$0xff] }
 0x2c1   : > { %v12394_v42 = vunpack.i.h.bf16 %v12392_v46  ;;  %v12393_v43 = vunpack.i.l.bf16 %v12392_v46  ;;  %4094 = vmatmul.mubr.f32.gmra.mrb[12].mxu1 %v3741_v27 }
 0x2c2   : > { %12546 = vrot.lane.b32.xlu1 %v12545_v19, %s13432_s15 }
 0x2c3   : > { %12551 = vrot.lane.b32.xlu0 %v12550_v47, %s13429_s18  ;;  %v12407_v26 = vpop.permute.xlu1 %12406  ;;  %v3806_v56 = vsel %vm522_vm14, %v3774_v55, %v12393_v43  ;;  %v3709_v15 = vsel %vm522_vm14, %v3677_v57, %v12394_v42  ;;  %v2751_v55 = vld [vmem:[#allocation3 + $0x91] sm:$0xff] }
 0x2c4   : > { %v12402_v62 = vpop.permute.xlu0 %12401  ;;  %v3838_v2 = vsel %vm3734_vm15, %v3806_v56, %v12398_v33  ;;  %v3742_v4 = vsel %vm3734_vm15, %v3709_v15, %v12399_v16  ;;  %v12409_v29 = vunpack.i.h.bf16 %v12407_v26  ;;  %v12408_v1 = vunpack.i.l.bf16 %v12407_v26  ;;  %v2623_v57 = vld [vmem:[#allocation3 + $0x78] sm:$0xff] }
 0x2c5   : > { %v12404_v51 = vunpack.i.h.bf16 %v12402_v62  ;;  %v12403_v8 = vunpack.i.l.bf16 %v12402_v62  ;;  %4098 = vmatprep.mubr.f32.mxu1 %v3838_v2 }
 0x2c6   : > { %4099 = vmatmul.mubr.f32.gmra.mrb[14].mxu1 %v3742_v4 }
 0x2c7   : > { %v12417_v20 = vpop.permute.xlu1 %12416  ;;  %v3775_v21 = vsel %vm457_vm3, %v2749_v25, %v12403_v8  ;;  %v3678_v17 = vsel %vm457_vm3, %v2621_v36, %v12404_v51 }
 0x2c8   : > { %v12412_v18 = vpop.permute.xlu0 %12411  ;;  %v12419_v53 = vunpack.i.h.bf16 %v12417_v20  ;;  %v12418_v22 = vunpack.i.l.bf16 %v12417_v20  ;;  %v3807_v41 = vsel %vm522_vm14, %v3775_v21, %v12408_v1  ;;  %v3710_v11 = vsel %vm522_vm14, %v3678_v17, %v12409_v29 }
 0x2c9   : > { %v12414_v38 = vunpack.i.h.bf16 %v12412_v18  ;;  %v12413_v63 = vunpack.i.l.bf16 %v12412_v18  ;;  %v11539_v37 = vpop.f32.mrb[20].mxu0 }
 0x2ca   : > { %v2495_v48 = vadd.f32 %v15066_v13, %v11539_v37  ;;  %v2489_v6 = vpop.f32.mrb[21].mxu0  ;;  %v3776_v44 = vsel %vm457_vm3, %v2750_v49, %v12418_v22  ;;  %v3679_v34 = vsel %vm457_vm3, %v2622_v30, %v12419_v53 }
 0x2cb   : > { %v2490_v45 = vadd.f32 %v15066_v13, %v2489_v6  ;;  %v12427_v50 = vpop.permute.xlu1 %12426  ;;  %v3839_v61 = vsel %vm3734_vm15, %v3807_v41, %v12413_v63  ;;  %v3743_v24 = vsel %vm3734_vm15, %v3710_v11, %v12414_v38 }
 0x2cc   : > { %v2569_v54 = vmax.f32 %v2495_v48, 0.0  ;;  %v12429_v35 = vunpack.i.h.bf16 %v12427_v50  ;;  %v12428_v7 = vunpack.i.l.bf16 %v12427_v50  ;;  %v12422_v9 = vpop.permute.xlu0 %12421  ;;  %4103 = vmatprep.mubr.f32.mxu1 %v3839_v61 }
 0x2cd   : > { %v2568_v40 = vmax.f32 %v2490_v45, 0.0  ;;  %v12424_v14 = vunpack.i.h.bf16 %v12422_v9  ;;  %v12423_v3 = vunpack.i.l.bf16 %v12422_v9  ;;  %4104 = vmatmul.mubr.f32.gmra.mrb[16].mxu1 %v3743_v24  ;;  %v2624_v45 = vld [vmem:[#allocation3 + $0x80] sm:$0xff]  ;;  %v12565_v24 = vpack.i.bf16 %v15176_v31, %v15251_v12 }
 0x2ce   : > { %2601 = vst.msk [vmem:[#allocation3 + $0x111] sm:$0xff] %vm457_vm3, %v2569_v54 }
 0x2cf   : > { %2600 = vst.msk [vmem:[#allocation3 + $0x109] sm:$0xff] %vm457_vm3, %v2568_v40  ;;  %v12437_v19 = vpop.permute.xlu1 %12436  ;;  %v3808_v47 = vsel %vm522_vm14, %v3776_v44, %v12423_v3  ;;  %v3711_v27 = vsel %vm522_vm14, %v3679_v34, %v12424_v14 }
 0x2d0   : > { %v12432_v16 = vpop.permute.xlu0 %12431  ;;  %v3840_v33 = vsel %vm3734_vm15, %v3808_v47, %v12428_v7  ;;  %v3744_v46 = vsel %vm3734_vm15, %v3711_v27, %v12429_v35  ;;  %v12439_v58 = vunpack.i.h.bf16 %v12437_v19  ;;  %v12438_v39 = vunpack.i.l.bf16 %v12437_v19 }
 0x2d1   : > { %v12434_v42 = vunpack.i.h.bf16 %v12432_v16  ;;  %v12433_v43 = vunpack.i.l.bf16 %v12432_v16  ;;  %4108 = vmatprep.mubr.f32.mxu1 %v3840_v33 }
 0x2d2   : > { %4109 = vmatmul.mubr.f32.gmra.mrb[18].mxu1 %v3744_v46 }
 0x2d3   : > { %v12447_v26 = vpop.permute.xlu1 %12446  ;;  %v3777_v56 = vsel %vm457_vm3, %v2751_v55, %v12433_v43  ;;  %v3680_v15 = vsel %vm457_vm3, %v2623_v57, %v12434_v42 }
 0x2d4   : > { %v12442_v62 = vpop.permute.xlu0 %12441  ;;  %v12449_v51 = vunpack.i.h.bf16 %v12447_v26  ;;  %v12448_v8 = vunpack.i.l.bf16 %v12447_v26  ;;  %v3809_v1 = vsel %vm522_vm14, %v3777_v56, %v12438_v39  ;;  %v3712_v20 = vsel %vm522_vm14, %v3680_v15, %v12439_v58  ;;  %v2753_v58 = vld [vmem:[#allocation3 + $0xa9] sm:$0xff] }
 0x2d5   : > { %v12444_v2 = vunpack.i.h.bf16 %v12442_v62  ;;  %v12443_v4 = vunpack.i.l.bf16 %v12442_v62  ;;  %v15321_v21 = vld [vmem:[#allocation3 + $0x112] sm:$0xff] }
 0x2d6   : > { %v15311_v29 = vld [vmem:[#allocation3 + $0x10a] sm:$0xff]  ;;  %v3681_v61 = vsel %vm457_vm3, %v2624_v45, %v12449_v51 }
 0x2d7   : > { %v15314_v25 = vld [vmem:[#allocation3 + $0x108] sm:$0xff]  ;;  %11590 = vmatprep.mubr.msk.f32.mxu0 %vm457_vm3, %v15311_v29  ;;  %v12457_v17 = vpop.permute.xlu1 %12456  ;;  %v3841_v18 = vsel %vm3734_vm15, %v3809_v1, %v12443_v4  ;;  %v3745_v63 = vsel %vm3734_vm15, %v3712_v20, %v12444_v2  ;;  %v15331_v6 = vld [vmem:[#allocation3 + $0x110] sm:$0xff] }
 0x2d8   : > { %v15316_v36 = vld [vmem:[#allocation3 + $0x109] sm:$0xff]  ;;  %v12555_v53 = vpack.i.bf16 %v15178_v32, %v15314_v25  ;;  %11591 = vmatmul.mubr.msk.f32.gmra.mrb[50].mxu0 %vm457_vm3, %v15321_v21  ;;  %v12459_v37 = vunpack.i.h.bf16 %v12457_v17  ;;  %v12458_v22 = vunpack.i.l.bf16 %v12457_v17  ;;  %v12452_v48 = vpop.permute.xlu0 %12451  ;;  %4113 = vmatprep.mubr.f32.mxu1 %v3841_v18  ;;  %v2752_v32 = vld [vmem:[#allocation3 + $0x99] sm:$0xff]  ;;  %v12570_v54 = vpack.i.bf16 %v15233_v10, %v15331_v6  ;;  %v15345_v14 = vld [vmem:[#allocation3 + $0x111] sm:$0xff] }
 0x2d9   : > { %v12560_v38 = vpack.i.bf16 %v15243_v28, %v15316_v36  ;;  %v12454_v41 = vunpack.i.h.bf16 %v12452_v48  ;;  %v12453_v11 = vunpack.i.l.bf16 %v12452_v48  ;;  %4114 = vmatmul.mubr.f32.gmra.mrb[20].mxu1 %v3745_v63  ;;  %v3778_v50 = vsel %vm457_vm3, %v2752_v32, %v12448_v8  ;;  %v2625_v39 = vld [vmem:[#allocation3 + $0x90] sm:$0xff] }
 0x2da   : > { %12556 = vrot.lane.b32.xlu1 %v12555_v53, %s13431_s19  ;;  %v12575_v3 = vpack.i.bf16 %v15263_v60, %v15345_v14  ;;  %v12580_v10 = vpack.i.bf16 %v15245_v59, %v15311_v29  ;;  %v2754_v53 = vld [vmem:[#allocation3 + $0xb1] sm:$0xff] }
 0x2db   : > { %12561 = vrot.lane.b32.xlu0 %v12560_v38, %s13432_s15  ;;  %v3810_v35 = vsel %vm522_vm14, %v3778_v50, %v12453_v11  ;;  %v3713_v7 = vsel %vm522_vm14, %v3681_v61, %v12454_v41  ;;  %v2626_v38 = vld [vmem:[#allocation3 + $0x98] sm:$0xff] }
 0x2dc   : > { %v3842_v9 = vsel %vm3734_vm15, %v3810_v35, %v12458_v22  ;;  %v3746_v40 = vsel %vm3734_vm15, %v3713_v7, %v12459_v37  ;;  %v12462_v49 = vpop.permute.xlu0 %12461 }
 0x2dd   : > { %4118 = vmatprep.mubr.f32.mxu1 %v3842_v9  ;;  %v12464_v30 = vunpack.i.h.bf16 %v12462_v49  ;;  %v12463_v44 = vunpack.i.l.bf16 %v12462_v49 }
 0x2de   : > { %12566 = vrot.lane.b32.xlu1 %v12565_v24, %s13429_s18  ;;  %4119 = vmatmul.mubr.f32.gmra.mrb[22].mxu1 %v3746_v40 }
 0x2df   : > { %12571 = vrot.lane.b32.xlu0 %v12570_v54, %s13431_s19  ;;  %v3779_v26 = vsel %vm457_vm3, %v2753_v58, %v12463_v44  ;;  %v3682_v56 = vsel %vm457_vm3, %v2625_v39, %v12464_v30 }
 0x2e2   : > { %12576 = vrot.lane.b32.xlu1 %v12575_v3, %s13432_s15  ;;  %v12595_v3 = vpack.i.bf16 %v15273_v52, %v15321_v21 }
 0x2e3   : > { %12581 = vrot.lane.b32.xlu0 %v12580_v10, %s13429_s18 }
 0x2e9   : > { %v11542_v34 = vpop.f32.mrb[22].mxu0 }
 0x2ea   : > { %v2505_v19 = vadd.f32 %v15066_v13, %v11542_v34  ;;  %v2499_v47 = vpop.f32.mrb[23].mxu0 }
 0x2eb   : > { %v2500_v27 = vadd.f32 %v15066_v13, %v2499_v47  ;;  %v12467_v16 = vpop.permute.xlu1 %12466 }
 0x2ec   : > { %v12472_v33 = vpop.permute.xlu0 %12471  ;;  %v2571_v46 = vmax.f32 %v2505_v19, 0.0  ;;  %v12469_v60 = vunpack.i.h.bf16 %v12467_v16  ;;  %v12468_v42 = vunpack.i.l.bf16 %v12467_v16 }
 0x2ed   : > { %v12474_v43 = vunpack.i.h.bf16 %v12472_v33  ;;  %v2570_v55 = vmax.f32 %v2500_v27, 0.0  ;;  %v12473_v57 = vunpack.i.l.bf16 %v12472_v33 }
 0x2ee   : > { %2603 = vst.msk [vmem:[#allocation3 + $0x129] sm:$0xff] %vm457_vm3, %v2571_v46  ;;  %v3811_v15 = vsel %vm522_vm14, %v3779_v26, %v12468_v42  ;;  %v3714_v62 = vsel %vm522_vm14, %v3682_v56, %v12469_v60 }
 0x2ef   : > { %2602 = vst.msk [vmem:[#allocation3 + $0x121] sm:$0xff] %vm457_vm3, %v2570_v55  ;;  %v12477_v2 = vpop.permute.xlu1 %12476  ;;  %v3843_v51 = vsel %vm3734_vm15, %v3811_v15, %v12473_v57  ;;  %v3747_v8 = vsel %vm3734_vm15, %v3714_v62, %v12474_v43  ;;  %v2755_v55 = vld [vmem:[#allocation3 + $0xc1] sm:$0xff] }
 0x2f0   : > { %v12482_v4 = vpop.permute.xlu0 %12481  ;;  %v12479_v1 = vunpack.i.h.bf16 %v12477_v2  ;;  %v12478_v20 = vunpack.i.l.bf16 %v12477_v2  ;;  %4123 = vmatprep.mubr.f32.mxu1 %v3843_v51  ;;  %v2627_v57 = vld [vmem:[#allocation3 + $0xa8] sm:$0xff] }
 0x2f1   : > { %v12484_v17 = vunpack.i.h.bf16 %v12482_v4  ;;  %v12483_v18 = vunpack.i.l.bf16 %v12482_v4  ;;  %4124 = vmatmul.mubr.f32.gmra.mrb[24].mxu1 %v3747_v8 }
 0x2f2   : > { %v3780_v63 = vsel %vm457_vm3, %v2754_v53, %v12478_v20  ;;  %v3683_v37 = vsel %vm457_vm3, %v2626_v38, %v12479_v1  ;;  %v2756_v53 = vld [vmem:[#allocation3 + $0xc9] sm:$0xff] }
 0x2f3   : > { %v12487_v22 = vpop.permute.xlu1 %12486  ;;  %v3812_v11 = vsel %vm522_vm14, %v3780_v63, %v12483_v18  ;;  %v3715_v32 = vsel %vm522_vm14, %v3683_v37, %v12484_v17  ;;  %v2628_v38 = vld [vmem:[#allocation3 + $0xb0] sm:$0xff] }
 0x2f4   : > { %v12489_v48 = vunpack.i.h.bf16 %v12487_v22  ;;  %v12488_v41 = vunpack.i.l.bf16 %v12487_v22  ;;  %v12492_v44 = vpop.permute.xlu0 %12491 }
 0x2f5   : > { %v15379_v35 = vld [vmem:[#allocation3 + $0x12a] sm:$0xff]  ;;  %v12494_v19 = vunpack.i.h.bf16 %v12492_v44 }
 0x2f6   : > { %v3844_v45 = vsel %vm3734_vm15, %v3812_v11, %v12488_v41  ;;  %v15370_v50 = vld [vmem:[#allocation3 + $0x122] sm:$0xff]  ;;  %v3748_v61 = vsel %vm3734_vm15, %v3715_v32, %v12489_v48 }
 0x2f7   : > { %v15373_v24 = vld [vmem:[#allocation3 + $0x120] sm:$0xff]  ;;  %4128 = vmatprep.mubr.f32.mxu1 %v3844_v45  ;;  %11593 = vmatprep.mubr.msk.f32.mxu0 %vm457_vm3, %v15370_v50  ;;  %v15387_v40 = vld [vmem:[#allocation3 + $0x128] sm:$0xff]  ;;  %v12610_v30 = vpack.i.bf16 %v15316_v36, %v15370_v50  ;;  %v3684_v15 = vsel %vm457_vm3, %v2627_v57, %v12494_v19 }
 0x2f8   : > { %v15375_v54 = vld [vmem:[#allocation3 + $0x121] sm:$0xff]  ;;  %v12585_v7 = vpack.i.bf16 %v15241_v23, %v15373_v24  ;;  %4129 = vmatmul.mubr.f32.gmra.mrb[26].mxu1 %v3748_v61  ;;  %11594 = vmatmul.mubr.msk.f32.gmra.mrb[52].mxu0 %vm457_vm3, %v15379_v35  ;;  %v12600_v10 = vpack.i.bf16 %v15251_v12, %v15387_v40  ;;  %v15395_v23 = vld [vmem:[#allocation3 + $0x129] sm:$0xff]  ;;  %v12493_v12 = vunpack.i.l.bf16 %v12492_v44 }
 0x2f9   : > { %v12590_v9 = vpack.i.bf16 %v15314_v25, %v15375_v54  ;;  %v12605_v49 = vpack.i.bf16 %v15331_v6, %v15395_v23 }
 0x2fa   : > { %12586 = vrot.lane.b32.xlu1 %v12585_v7, %s13431_s19  ;;  %v3781_v56 = vsel %vm457_vm3, %v2755_v55, %v12493_v12 }
 0x2fb   : > { %12591 = vrot.lane.b32.xlu0 %v12590_v9, %s13432_s15 }
 0x2fe   : > { %12596 = vrot.lane.b32.xlu1 %v12595_v3, %s13429_s18 }
 0x2ff   : > { %12601 = vrot.lane.b32.xlu0 %v12600_v10, %s13431_s19 }
 0x302   : > { %12606 = vrot.lane.b32.xlu1 %v12605_v49, %s13432_s15 }
 0x303   : > { %12611 = vrot.lane.b32.xlu0 %v12610_v30, %s13429_s18 }
 0x308   : > { %v11545_v34 = vpop.f32.mrb[24].mxu0 }
 0x309   : > { %v2515_v47 = vadd.f32 %v15066_v13, %v11545_v34  ;;  %v2509_v27 = vpop.f32.mrb[25].mxu0  ;;  %v12625_v34 = vpack.i.bf16 %v15345_v14, %v15379_v35 }
 0x30a   : > { %v2510_v16 = vadd.f32 %v15066_v13, %v2509_v27 }
 0x30b   : > { %v2573_v33 = vmax.f32 %v2515_v47, 0.0  ;;  %v12497_v46 = vpop.permute.xlu1 %12496 }
 0x30c   : > { %v12502_v60 = vpop.permute.xlu0 %12501  ;;  %v2572_v42 = vmax.f32 %v2510_v16, 0.0  ;;  %v12499_v43 = vunpack.i.h.bf16 %v12497_v46  ;;  %v12498_v58 = vunpack.i.l.bf16 %v12497_v46  ;;  %v15458_v46 = vld [vmem:[%s19109_s11] ss:$0 sm:$0xff] }
 0x30d   : > { %v12504_v39 = vunpack.i.h.bf16 %v12502_v60  ;;  %2605 = vst.msk [vmem:[#allocation3 + $0x141] sm:$0xff] %vm457_vm3, %v2573_v33  ;;  %v12503_v26 = vunpack.i.l.bf16 %v12502_v60 }
 0x30e   : > { %2604 = vst.msk [vmem:[#allocation3 + $0x139] sm:$0xff] %vm457_vm3, %v2572_v42  ;;  %v3813_v13 = vsel %vm522_vm14, %v3781_v56, %v12498_v58  ;;  %v3716_v62 = vsel %vm522_vm14, %v3684_v15, %v12499_v43  ;;  %v2629_v15 = vld [vmem:[#allocation3 + $0xc0] sm:$0xff] }
 0x30f   : > { %v12507_v2 = vpop.permute.xlu1 %12506  ;;  %v3845_v51 = vsel %vm3734_vm15, %v3813_v13, %v12503_v26  ;;  %v3749_v8 = vsel %vm3734_vm15, %v3716_v62, %v12504_v39 }
 0x310   : > { %v12512_v4 = vpop.permute.xlu0 %12511  ;;  %v12509_v1 = vunpack.i.h.bf16 %v12507_v2  ;;  %v12508_v20 = vunpack.i.l.bf16 %v12507_v2  ;;  %4133 = vmatprep.mubr.f32.mxu1 %v3845_v51 }
 0x311   : > { %v12514_v17 = vunpack.i.h.bf16 %v12512_v4  ;;  %v12513_v18 = vunpack.i.l.bf16 %v12512_v4  ;;  %4134 = vmatmul.mubr.f32.gmra.mrb[28].mxu1 %v3749_v8 }
 0x312   : > { %v3782_v63 = vsel %vm457_vm3, %v2756_v53, %v12508_v20  ;;  %v3685_v37 = vsel %vm457_vm3, %v2628_v38, %v12509_v1 }
 0x313   : > { %v12517_v22 = vpop.permute.xlu1 %12516  ;;  %v3814_v11 = vsel %vm522_vm14, %v3782_v63, %v12513_v18  ;;  %v3717_v45 = vsel %vm522_vm14, %v3685_v37, %v12514_v17 }
 0x314   : > { %v12519_v48 = vunpack.i.h.bf16 %v12517_v22  ;;  %v12518_v41 = vunpack.i.l.bf16 %v12517_v22  ;;  %v15429_v10 = vld [vmem:[#allocation3 + $0x142] sm:$0xff]  ;;  %v12522_v27 = vpop.permute.xlu0 %12521 }
 0x315   : > { %v15418_v32 = vld [vmem:[#allocation3 + $0x13a] sm:$0xff]  ;;  %v12524_v33 = vunpack.i.h.bf16 %v12522_v27 }
 0x316   : > { %v15421_v61 = vld [vmem:[#allocation3 + $0x138] sm:$0xff]  ;;  %v3846_v9 = vsel %vm3734_vm15, %v3814_v11, %v12518_v41  ;;  %11596 = vmatprep.mubr.msk.f32.mxu0 %vm457_vm3, %v15418_v32  ;;  %v3750_v3 = vsel %vm3734_vm15, %v3717_v45, %v12519_v48  ;;  %v15438_v44 = vld [vmem:[#allocation3 + $0x140] sm:$0xff]  ;;  %v12640_v47 = vpack.i.bf16 %v15375_v54, %v15418_v32 }
 0x317   : > { %v15423_v7 = vld [vmem:[#allocation3 + $0x139] sm:$0xff]  ;;  %v12615_v49 = vpack.i.bf16 %v15311_v29, %v15421_v61  ;;  %4138 = vmatprep.mubr.f32.mxu1 %v3846_v9  ;;  %11597 = vmatmul.mubr.msk.f32.gmra.mrb[54].mxu0 %vm457_vm3, %v15429_v10  ;;  %v12630_v29 = vpack.i.bf16 %v15321_v21, %v15438_v44  ;;  %v15445_v19 = vld [vmem:[#allocation3 + $0x141] sm:$0xff]  ;;  %v12523_v21 = vunpack.i.l.bf16 %v12522_v27  ;;  %v3686_v2 = vsel %vm457_vm3, %v2629_v15, %v12524_v33 }
 0x318   : > { %v12620_v30 = vpack.i.bf16 %v15373_v24, %v15423_v7  ;;  %4139 = vmatmul.mubr.f32.gmra.mrb[30].mxu1 %v3750_v3  ;;  %v12635_v12 = vpack.i.bf16 %v15387_v40, %v15445_v19 }
 0x319   : > { %12616 = vrot.lane.b32.xlu1 %v12615_v49, %s13431_s19  ;;  %v3783_v62 = vsel %vm457_vm3, %v15147_v5, %v12523_v21  ;;  %v2630_v5 = vld [vmem:[#allocation3 + $0xc8] sm:$0xff] }
 0x31a   : > { %12621 = vrot.lane.b32.xlu0 %v12620_v30, %s13432_s15 }
 0x31d   : > { %12626 = vrot.lane.b32.xlu1 %v12625_v34, %s13429_s18 }
 0x31e   : > { %12631 = vrot.lane.b32.xlu0 %v12630_v29, %s13431_s19 }
 0x321   : > { %12636 = vrot.lane.b32.xlu1 %v12635_v12, %s13432_s15 }
 0x322   : > { %12641 = vrot.lane.b32.xlu0 %v12640_v47, %s13429_s18 }
 0x328   : > { %v11548_v16 = vpop.f32.mrb[26].mxu0 }
 0x329   : > { %v2525_v60 = vadd.f32 %v15458_v46, %v11548_v16  ;;  %v2519_v42 = vpop.f32.mrb[27].mxu0  ;;  %v12655_v16 = vpack.i.bf16 %v15395_v23, %v15429_v10 }
 0x32a   : > { %v2520_v40 = vadd.f32 %v15458_v46, %v2519_v42 }
 0x32b   : > { %v2575_v43 = vmax.f32 %v2525_v60, 0.0 }
 0x32c   : > { %v12527_v58 = vpop.permute.xlu1 %12526  ;;  %v2574_v55 = vmax.f32 %v2520_v40, 0.0 }
 0x32d   : > { %v12532_v39 = vpop.permute.xlu0 %12531  ;;  %v12529_v57 = vunpack.i.h.bf16 %v12527_v58  ;;  %v12528_v26 = vunpack.i.l.bf16 %v12527_v58  ;;  %2607 = vst.msk [vmem:[#allocation3 + $0x159] sm:$0xff] %vm457_vm3, %v2575_v43 }
 0x32e   : > { %v12534_v56 = vunpack.i.h.bf16 %v12532_v39  ;;  %v12533_v13 = vunpack.i.l.bf16 %v12532_v39  ;;  %2606 = vst.msk [vmem:[#allocation3 + $0x151] sm:$0xff] %vm457_vm3, %v2574_v55 }
 0x32f   : > { %v3815_v4 = vsel %vm522_vm14, %v3783_v62, %v12528_v26  ;;  %v3718_v51 = vsel %vm522_vm14, %v3686_v2, %v12529_v57  ;;  %v2631_v62 = vld [vmem:[#allocation3 + $0xd8] sm:$0xff] }
 0x330   : > { %v12537_v8 = vpop.permute.xlu1 %12536  ;;  %v3847_v20 = vsel %vm3734_vm15, %v3815_v4, %v12533_v13  ;;  %v3751_v17 = vsel %vm3734_vm15, %v3718_v51, %v12534_v56 }
 0x331   : > { %v12542_v1 = vpop.permute.xlu0 %12541  ;;  %v12539_v18 = vunpack.i.h.bf16 %v12537_v8  ;;  %v12538_v53 = vunpack.i.l.bf16 %v12537_v8  ;;  %4143 = vmatprep.mubr.f32.mxu1 %v3847_v20 }
 0x332   : > { %v12544_v38 = vunpack.i.h.bf16 %v12542_v1  ;;  %v12543_v63 = vunpack.i.l.bf16 %v12542_v1  ;;  %4144 = vmatmul.mubr.f32.gmra.mrb[32].mxu1 %v3751_v17 }
 0x333   : > { %v3784_v37 = vsel %vm457_vm3, %v15176_v31, %v12538_v53  ;;  %v3687_v22 = vsel %vm457_vm3, %v2630_v5, %v12539_v18 }
 0x334   : > { %v12547_v48 = vpop.permute.xlu1 %12546  ;;  %v3816_v45 = vsel %vm522_vm14, %v3784_v37, %v12543_v63  ;;  %v3719_v3 = vsel %vm522_vm14, %v3687_v22, %v12544_v38  ;;  %v15486_v29 = vld [vmem:[#allocation3 + $0x15a] sm:$0xff] }
 0x335   : > { %v12549_v41 = vunpack.i.h.bf16 %v12547_v48  ;;  %v12548_v11 = vunpack.i.l.bf16 %v12547_v48  ;;  %v15475_v9 = vld [vmem:[#allocation3 + $0x152] sm:$0xff]  ;;  %v12552_v60 = vpop.permute.xlu0 %12551 }
 0x336   : > { %v15478_v49 = vld [vmem:[#allocation3 + $0x150] sm:$0xff]  ;;  %11599 = vmatprep.mubr.msk.f32.mxu0 %vm457_vm3, %v15475_v9  ;;  %v15495_v27 = vld [vmem:[#allocation3 + $0x158] sm:$0xff]  ;;  %v12670_v21 = vpack.i.bf16 %v15423_v7, %v15475_v9  ;;  %v12554_v40 = vunpack.i.h.bf16 %v12552_v60 }
 0x337   : > { %v15480_v30 = vld [vmem:[#allocation3 + $0x151] sm:$0xff]  ;;  %v3848_v34 = vsel %vm3734_vm15, %v3816_v45, %v12548_v11  ;;  %v3752_v31 = vsel %vm3734_vm15, %v3719_v3, %v12549_v41  ;;  %v12645_v12 = vpack.i.bf16 %v15370_v50, %v15478_v49  ;;  %11600 = vmatmul.mubr.msk.f32.gmra.mrb[56].mxu0 %vm457_vm3, %v15486_v29  ;;  %v12660_v50 = vpack.i.bf16 %v15379_v35, %v15495_v27  ;;  %v15502_v33 = vld [vmem:[#allocation3 + $0x159] sm:$0xff] }
 0x338   : > { %v12650_v47 = vpack.i.bf16 %v15421_v61, %v15480_v30  ;;  %4148 = vmatprep.mubr.f32.mxu1 %v3848_v34  ;;  %v12665_v61 = vpack.i.bf16 %v15438_v44, %v15502_v33  ;;  %v12553_v35 = vunpack.i.l.bf16 %v12552_v60  ;;  %v3688_v51 = vsel %vm457_vm3, %v2631_v62, %v12554_v40 }
 0x339   : > { %4149 = vmatmul.mubr.f32.gmra.mrb[34].mxu1 %v3752_v31  ;;  %12646 = vrot.lane.b32.xlu1 %v12645_v12, %s13431_s19 }
 0x33a   : > { %12651 = vrot.lane.b32.xlu0 %v12650_v47, %s13432_s15  ;;  %v3785_v4 = vsel %vm457_vm3, %v15245_v59, %v12553_v35  ;;  %v2632_v59 = vld [vmem:[#allocation3 + $0xe0] sm:$0xff] }
 0x33d   : > { %12656 = vrot.lane.b32.xlu1 %v12655_v16, %s13429_s18 }
 0x33e   : > { %12661 = vrot.lane.b32.xlu0 %v12660_v50, %s13431_s19 }
 0x341   : > { %12666 = vrot.lane.b32.xlu1 %v12665_v61, %s13432_s15 }
 0x342   : > { %12671 = vrot.lane.b32.xlu0 %v12670_v21, %s13429_s18 }
 0x348   : > { %v11551_v42 = vpop.f32.mrb[28].mxu0 }
 0x349   : > { %v2535_v43 = vadd.f32 %v15458_v46, %v11551_v42  ;;  %v2529_v58 = vpop.f32.mrb[29].mxu0  ;;  %v12685_v42 = vpack.i.bf16 %v15445_v19, %v15486_v29 }
 0x34a   : > { %v2530_v39 = vadd.f32 %v15458_v46, %v2529_v58 }
 0x34b   : > { %v2577_v55 = vmax.f32 %v2535_v43, 0.0 }
 0x34c   : > { %v12557_v57 = vpop.permute.xlu1 %12556  ;;  %v2576_v44 = vmax.f32 %v2530_v39, 0.0 }
 0x34d   : > { %v12562_v26 = vpop.permute.xlu0 %12561  ;;  %v12559_v56 = vunpack.i.h.bf16 %v12557_v57  ;;  %v12558_v15 = vunpack.i.l.bf16 %v12557_v57  ;;  %2609 = vst.msk [vmem:[#allocation3 + $0x171] sm:$0xff] %vm457_vm3, %v2577_v55 }
 0x34e   : > { %v12564_v13 = vunpack.i.h.bf16 %v12562_v26  ;;  %v12563_v2 = vunpack.i.l.bf16 %v12562_v26  ;;  %2608 = vst.msk [vmem:[#allocation3 + $0x169] sm:$0xff] %vm457_vm3, %v2576_v44 }
 0x34f   : > { %v3817_v8 = vsel %vm522_vm14, %v3785_v4, %v12558_v15  ;;  %v3720_v1 = vsel %vm522_vm14, %v3688_v51, %v12559_v56 }
 0x350   : > { %v12567_v20 = vpop.permute.xlu1 %12566  ;;  %v3849_v18 = vsel %vm3734_vm15, %v3817_v8, %v12563_v2  ;;  %v3753_v53 = vsel %vm3734_vm15, %v3720_v1, %v12564_v13 }
 0x351   : > { %v12572_v17 = vpop.permute.xlu0 %12571  ;;  %v12569_v38 = vunpack.i.h.bf16 %v12567_v20  ;;  %v12568_v63 = vunpack.i.l.bf16 %v12567_v20  ;;  %4153 = vmatprep.mubr.f32.mxu1 %v3849_v18 }
 0x352   : > { %v12574_v5 = vunpack.i.h.bf16 %v12572_v17  ;;  %v12573_v37 = vunpack.i.l.bf16 %v12572_v17  ;;  %4154 = vmatmul.mubr.f32.gmra.mrb[36].mxu1 %v3753_v53  ;;  %v15581_v53 = vld [vmem:[%s19109_s11 + $0x1] ss:$0 sm:$0xff] }
 0x353   : > { %v3786_v22 = vsel %vm457_vm3, %v15273_v52, %v12568_v63  ;;  %v3689_v48 = vsel %vm457_vm3, %v2632_v59, %v12569_v38 }
 0x354   : > { %v12577_v41 = vpop.permute.xlu1 %12576  ;;  %v3818_v3 = vsel %vm522_vm14, %v3786_v22, %v12573_v37  ;;  %v3721_v31 = vsel %vm522_vm14, %v3689_v48, %v12574_v5  ;;  %v15538_v50 = vld [vmem:[#allocation3 + $0x172] sm:$0xff] }
 0x355   : > { %v12579_v11 = vunpack.i.h.bf16 %v12577_v41  ;;  %v12578_v45 = vunpack.i.l.bf16 %v12577_v41  ;;  %v15527_v34 = vld [vmem:[#allocation3 + $0x16a] sm:$0xff]  ;;  %v12582_v39 = vpop.permute.xlu0 %12581 }
 0x356   : > { %v15530_v12 = vld [vmem:[#allocation3 + $0x168] sm:$0xff]  ;;  %11602 = vmatprep.mubr.msk.f32.mxu0 %vm457_vm3, %v15527_v34  ;;  %v15547_v60 = vld [vmem:[#allocation3 + $0x170] sm:$0xff]  ;;  %v12700_v43 = vpack.i.bf16 %v15480_v30, %v15527_v34  ;;  %v12584_v44 = vunpack.i.h.bf16 %v12582_v39  ;;  %v12583_v56 = vunpack.i.l.bf16 %v12582_v39 }
 0x357   : > { %v15532_v47 = vld [vmem:[#allocation3 + $0x169] sm:$0xff]  ;;  %v3850_v16 = vsel %vm3734_vm15, %v3818_v3, %v12578_v45  ;;  %v3754_v52 = vsel %vm3734_vm15, %v3721_v31, %v12579_v11  ;;  %v12675_v61 = vpack.i.bf16 %v15418_v32, %v15530_v12  ;;  %11603 = vmatmul.mubr.msk.f32.gmra.mrb[58].mxu0 %vm457_vm3, %v15538_v50  ;;  %v12690_v32 = vpack.i.bf16 %v15429_v10, %v15547_v60  ;;  %v15554_v40 = vld [vmem:[#allocation3 + $0x171] sm:$0xff] }
 0x358   : > { %v12680_v21 = vpack.i.bf16 %v15478_v49, %v15532_v47  ;;  %4158 = vmatprep.mubr.f32.mxu1 %v3850_v16  ;;  %v12695_v35 = vpack.i.bf16 %v15495_v27, %v15554_v40  ;;  %v3690_v17 = vsel %vm457_vm3, %v15243_v28, %v12584_v44  ;;  %v2634_v16 = vld [vmem:[#allocation3 + $0xf8] sm:$0xff] }
 0x359   : > { %4159 = vmatmul.mubr.f32.gmra.mrb[38].mxu1 %v3754_v52  ;;  %12676 = vrot.lane.b32.xlu1 %v12675_v61, %s13431_s19 }
 0x35a   : > { %12681 = vrot.lane.b32.xlu0 %v12680_v21, %s13432_s15 }
 0x35d   : > { %12686 = vrot.lane.b32.xlu1 %v12685_v42, %s13429_s18 }
 0x35e   : > { %12691 = vrot.lane.b32.xlu0 %v12690_v32, %s13431_s19 }
 0x361   : > { %12696 = vrot.lane.b32.xlu1 %v12695_v35, %s13432_s15 }
 0x362   : > { %12701 = vrot.lane.b32.xlu0 %v12700_v43, %s13429_s18 }
 0x365   : > { %v11554_v58 = vpop.f32.mrb[30].mxu0 }
 0x366   : > { %v2545_v10 = vadd.f32 %v15458_v46, %v11554_v58  ;;  %v2539_v55 = vpop.f32.mrb[31].mxu0 }
 0x367   : > { %v2540_v57 = vadd.f32 %v15458_v46, %v2539_v55  ;;  %v3787_v46 = vsel %vm457_vm3, %v15316_v36, %v12583_v56 }
 0x368   : > { %v2579_v26 = vmax.f32 %v2545_v10, 0.0 }
 0x369   : > { %v2578_v15 = vmax.f32 %v2540_v57, 0.0  ;;  %v15566_v13 = vpop.f32.mrb[32].mxu0 }
 0x36a   : > { %2611 = vst.msk [vmem:[#allocation3 + $0x189] sm:$0xff] %vm457_vm3, %v2579_v26  ;;  %v4290_v27 = vpop.f32.mrb[33].mxu0 }
 0x36b   : > { %2610 = vst.msk [vmem:[#allocation3 + $0x181] sm:$0xff] %vm457_vm3, %v2578_v15 }
 0x36c   : > { %v12587_v62 = vpop.permute.xlu1 %12586 }
 0x36d   : > { %v12592_v2 = vpop.permute.xlu0 %12591  ;;  %v12589_v4 = vunpack.i.h.bf16 %v12587_v62  ;;  %v12588_v51 = vunpack.i.l.bf16 %v12587_v62  ;;  %v15570_v20 = vpop.f32.mrb[34].mxu0 }
 0x36e   : > { %v12594_v8 = vunpack.i.h.bf16 %v12592_v2  ;;  %v12593_v1 = vunpack.i.l.bf16 %v12592_v2  ;;  %v15576_v18 = vpop.f32.mrb[35].mxu0 }
 0x36f   : > { %v3819_v38 = vsel %vm522_vm14, %v3787_v46, %v12588_v51  ;;  %v3722_v63 = vsel %vm522_vm14, %v3690_v17, %v12589_v4  ;;  %v4065_v28 = vpop.f32.mrb[0].mxu1 }
 0x370   : > { %v12597_v5 = vpop.permute.xlu1 %12596  ;;  %v3851_v59 = vsel %vm3734_vm15, %v3819_v38, %v12593_v1  ;;  %v3755_v36 = vsel %vm3734_vm15, %v3722_v63, %v12594_v8  ;;  %v4066_v45 = vadd.f32 %v15581_v53, %v4065_v28  ;;  %v4067_v3 = vpop.f32.mrb[1].mxu1  ;;  %v12715_v1 = vpack.i.bf16 %v15502_v33, %v15538_v50  ;;  %v2868_v28 = vld [vmem:[#allocation3 + $0x199] sm:$0xff] }
 0x371   : > { %v12602_v37 = vpop.permute.xlu0 %12601  ;;  %v12599_v22 = vunpack.i.h.bf16 %v12597_v5  ;;  %v12598_v48 = vunpack.i.l.bf16 %v12597_v5  ;;  %4163 = vmatprep.mubr.f32.mxu1 %v3851_v59  ;;  %v15588_v31 = vpop.f32.mrb[36].mxu0  ;;  %v15598_v39 = vld [vmem:[#allocation3 + $0x18a] sm:$0xff]  ;;  %v2900_v59 = vld [vmem:[#allocation3 + $0x19a] sm:$0xff] }
 0x372   : > { %v12604_v41 = vunpack.i.h.bf16 %v12602_v37  ;;  %v12603_v11 = vunpack.i.l.bf16 %v12602_v37  ;;  %4164 = vmatmul.mubr.f32.gmra.mrb[40].mxu1 %v3755_v36  ;;  %v15590_v52 = vpop.f32.mrb[37].mxu0  ;;  %v2898_v61 = vld [vmem:[#allocation3 + $0x182] sm:$0xff]  ;;  %v4291_v43 = vadd.f32 %v4290_v27, %v4066_v45 }
 0x373   : > { %v2834_v21 = vld [vmem:[#allocation3 + $0x180] sm:$0xff]  ;;  %v3788_v32 = vsel %vm457_vm3, %v15345_v14, %v12598_v48  ;;  %v3691_v35 = vsel %vm457_vm3, %v2634_v16, %v12599_v22  ;;  %11605 = vmatprep.mubr.msk.f32.mxu0 %vm457_vm3, %v2898_v61  ;;  %v15605_v44 = vld [vmem:[#allocation3 + $0x188] sm:$0xff]  ;;  %v2836_v48 = vld [vmem:[#allocation3 + $0x198] sm:$0xff] }
 0x374   : > { %v15592_v42 = vld [vmem:[#allocation3 + $0x181] sm:$0xff]  ;;  %v12607_v58 = vpop.permute.xlu1 %12606  ;;  %v12705_v10 = vpack.i.bf16 %v15475_v9, %v2834_v21  ;;  %11606 = vmatmul.mubr.msk.f32.gmra.mrb[60].mxu0 %vm457_vm3, %v15598_v39  ;;  %v4449_v14 = vmax.f32 %v4291_v43, 0.0  ;;  %v4070_v56 = vpop.f32.mrb[2].mxu1  ;;  %v3820_v9 = vsel %vm522_vm14, %v3788_v32, %v12603_v11  ;;  %v3723_v27 = vsel %vm522_vm14, %v3691_v35, %v12604_v41  ;;  %v15624_v38 = vld [vmem:[#allocation3 + $0x189] sm:$0xff] }
 0x375   : > { %v12710_v55 = vpack.i.bf16 %v15530_v12, %v15592_v42  ;;  %v12609_v57 = vunpack.i.h.bf16 %v12607_v58  ;;  %v12608_v26 = vunpack.i.l.bf16 %v12607_v58  ;;  %v15607_v15 = vpop.f32.mrb[38].mxu0  ;;  %v4071_v62 = vadd.f32 %v15581_v53, %v4070_v56  ;;  %v4072_v2 = vpop.f32.mrb[3].mxu1  ;;  %v2901_v36 = vld [vmem:[#allocation3 + $0x1a2] sm:$0xff]  ;;  %11608 = vmatprep.mubr.msk.f32.mxu0 %vm457_vm3, %v2900_v59 }
 0x376   : > { %12706 = vrot.lane.b32.xlu1 %v12705_v10, %s13431_s19  ;;  %v15615_v51 = vpop.f32.mrb[39].mxu0  ;;  %4481 = vst.msk [vmem:[#allocation3 + $0x19] sm:$0xff] %vm457_vm3, %v4449_v14  ;;  %v12720_v46 = vpack.i.bf16 %v15486_v29, %v15605_v44  ;;  %v12725_v22 = vpack.i.bf16 %v15547_v60, %v15624_v38  ;;  %v12730_v29 = vpack.i.bf16 %v15532_v47, %v2898_v61  ;;  %v2837_v35 = vld [vmem:[#allocation3 + $0x1a0] sm:$0xff]  ;;  %v12612_v56 = vpop.permute.xlu0 %12611 }
 0x377   : > { %12711 = vrot.lane.b32.xlu0 %v12710_v55, %s13432_s15  ;;  %v3852_v4 = vsel %vm3734_vm15, %v3820_v9, %v12608_v26  ;;  %v3756_v8 = vsel %vm3734_vm15, %v3723_v27, %v12609_v57  ;;  %v4296_v17 = vadd.f32 %v15566_v13, %v4071_v62  ;;  %v12735_v61 = vpack.i.bf16 %v15527_v34, %v2836_v48  ;;  %v2869_v14 = vld [vmem:[#allocation3 + $0x1a1] sm:$0xff] }
 0x378   : > { %4168 = vmatprep.mubr.f32.mxu1 %v3852_v4  ;;  %11609 = vmatmul.mubr.msk.f32.gmra.mrb[62].mxu0 %vm457_vm3, %v2901_v36  ;;  %v12740_v32 = vpack.i.bf16 %v2834_v21, %v2868_v28  ;;  %v12745_v34 = vpack.i.bf16 %v15554_v40, %v15598_v39  ;;  %v12755_v2 = vpack.i.bf16 %v15605_v44, %v2869_v14  ;;  %v12614_v4 = vunpack.i.h.bf16 %v12612_v56 }
 0x379   : > { %4169 = vmatmul.mubr.f32.gmra.mrb[42].mxu1 %v3756_v8  ;;  %v15626_v63 = vpop.f32.mrb[40].mxu0  ;;  %v4450_v5 = vmax.f32 %v4296_v17, 0.0  ;;  %v12613_v8 = vunpack.i.l.bf16 %v12612_v56 }
 0x37a   : > { %12716 = vrot.lane.b32.xlu1 %v12715_v1, %s13429_s18  ;;  %v15630_v37 = vpop.f32.mrb[41].mxu0  ;;  %v3692_v48 = vsel %vm457_vm3, %v15314_v25, %v12614_v4  ;;  %v4940_v25 = vld [vmem:[%s19101_s3 + $0x88] sm:$0xff] }
 0x37b   : > { %12721 = vrot.lane.b32.xlu0 %v12720_v46, %s13431_s19  ;;  %4482 = vst.msk [vmem:[#allocation3 + $0x21] sm:$0xff] %vm457_vm3, %v4450_v5 }
 0x37c   : > { %v4075_v13 = vpop.f32.mrb[4].mxu1 }
 0x37d   : > { %v4076_v41 = vadd.f32 %v15581_v53, %v4075_v13  ;;  %v4077_v11 = vpop.f32.mrb[5].mxu1  ;;  %v15639_v45 = vpop.f32.mrb[42].mxu0  ;;  %v3789_v13 = vsel %vm457_vm3, %v15375_v54, %v12613_v8  ;;  %v4939_v54 = vld [vmem:[%s19101_s3 + $0x80] sm:$0xff] }
 0x37e   : > { %12726 = vrot.lane.b32.xlu1 %v12725_v22, %s13432_s15  ;;  %v15643_v3 = vpop.f32.mrb[43].mxu0  ;;  %v11840_v56 = vpack.c.bf16 %v4940_v25, %v4939_v54 }
 0x37f   : > { %12731 = vrot.lane.b32.xlu0 %v12730_v29, %s13429_s18  ;;  %v4301_v16 = vadd.f32 %v15576_v18, %v4076_v41  ;;  %v12750_v18 = vpack.i.bf16 %v15538_v50, %v2837_v35 }
 0x380   : > { %11841 = vmatprep.subr.bf16.mxu0 %v11840_v56 }
 0x381   : > { %v4451_v43 = vmax.f32 %v4301_v16, 0.0  ;;  %v4080_v58 = vpop.f32.mrb[6].mxu1  ;;  %v15647_v10 = vpop.f32.mrb[44].mxu0 }
 0x382   : > { %12736 = vrot.lane.b32.xlu1 %v12735_v61, %s13431_s19  ;;  %v4081_v55 = vadd.f32 %v15581_v53, %v4080_v58  ;;  %v4082_v57 = vpop.f32.mrb[7].mxu1  ;;  %v15652_v26 = vpop.f32.mrb[45].mxu0  ;;  %v4514_v11 = vld [vmem:[#allocation3 + $0x19] ss:$2 sm:$0xff]  ;;  %v4530_v16 = vld [vmem:[#allocation3 + $0x1a] ss:$2 sm:$0xff] }
 0x383   : > { %12741 = vrot.lane.b32.xlu0 %v12740_v32, %s13432_s15  ;;  %4483 = vst.msk [vmem:[#allocation3 + $0x31] sm:$0xff] %vm457_vm3, %v4451_v43  ;;  %v4577_v8 = vmax.f32 %v4514_v11, %v4530_v16 }
 0x384   : > { %v4306_v21 = vadd.f32 %v15570_v20, %v4081_v55 }
 0x385   : > { %v15659_v9 = vpop.f32.mrb[46].mxu0 }
 0x386   : > { %12746 = vrot.lane.b32.xlu1 %v12745_v34, %s13429_s18  ;;  %v4452_v27 = vmax.f32 %v4306_v21, 0.0  ;;  %v15663_v62 = vpop.f32.mrb[47].mxu0 }
 0x387   : > { %12751 = vrot.lane.b32.xlu0 %v12750_v18, %s13431_s19 }
 0x388   : > { %4484 = vst.msk [vmem:[#allocation3 + $0x39] sm:$0xff] %vm457_vm3, %v4452_v27  ;;  %v4085_v50 = vpop.f32.mrb[8].mxu1  ;;  %v4923_v27 = vld [vmem:[%s19101_s3] sm:$0xff] }
 0x389   : > { %v4086_v20 = vadd.f32 %v15581_v53, %v4085_v50  ;;  %v4087_v39 = vpop.f32.mrb[9].mxu1 }
 0x38a   : > { %12756 = vrot.lane.b32.xlu1 %v12755_v2, %s13432_s15 }
 0x38b   : > { %v12617_v1 = vpop.permute.xlu1 %12616  ;;  %v4311_v46 = vadd.f32 %v15590_v52, %v4086_v20  ;;  %v15670_v17 = vpop.f32.mrb[48].mxu0  ;;  %v4924_v20 = vld [vmem:[%s19101_s3 + $0x8] sm:$0xff] }
 0x38c   : > { %v12619_v5 = vunpack.i.h.bf16 %v12617_v1  ;;  %v12618_v59 = vunpack.i.l.bf16 %v12617_v1  ;;  %v12622_v36 = vpop.permute.xlu0 %12621  ;;  %v15672_v29 = vpop.f32.mrb[49].mxu0 }
 0x38d   : > { %v12624_v22 = vunpack.i.h.bf16 %v12622_v36  ;;  %v12623_v44 = vunpack.i.l.bf16 %v12622_v36  ;;  %v4453_v28 = vmax.f32 %v4311_v46, 0.0  ;;  %v4090_v61 = vpop.f32.mrb[10].mxu1 }
 0x38e   : > { %v3821_v41 = vsel %vm522_vm14, %v3789_v13, %v12618_v59  ;;  %v3724_v52 = vsel %vm522_vm14, %v3692_v48, %v12619_v5  ;;  %v4091_v58 = vadd.f32 %v15581_v53, %v4090_v61  ;;  %v4092_v55 = vpop.f32.mrb[11].mxu1  ;;  %v11842_v5 = vpack.c.bf16 %v4924_v20, %v4923_v27  ;;  %v4944_v61 = vld [vmem:[%s19101_s3 + $0xa8] sm:$0xff]  ;;  %v4929_v27 = vld [vmem:[%s19101_s3 + $0x30] sm:$0xff] }
 0x38f   : > { %v12627_v32 = vpop.permute.xlu1 %12626  ;;  %v3853_v35 = vsel %vm3734_vm15, %v3821_v41, %v12623_v44  ;;  %v3757_v43 = vsel %vm3734_vm15, %v3724_v52, %v12624_v22  ;;  %4485 = vst.msk [vmem:[#allocation3 + $0x49] sm:$0xff] %vm457_vm3, %v4453_v28  ;;  %v4546_v21 = vld [vmem:[#allocation3 + $0x31] ss:$2 sm:$0xff]  ;;  %v4562_v14 = vld [vmem:[#allocation3 + $0x32] ss:$2 sm:$0xff]  ;;  %v4942_v44 = vld [vmem:[%s19101_s3 + $0x98] sm:$0xff] }
 0x390   : > { %v12629_v57 = vunpack.i.h.bf16 %v12627_v32  ;;  %v12628_v34 = vunpack.i.l.bf16 %v12627_v32  ;;  %v12632_v18 = vpop.permute.xlu0 %12631  ;;  %4173 = vmatprep.mubr.f32.mxu1 %v3853_v35  ;;  %v4585_v50 = vmax.f32 %v4546_v21, %v4562_v14  ;;  %v4316_v39 = vadd.f32 %v15588_v31, %v4091_v58  ;;  %v4941_v22 = vld [vmem:[%s19101_s3 + $0x90] sm:$0xff]  ;;  %11843 = vmatpush3.bf16.msra.mxu0 %v11842_v5  ;;  %v4926_v28 = vld [vmem:[%s19101_s3 + $0x18] sm:$0xff]  ;;  %v4943_v41 = vld [vmem:[%s19101_s3 + $0xa0] sm:$0xff] }
 0x391   : > { %v12634_v2 = vunpack.i.h.bf16 %v12632_v18  ;;  %v12633_v4 = vunpack.i.l.bf16 %v12632_v18  ;;  %4174 = vmatmul.mubr.f32.gmra.mrb[44].mxu1 %v3757_v43  ;;  %v4927_v32 = vld [vmem:[%s19101_s3 + $0x20] sm:$0xff]  ;;  %v4928_v35 = vld [vmem:[%s19101_s3 + $0x28] sm:$0xff]  ;;  %v11848_v58 = vpack.c.bf16 %v4944_v61, %v4943_v41  ;;  %v4945_v55 = vld [vmem:[%s19101_s3 + $0xb0] sm:$0xff] }
 0x392   : > { %v3790_v1 = vsel %vm457_vm3, %v15395_v23, %v12628_v34  ;;  %v3693_v46 = vsel %vm457_vm3, %v15331_v6, %v12629_v57  ;;  %v4593_v36 = vmax.f32 %v4577_v8, %v4585_v50  ;;  %v4454_v13 = vmax.f32 %v4316_v39, 0.0  ;;  %v4925_v6 = vld [vmem:[%s19101_s3 + $0x10] sm:$0xff]  ;;  %v4946_v57 = vld [vmem:[%s19101_s3 + $0xb8] sm:$0xff]  ;;  %v4618_v8 = vld [vmem:[#allocation4 + $0x1] sm:$0xff] }
 0x393   : > { %v12637_v59 = vpop.permute.xlu1 %12636  ;;  %v11844_v23 = vpack.c.bf16 %v4942_v44, %v4941_v22  ;;  %v3822_v52 = vsel %vm522_vm14, %v3790_v1, %v12633_v4  ;;  %v3725_v11 = vsel %vm522_vm14, %v3693_v46, %v12634_v2  ;;  %v11846_v16 = vpack.c.bf16 %v4926_v28, %v4925_v6  ;;  %v4930_v2 = vld [vmem:[%s19101_s3 + $0x38] sm:$0xff]  ;;  %v4947_v50 = vld [vmem:[%s19101_s3 + $0xc0] sm:$0xff]  ;;  %v4933_v41 = vld [vmem:[%s19101_s3 + $0x50] sm:$0xff] }
 0x394   : > { %v12639_v31 = vunpack.i.h.bf16 %v12637_v59  ;;  %v12638_v48 = vunpack.i.l.bf16 %v12637_v59  ;;  %4601 = vst.msk [vmem:[#allocation4 + $0x11] sm:$0xff] %vm457_vm3, %v4593_v36  ;;  %4486 = vst.msk [vmem:[#allocation3 + $0x51] sm:$0xff] %vm457_vm3, %v4454_v13  ;;  %v4095_v43 = vpop.f32.mrb[12].mxu1  ;;  %v11850_v21 = vpack.c.bf16 %v4928_v35, %v4927_v32  ;;  %v11852_v56 = vpack.c.bf16 %v4946_v57, %v4945_v55  ;;  %v4931_v44 = vld [vmem:[%s19101_s3 + $0x40] sm:$0xff]  ;;  %v4932_v13 = vld [vmem:[%s19101_s3 + $0x48] sm:$0xff]  ;;  %v12642_v35 = vpop.permute.xlu0 %12641 }
 0x395   : > { %11845 = vmatprep.subr.bf16.mxu0 %v11844_v23  ;;  %v4096_v34 = vadd.f32 %v15581_v53, %v4095_v43  ;;  %v4097_v18 = vpop.f32.mrb[13].mxu1  ;;  %v11854_v5 = vpack.c.bf16 %v4930_v2, %v4929_v27  ;;  %v11858_v23 = vpack.c.bf16 %v4932_v13, %v4931_v44  ;;  %v4935_v27 = vld [vmem:[%s19101_s3 + $0x60] sm:$0xff]  ;;  %v12644_v2 = vunpack.i.h.bf16 %v12642_v35 }
 0x396   : > { %v3854_v54 = vsel %vm3734_vm15, %v3822_v52, %v12638_v48  ;;  %v3758_v25 = vsel %vm3734_vm15, %v3725_v11, %v12639_v31  ;;  %11847 = vmatpush3.bf16.msra.mxu0 %v11846_v16  ;;  %v4949_v31 = vld [vmem:[%s19101_s3 + $0xd0] sm:$0xff]  ;;  %v4934_v52 = vld [vmem:[%s19101_s3 + $0x58] sm:$0xff]  ;;  %v4952_v18 = vld [vmem:[%s19101_s3 + $0xe8] sm:$0xff] }
 0x397   : > { %4178 = vmatprep.mubr.f32.mxu1 %v3854_v54  ;;  %v4321_v14 = vadd.f32 %v15615_v51, %v4096_v34  ;;  %11849 = vmatprep.subr.bf16.mxu0 %v11848_v58  ;;  %v4948_v51 = vld [vmem:[%s19101_s3 + $0xc8] sm:$0xff]  ;;  %v11862_v32 = vpack.c.bf16 %v4934_v52, %v4933_v41  ;;  %v4951_v34 = vld [vmem:[%s19101_s3 + $0xe0] sm:$0xff]  ;;  %v3694_v52 = vsel %vm457_vm3, %v15373_v24, %v12644_v2 }
 0x398   : > { %4179 = vmatmul.mubr.f32.gmra.mrb[46].mxu1 %v3758_v25  ;;  %v11856_v22 = vpack.c.bf16 %v4948_v51, %v4947_v50  ;;  %v4936_v51 = vld [vmem:[%s19101_s3 + $0x68] sm:$0xff] }
 0x399   : > { %v4100_v4 = vpop.f32.mrb[14].mxu1  ;;  %v4455_v20 = vmax.f32 %v4321_v14, 0.0 }
 0x39a   : > { %v4101_v39 = vadd.f32 %v15581_v53, %v4100_v4  ;;  %v4102_v1 = vpop.f32.mrb[15].mxu1  ;;  %11851 = vmatpush3.bf16.msra.mxu0 %v11850_v21 }
 0x39b   : > { %v15752_v46 = vld [vmem:[#allocation4 + $0x12] sm:$0xff]  ;;  %4487 = vst.msk [vmem:[#allocation3 + $0x61] sm:$0xff] %vm457_vm3, %v4455_v20  ;;  %11853 = vmatprep.subr.bf16.mxu0 %v11852_v56  ;;  %v4532_v58 = vld [vmem:[#allocation3 + $0x4a] ss:$2 sm:$0xff]  ;;  %v11864_v56 = vpack.c.bf16 %v4952_v18, %v4951_v34  ;;  %v11866_v20 = vpack.c.bf16 %v4936_v51, %v4935_v27 }
 0x39c   : > { %v4326_v59 = vadd.f32 %v15607_v15, %v4101_v39  ;;  %v12760_v36 = vpack.i.bf16 %v4618_v8, %v15752_v46  ;;  %v4950_v15 = vld [vmem:[%s19101_s3 + $0xd8] sm:$0xff] }
 0x39d   : > { %v11860_v28 = vpack.c.bf16 %v4950_v15, %v4949_v31  ;;  %v4516_v25 = vld [vmem:[#allocation3 + $0x49] ss:$2 sm:$0xff] }
 0x39e   : > { %v4456_v48 = vmax.f32 %v4326_v59, 0.0  ;;  %12761 = vrot.lane.b32.xlu0 %v12760_v36, %s13429_s18  ;;  %11855 = vmatpush3.bf16.msra.mxu0 %v11854_v5  ;;  %v4578_v8 = vmax.f32 %v4516_v25, %v4532_v58  ;;  %v4953_v59 = vld [vmem:[%s19101_s3 + $0xf0] sm:$0xff]  ;;  %v4954_v36 = vld [vmem:[%s19101_s3 + $0xf8] sm:$0xff] }
 0x39f   : > { %11857 = vmatprep.subr.bf16.mxu0 %v11856_v22  ;;  %v11868_v15 = vpack.c.bf16 %v4954_v36, %v4953_v59 }
 0x3a0   : > { %4488 = vst.msk [vmem:[#allocation3 + $0x69] sm:$0xff] %vm457_vm3, %v4456_v48  ;;  %v4105_v6 = vpop.f32.mrb[16].mxu1  ;;  %v4937_v48 = vld [vmem:[%s19101_s3 + $0x70] sm:$0xff] }
 0x3a1   : > { %v4106_v11 = vadd.f32 %v15581_v53, %v4105_v6  ;;  %v4107_v16 = vpop.f32.mrb[17].mxu1 }
 0x3a2   : > { %11859 = vmatpush3.bf16.msra.mxu0 %v11858_v23  ;;  %v4938_v23 = vld [vmem:[%s19101_s3 + $0x78] sm:$0xff] }
 0x3a3   : > { %v4331_v61 = vadd.f32 %v15630_v37, %v4106_v11  ;;  %11861 = vmatprep.subr.bf16.mxu0 %v11860_v28  ;;  %v12643_v37 = vunpack.i.l.bf16 %v12642_v35 }
 0x3a5   : > { %v4457_v43 = vmax.f32 %v4331_v61, 0.0  ;;  %v4110_v54 = vpop.f32.mrb[18].mxu1  ;;  %v3791_v31 = vsel %vm457_vm3, %v15423_v7, %v12643_v37  ;;  %v11870_v7 = vpack.c.bf16 %v4938_v23, %v4937_v48  ;;  %v2638_v37 = vld [vmem:[#allocation3 + $0x128] sm:$0xff] }
 0x3a6   : > { %v4111_v55 = vadd.f32 %v15581_v53, %v4110_v54  ;;  %v4112_v57 = vpop.f32.mrb[19].mxu1  ;;  %11863 = vmatpush3.bf16.msra.mxu0 %v11862_v32  ;;  %v15845_v48 = vld [vmem:[#allocation4 + $0x11] sm:$0xff] }
 0x3a7   : > { %4489 = vst.msk [vmem:[#allocation3 + $0x79] sm:$0xff] %vm457_vm3, %v4457_v43  ;;  %v4548_v21 = vld [vmem:[#allocation3 + $0x61] ss:$2 sm:$0xff]  ;;  %v4564_v14 = vld [vmem:[#allocation3 + $0x62] ss:$2 sm:$0xff]  ;;  %11865 = vmatprep.subr.bf16.mxu0 %v11864_v56 }
 0x3a8   : > { %v4336_v4 = vadd.f32 %v15626_v63, %v4111_v55  ;;  %v4586_v50 = vmax.f32 %v4548_v21, %v4564_v14  ;;  %v4626_v21 = vld [vmem:[#allocation4 + $0x2] sm:$0xff] }
 0x3aa   : > { %v4458_v39 = vmax.f32 %v4336_v4, 0.0  ;;  %v4594_v5 = vmax.f32 %v4578_v8, %v4586_v50  ;;  %11867 = vmatpush3.bf16.msra.mxu0 %v11866_v20 }
 0x3ab   : > { %v12647_v1 = vpop.permute.xlu1 %12646  ;;  %v15800_v63 = vpop.f32.mrb[50].mxu0  ;;  %11869 = vmatprep.subr.bf16.mxu0 %v11868_v15 }
 0x3ac   : > { %v12649_v22 = vunpack.i.h.bf16 %v12647_v1  ;;  %v12648_v44 = vunpack.i.l.bf16 %v12647_v1  ;;  %v12652_v13 = vpop.permute.xlu0 %12651  ;;  %4490 = vst.msk [vmem:[#allocation3 + $0x81] sm:$0xff] %vm457_vm3, %v4458_v39  ;;  %v15811_v41 = vpop.f32.mrb[51].mxu0  ;;  %4602 = vst.msk [vmem:[#allocation4 + $0x21] sm:$0xff] %vm457_vm3, %v4594_v5  ;;  %v15826_v39 = vld [vmem:[#allocation4 + $0x10] sm:$0xff] }
 0x3ad   : > { %v12654_v6 = vunpack.i.h.bf16 %v12652_v13  ;;  %v12653_v28 = vunpack.i.l.bf16 %v12652_v13  ;;  %v4115_v11 = vpop.f32.mrb[20].mxu1 }
 0x3ae   : > { %v3823_v16 = vsel %vm522_vm14, %v3791_v31, %v12648_v44  ;;  %v3726_v61 = vsel %vm522_vm14, %v3694_v52, %v12649_v22  ;;  %v4116_v32 = vadd.f32 %v15581_v53, %v4115_v11  ;;  %v4117_v35 = vpop.f32.mrb[21].mxu1  ;;  %11871 = vmatpush3.bf16.msra.mxu0 %v11870_v7 }
 0x3af   : > { %v12657_v43 = vpop.permute.xlu1 %12656  ;;  %v3855_v54 = vsel %vm3734_vm15, %v3823_v16, %v12653_v28  ;;  %v3759_v25 = vsel %vm3734_vm15, %v3726_v61, %v12654_v6 }
 0x3b0   : > { %v12659_v58 = vunpack.i.h.bf16 %v12657_v43  ;;  %v12658_v55 = vunpack.i.l.bf16 %v12657_v43  ;;  %v12662_v24 = vpop.permute.xlu0 %12661  ;;  %4183 = vmatprep.mubr.f32.mxu1 %v3855_v54  ;;  %v4341_v57 = vadd.f32 %v15643_v3, %v4116_v32 }
 0x3b1   : > { %v12664_v34 = vunpack.i.h.bf16 %v12662_v24  ;;  %v12663_v18 = vunpack.i.l.bf16 %v12662_v24  ;;  %4184 = vmatmul.mubr.f32.gmra.mrb[48].mxu1 %v3759_v25  ;;  %v4120_v2 = vpop.f32.mrb[22].mxu1 }
 0x3b2   : > { %v3792_v14 = vsel %vm457_vm3, %v15445_v19, %v12658_v55  ;;  %v3695_v56 = vsel %vm457_vm3, %v2638_v37, %v12659_v58  ;;  %v4459_v27 = vmax.f32 %v4341_v57, 0.0  ;;  %v4121_v8 = vadd.f32 %v15581_v53, %v4120_v2  ;;  %v4122_v50 = vpop.f32.mrb[23].mxu1 }
 0x3b3   : > { %v12667_v4 = vpop.permute.xlu1 %12666  ;;  %v15828_v3 = vld [vmem:[#allocation4 + $0x21] sm:$0xff]  ;;  %v3824_v59 = vsel %vm522_vm14, %v3792_v14, %v12663_v18  ;;  %v3727_v36 = vsel %vm522_vm14, %v3695_v56, %v12664_v34  ;;  %v4534_v6 = vld [vmem:[#allocation3 + $0x7a] ss:$2 sm:$0xff] }
 0x3b4   : > { %v12669_v51 = vunpack.i.h.bf16 %v12667_v4  ;;  %v12668_v20 = vunpack.i.l.bf16 %v12667_v4  ;;  %v15830_v1 = vld [vmem:[#allocation4 + $0x20] sm:$0xff]  ;;  %4491 = vst.msk [vmem:[#allocation3 + $0x91] sm:$0xff] %vm457_vm3, %v4459_v27  ;;  %v12770_v19 = vpack.i.bf16 %v15826_v39, %v15828_v3  ;;  %v4346_v22 = vadd.f32 %v15639_v45, %v4121_v8  ;;  %v4518_v45 = vld [vmem:[#allocation3 + $0x79] ss:$2 sm:$0xff]  ;;  %v12672_v32 = vpop.permute.xlu0 %12671 }
 0x3b5   : > { %v12765_v5 = vpack.i.bf16 %v4626_v21, %v15830_v1  ;;  %v15841_v31 = vld [vmem:[#allocation4 + $0x22] sm:$0xff]  ;;  %v4579_v7 = vmax.f32 %v4518_v45, %v4534_v6  ;;  %v12674_v25 = vunpack.i.h.bf16 %v12672_v32  ;;  %v12673_v58 = vunpack.i.l.bf16 %v12672_v32 }
 0x3b6   : > { %v3856_v44 = vsel %vm3734_vm15, %v3824_v59, %v12668_v20  ;;  %v3760_v13 = vsel %vm3734_vm15, %v3727_v36, %v12669_v51  ;;  %12771 = vrot.lane.b32.xlu0 %v12770_v19, %s13432_s15  ;;  %v4460_v15 = vmax.f32 %v4346_v22, 0.0  ;;  %v12775_v23 = vpack.i.bf16 %v15845_v48, %v15841_v31  ;;  %v2639_v21 = vld [vmem:[#allocation3 + $0x138] sm:$0xff] }
 0x3b7   : > { %12766 = vrot.lane.b32.xlu1 %v12765_v5, %s13431_s19  ;;  %4188 = vmatprep.mubr.f32.mxu1 %v3856_v44  ;;  %v3793_v8 = vsel %vm457_vm3, %v15480_v30, %v12673_v58  ;;  %v3696_v50 = vsel %vm457_vm3, %v2639_v21, %v12674_v25 }
 0x3b8   : > { %4189 = vmatmul.mubr.f32.gmra.mrb[50].mxu1 %v3760_v13  ;;  %4492 = vst.msk [vmem:[#allocation3 + $0x99] sm:$0xff] %vm457_vm3, %v4460_v15 }
 0x3bb   : > { %12776 = vrot.lane.b32.xlu1 %v12775_v23, %s13429_s18 }
 0x3bf   : > { %v4550_v28 = vld [vmem:[#allocation3 + $0x91] ss:$2 sm:$0xff]  ;;  %v4566_v52 = vld [vmem:[#allocation3 + $0x92] ss:$2 sm:$0xff] }
 0x3c0   : > { %v4587_v11 = vmax.f32 %v4550_v28, %v4566_v52  ;;  %v2640_v52 = vld [vmem:[#allocation3 + $0x140] sm:$0xff] }
 0x3c2   : > { %v4595_v16 = vmax.f32 %v4579_v7, %v4587_v11 }
 0x3c4   : > { %v4125_v61 = vpop.f32.mrb[24].mxu1  ;;  %4603 = vst.msk [vmem:[#allocation4 + $0x31] sm:$0xff] %vm457_vm3, %v4595_v16 }
 0x3c5   : > { %v4126_v35 = vadd.f32 %v15581_v53, %v4125_v61  ;;  %v4127_v43 = vpop.f32.mrb[25].mxu1 }
 0x3c7   : > { %v4351_v54 = vadd.f32 %v15652_v26, %v4126_v35 }
 0x3c9   : > { %v4461_v55 = vmax.f32 %v4351_v54, 0.0 }
 0x3cb   : > { %v12677_v24 = vpop.permute.xlu1 %12676  ;;  %4493 = vst.msk [vmem:[#allocation3 + $0xa9] sm:$0xff] %vm457_vm3, %v4461_v55  ;;  %v15855_v57 = vpop.f32.mrb[52].mxu0  ;;  %v15859_v4 = vld [vmem:[#allocation4 + $0x30] sm:$0xff] }
 0x3cc   : > { %v12679_v34 = vunpack.i.h.bf16 %v12677_v24  ;;  %v12678_v18 = vunpack.i.l.bf16 %v12677_v24  ;;  %v12682_v37 = vpop.permute.xlu0 %12681  ;;  %v4130_v27 = vpop.f32.mrb[26].mxu1  ;;  %v15861_v26 = vld [vmem:[#allocation4 + $0x31] sm:$0xff]  ;;  %v12780_v19 = vpack.i.bf16 %v15752_v46, %v15859_v4 }
 0x3cd   : > { %v12684_v14 = vunpack.i.h.bf16 %v12682_v37  ;;  %v12683_v56 = vunpack.i.l.bf16 %v12682_v37  ;;  %v15857_v2 = vpop.f32.mrb[53].mxu0  ;;  %v4131_v51 = vadd.f32 %v15581_v53, %v4130_v27  ;;  %v4132_v20 = vpop.f32.mrb[27].mxu1  ;;  %v12785_v5 = vpack.i.bf16 %v15830_v1, %v15861_v26  ;;  %v15874_v13 = vld [vmem:[#allocation4 + $0x32] sm:$0xff] }
 0x3ce   : > { %v3825_v59 = vsel %vm522_vm14, %v3793_v8, %v12678_v18  ;;  %v3728_v44 = vsel %vm522_vm14, %v3696_v50, %v12679_v34  ;;  %12781 = vrot.lane.b32.xlu0 %v12780_v19, %s13431_s19  ;;  %v12790_v11 = vpack.i.bf16 %v15828_v3, %v15874_v13 }
 0x3cf   : > { %v12687_v36 = vpop.permute.xlu1 %12686  ;;  %v3857_v22 = vsel %vm3734_vm15, %v3825_v59, %v12683_v56  ;;  %v4356_v30 = vadd.f32 %v15647_v10, %v4131_v51  ;;  %12786 = vrot.lane.b32.xlu1 %v12785_v5, %s13432_s15  ;;  %v3761_v45 = vsel %vm3734_vm15, %v3728_v44, %v12684_v14 }
 0x3d0   : > { %v12689_v15 = vunpack.i.h.bf16 %v12687_v36  ;;  %v12688_v46 = vunpack.i.l.bf16 %v12687_v36  ;;  %v12692_v23 = vpop.permute.xlu0 %12691  ;;  %4193 = vmatprep.mubr.f32.mxu1 %v3857_v22 }
 0x3d1   : > { %v12694_v6 = vunpack.i.h.bf16 %v12692_v23  ;;  %v12693_v28 = vunpack.i.l.bf16 %v12692_v23  ;;  %v4462_v7 = vmax.f32 %v4356_v30, 0.0  ;;  %4194 = vmatmul.mubr.f32.gmra.mrb[52].mxu1 %v3761_v45 }
 0x3d2   : > { %v3794_v10 = vsel %vm457_vm3, %v15502_v33, %v12688_v46  ;;  %v3697_v16 = vsel %vm457_vm3, %v2640_v52, %v12689_v15  ;;  %12791 = vrot.lane.b32.xlu0 %v12790_v11, %s13429_s18 }
 0x3d3   : > { %v12697_v61 = vpop.permute.xlu1 %12696  ;;  %4494 = vst.msk [vmem:[#allocation3 + $0xb1] sm:$0xff] %vm457_vm3, %v4462_v7  ;;  %v3826_v43 = vsel %vm522_vm14, %v3794_v10, %v12693_v28  ;;  %v3729_v54 = vsel %vm522_vm14, %v3697_v16, %v12694_v6  ;;  %v13411_v10 = vld [vmem:[#allocation3 + $0x158] sm:$0xff] }
 0x3d4   : > { %v12699_v32 = vunpack.i.h.bf16 %v12697_v61  ;;  %v12698_v35 = vunpack.i.l.bf16 %v12697_v61  ;;  %v12702_v33 = vpop.permute.xlu0 %12701 }
 0x3d5   : > { %v12704_v24 = vunpack.i.h.bf16 %v12702_v33  ;;  %v12703_v34 = vunpack.i.l.bf16 %v12702_v33 }
 0x3d6   : > { %v3858_v25 = vsel %vm3734_vm15, %v3826_v43, %v12698_v35  ;;  %v3762_v58 = vsel %vm3734_vm15, %v3729_v54, %v12699_v32 }
 0x3d7   : > { %4198 = vmatprep.mubr.f32.mxu1 %v3858_v25  ;;  %v3795_v19 = vsel %vm457_vm3, %v15532_v47, %v12703_v34  ;;  %v3698_v5 = vsel %vm457_vm3, %v15478_v49, %v12704_v24 }
 0x3d8   : > { %4199 = vmatmul.mubr.f32.gmra.mrb[54].mxu1 %v3762_v58 }
 0x3e4   : > { %v4135_v55 = vpop.f32.mrb[28].mxu1 }
 0x3e5   : > { %v4136_v18 = vadd.f32 %v15581_v53, %v4135_v55  ;;  %v4137_v37 = vpop.f32.mrb[29].mxu1 }
 0x3e7   : > { %v4361_v21 = vadd.f32 %v15663_v62, %v4136_v18 }
 0x3e8   : > { %v12707_v14 = vpop.permute.xlu1 %12706 }
 0x3e9   : > { %v12712_v56 = vpop.permute.xlu0 %12711  ;;  %v12709_v27 = vunpack.i.h.bf16 %v12707_v14  ;;  %v12708_v8 = vunpack.i.l.bf16 %v12707_v14  ;;  %v4463_v20 = vmax.f32 %v4361_v21, 0.0 }
 0x3ea   : > { %v12714_v50 = vunpack.i.h.bf16 %v12712_v56  ;;  %v12713_v51 = vunpack.i.l.bf16 %v12712_v56  ;;  %v15897_v59 = vpop.f32.mrb[54].mxu0 }
 0x3eb   : > { %v3827_v36 = vsel %vm522_vm14, %v3795_v19, %v12708_v8  ;;  %v3730_v22 = vsel %vm522_vm14, %v3698_v5, %v12709_v27  ;;  %4495 = vst.msk [vmem:[#allocation3 + $0xc1] sm:$0xff] %vm457_vm3, %v4463_v20  ;;  %v4140_v62 = vpop.f32.mrb[30].mxu1  ;;  %v15902_v44 = vpop.f32.mrb[55].mxu0  ;;  %v4536_v20 = vld [vmem:[#allocation3 + $0xaa] ss:$2 sm:$0xff] }
 0x3ec   : > { %v3859_v30 = vsel %vm3734_vm15, %v3827_v36, %v12713_v51  ;;  %v3763_v15 = vsel %vm3734_vm15, %v3730_v22, %v12714_v50  ;;  %v4141_v47 = vadd.f32 %v15581_v53, %v4140_v62  ;;  %v12717_v46 = vpop.permute.xlu1 %12716  ;;  %v4142_v6 = vpop.f32.mrb[31].mxu1  ;;  %v4520_v51 = vld [vmem:[#allocation3 + $0xa9] ss:$2 sm:$0xff] }
 0x3ed   : > { %v12722_v23 = vpop.permute.xlu0 %12721  ;;  %4203 = vmatprep.mubr.f32.mxu1 %v3859_v30  ;;  %v12719_v49 = vunpack.i.h.bf16 %v12717_v46  ;;  %v12718_v45 = vunpack.i.l.bf16 %v12717_v46 }
 0x3ee   : > { %4204 = vmatmul.mubr.f32.gmra.mrb[56].mxu1 %v3763_v15  ;;  %v4366_v28 = vadd.f32 %v15659_v9, %v4141_v47  ;;  %v12724_v52 = vunpack.i.h.bf16 %v12722_v23  ;;  %v12723_v7 = vunpack.i.l.bf16 %v12722_v23 }
 0x3ef   : > { %v3796_v11 = vsel %vm457_vm3, %v15554_v40, %v12718_v45  ;;  %v3699_v16 = vsel %vm457_vm3, %v13411_v10, %v12719_v49 }
 0x3f0   : > { %v4464_v61 = vmax.f32 %v4366_v28, 0.0  ;;  %v12727_v32 = vpop.permute.xlu1 %12726  ;;  %v3828_v33 = vsel %vm522_vm14, %v3796_v11, %v12723_v7  ;;  %v3731_v9 = vsel %vm522_vm14, %v3699_v16, %v12724_v52 }
 0x3f1   : > { %v12732_v35 = vpop.permute.xlu0 %12731  ;;  %v12729_v43 = vunpack.i.h.bf16 %v12727_v32  ;;  %v12728_v54 = vunpack.i.l.bf16 %v12727_v32 }
 0x3f2   : > { %4496 = vst.msk [vmem:[#allocation3 + $0xc9] sm:$0xff] %vm457_vm3, %v4464_v61  ;;  %v12734_v25 = vunpack.i.h.bf16 %v12732_v35  ;;  %v12733_v58 = vunpack.i.l.bf16 %v12732_v35 }
 0x3f3   : > { %v3860_v55 = vsel %vm3734_vm15, %v3828_v33, %v12728_v54  ;;  %v3764_v40 = vsel %vm3734_vm15, %v3731_v9, %v12729_v43 }
 0x3f4   : > { %v12737_v24 = vpop.permute.xlu1 %12736  ;;  %4208 = vmatprep.mubr.f32.mxu1 %v3860_v55  ;;  %v3797_v56 = vsel %vm457_vm3, %v15592_v42, %v12733_v58  ;;  %v3700_v27 = vsel %vm457_vm3, %v15530_v12, %v12734_v25  ;;  %v4580_v12 = vmax.f32 %v4520_v51, %v4536_v20 }
 0x3f5   : > { %v12742_v34 = vpop.permute.xlu0 %12741  ;;  %v12739_v18 = vunpack.i.h.bf16 %v12737_v24  ;;  %v12738_v37 = vunpack.i.l.bf16 %v12737_v24  ;;  %4209 = vmatmul.mubr.f32.gmra.mrb[58].mxu1 %v3764_v40 }
 0x3f6   : > { %v12744_v21 = vunpack.i.h.bf16 %v12742_v34  ;;  %v12743_v14 = vunpack.i.l.bf16 %v12742_v34 }
 0x3f7   : > { %v3829_v8 = vsel %vm522_vm14, %v3797_v56, %v12738_v37  ;;  %v3732_v50 = vsel %vm522_vm14, %v3700_v27, %v12739_v18 }
 0x3f8   : > { %v12747_v19 = vpop.permute.xlu1 %12746  ;;  %v3861_v36 = vsel %vm3734_vm15, %v3829_v8, %v12743_v14  ;;  %v3765_v22 = vsel %vm3734_vm15, %v3732_v50, %v12744_v21  ;;  %v4610_v50 = vld [vmem:[#allocation4] sm:$0xff] }
 0x3f9   : > { %v12752_v5 = vpop.permute.xlu0 %12751  ;;  %v12749_v62 = vunpack.i.h.bf16 %v12747_v19  ;;  %v12748_v30 = vunpack.i.l.bf16 %v12747_v19  ;;  %4213 = vmatprep.mubr.f32.mxu1 %v3861_v36  ;;  %v4552_v15 = vld [vmem:[#allocation3 + $0xc1] ss:$2 sm:$0xff]  ;;  %v4568_v42 = vld [vmem:[#allocation3 + $0xc2] ss:$2 sm:$0xff] }
 0x3fa   : > { %v12754_v47 = vunpack.i.h.bf16 %v12752_v5  ;;  %v12753_v46 = vunpack.i.l.bf16 %v12752_v5  ;;  %4214 = vmatmul.mubr.f32.gmra.mrb[60].mxu1 %v3765_v22  ;;  %v4588_v23 = vmax.f32 %v4552_v15, %v4568_v42 }
 0x3fb   : > { %v3798_v49 = vsel %vm457_vm3, %v15624_v38, %v12748_v30  ;;  %v3701_v45 = vsel %vm457_vm3, %v15547_v60, %v12749_v62 }
 0x3fc   : > { %v12757_v6 = vpop.permute.xlu1 %12756  ;;  %v4596_v28 = vmax.f32 %v4580_v12, %v4588_v23  ;;  %v3830_v11 = vsel %vm522_vm14, %v3798_v49, %v12753_v46  ;;  %v3733_v10 = vsel %vm522_vm14, %v3701_v45, %v12754_v47  ;;  %v15972_v12 = vld [vmem:[%s19109_s11 + $0x1] ss:$0 sm:$0xff] }
 0x3fd   : > { %v12759_v52 = vunpack.i.h.bf16 %v12757_v6  ;;  %v12758_v7 = vunpack.i.l.bf16 %v12757_v6 }
 0x3fe   : > { %4604 = vst.msk [vmem:[#allocation4 + $0x41] sm:$0xff] %vm457_vm3, %v4596_v28 }
 0x3ff   : > { %v3862_v16 = vsel %vm3734_vm15, %v3830_v11, %v12758_v7  ;;  %v3766_v61 = vsel %vm3734_vm15, %v3733_v10, %v12759_v52 }
 0x400   : > { %4218 = vmatprep.mubr.f32.mxu1 %v3862_v16 }
 0x401   : > { %4219 = vmatmul.mubr.f32.gmra.mrb[62].mxu1 %v3766_v61 }
 0x405   : > { %v4145_v38 = vpop.f32.mrb[32].mxu1  ;;  %v15934_v35 = vld [vmem:[#allocation4 + $0x40] sm:$0xff] }
 0x406   : > { %v4146_v32 = vadd.f32 %v15581_v53, %v4145_v38  ;;  %v4147_v60 = vpop.f32.mrb[33].mxu1  ;;  %v15936_v43 = vld [vmem:[#allocation4 + $0x41] sm:$0xff]  ;;  %v12795_v54 = vpack.i.bf16 %v15841_v31, %v15934_v35 }
 0x407   : > { %v12800_v25 = vpack.i.bf16 %v15859_v4, %v15936_v43  ;;  %v15943_v33 = vld [vmem:[#allocation4 + $0x42] sm:$0xff] }
 0x408   : > { %v4371_v58 = vadd.f32 %v15672_v29, %v4146_v32  ;;  %12796 = vrot.lane.b32.xlu1 %v12795_v54, %s13431_s19  ;;  %v12805_v40 = vpack.i.bf16 %v15861_v26, %v15943_v33 }
 0x409   : > { %12801 = vrot.lane.b32.xlu0 %v12800_v25, %s13432_s15 }
 0x40a   : > { %v4465_v9 = vmax.f32 %v4371_v58, 0.0  ;;  %v15947_v55 = vpop.f32.mrb[56].mxu0 }
 0x40b   : > { %v15952_v24 = vpop.f32.mrb[57].mxu0 }
 0x40c   : > { %4497 = vst.msk [vmem:[#allocation3 + $0xd9] sm:$0xff] %vm457_vm3, %v4465_v9  ;;  %v4150_v31 = vpop.f32.mrb[34].mxu1  ;;  %12806 = vrot.lane.b32.xlu1 %v12805_v40, %s13429_s18 }
 0x40d   : > { %v4151_v34 = vadd.f32 %v15581_v53, %v4150_v31  ;;  %v4152_v29 = vpop.f32.mrb[35].mxu1 }
 0x40f   : > { %v4376_v18 = vadd.f32 %v15670_v17, %v4151_v34 }
 0x410   : > { %v12762_v21 = vpop.permute.xlu0 %12761 }
 0x411   : > { %v4466_v37 = vmax.f32 %v4376_v18, 0.0  ;;  %v12764_v8 = vunpack.i.h.bf16 %v12762_v21  ;;  %v12763_v51 = vunpack.i.l.bf16 %v12762_v21 }
 0x413   : > { %4498 = vst.msk [vmem:[#allocation3 + $0xe1] sm:$0xff] %vm457_vm3, %v4466_v37  ;;  %v4875_v17 = vsel %vm457_vm3, %v4610_v50, %v12764_v8  ;;  %v4899_v46 = vsel %vm457_vm3, %v15845_v48, %v12763_v51 }
 0x41a   : > { %v4522_v7 = vld [vmem:[#allocation3 + $0xd9] ss:$2 sm:$0xff]  ;;  %v4538_v11 = vld [vmem:[#allocation3 + $0xda] ss:$2 sm:$0xff] }
 0x41b   : > { %v4581_v61 = vmax.f32 %v4522_v7, %v4538_v11 }
 0x425   : > { %v4155_v14 = vpop.f32.mrb[36].mxu1 }
 0x426   : > { %v4156_v56 = vadd.f32 %v15581_v53, %v4155_v14  ;;  %v4157_v27 = vpop.f32.mrb[37].mxu1 }
 0x428   : > { %v4381_v20 = vadd.f32 %v15811_v41, %v4156_v56  ;;  %v12772_v19 = vpop.permute.xlu0 %12771 }
 0x429   : > { %v12767_v5 = vpop.permute.xlu1 %12766  ;;  %v12774_v22 = vunpack.i.h.bf16 %v12772_v19  ;;  %v12773_v62 = vunpack.i.l.bf16 %v12772_v19 }
 0x42a   : > { %v4467_v36 = vmax.f32 %v4381_v20, 0.0  ;;  %v12769_v30 = vunpack.i.h.bf16 %v12767_v5  ;;  %v12768_v15 = vunpack.i.l.bf16 %v12767_v5  ;;  %v15961_v42 = vpop.f32.mrb[58].mxu0 }
 0x42b   : > { %v15964_v47 = vpop.f32.mrb[59].mxu0 }
 0x42c   : > { %4499 = vst.msk [vmem:[#allocation3 + $0xf1] sm:$0xff] %vm457_vm3, %v4467_v36  ;;  %v4160_v53 = vpop.f32.mrb[38].mxu1  ;;  %v4883_v41 = vsel %vm522_vm14, %v4875_v17, %v12769_v30  ;;  %v4907_v45 = vsel %vm522_vm14, %v4899_v46, %v12768_v15 }
 0x42d   : > { %v4161_v23 = vadd.f32 %v15972_v12, %v4160_v53  ;;  %v4162_v49 = vpop.f32.mrb[39].mxu1  ;;  %v4891_v6 = vsel %vm3734_vm15, %v4883_v41, %v12774_v22  ;;  %v4915_v28 = vsel %vm3734_vm15, %v4907_v45, %v12773_v62  ;;  %v12777_v32 = vpop.permute.xlu1 %12776 }
 0x42e   : > { %5051 = vmatprep.mubr.f32.mxu0 %v4915_v28  ;;  %v12779_v54 = vunpack.i.h.bf16 %v12777_v32  ;;  %v12778_v25 = vunpack.i.l.bf16 %v12777_v32 }
 0x42f   : > { %v4386_v52 = vadd.f32 %v15800_v63, %v4161_v23  ;;  %5052 = vmatmul.mubr.f32.vlgmr.msra.gmra.mrb[64].mxu0 %v4891_v6 }
 0x430   : > { %v4900_v29 = vsel %vm457_vm3, %v15828_v3, %v12778_v25  ;;  %v4876_v18 = vsel %vm457_vm3, %v15826_v39, %v12779_v54 }
 0x431   : > { %v4468_v48 = vmax.f32 %v4386_v52, 0.0 }
 0x433   : > { %4500 = vst.msk [vmem:[#allocation3 + $0xf9] sm:$0xff] %vm457_vm3, %v4468_v48 }
 0x43a   : > { %v4554_v10 = vld [vmem:[#allocation3 + $0xf1] ss:$2 sm:$0xff]  ;;  %v4570_v16 = vld [vmem:[#allocation3 + $0xf2] ss:$2 sm:$0xff] }
 0x43b   : > { %v4589_v38 = vmax.f32 %v4554_v10, %v4570_v16 }
 0x43d   : > { %v4597_v60 = vmax.f32 %v4581_v61, %v4589_v38 }
 0x43f   : > { %4605 = vst.msk [vmem:[#allocation4 + $0x51] sm:$0xff] %vm457_vm3, %v4597_v60 }
 0x440   : > { %v12782_v58 = vpop.permute.xlu0 %12781 }
 0x441   : > { %v12787_v9 = vpop.permute.xlu1 %12786  ;;  %v12784_v63 = vunpack.i.h.bf16 %v12782_v58  ;;  %v12783_v40 = vunpack.i.l.bf16 %v12782_v58 }
 0x442   : > { %v12789_v31 = vunpack.i.h.bf16 %v12787_v9  ;;  %v12788_v34 = vunpack.i.l.bf16 %v12787_v9 }
 0x443   : > { %v4908_v21 = vsel %vm522_vm14, %v4900_v29, %v12783_v40  ;;  %v4884_v14 = vsel %vm522_vm14, %v4876_v18, %v12784_v63 }
 0x444   : > { %v4916_v8 = vsel %vm3734_vm15, %v4908_v21, %v12788_v34  ;;  %v4892_v50 = vsel %vm3734_vm15, %v4884_v14, %v12789_v31  ;;  %v12792_v10 = vpop.permute.xlu0 %12791 }
 0x445   : > { %v4165_v37 = vpop.f32.mrb[40].mxu1  ;;  %5056 = vmatprep.mubr.f32.mxu0 %v4916_v8  ;;  %v12794_v38 = vunpack.i.h.bf16 %v12792_v10  ;;  %v12793_v32 = vunpack.i.l.bf16 %v12792_v10 }
 0x446   : > { %v4166_v56 = vadd.f32 %v15972_v12, %v4165_v37  ;;  %v4167_v27 = vpop.f32.mrb[41].mxu1  ;;  %v15990_v51 = vld [vmem:[#allocation4 + $0x51] sm:$0xff]  ;;  %5057 = vmatmul.mubr.f32.gmra.mrb[66].mxu0 %v4892_v50 }
 0x447   : > { %v15992_v20 = vld [vmem:[#allocation4 + $0x50] sm:$0xff]  ;;  %v12815_v39 = vpack.i.bf16 %v15934_v35, %v15990_v51  ;;  %v15999_v5 = vpop.f32.mrb[60].mxu0  ;;  %v4877_v29 = vsel %vm457_vm3, %v15830_v1, %v12794_v38 }
 0x448   : > { %v12810_v3 = vpack.i.bf16 %v15874_v13, %v15992_v20  ;;  %v4391_v19 = vadd.f32 %v15857_v2, %v4166_v56  ;;  %v16001_v36 = vld [vmem:[#allocation4 + $0x52] sm:$0xff]  ;;  %v16005_v22 = vpop.f32.mrb[61].mxu0 }
 0x449   : > { %12816 = vrot.lane.b32.xlu1 %v12815_v39, %s13432_s15  ;;  %v12820_v30 = vpack.i.bf16 %v15936_v43, %v16001_v36 }
 0x44a   : > { %12811 = vrot.lane.b32.xlu0 %v12810_v3, %s13431_s19  ;;  %v4469_v62 = vmax.f32 %v4391_v19, 0.0 }
 0x44b   : > { %v16013_v53 = vpop.f32.mrb[62].mxu0 }
 0x44c   : > { %4501 = vst.msk [vmem:[#allocation3 + $0x109] sm:$0xff] %vm457_vm3, %v4469_v62  ;;  %v4170_v13 = vpop.f32.mrb[42].mxu1  ;;  %v16015_v41 = vpop.f32.mrb[63].mxu0 }
 0x44d   : > { %v4171_v2 = vadd.f32 %v15972_v12, %v4170_v13  ;;  %v4172_v17 = vpop.f32.mrb[43].mxu1 }
 0x44e   : > { %12821 = vrot.lane.b32.xlu0 %v12820_v30, %s13429_s18 }
 0x44f   : > { %v4396_v15 = vadd.f32 %v15855_v57, %v4171_v2 }
 0x451   : > { %v4470_v46 = vmax.f32 %v4396_v15, 0.0 }
 0x453   : > { %4502 = vst.msk [vmem:[#allocation3 + $0x111] sm:$0xff] %vm457_vm3, %v4470_v46 }
 0x45a   : > { %v4524_v16 = vld [vmem:[#allocation3 + $0x109] ss:$2 sm:$0xff]  ;;  %v4540_v61 = vld [vmem:[#allocation3 + $0x10a] ss:$2 sm:$0xff] }
 0x45b   : > { %v4582_v9 = vmax.f32 %v4524_v16, %v4540_v61 }
 0x464   : > { %v4175_v23 = vpop.f32.mrb[44].mxu1 }
 0x465   : > { %v4176_v49 = vadd.f32 %v15972_v12, %v4175_v23  ;;  %v4177_v45 = vpop.f32.mrb[45].mxu1 }
 0x467   : > { %v4401_v6 = vadd.f32 %v15902_v44, %v4176_v49 }
 0x469   : > { %v4471_v28 = vmax.f32 %v4401_v6, 0.0 }
 0x46b   : > { %4503 = vst.msk [vmem:[#allocation3 + $0x121] sm:$0xff] %vm457_vm3, %v4471_v28  ;;  %v4180_v52 = vpop.f32.mrb[46].mxu1 }
 0x46c   : > { %v4181_v48 = vadd.f32 %v15972_v12, %v4180_v52  ;;  %v4182_v57 = vpop.f32.mrb[47].mxu1 }
 0x46e   : > { %v4406_v7 = vadd.f32 %v15897_v59, %v4181_v48  ;;  %v4901_v59 = vsel %vm457_vm3, %v15861_v26, %v12793_v32 }
 0x470   : > { %v4472_v11 = vmax.f32 %v4406_v7, 0.0 }
 0x472   : > { %4504 = vst.msk [vmem:[#allocation3 + $0x129] sm:$0xff] %vm457_vm3, %v4472_v11 }
 0x479   : > { %v4556_v60 = vld [vmem:[#allocation3 + $0x121] ss:$2 sm:$0xff]  ;;  %v4572_v54 = vld [vmem:[#allocation3 + $0x122] ss:$2 sm:$0xff] }
 0x47a   : > { %v4590_v44 = vmax.f32 %v4556_v60, %v4572_v54  ;;  %v12797_v25 = vpop.permute.xlu1 %12796 }
 0x47b   : > { %v12802_v58 = vpop.permute.xlu0 %12801  ;;  %v12799_v63 = vunpack.i.h.bf16 %v12797_v25  ;;  %v12798_v40 = vunpack.i.l.bf16 %v12797_v25 }
 0x47c   : > { %v12804_v31 = vunpack.i.h.bf16 %v12802_v58  ;;  %v12803_v34 = vunpack.i.l.bf16 %v12802_v58  ;;  %v4598_v18 = vmax.f32 %v4582_v9, %v4590_v44 }
 0x47d   : > { %v4909_v37 = vsel %vm522_vm14, %v4901_v59, %v12798_v40  ;;  %v4885_v21 = vsel %vm522_vm14, %v4877_v29, %v12799_v63 }
 0x47e   : > { %v4917_v14 = vsel %vm3734_vm15, %v4909_v37, %v12803_v34  ;;  %v4893_v56 = vsel %vm3734_vm15, %v4885_v21, %v12804_v31  ;;  %4606 = vst.msk [vmem:[#allocation4 + $0x61] sm:$0xff] %vm457_vm3, %v4598_v18 }
 0x47f   : > { %5061 = vmatprep.mubr.f32.mxu0 %v4917_v14 }
 0x480   : > { %5062 = vmatmul.mubr.f32.gmra.mrb[68].mxu0 %v4893_v56 }
 0x484   : > { %v4185_v27 = vpop.f32.mrb[48].mxu1 }
 0x485   : > { %v4186_v8 = vadd.f32 %v15972_v12, %v4185_v27  ;;  %v4187_v26 = vpop.f32.mrb[49].mxu1  ;;  %v16034_v50 = vld [vmem:[#allocation4 + $0x60] sm:$0xff] }
 0x486   : > { %v16036_v1 = vld [vmem:[#allocation4 + $0x61] sm:$0xff]  ;;  %v12825_v3 = vpack.i.bf16 %v15943_v33, %v16034_v50 }
 0x487   : > { %v4411_v39 = vadd.f32 %v15952_v24, %v4186_v8  ;;  %v12830_v19 = vpack.i.bf16 %v15992_v20, %v16036_v1  ;;  %v16043_v62 = vld [vmem:[#allocation4 + $0x62] sm:$0xff] }
 0x488   : > { %12826 = vrot.lane.b32.xlu1 %v12825_v3, %s13431_s19  ;;  %v12835_v13 = vpack.i.bf16 %v15990_v51, %v16043_v62 }
 0x489   : > { %v4473_v30 = vmax.f32 %v4411_v39, 0.0  ;;  %12831 = vrot.lane.b32.xlu0 %v12830_v19, %s13432_s15 }
 0x48b   : > { %4505 = vst.msk [vmem:[#allocation3 + $0x139] sm:$0xff] %vm457_vm3, %v4473_v30  ;;  %v4190_v2 = vpop.f32.mrb[50].mxu1 }
 0x48c   : > { %v4191_v24 = vadd.f32 %v15972_v12, %v4190_v2  ;;  %v4192_v17 = vpop.f32.mrb[51].mxu1  ;;  %12836 = vrot.lane.b32.xlu1 %v12835_v13, %s13429_s18 }
 0x48e   : > { %v4416_v15 = vadd.f32 %v15947_v55, %v4191_v24  ;;  %v12807_v55 = vpop.permute.xlu1 %12806 }
 0x48f   : > { %v12809_v61 = vunpack.i.h.bf16 %v12807_v55  ;;  %v12808_v38 = vunpack.i.l.bf16 %v12807_v55 }
 0x490   : > { %v4474_v46 = vmax.f32 %v4416_v15, 0.0 }
 0x491   : > { %v4878_v31 = vsel %vm457_vm3, %v15859_v4, %v12809_v61 }
 0x492   : > { %4506 = vst.msk [vmem:[#allocation3 + $0x141] sm:$0xff] %vm457_vm3, %v4474_v46 }
 0x499   : > { %v4526_v10 = vld [vmem:[#allocation3 + $0x139] ss:$2 sm:$0xff]  ;;  %v4542_v16 = vld [vmem:[#allocation3 + $0x13a] ss:$2 sm:$0xff] }
 0x49a   : > { %v4583_v25 = vmax.f32 %v4526_v10, %v4542_v16 }
 0x4a4   : > { %v4195_v23 = vpop.f32.mrb[52].mxu1 }
 0x4a5   : > { %v4196_v49 = vadd.f32 %v15972_v12, %v4195_v23  ;;  %v4197_v45 = vpop.f32.mrb[53].mxu1 }
 0x4a6   : > { %v4955_v45 = vld [vmem:[%s19101_s3 + $0x100] sm:$0xff] }
 0x4a7   : > { %v4421_v6 = vadd.f32 %v15964_v47, %v4196_v49 }
 0x4a9   : > { %v4475_v28 = vmax.f32 %v4421_v6, 0.0 }
 0x4ab   : > { %v4200_v52 = vpop.f32.mrb[54].mxu1  ;;  %4507 = vst.msk [vmem:[#allocation3 + $0x151] sm:$0xff] %vm457_vm3, %v4475_v28 }
 0x4ac   : > { %v4201_v48 = vadd.f32 %v15972_v12, %v4200_v52  ;;  %v4202_v57 = vpop.f32.mrb[55].mxu1 }
 0x4ad   : > { %v4958_v57 = vld [vmem:[%s19101_s3 + $0x118] sm:$0xff] }
 0x4ae   : > { %v4426_v7 = vadd.f32 %v15961_v42, %v4201_v48  ;;  %v4902_v42 = vsel %vm457_vm3, %v15936_v43, %v12808_v38 }
 0x4b0   : > { %v4476_v11 = vmax.f32 %v4426_v7, 0.0 }
 0x4b2   : > { %4508 = vst.msk [vmem:[#allocation3 + $0x159] sm:$0xff] %vm457_vm3, %v4476_v11 }
 0x4b9   : > { %v4558_v32 = vld [vmem:[#allocation3 + $0x151] ss:$2 sm:$0xff]  ;;  %v4574_v60 = vld [vmem:[#allocation3 + $0x152] ss:$2 sm:$0xff] }
 0x4ba   : > { %v4591_v47 = vmax.f32 %v4558_v32, %v4574_v60 }
 0x4bb   : > { %v12817_v54 = vpop.permute.xlu1 %12816 }
 0x4bc   : > { %v12812_v44 = vpop.permute.xlu0 %12811  ;;  %v12819_v58 = vunpack.i.h.bf16 %v12817_v54  ;;  %v12818_v9 = vunpack.i.l.bf16 %v12817_v54  ;;  %v4599_v34 = vmax.f32 %v4583_v25, %v4591_v47 }
 0x4bd   : > { %v12814_v63 = vunpack.i.h.bf16 %v12812_v44  ;;  %v12813_v40 = vunpack.i.l.bf16 %v12812_v44 }
 0x4be   : > { %4607 = vst.msk [vmem:[#allocation4 + $0x71] sm:$0xff] %vm457_vm3, %v4599_v34 }
 0x4bf   : > { %v4910_v59 = vsel %vm522_vm14, %v4902_v42, %v12813_v40  ;;  %v4886_v29 = vsel %vm522_vm14, %v4878_v31, %v12814_v63  ;;  %v4674_v40 = vld [vmem:[#allocation4 + $0x91] sm:$0xff] }
 0x4c0   : > { %v4918_v18 = vsel %vm3734_vm15, %v4910_v59, %v12818_v9  ;;  %v4894_v37 = vsel %vm3734_vm15, %v4886_v29, %v12819_v58  ;;  %v4666_v58 = vld [vmem:[#allocation4 + $0x90] sm:$0xff]  ;;  %v12822_v42 = vpop.permute.xlu0 %12821 }
 0x4c1   : > { %5066 = vmatprep.mubr.f32.mxu0 %v4918_v18  ;;  %v4205_v21 = vpop.f32.mrb[56].mxu1  ;;  %v12824_v34 = vunpack.i.h.bf16 %v12822_v42  ;;  %v12823_v59 = vunpack.i.l.bf16 %v12822_v42 }
 0x4c2   : > { %5067 = vmatmul.mubr.f32.gmra.mrb[70].mxu0 %v4894_v37  ;;  %v4206_v14 = vadd.f32 %v15972_v12, %v4205_v21  ;;  %v4207_v43 = vpop.f32.mrb[57].mxu1 }
 0x4c4   : > { %v4431_v56 = vadd.f32 %v16005_v22, %v4206_v14 }
 0x4c5   : > { %v16071_v27 = vld [vmem:[#allocation4 + $0x71] sm:$0xff] }
 0x4c6   : > { %v4477_v4 = vmax.f32 %v4431_v56, 0.0  ;;  %v16073_v8 = vld [vmem:[#allocation4 + $0x70] sm:$0xff]  ;;  %v12845_v26 = vpack.i.bf16 %v16034_v50, %v16071_v27  ;;  %v4903_v56 = vsel %vm457_vm3, %v15990_v51, %v12823_v59 }
 0x4c7   : > { %v12840_v39 = vpack.i.bf16 %v16001_v36, %v16073_v8  ;;  %v16080_v3 = vld [vmem:[#allocation4 + $0x72] sm:$0xff] }
 0x4c8   : > { %4509 = vst.msk [vmem:[#allocation3 + $0x169] sm:$0xff] %vm457_vm3, %v4477_v4  ;;  %v4210_v19 = vpop.f32.mrb[58].mxu1  ;;  %12846 = vrot.lane.b32.xlu1 %v12845_v26, %s13432_s15  ;;  %v12850_v13 = vpack.i.bf16 %v16036_v1, %v16080_v3  ;;  %v12865_v63 = vpack.i.bf16 %v16080_v3, %v4666_v58  ;;  %v4879_v4 = vsel %vm457_vm3, %v15934_v35, %v12824_v34 }
 0x4c9   : > { %12841 = vrot.lane.b32.xlu0 %v12840_v39, %s13431_s19  ;;  %v4211_v22 = vadd.f32 %v15972_v12, %v4210_v19  ;;  %v4212_v30 = vpop.f32.mrb[59].mxu1 }
 0x4cb   : > { %v4436_v2 = vadd.f32 %v15999_v5, %v4211_v22  ;;  %v4956_v5 = vld [vmem:[%s19101_s3 + $0x108] sm:$0xff] }
 0x4cc   : > { %v11872_v28 = vpack.c.bf16 %v4956_v5, %v4955_v45 }
 0x4cd   : > { %12851 = vrot.lane.b32.xlu0 %v12850_v13, %s13429_s18  ;;  %v4478_v24 = vmax.f32 %v4436_v2, 0.0  ;;  %v4215_v17 = vpop.f32.mrb[60].mxu1 }
 0x4ce   : > { %v4216_v15 = vadd.f32 %v15972_v12, %v4215_v17  ;;  %v4217_v46 = vpop.f32.mrb[61].mxu1  ;;  %11873 = vmatprep.subr.bf16.mxu0 %v11872_v28 }
 0x4cf   : > { %4510 = vst.msk [vmem:[#allocation3 + $0x171] sm:$0xff] %vm457_vm3, %v4478_v24  ;;  %11875 = vmatpush3.bf16.msra.mxu0 %v11872_v28 }
 0x4d0   : > { %v4441_v23 = vadd.f32 %v16015_v41, %v4216_v15  ;;  %v4957_v41 = vld [vmem:[%s19101_s3 + $0x110] sm:$0xff] }
 0x4d1   : > { %v11876_v7 = vpack.c.bf16 %v4958_v57, %v4957_v41 }
 0x4d2   : > { %v4479_v49 = vmax.f32 %v4441_v23, 0.0 }
 0x4d3   : > { %11877 = vmatprep.subr.bf16.mxu0 %v11876_v7 }
 0x4d4   : > { %4511 = vst.msk [vmem:[#allocation3 + $0x181] sm:$0xff] %vm457_vm3, %v4479_v49  ;;  %v4220_v6 = vpop.f32.mrb[62].mxu1  ;;  %11879 = vmatpush3.bf16.msra.mxu0 %v11876_v7 }
 0x4d5   : > { %v4221_v52 = vadd.f32 %v15972_v12, %v4220_v6  ;;  %v4222_v48 = vpop.f32.mrb[63].mxu1 }
 0x4d6   : > { %v4528_v12 = vld [vmem:[#allocation3 + $0x169] ss:$2 sm:$0xff]  ;;  %v4544_v10 = vld [vmem:[#allocation3 + $0x16a] ss:$2 sm:$0xff] }
 0x4d7   : > { %v4446_v11 = vadd.f32 %v16013_v53, %v4221_v52  ;;  %v4584_v38 = vmax.f32 %v4528_v12, %v4544_v10 }
 0x4d9   : > { %v4480_v55 = vmax.f32 %v4446_v11, 0.0 }
 0x4db   : > { %4512 = vst.msk [vmem:[#allocation3 + $0x189] sm:$0xff] %vm457_vm3, %v4480_v55 }
 0x4e2   : > { %v4560_v16 = vld [vmem:[#allocation3 + $0x181] ss:$2 sm:$0xff]  ;;  %v4576_v61 = vld [vmem:[#allocation3 + $0x182] ss:$2 sm:$0xff] }
 0x4e3   : > { %v4592_v32 = vmax.f32 %v4560_v16, %v4576_v61 }
 0x4e5   : > { %v4600_v60 = vmax.f32 %v4584_v38, %v4592_v32 }
 0x4e7   : > { %4608 = vst.msk [vmem:[#allocation4 + $0x81] sm:$0xff] %vm457_vm3, %v4600_v60 }
 0x4ee   : > { %v4665_v47 = vld [vmem:[#allocation4 + $0x80] sm:$0xff] }
 0x4ef   : > { %v16109_v54 = vld [vmem:[#allocation4 + $0x81] sm:$0xff]  ;;  %v12855_v53 = vpack.i.bf16 %v16043_v62, %v4665_v47  ;;  %v12875_v31 = vpack.i.bf16 %v4665_v47, %v4674_v40 }
 0x4f0   : > { %v12860_v44 = vpack.i.bf16 %v16073_v8, %v16109_v54  ;;  %v16114_v25 = vld [vmem:[#allocation4 + $0x82] sm:$0xff] }
 0x4f1   : > { %12856 = vrot.lane.b32.xlu1 %v12855_v53, %s13431_s19  ;;  %v12870_v9 = vpack.i.bf16 %v16071_v27, %v16114_v25 }
 0x4f2   : > { %12861 = vrot.lane.b32.xlu0 %v12860_v44, %s13432_s15 }
 0x4f5   : > { %12871 = vrot.lane.b32.xlu1 %v12870_v9, %s13429_s18 }
 0x4f6   : > { %12866 = vrot.lane.b32.xlu0 %v12865_v63, %s13431_s19 }
 0x4f9   : > { %12876 = vrot.lane.b32.xlu1 %v12875_v31, %s13432_s15 }
 0x4fa   : > { %v12827_v29 = vpop.permute.xlu1 %12826 }
 0x4fb   : > { %v12832_v18 = vpop.permute.xlu0 %12831  ;;  %v12829_v37 = vunpack.i.h.bf16 %v12827_v29  ;;  %v12828_v21 = vunpack.i.l.bf16 %v12827_v29 }
 0x4fc   : > { %v12834_v14 = vunpack.i.h.bf16 %v12832_v18  ;;  %v12833_v43 = vunpack.i.l.bf16 %v12832_v18 }
 0x4fd   : > { %v4911_v26 = vsel %vm522_vm14, %v4903_v56, %v12828_v21  ;;  %v4887_v39 = vsel %vm522_vm14, %v4879_v4, %v12829_v37 }
 0x4fe   : > { %v4919_v19 = vsel %vm3734_vm15, %v4911_v26, %v12833_v43  ;;  %v4895_v22 = vsel %vm3734_vm15, %v4887_v39, %v12834_v14  ;;  %v12837_v15 = vpop.permute.xlu1 %12836 }
 0x4ff   : > { %5071 = vmatprep.mubr.f32.mxu0 %v4919_v19  ;;  %v12839_v35 = vunpack.i.h.bf16 %v12837_v15  ;;  %v12838_v46 = vunpack.i.l.bf16 %v12837_v15  ;;  %v4675_v19 = vld [vmem:[#allocation4 + $0x22] sm:$0xff] }
 0x500   : > { %5072 = vmatmul.mubr.f32.gmra.mrb[72].mxu0 %v4895_v22 }
 0x501   : > { %v4904_v52 = vsel %vm457_vm3, %v16036_v1, %v12838_v46  ;;  %v4880_v48 = vsel %vm457_vm3, %v15992_v20, %v12839_v35  ;;  %v5465_v46 = vld [vmem:[%s19102_s4 + $0x90] sm:$0xff] }
 0x502   : > { %v10929_v30 = vpop.f32.mrb[64].mxu0 }
 0x503   : > { %v10930_v13 = vpop.f32.mrb[65].mxu0 }
 0x504   : > { %v16132_v2 = vadd.f32 %v10930_v13, %v10929_v30 }
 0x519   : > { %v10932_v24 = vpop.f32.mrb[66].mxu0 }
 0x51a   : > { %v10933_v17 = vpop.f32.mrb[67].mxu0 }
 0x51b   : > { %v16134_v51 = vadd.f32 %v10933_v17, %v10932_v24 }
 0x53a   : > { %v12847_v23 = vpop.permute.xlu1 %12846 }
 0x53b   : > { %v12842_v49 = vpop.permute.xlu0 %12841  ;;  %v12849_v45 = vunpack.i.h.bf16 %v12847_v23  ;;  %v12848_v5 = vunpack.i.l.bf16 %v12847_v23  ;;  %v5466_v23 = vld [vmem:[%s19102_s4 + $0x98] sm:$0xff] }
 0x53c   : > { %v12844_v6 = vunpack.i.h.bf16 %v12842_v49  ;;  %v12843_v28 = vunpack.i.l.bf16 %v12842_v49  ;;  %v5449_v49 = vld [vmem:[%s19102_s4 + $0x10] sm:$0xff] }
 0x53e   : > { %v4912_v41 = vsel %vm522_vm14, %v4904_v52, %v12843_v28  ;;  %v4888_v57 = vsel %vm522_vm14, %v4880_v48, %v12844_v6  ;;  %v5467_v28 = vld [vmem:[%s19102_s4 + $0xa0] sm:$0xff]  ;;  %v5468_v52 = vld [vmem:[%s19102_s4 + $0xa8] sm:$0xff] }
 0x53f   : > { %v4920_v7 = vsel %vm3734_vm15, %v4912_v41, %v12848_v5  ;;  %v4896_v11 = vsel %vm3734_vm15, %v4888_v57, %v12849_v45  ;;  %v12852_v16 = vpop.permute.xlu0 %12851  ;;  %v11884_v45 = vpack.c.bf16 %v5466_v23, %v5465_v46  ;;  %v5450_v5 = vld [vmem:[%s19102_s4 + $0x18] sm:$0xff]  ;;  %v5451_v48 = vld [vmem:[%s19102_s4 + $0x20] sm:$0xff]  ;;  %v11888_v41 = vpack.c.bf16 %v5468_v52, %v5467_v28  ;;  %v5452_v57 = vld [vmem:[%s19102_s4 + $0x28] sm:$0xff] }
 0x540   : > { %5076 = vmatprep.mubr.f32.mxu0 %v4920_v7  ;;  %v12854_v61 = vunpack.i.h.bf16 %v12852_v16  ;;  %v12853_v1 = vunpack.i.l.bf16 %v12852_v16  ;;  %v11886_v6 = vpack.c.bf16 %v5450_v5, %v5449_v49  ;;  %v11890_v7 = vpack.c.bf16 %v5452_v57, %v5451_v48  ;;  %v5461_v46 = vld [vmem:[%s19102_s4 + $0x70] sm:$0xff]  ;;  %v5462_v23 = vld [vmem:[%s19102_s4 + $0x78] sm:$0xff]  ;;  %v5503_v28 = vld [vmem:[%s19102_s4 + $0x1c0] sm:$0xff] }
 0x541   : > { %5077 = vmatmul.mubr.f32.gmra.mrb[74].mxu0 %v4896_v11  ;;  %v5469_v11 = vld [vmem:[%s19102_s4 + $0xb0] sm:$0xff]  ;;  %v5504_v52 = vld [vmem:[%s19102_s4 + $0x1c8] sm:$0xff]  ;;  %v11910_v48 = vpack.c.bf16 %v5462_v23, %v5461_v46 }
 0x542   : > { %v4905_v44 = vsel %vm457_vm3, %v16071_v27, %v12853_v1  ;;  %v4881_v58 = vsel %vm457_vm3, %v16034_v50, %v12854_v61  ;;  %v5454_v61 = vld [vmem:[%s19102_s4 + $0x38] sm:$0xff]  ;;  %v5471_v1 = vld [vmem:[%s19102_s4 + $0xc0] sm:$0xff]  ;;  %v5485_v5 = vld [vmem:[%s19102_s4 + $0x130] sm:$0xff]  ;;  %v11928_v57 = vpack.c.bf16 %v5504_v52, %v5503_v28 }
 0x543   : > { %v5222_v46 = vld [vmem:[#allocation5 + $0x1] sm:$0xff]  ;;  %v5509_v23 = vld [vmem:[%s19102_s4 + $0x1f0] sm:$0xff] }
 0x553   : > { %v10935_v55 = vpop.f32.mrb[68].mxu0 }
 0x554   : > { %v10936_v12 = vpop.f32.mrb[69].mxu0 }
 0x555   : > { %v16144_v10 = vadd.f32 %v10936_v12, %v10935_v55  ;;  %v5470_v55 = vld [vmem:[%s19102_s4 + $0xb8] sm:$0xff]  ;;  %v5453_v12 = vld [vmem:[%s19102_s4 + $0x30] sm:$0xff] }
 0x556   : > { %v11892_v16 = vpack.c.bf16 %v5470_v55, %v5469_v11  ;;  %v5488_v11 = vld [vmem:[%s19102_s4 + $0x148] sm:$0xff] }
 0x563   : > { %v12857_v38 = vpop.permute.xlu1 %12856 }
 0x564   : > { %v12862_v32 = vpop.permute.xlu0 %12861  ;;  %v12859_v20 = vunpack.i.h.bf16 %v12857_v38  ;;  %v12858_v60 = vunpack.i.l.bf16 %v12857_v38  ;;  %v5472_v38 = vld [vmem:[%s19102_s4 + $0xc8] sm:$0xff] }
 0x565   : > { %v12864_v47 = vunpack.i.h.bf16 %v12862_v32  ;;  %v12863_v53 = vunpack.i.l.bf16 %v12862_v32  ;;  %v11894_v32 = vpack.c.bf16 %v5454_v61, %v5453_v12 }
 0x566   : > { %v4913_v9 = vsel %vm522_vm14, %v4905_v44, %v12858_v60  ;;  %v4889_v63 = vsel %vm522_vm14, %v4881_v58, %v12859_v20  ;;  %v11896_v20 = vpack.c.bf16 %v5472_v38, %v5471_v1  ;;  %v5455_v60 = vld [vmem:[%s19102_s4 + $0x40] sm:$0xff]  ;;  %v5474_v44 = vld [vmem:[%s19102_s4 + $0xd8] sm:$0xff] }
 0x567   : > { %v12872_v40 = vpop.permute.xlu1 %12871  ;;  %v4921_v31 = vsel %vm3734_vm15, %v4913_v9, %v12863_v53  ;;  %v4897_v34 = vsel %vm3734_vm15, %v4889_v63, %v12864_v47  ;;  %v5456_v47 = vld [vmem:[%s19102_s4 + $0x48] sm:$0xff]  ;;  %v5473_v53 = vld [vmem:[%s19102_s4 + $0xd0] sm:$0xff]  ;;  %v5458_v63 = vld [vmem:[%s19102_s4 + $0x58] sm:$0xff] }
 0x568   : > { %v12867_v42 = vpop.permute.xlu0 %12866  ;;  %v12874_v59 = vunpack.i.h.bf16 %v12872_v40  ;;  %v12873_v29 = vunpack.i.l.bf16 %v12872_v40  ;;  %5081 = vmatprep.mubr.f32.mxu0 %v4921_v31  ;;  %v11898_v58 = vpack.c.bf16 %v5456_v47, %v5455_v60  ;;  %v5457_v9 = vld [vmem:[%s19102_s4 + $0x50] sm:$0xff]  ;;  %v5475_v40 = vld [vmem:[%s19102_s4 + $0xe0] sm:$0xff]  ;;  %v5476_v31 = vld [vmem:[%s19102_s4 + $0xe8] sm:$0xff] }
 0x569   : > { %v12869_v18 = vunpack.i.h.bf16 %v12867_v42  ;;  %v12868_v37 = vunpack.i.l.bf16 %v12867_v42  ;;  %5082 = vmatmul.mubr.f32.gmra.mrb[76].mxu0 %v4897_v34  ;;  %v11900_v42 = vpack.c.bf16 %v5474_v44, %v5473_v53  ;;  %v5495_v34 = vld [vmem:[%s19102_s4 + $0x180] sm:$0xff] }
 0x56a   : > { %v4906_v27 = vsel %vm457_vm3, %v16109_v54, %v12873_v29  ;;  %v4882_v50 = vsel %vm457_vm3, %v16073_v8, %v12874_v59  ;;  %v4676_v54 = vld [vmem:[#allocation4 + $0x32] sm:$0xff]  ;;  %v5496_v59 = vld [vmem:[%s19102_s4 + $0x188] sm:$0xff]  ;;  %v10736_v47 = vld [vmem:[%s19109_s11 + $0x2] ss:$0 sm:$0xff] }
 0x56b   : > { %v12877_v21 = vpop.permute.xlu1 %12876  ;;  %v4914_v56 = vsel %vm522_vm14, %v4906_v27, %v12868_v37  ;;  %v4890_v4 = vsel %vm522_vm14, %v4882_v50, %v12869_v18  ;;  %v4682_v8 = vld [vmem:[#allocation4 + $0x92] sm:$0xff]  ;;  %v11912_v29 = vpack.c.bf16 %v5496_v59, %v5495_v34  ;;  %v5479_v18 = vld [vmem:[%s19102_s4 + $0x100] sm:$0xff]  ;;  %v5480_v37 = vld [vmem:[%s19102_s4 + $0x108] sm:$0xff]  ;;  %v5059_v44 = vadd.f32 %v16134_v51, %v10736_v47 }
 0x56c   : > { %v12879_v14 = vunpack.i.h.bf16 %v12877_v21  ;;  %v12878_v43 = vunpack.i.l.bf16 %v12877_v21  ;;  %v5497_v27 = vld [vmem:[%s19102_s4 + $0x190] sm:$0xff]  ;;  %v11914_v50 = vpack.c.bf16 %v5480_v37, %v5479_v18  ;;  %v5498_v21 = vld [vmem:[%s19102_s4 + $0x198] sm:$0xff]  ;;  %v5064_v37 = vadd.f32 %v16144_v10, %v10736_v47  ;;  %v5512_v10 = vld [vmem:[%s19102_s4 + $0x208] sm:$0xff] }
 0x56d   : > { %11913 = vmatprep.subr.bf16.mxu0 %v11912_v29  ;;  %v5505_v59 = vld [vmem:[%s19102_s4 + $0x1d0] sm:$0xff]  ;;  %v5506_v29 = vld [vmem:[%s19102_s4 + $0x1d8] sm:$0xff] }
 0x56e   : > { %v4922_v26 = vsel %vm3734_vm15, %v4914_v56, %v12878_v43  ;;  %v4898_v39 = vsel %vm3734_vm15, %v4890_v4, %v12879_v14  ;;  %v5481_v14 = vld [vmem:[%s19102_s4 + $0x110] sm:$0xff]  ;;  %v5482_v43 = vld [vmem:[%s19102_s4 + $0x118] sm:$0xff]  ;;  %v11902_v56 = vpack.c.bf16 %v5458_v63, %v5457_v9  ;;  %v5459_v4 = vld [vmem:[%s19102_s4 + $0x60] sm:$0xff]  ;;  %v5054_v9 = vadd.f32 %v16132_v2, %v10736_v47 }
 0x56f   : > { %5086 = vmatprep.mubr.f32.mxu0 %v4922_v26  ;;  %v5460_v26 = vld [vmem:[%s19102_s4 + $0x68] sm:$0xff]  ;;  %v5489_v51 = vld [vmem:[%s19102_s4 + $0x150] sm:$0xff] }
 0x570   : > { %5087 = vmatmul.mubr.f32.gmra.mrb[78].mxu0 %v4898_v39  ;;  %v11916_v39 = vpack.c.bf16 %v5498_v21, %v5497_v27  ;;  %v11932_v27 = vpack.c.bf16 %v5506_v29, %v5505_v59 }
 0x571   : > { %11619 = vmatprep.mubr.msk.f32.mxu0 %vm457_vm3, %v4675_v19  ;;  %v11904_v19 = vpack.c.bf16 %v5476_v31, %v5475_v40 }
 0x574   : > { %11620 = vmatmul.mubr.msk.f32.vlgmr.msra.gmra.mrb[80].mxu0 %vm457_vm3, %v4676_v54  ;;  %v11918_v54 = vpack.c.bf16 %v5482_v43, %v5481_v14 }
 0x575   : > { %11622 = vmatprep.mubr.msk.f32.mxu0 %vm457_vm3, %v15943_v33  ;;  %v5463_v33 = vld [vmem:[%s19102_s4 + $0x80] sm:$0xff]  ;;  %11915 = vmatpush3.bf16.msra.mxu0 %v11914_v50 }
 0x576   : > { %11917 = vmatprep.subr.bf16.mxu0 %v11916_v39 }
 0x578   : > { %11623 = vmatmul.mubr.msk.f32.gmra.mrb[82].mxu0 %vm457_vm3, %v16001_v36  ;;  %v5464_v36 = vld [vmem:[%s19102_s4 + $0x88] sm:$0xff] }
 0x579   : > { %11625 = vmatprep.mubr.msk.f32.mxu0 %vm457_vm3, %v16043_v62  ;;  %v5447_v62 = vld [vmem:[%s19102_s4] sm:$0xff]  ;;  %11919 = vmatpush3.bf16.msra.mxu0 %v11918_v54  ;;  %v5508_v54 = vld [vmem:[%s19102_s4 + $0x1e8] sm:$0xff] }
 0x57c   : > { %11626 = vmatmul.mubr.msk.f32.gmra.mrb[84].mxu0 %vm457_vm3, %v16080_v3  ;;  %v11880_v3 = vpack.c.bf16 %v5464_v36, %v5463_v33  ;;  %v5478_v33 = vld [vmem:[%s19102_s4 + $0xf8] sm:$0xff] }
 0x57d   : > { %11628 = vmatprep.mubr.msk.f32.mxu0 %vm457_vm3, %v16114_v25  ;;  %v5448_v25 = vld [vmem:[%s19102_s4 + $0x8] sm:$0xff] }
 0x57e   : > { %v11882_v17 = vpack.c.bf16 %v5448_v25, %v5447_v62  ;;  %11881 = vmatprep.subr.bf16.mxu1 %v11880_v3  ;;  %v5483_v62 = vld [vmem:[%s19102_s4 + $0x120] sm:$0xff]  ;;  %v5484_v3 = vld [vmem:[%s19102_s4 + $0x128] sm:$0xff]  ;;  %v5501_v25 = vld [vmem:[%s19102_s4 + $0x1b0] sm:$0xff] }
 0x57f   : > { %v11922_v49 = vpack.c.bf16 %v5484_v3, %v5483_v62  ;;  %v5492_v62 = vld [vmem:[%s19102_s4 + $0x168] sm:$0xff] }
 0x580   : > { %11629 = vmatmul.mubr.msk.f32.gmra.mrb[86].mxu0 %vm457_vm3, %v4682_v8  ;;  %11883 = vmatpush3.bf16.msra.mxu1 %v11882_v17  ;;  %v5477_v8 = vld [vmem:[%s19102_s4 + $0xf0] sm:$0xff]  ;;  %v11906_v17 = vpack.c.bf16 %v5460_v26, %v5459_v4 }
 0x581   : > { %11885 = vmatprep.subr.bf16.mxu1 %v11884_v45 }
 0x584   : > { %11887 = vmatpush3.bf16.msra.mxu1 %v11886_v6  ;;  %v5486_v6 = vld [vmem:[%s19102_s4 + $0x138] sm:$0xff] }
 0x585   : > { %11889 = vmatprep.subr.bf16.mxu1 %v11888_v41  ;;  %v11926_v41 = vpack.c.bf16 %v5486_v6, %v5485_v5 }
 0x588   : > { %11891 = vmatpush3.bf16.msra.mxu1 %v11890_v7  ;;  %v5487_v7 = vld [vmem:[%s19102_s4 + $0x140] sm:$0xff] }
 0x589   : > { %11893 = vmatprep.subr.bf16.mxu1 %v11892_v16  ;;  %v11930_v55 = vpack.c.bf16 %v5488_v11, %v5487_v7 }
 0x58c   : > { %11895 = vmatpush3.bf16.msra.mxu1 %v11894_v32 }
 0x58d   : > { %11897 = vmatprep.subr.bf16.mxu1 %v11896_v20 }
 0x590   : > { %11899 = vmatpush3.bf16.msra.mxu1 %v11898_v58 }
 0x591   : > { %11901 = vmatprep.subr.bf16.mxu1 %v11900_v42 }
 0x594   : > { %11903 = vmatpush3.bf16.msra.mxu1 %v11902_v56  ;;  %v5511_v56 = vld [vmem:[%s19102_s4 + $0x200] sm:$0xff] }
 0x595   : > { %v10938_v22 = vpop.f32.mrb[70].mxu0  ;;  %11905 = vmatprep.subr.bf16.mxu1 %v11904_v19  ;;  %v16414_v39 = vpack.c.bf16 %v5512_v10, %v5511_v56  ;;  %v5507_v19 = vld [vmem:[%s19102_s4 + $0x1e0] sm:$0xff] }
 0x596   : > { %v10939_v30 = vpop.f32.mrb[71].mxu0 }
 0x597   : > { %v16175_v13 = vadd.f32 %v10939_v30, %v10938_v22  ;;  %v5499_v22 = vld [vmem:[%s19102_s4 + $0x1a0] sm:$0xff]  ;;  %v5500_v30 = vld [vmem:[%s19102_s4 + $0x1a8] sm:$0xff] }
 0x598   : > { %v11920_v36 = vpack.c.bf16 %v5500_v30, %v5499_v22  ;;  %11907 = vmatpush3.bf16.msra.mxu1 %v11906_v17 }
 0x599   : > { %v5069_v34 = vadd.f32 %v16175_v13, %v10736_v47  ;;  %v5490_v13 = vld [vmem:[%s19102_s4 + $0x158] sm:$0xff] }
 0x59a   : > { %11921 = vmatprep.subr.bf16.mxu0 %v11920_v36  ;;  %v11934_v14 = vpack.c.bf16 %v5490_v13, %v5489_v51  ;;  %v5491_v36 = vld [vmem:[%s19102_s4 + $0x160] sm:$0xff] }
 0x59b   : > { %11923 = vmatpush3.bf16.msra.mxu0 %v11922_v49  ;;  %v5510_v49 = vld [vmem:[%s19102_s4 + $0x1f8] sm:$0xff] }
 0x59c   : > { %v11940_v52 = vpack.c.bf16 %v5510_v49, %v5509_v23 }
 0x5d3   : > { %v10941_v24 = vpop.f32.mrb[72].mxu0 }
 0x5d4   : > { %v10942_v15 = vpop.f32.mrb[73].mxu0 }
 0x5d5   : > { %v16241_v35 = vadd.f32 %v10942_v15, %v10941_v24  ;;  %v5502_v24 = vld [vmem:[%s19102_s4 + $0x1b8] sm:$0xff]  ;;  %v11908_v15 = vpack.c.bf16 %v5478_v33, %v5477_v8  ;;  %v11936_v33 = vpack.c.bf16 %v5508_v54, %v5507_v19 }
 0x5d6   : > { %v11924_v45 = vpack.c.bf16 %v5502_v24, %v5501_v25  ;;  %v11938_v24 = vpack.c.bf16 %v5492_v62, %v5491_v36 }
 0x5d7   : > { %11909 = vmatprep.subr.bf16.mxu1 %v11908_v15  ;;  %v5074_v30 = vadd.f32 %v16241_v35, %v10736_v47 }
 0x5d8   : > { %11925 = vmatprep.subr.bf16.mxu0 %v11924_v45  ;;  %11911 = vmatpush3.bf16.msra.mxu1 %v11910_v48 }
 0x5d9   : > { %11927 = vmatpush3.bf16.msra.mxu0 %v11926_v41  ;;  %11945 = vmatprep.subr.bf16.mxu1 %v16414_v39 }
 0x5da   : > { %11929 = vmatprep.subr.bf16.mxu0 %v11928_v57 }
 0x5dd   : > { %11931 = vmatpush3.bf16.msra.mxu0 %v11930_v55 }
 0x5de   : > { %11933 = vmatprep.subr.bf16.mxu0 %v11932_v27 }
 0x5e1   : > { %11935 = vmatpush3.bf16.msra.mxu0 %v11934_v14 }
 0x5e2   : > { %11937 = vmatprep.subr.bf16.mxu0 %v11936_v33 }
 0x5e5   : > { %11939 = vmatpush3.bf16.msra.mxu0 %v11938_v24 }
 0x5e6   : > { %11941 = vmatprep.subr.bf16.mxu0 %v11940_v52 }
 0x614   : > { %v10944_v12 = vpop.f32.mrb[74].mxu0 }
 0x615   : > { %v10945_v16 = vpop.f32.mrb[75].mxu0 }
 0x616   : > { %v10946_v61 = vadd.f32 %v10945_v16, %v10944_v12  ;;  %v5493_v16 = vld [vmem:[%s19102_s4 + $0x170] sm:$0xff] }
 0x618   : > { %v5079_v26 = vadd.f32 %v10946_v61, %v10736_v47  ;;  %v5494_v61 = vld [vmem:[%s19102_s4 + $0x178] sm:$0xff] }
 0x63c   : > { %v10947_v1 = vpop.f32.mrb[76].mxu0 }
 0x63d   : > { %v10948_v38 = vpop.f32.mrb[77].mxu0 }
 0x63e   : > { %v10949_v32 = vadd.f32 %v10948_v38, %v10947_v1  ;;  %v11942_v38 = vpack.c.bf16 %v5494_v61, %v5493_v16 }
 0x640   : > { %v5084_v6 = vadd.f32 %v10949_v32, %v10736_v47  ;;  %11943 = vmatpush3.bf16.msra.mxu0 %v11942_v38 }
 0x643   : > { %v10950_v20 = vpop.f32.mrb[78].mxu0 }
 0x644   : > { %v10951_v60 = vpop.f32.mrb[79].mxu0 }
 0x645   : > { %v10952_v53 = vadd.f32 %v10951_v60, %v10950_v20 }
 0x647   : > { %v11621_v58 = vpop.f32.mrb[80].mxu0  ;;  %v5089_v15 = vadd.f32 %v10952_v53, %v10736_v47 }
 0x648   : > { %v5164_v63 = vadd.f32 %v11621_v58, %v5059_v44  ;;  %v5158_v40 = vpop.f32.mrb[81].mxu0 }
 0x649   : > { %v5159_v42 = vadd.f32 %v5158_v40, %v5054_v9 }
 0x64a   : > { %v5198_v31 = vmax.f32 %v5164_v63, 0.0 }
 0x64b   : > { %v5197_v18 = vmax.f32 %v5159_v42, 0.0  ;;  %v11624_v2 = vpop.f32.mrb[82].mxu0 }
 0x64c   : > { %5206 = vst.msk [vmem:[#allocation5 + $0x21] sm:$0xff] %vm522_vm14, %v5198_v31  ;;  %v5174_v50 = vadd.f32 %v11624_v2, %v5069_v34  ;;  %v5168_v21 = vpop.f32.mrb[83].mxu0 }
 0x64d   : > { %5205 = vst.msk [vmem:[#allocation5 + $0x11] sm:$0xff] %vm522_vm14, %v5197_v18  ;;  %v5169_v43 = vadd.f32 %v5168_v21, %v5064_v37 }
 0x64e   : > { %v5200_v4 = vmax.f32 %v5174_v50, 0.0 }
 0x64f   : > { %v5199_v8 = vmax.f32 %v5169_v43, 0.0  ;;  %v11627_v22 = vpop.f32.mrb[84].mxu0 }
 0x650   : > { %5208 = vst.msk [vmem:[#allocation5 + $0x41] sm:$0xff] %vm522_vm14, %v5200_v4  ;;  %v5184_v3 = vadd.f32 %v11627_v22, %v5079_v26  ;;  %v5178_v25 = vpop.f32.mrb[85].mxu0 }
 0x651   : > { %5207 = vst.msk [vmem:[#allocation5 + $0x31] sm:$0xff] %vm522_vm14, %v5199_v8  ;;  %v5179_v17 = vadd.f32 %v5178_v25, %v5074_v30  ;;  %v5278_v8 = vld [vmem:[#allocation5 + $0x91] sm:$0xff] }
 0x652   : > { %v5202_v35 = vmax.f32 %v5184_v3, 0.0  ;;  %v5230_v3 = vld [vmem:[#allocation5 + $0x2] sm:$0xff] }
 0x653   : > { %v5201_v45 = vmax.f32 %v5179_v17, 0.0  ;;  %v11630_v5 = vpop.f32.mrb[86].mxu0  ;;  %v16438_v28 = vld [vmem:[#allocation5 + $0x20] sm:$0xff] }
 0x654   : > { %5210 = vst.msk [vmem:[#allocation5 + $0x61] sm:$0xff] %vm522_vm14, %v5202_v35  ;;  %v5194_v48 = vadd.f32 %v11630_v5, %v5089_v15  ;;  %v5188_v41 = vpop.f32.mrb[87].mxu0  ;;  %v16441_v57 = vld [vmem:[#allocation5 + $0x10] sm:$0xff]  ;;  %v16460_v60 = vld [vmem:[#allocation5 + $0x21] sm:$0xff]  ;;  %v5514_v15 = vld [vmem:[%s19102_s4 + $0x218] sm:$0xff] }
 0x655   : > { %v16443_v7 = vld [vmem:[#allocation5 + $0x11] sm:$0xff]  ;;  %5209 = vst.msk [vmem:[#allocation5 + $0x51] sm:$0xff] %vm522_vm14, %v5201_v45  ;;  %v5189_v11 = vadd.f32 %v5188_v41, %v5084_v6  ;;  %v12880_v55 = vpack.i.bf16 %v5222_v46, %v16441_v57  ;;  %v16489_v29 = vld [vmem:[#allocation5 + $0x22] sm:$0xff] }
 0x656   : > { %v12885_v12 = vpack.i.bf16 %v16443_v7, %v16438_v28  ;;  %v5204_v1 = vmax.f32 %v5194_v48, 0.0  ;;  %v16471_v9 = vld [vmem:[#allocation5 + $0x12] sm:$0xff]  ;;  %v5214_v17 = vld [vmem:[#allocation5] sm:$0xff] }
 0x657   : > { %v5203_v32 = vmax.f32 %v5189_v11, 0.0  ;;  %12881 = vrot.lane.b32.xlu0 %v12880_v55, %s13431_s19  ;;  %v16457_v20 = vld [vmem:[#allocation5 + $0x40] sm:$0xff]  ;;  %v12895_v42 = vpack.i.bf16 %v16471_v9, %v16460_v60  ;;  %v5513_v35 = vld [vmem:[%s19102_s4 + $0x210] sm:$0xff]  ;;  %v5516_v55 = vld [vmem:[%s19102_s4 + $0x228] sm:$0xff] }
 0x658   : > { %12886 = vrot.lane.b32.xlu1 %v12885_v12, %s13431_s19  ;;  %5212 = vst.msk [vmem:[#allocation5 + $0x81] sm:$0xff] %vm522_vm14, %v5204_v1  ;;  %v16462_v47 = vld [vmem:[#allocation5 + $0x30] sm:$0xff]  ;;  %v16475_v63 = vld [vmem:[#allocation5 + $0x41] sm:$0xff]  ;;  %v11948_v6 = vpack.c.bf16 %v5514_v15, %v5513_v35 }
 0x659   : > { %v16464_v53 = vld [vmem:[#allocation5 + $0x31] sm:$0xff]  ;;  %5211 = vst.msk [vmem:[#allocation5 + $0x71] sm:$0xff] %vm522_vm14, %v5203_v32  ;;  %v12890_v44 = vpack.i.bf16 %v16460_v60, %v16462_v47  ;;  %v16513_v43 = vld [vmem:[#allocation5 + $0x42] sm:$0xff] }
 0x65a   : > { %v12900_v58 = vpack.i.bf16 %v16464_v53, %v16457_v20  ;;  %v12905_v51 = vpack.i.bf16 %v16489_v29, %v16464_v53  ;;  %v16495_v2 = vld [vmem:[#allocation5 + $0x32] sm:$0xff]  ;;  %v5515_v11 = vld [vmem:[%s19102_s4 + $0x220] sm:$0xff] }
 0x65b   : > { %12891 = vrot.lane.b32.xlu0 %v12890_v44, %s13431_s19  ;;  %v16485_v59 = vld [vmem:[#allocation5 + $0x60] sm:$0xff]  ;;  %v12910_v13 = vpack.i.bf16 %v16495_v2, %v16475_v63  ;;  %v11952_v61 = vpack.c.bf16 %v5516_v55, %v5515_v11 }
 0x65c   : > { %12901 = vrot.lane.b32.xlu1 %v12900_v58, %s13431_s19  ;;  %v16477_v40 = vld [vmem:[#allocation5 + $0x50] sm:$0xff]  ;;  %v16501_v27 = vld [vmem:[#allocation5 + $0x61] sm:$0xff] }
 0x65d   : > { %v12915_v31 = vpack.i.bf16 %v16475_v63, %v16477_v40  ;;  %v16483_v34 = vld [vmem:[#allocation5 + $0x51] sm:$0xff]  ;;  %v16523_v26 = vld [vmem:[#allocation5 + $0x62] sm:$0xff] }
 0x65e   : > { %v12920_v18 = vpack.i.bf16 %v16483_v34, %v16485_v59  ;;  %v12925_v56 = vpack.i.bf16 %v16513_v43, %v16483_v34  ;;  %v16519_v4 = vld [vmem:[#allocation5 + $0x52] sm:$0xff] }
 0x65f   : > { %12896 = vrot.lane.b32.xlu0 %v12895_v42, %s13431_s19  ;;  %v16509_v14 = vld [vmem:[#allocation5 + $0x80] sm:$0xff]  ;;  %v12940_v19 = vpack.i.bf16 %v16519_v4, %v16501_v27  ;;  %v5517_v58 = vld [vmem:[%s19102_s4 + $0x230] sm:$0xff]  ;;  %v5518_v42 = vld [vmem:[%s19102_s4 + $0x238] sm:$0xff] }
 0x660   : > { %12916 = vrot.lane.b32.xlu1 %v12915_v31, %s13431_s19  ;;  %v16497_v37 = vld [vmem:[#allocation5 + $0x70] sm:$0xff]  ;;  %v16531_v30 = vld [vmem:[#allocation5 + $0x81] sm:$0xff] }
 0x661   : > { %v12930_v50 = vpack.i.bf16 %v16501_v27, %v16497_v37  ;;  %v16507_v21 = vld [vmem:[#allocation5 + $0x71] sm:$0xff]  ;;  %v16533_v33 = vld [vmem:[#allocation5 + $0x82] sm:$0xff] }
 0x662   : > { %v12935_v10 = vpack.i.bf16 %v16507_v21, %v16509_v14  ;;  %v12945_v54 = vpack.i.bf16 %v16523_v26, %v16507_v21  ;;  %v16529_v22 = vld [vmem:[#allocation5 + $0x72] sm:$0xff]  ;;  %v12955_v62 = vpack.i.bf16 %v16533_v33, %v5278_v8 }
 0x663   : > { %12906 = vrot.lane.b32.xlu0 %v12905_v51, %s13431_s19  ;;  %v12950_v36 = vpack.i.bf16 %v16529_v22, %v16531_v30 }
 0x664   : > { %12921 = vrot.lane.b32.xlu1 %v12920_v18, %s13431_s19 }
 0x667   : > { %12911 = vrot.lane.b32.xlu0 %v12910_v13, %s13431_s19  ;;  %v11956_v13 = vpack.c.bf16 %v5518_v42, %v5517_v58 }
 0x668   : > { %12931 = vrot.lane.b32.xlu1 %v12930_v50, %s13431_s19 }
 0x66b   : > { %12926 = vrot.lane.b32.xlu0 %v12925_v56, %s13431_s19 }
 0x66c   : > { %12936 = vrot.lane.b32.xlu1 %v12935_v10, %s13431_s19 }
 0x66f   : > { %12941 = vrot.lane.b32.xlu0 %v12940_v19, %s13431_s19 }
 0x670   : > { %12946 = vrot.lane.b32.xlu1 %v12945_v54, %s13431_s19 }
 0x673   : > { %12951 = vrot.lane.b32.xlu0 %v12950_v36, %s13431_s19 }
 0x674   : > { %12956 = vrot.lane.b32.xlu1 %v12955_v62, %s13431_s19 }
 0x6c9   : > { %v12882_v25 = vpop.permute.xlu0 %12881 }
 0x6ca   : > { %v12887_v24 = vpop.permute.xlu1 %12886  ;;  %v12884_v46 = vunpack.i.h.bf16 %v12882_v25  ;;  %v12883_v23 = vunpack.i.l.bf16 %v12882_v25 }
 0x6cb   : > { %v12888_v49 = vunpack.i.l.bf16 %v12887_v24  ;;  %v12889_v52 = vunpack.i.h.bf16 %v12887_v24 }
 0x6cc   : > { %v5423_v45 = vsel %vm522_vm14, %v5230_v3, %v12883_v23  ;;  %v5415_v5 = vsel %vm522_vm14, %v5214_v17, %v12884_v46 }
 0x6cd   : > { %5611 = vmatprep.mubr.f32.mxu1 %v5423_v45  ;;  %v12892_v48 = vpop.permute.xlu0 %12891  ;;  %v5424_v16 = vsel %vm522_vm14, %v16471_v9, %v12888_v49  ;;  %v5416_v44 = vsel %vm522_vm14, %v16441_v57, %v12889_v52 }
 0x6ce   : > { %v12902_v41 = vpop.permute.xlu1 %12901  ;;  %v12893_v12 = vunpack.i.l.bf16 %v12892_v48  ;;  %5612 = vmatmul.mubr.f32.vlgmr.msra.gmra.mrb[64].mxu1 %v5415_v5  ;;  %v12894_v1 = vunpack.i.h.bf16 %v12892_v48 }
 0x6cf   : > { %11947 = vmatpush3.bf16.msra.mxu1 %v16414_v39  ;;  %5616 = vmatprep.mubr.f32.mxu1 %v5424_v16  ;;  %v12903_v9 = vunpack.i.l.bf16 %v12902_v41  ;;  %v12904_v50 = vunpack.i.h.bf16 %v12902_v41 }
 0x6d0   : > { %11949 = vmatprep.subr.bf16.mxu1 %v11948_v6  ;;  %v5425_v51 = vsel %vm522_vm14, %v16489_v29, %v12893_v12  ;;  %v5417_v19 = vsel %vm522_vm14, %v16438_v28, %v12894_v1 }
 0x6d1   : > { %v12897_v38 = vpop.permute.xlu0 %12896  ;;  %v5426_v62 = vsel %vm522_vm14, %v16495_v2, %v12903_v9  ;;  %v5418_v17 = vsel %vm522_vm14, %v16462_v47, %v12904_v50 }
 0x6d2   : > { %v12917_v32 = vpop.permute.xlu1 %12916  ;;  %v12899_v31 = vunpack.i.h.bf16 %v12897_v38  ;;  %v12898_v39 = vunpack.i.l.bf16 %v12897_v38  ;;  %5617 = vmatmul.mubr.f32.gmra.mrb[66].mxu1 %v5416_v44 }
 0x6d3   : > { %5621 = vmatprep.mubr.f32.mxu1 %v5425_v51  ;;  %11951 = vmatpush3.bf16.msra.mxu1 %v11948_v6  ;;  %v12918_v54 = vunpack.i.l.bf16 %v12917_v32  ;;  %v12919_v25 = vunpack.i.h.bf16 %v12917_v32 }
 0x6d4   : > { %v5439_v57 = vsel %vm522_vm14, %v16438_v28, %v12898_v39  ;;  %v5431_v18 = vsel %vm522_vm14, %v16443_v7, %v12899_v31  ;;  %11953 = vmatprep.subr.bf16.mxu1 %v11952_v61 }
 0x6d5   : > { %v12907_v56 = vpop.permute.xlu0 %12906  ;;  %5716 = vmatprep.mubr.f32.mxu0 %v5439_v57  ;;  %v5427_v23 = vsel %vm522_vm14, %v16513_v43, %v12918_v54  ;;  %v5419_v52 = vsel %vm522_vm14, %v16457_v20, %v12919_v25  ;;  %v6091_v25 = vld [vmem:[%s19103_s5 + $0x100] sm:$0xff] }
 0x6d6   : > { %v12922_v10 = vpop.permute.xlu1 %12921  ;;  %v12909_v8 = vunpack.i.h.bf16 %v12907_v56  ;;  %v12908_v36 = vunpack.i.l.bf16 %v12907_v56  ;;  %5622 = vmatmul.mubr.f32.gmra.mrb[68].mxu1 %v5417_v19  ;;  %5717 = vmatmul.mubr.f32.vlgmr.msra.gmra.mrb[88].mxu0 %v5431_v18  ;;  %v5270_v19 = vld [vmem:[#allocation5 + $0x90] sm:$0xff] }
 0x6d7   : > { %5626 = vmatprep.mubr.f32.mxu1 %v5426_v62  ;;  %11955 = vmatpush3.bf16.msra.mxu1 %v11952_v61  ;;  %v12923_v35 = vunpack.i.l.bf16 %v12922_v10  ;;  %v12924_v45 = vunpack.i.h.bf16 %v12922_v10  ;;  %v6062_v62 = vld [vmem:[%s19103_s5 + $0x18] sm:$0xff] }
 0x6d8   : > { %v5440_v7 = vsel %vm522_vm14, %v16462_v47, %v12908_v36  ;;  %v5432_v3 = vsel %vm522_vm14, %v16460_v60, %v12909_v8  ;;  %11957 = vmatprep.subr.bf16.mxu1 %v11956_v13  ;;  %v6061_v36 = vld [vmem:[%s19103_s5 + $0x10] sm:$0xff] }
 0x6d9   : > { %v12912_v24 = vpop.permute.xlu0 %12911  ;;  %5721 = vmatprep.mubr.f32.mxu0 %v5440_v7  ;;  %v5428_v11 = vsel %vm522_vm14, %v16519_v4, %v12923_v35  ;;  %v6107_v7 = vld [vmem:[%s19103_s5 + $0x180] sm:$0xff] }
 0x6da   : > { %v12932_v28 = vpop.permute.xlu1 %12931  ;;  %v12914_v15 = vunpack.i.h.bf16 %v12912_v24  ;;  %v12913_v46 = vunpack.i.l.bf16 %v12912_v24  ;;  %5627 = vmatmul.mubr.f32.gmra.mrb[70].mxu1 %v5418_v17  ;;  %5722 = vmatmul.mubr.f32.gmra.mrb[90].mxu0 %v5432_v3  ;;  %v6108_v3 = vld [vmem:[%s19103_s5 + $0x188] sm:$0xff] }
 0x6db   : > { %5631 = vmatprep.mubr.f32.mxu1 %v5427_v23  ;;  %11959 = vmatpush3.bf16.msra.mxu1 %v11956_v13  ;;  %v12933_v5 = vunpack.i.l.bf16 %v12932_v28  ;;  %v12934_v12 = vunpack.i.h.bf16 %v12932_v28  ;;  %v6092_v24 = vld [vmem:[%s19103_s5 + $0x108] sm:$0xff]  ;;  %v11966_v28 = vpack.c.bf16 %v6062_v62, %v6061_v36  ;;  %v11992_v17 = vpack.c.bf16 %v6108_v3, %v6107_v7  ;;  %v6063_v23 = vld [vmem:[%s19103_s5 + $0x20] sm:$0xff]  ;;  %v6102_v36 = vld [vmem:[%s19103_s5 + $0x158] sm:$0xff] }
 0x6dc   : > { %v5441_v60 = vsel %vm522_vm14, %v16457_v20, %v12913_v46  ;;  %v5433_v49 = vsel %vm522_vm14, %v16464_v53, %v12914_v15  ;;  %v5420_v20 = vsel %vm522_vm14, %v16477_v40, %v12924_v45  ;;  %v11994_v35 = vpack.c.bf16 %v6092_v24, %v6091_v25  ;;  %v6079_v15 = vld [vmem:[%s19103_s5 + $0xa0] sm:$0xff]  ;;  %v6080_v46 = vld [vmem:[%s19103_s5 + $0xa8] sm:$0xff]  ;;  %v6109_v45 = vld [vmem:[%s19103_s5 + $0x190] sm:$0xff] }
 0x6dd   : > { %v12927_v6 = vpop.permute.xlu0 %12926  ;;  %5726 = vmatprep.mubr.f32.mxu0 %v5441_v60  ;;  %v5429_v1 = vsel %vm522_vm14, %v16523_v26, %v12933_v5  ;;  %v11968_v60 = vpack.c.bf16 %v6080_v46, %v6079_v15  ;;  %v6110_v5 = vld [vmem:[%s19103_s5 + $0x198] sm:$0xff]  ;;  %11993 = vmatprep.subr.bf16.mxu1 %v11992_v17  ;;  %v6071_v7 = vld [vmem:[%s19103_s5 + $0x60] sm:$0xff]  ;;  %v6072_v3 = vld [vmem:[%s19103_s5 + $0x68] sm:$0xff] }
 0x6de   : > { %v12937_v47 = vpop.permute.xlu1 %12936  ;;  %v12929_v48 = vunpack.i.h.bf16 %v12927_v6  ;;  %v12928_v41 = vunpack.i.l.bf16 %v12927_v6  ;;  %5632 = vmatmul.mubr.f32.gmra.mrb[72].mxu1 %v5419_v52  ;;  %5727 = vmatmul.mubr.f32.gmra.mrb[92].mxu0 %v5433_v49  ;;  %v6064_v49 = vld [vmem:[%s19103_s5 + $0x28] sm:$0xff]  ;;  %v11996_v6 = vpack.c.bf16 %v6110_v5, %v6109_v45  ;;  %v6094_v52 = vld [vmem:[%s19103_s5 + $0x118] sm:$0xff]  ;;  %v6089_v25 = vld [vmem:[%s19103_s5 + $0xf0] sm:$0xff]  ;;  %v11986_v17 = vpack.c.bf16 %v6072_v3, %v6071_v7 }
 0x6df   : > { %5636 = vmatprep.mubr.f32.mxu1 %v5428_v11  ;;  %v12938_v38 = vunpack.i.l.bf16 %v12937_v47  ;;  %v12939_v9 = vunpack.i.h.bf16 %v12937_v47  ;;  %v6093_v47 = vld [vmem:[%s19103_s5 + $0x110] sm:$0xff]  ;;  %v6082_v11 = vld [vmem:[%s19103_s5 + $0xb8] sm:$0xff]  ;;  %v16804_v5 = vld [vmem:[%s19109_s11 + $0x3] ss:$0 sm:$0xff] }
 0x6e0   : > { %v5442_v55 = vsel %vm522_vm14, %v16477_v40, %v12928_v41  ;;  %v5434_v53 = vsel %vm522_vm14, %v16475_v63, %v12929_v48  ;;  %v5421_v40 = vsel %vm522_vm14, %v16485_v59, %v12934_v12  ;;  %v6081_v48 = vld [vmem:[%s19103_s5 + $0xb0] sm:$0xff]  ;;  %v11998_v41 = vpack.c.bf16 %v6094_v52, %v6093_v47  ;;  %v6112_v12 = vld [vmem:[%s19103_s5 + $0x1a8] sm:$0xff]  ;;  %v6090_v24 = vld [vmem:[%s19103_s5 + $0xf8] sm:$0xff] }
 0x6e1   : > { %v12942_v16 = vpop.permute.xlu0 %12941  ;;  %5731 = vmatprep.mubr.f32.mxu0 %v5442_v55  ;;  %v5430_v57 = vsel %vm522_vm14, %v16529_v22, %v12938_v38  ;;  %v5422_v50 = vsel %vm522_vm14, %v16497_v37, %v12939_v9  ;;  %v11970_v55 = vpack.c.bf16 %v6064_v49, %v6063_v23  ;;  %v6114_v9 = vld [vmem:[%s19103_s5 + $0x1b8] sm:$0xff] }
 0x6e2   : > { %v12947_v61 = vpop.permute.xlu1 %12946  ;;  %v12944_v32 = vunpack.i.h.bf16 %v12942_v16  ;;  %v12943_v44 = vunpack.i.l.bf16 %v12942_v16  ;;  %5637 = vmatmul.mubr.f32.gmra.mrb[74].mxu1 %v5420_v20  ;;  %5732 = vmatmul.mubr.f32.gmra.mrb[94].mxu0 %v5434_v53  ;;  %v6111_v53 = vld [vmem:[%s19103_s5 + $0x1a0] sm:$0xff]  ;;  %v6065_v20 = vld [vmem:[%s19103_s5 + $0x30] sm:$0xff] }
 0x6e3   : > { %v12948_v58 = vunpack.i.l.bf16 %v12947_v61  ;;  %5641 = vmatprep.mubr.f32.mxu1 %v5429_v1  ;;  %v12949_v31 = vunpack.i.h.bf16 %v12947_v61  ;;  %v6095_v16 = vld [vmem:[%s19103_s5 + $0x120] sm:$0xff]  ;;  %v11972_v61 = vpack.c.bf16 %v6082_v11, %v6081_v48  ;;  %v6066_v1 = vld [vmem:[%s19103_s5 + $0x38] sm:$0xff]  ;;  %v12000_v38 = vpack.c.bf16 %v6112_v12, %v6111_v53 }
 0x6e4   : > { %v5443_v63 = vsel %vm522_vm14, %v16485_v59, %v12943_v44  ;;  %v5435_v42 = vsel %vm522_vm14, %v16483_v34, %v12944_v32  ;;  %v6096_v32 = vld [vmem:[%s19103_s5 + $0x128] sm:$0xff]  ;;  %v6083_v44 = vld [vmem:[%s19103_s5 + $0xc0] sm:$0xff] }
 0x6e5   : > { %v12952_v39 = vpop.permute.xlu0 %12951  ;;  %5736 = vmatprep.mubr.f32.mxu0 %v5443_v63  ;;  %v5444_v18 = vsel %vm522_vm14, %v16497_v37, %v12948_v58  ;;  %v5436_v56 = vsel %vm522_vm14, %v16501_v27, %v12949_v31  ;;  %v6084_v58 = vld [vmem:[%s19103_s5 + $0xc8] sm:$0xff]  ;;  %v6113_v63 = vld [vmem:[%s19103_s5 + $0x1b0] sm:$0xff]  ;;  %v11974_v31 = vpack.c.bf16 %v6066_v1, %v6065_v20 }
 0x6e6   : > { %v12953_v51 = vunpack.i.l.bf16 %v12952_v39  ;;  %5642 = vmatmul.mubr.f32.gmra.mrb[76].mxu1 %v5421_v40  ;;  %5737 = vmatmul.mubr.f32.gmra.mrb[96].mxu0 %v5435_v42  ;;  %v12957_v13 = vpop.permute.xlu1 %12956  ;;  %v12954_v34 = vunpack.i.h.bf16 %v12952_v39  ;;  %v12002_v42 = vpack.c.bf16 %v6096_v32, %v6095_v16  ;;  %v6067_v39 = vld [vmem:[%s19103_s5 + $0x40] sm:$0xff]  ;;  %v12004_v40 = vpack.c.bf16 %v6114_v9, %v6113_v63 }
 0x6e7   : > { %5646 = vmatprep.mubr.f32.mxu1 %v5430_v57  ;;  %5741 = vmatprep.mubr.f32.mxu0 %v5444_v18  ;;  %v12958_v59 = vunpack.i.l.bf16 %v12957_v13  ;;  %v12959_v54 = vunpack.i.h.bf16 %v12957_v13  ;;  %v6098_v57 = vld [vmem:[%s19103_s5 + $0x138] sm:$0xff]  ;;  %v11976_v18 = vpack.c.bf16 %v6084_v58, %v6083_v44  ;;  %v6068_v13 = vld [vmem:[%s19103_s5 + $0x48] sm:$0xff] }
 0x6e8   : > { %v5445_v10 = vsel %vm522_vm14, %v16509_v14, %v12953_v51  ;;  %v5437_v8 = vsel %vm522_vm14, %v16507_v21, %v12954_v34  ;;  %v6076_v21 = vld [vmem:[%s19103_s5 + $0x88] sm:$0xff]  ;;  %v6059_v14 = vld [vmem:[%s19103_s5] sm:$0xff]  ;;  %v6097_v51 = vld [vmem:[%s19103_s5 + $0x130] sm:$0xff] }
 0x6e9   : > { %v5446_v37 = vsel %vm522_vm14, %v5270_v19, %v12958_v59  ;;  %v5438_v27 = vsel %vm522_vm14, %v16531_v30, %v12959_v54  ;;  %v6115_v34 = vld [vmem:[%s19103_s5 + $0x1c0] sm:$0xff]  ;;  %v6086_v59 = vld [vmem:[%s19103_s5 + $0xd8] sm:$0xff]  ;;  %v11978_v19 = vpack.c.bf16 %v6068_v13, %v6067_v39  ;;  %v6069_v54 = vld [vmem:[%s19103_s5 + $0x50] sm:$0xff] }
 0x6ea   : > { %5647 = vmatmul.mubr.f32.gmra.mrb[78].mxu1 %v5422_v50  ;;  %5742 = vmatmul.mubr.f32.gmra.mrb[98].mxu0 %v5436_v56  ;;  %v6116_v50 = vld [vmem:[%s19103_s5 + $0x1c8] sm:$0xff]  ;;  %v6085_v56 = vld [vmem:[%s19103_s5 + $0xd0] sm:$0xff] }
 0x6eb   : > { %5746 = vmatprep.mubr.f32.mxu0 %v5445_v10  ;;  %11647 = vmatprep.mubr.msk.f32.mxu1 %vm522_vm14, %v16489_v29  ;;  %v5286_v29 = vld [vmem:[#allocation5 + $0x92] sm:$0xff]  ;;  %v12006_v10 = vpack.c.bf16 %v6098_v57, %v6097_v51 }
 0x6ee   : > { %5747 = vmatmul.mubr.f32.gmra.mrb[100].mxu0 %v5437_v8  ;;  %11648 = vmatmul.mubr.msk.f32.vlgmr.msra.gmra.mrb[80].mxu1 %vm522_vm14, %v16495_v2  ;;  %v6075_v2 = vld [vmem:[%s19103_s5 + $0x80] sm:$0xff]  ;;  %v12008_v8 = vpack.c.bf16 %v6116_v50, %v6115_v34 }
 0x6ef   : > { %5751 = vmatprep.mubr.f32.mxu0 %v5446_v37  ;;  %11650 = vmatprep.mubr.msk.f32.mxu1 %vm522_vm14, %v16513_v43  ;;  %v11960_v43 = vpack.c.bf16 %v6076_v21, %v6075_v2  ;;  %v6099_v37 = vld [vmem:[%s19103_s5 + $0x140] sm:$0xff]  ;;  %v6070_v2 = vld [vmem:[%s19103_s5 + $0x58] sm:$0xff]  ;;  %v6117_v21 = vld [vmem:[%s19103_s5 + $0x1d0] sm:$0xff] }
 0x6f0   : > { %11995 = vmatpush3.bf16.msra.mxu1 %v11994_v35  ;;  %v11988_v35 = vpack.c.bf16 %v6090_v24, %v6089_v25 }
 0x6f1   : > { %11961 = vmatprep.subr.bf16.mxu0 %v11960_v43  ;;  %11997 = vmatprep.subr.bf16.mxu1 %v11996_v6  ;;  %v6087_v43 = vld [vmem:[%s19103_s5 + $0xe0] sm:$0xff] }
 0x6f2   : > { %5752 = vmatmul.mubr.f32.gmra.mrb[102].mxu0 %v5438_v27  ;;  %11651 = vmatmul.mubr.msk.f32.gmra.mrb[82].mxu1 %vm522_vm14, %v16519_v4  ;;  %v6060_v4 = vld [vmem:[%s19103_s5 + $0x8] sm:$0xff] }
 0x6f3   : > { %11653 = vmatprep.mubr.msk.f32.mxu1 %vm522_vm14, %v16523_v26  ;;  %v6077_v26 = vld [vmem:[%s19103_s5 + $0x90] sm:$0xff]  ;;  %v11962_v30 = vpack.c.bf16 %v6060_v4, %v6059_v14  ;;  %v6100_v27 = vld [vmem:[%s19103_s5 + $0x148] sm:$0xff]  ;;  %v6118_v14 = vld [vmem:[%s19103_s5 + $0x1d8] sm:$0xff] }
 0x6f4   : > { %11999 = vmatpush3.bf16.msra.mxu1 %v11998_v41  ;;  %v6088_v4 = vld [vmem:[%s19103_s5 + $0xe8] sm:$0xff] }
 0x6f5   : > { %11963 = vmatpush3.bf16.msra.mxu0 %v11962_v30  ;;  %12001 = vmatprep.subr.bf16.mxu1 %v12000_v38  ;;  %v12012_v30 = vpack.c.bf16 %v6118_v14, %v6117_v21  ;;  %v11984_v62 = vpack.c.bf16 %v6088_v4, %v6087_v43 }
 0x6f6   : > { %11654 = vmatmul.mubr.msk.f32.gmra.mrb[84].mxu1 %vm522_vm14, %v16529_v22  ;;  %v6078_v22 = vld [vmem:[%s19103_s5 + $0x98] sm:$0xff] }
 0x6f7   : > { %11656 = vmatprep.mubr.msk.f32.mxu1 %vm522_vm14, %v16533_v33  ;;  %v11964_v33 = vpack.c.bf16 %v6078_v22, %v6077_v26  ;;  %v12010_v26 = vpack.c.bf16 %v6100_v27, %v6099_v37  ;;  %v11982_v22 = vpack.c.bf16 %v6070_v2, %v6069_v54 }
 0x6f8   : > { %12003 = vmatpush3.bf16.msra.mxu1 %v12002_v42 }
 0x6f9   : > { %11965 = vmatprep.subr.bf16.mxu0 %v11964_v33  ;;  %12005 = vmatprep.subr.bf16.mxu1 %v12004_v40  ;;  %v6101_v33 = vld [vmem:[%s19103_s5 + $0x150] sm:$0xff] }
 0x6fa   : > { %11657 = vmatmul.mubr.msk.f32.gmra.mrb[86].mxu1 %vm522_vm14, %v5286_v29  ;;  %11967 = vmatpush3.bf16.msra.mxu0 %v11966_v28  ;;  %v11980_v29 = vpack.c.bf16 %v6086_v59, %v6085_v56  ;;  %v12014_v28 = vpack.c.bf16 %v6102_v36, %v6101_v33 }
 0x6fb   : > { %11969 = vmatprep.subr.bf16.mxu0 %v11968_v60 }
 0x6fc   : > { %12007 = vmatpush3.bf16.msra.mxu1 %v12006_v10 }
 0x6fd   : > { %12009 = vmatprep.subr.bf16.mxu1 %v12008_v8 }
 0x6fe   : > { %11971 = vmatpush3.bf16.msra.mxu0 %v11970_v55 }
 0x6ff   : > { %11973 = vmatprep.subr.bf16.mxu0 %v11972_v61 }
 0x700   : > { %12011 = vmatpush3.bf16.msra.mxu1 %v12010_v26 }
 0x701   : > { %12013 = vmatprep.subr.bf16.mxu1 %v12012_v30 }
 0x702   : > { %11975 = vmatpush3.bf16.msra.mxu0 %v11974_v31 }
 0x703   : > { %11977 = vmatprep.subr.bf16.mxu0 %v11976_v18 }
 0x704   : > { %12015 = vmatpush3.bf16.msra.mxu1 %v12014_v28 }
 0x706   : > { %11979 = vmatpush3.bf16.msra.mxu0 %v11978_v19 }
 0x707   : > { %11981 = vmatprep.subr.bf16.mxu0 %v11980_v29 }
 0x70a   : > { %11983 = vmatpush3.bf16.msra.mxu0 %v11982_v22 }
 0x70b   : > { %11985 = vmatprep.subr.bf16.mxu0 %v11984_v62 }
 0x70e   : > { %11987 = vmatpush3.bf16.msra.mxu0 %v11986_v17 }
 0x70f   : > { %11989 = vmatprep.subr.bf16.mxu0 %v11988_v35 }
 0x7a1   : > { %v10997_v15 = vpop.f32.mrb[64].mxu1 }
 0x7a2   : > { %v10998_v46 = vpop.f32.mrb[65].mxu1 }
 0x7a3   : > { %v10999_v23 = vadd.f32 %v10998_v46, %v10997_v15 }
 0x7a5   : > { %v11000_v60 = vpop.f32.mrb[66].mxu1  ;;  %v5614_v41 = vadd.f32 %v10999_v23, %v16804_v5 }
 0x7a6   : > { %v11001_v49 = vpop.f32.mrb[67].mxu1 }
 0x7a7   : > { %v11002_v45 = vadd.f32 %v11001_v49, %v11000_v60 }
 0x7a9   : > { %v11003_v6 = vpop.f32.mrb[68].mxu1  ;;  %v11053_v47 = vpop.f32.mrb[88].mxu0  ;;  %v5619_v1 = vadd.f32 %v11002_v45, %v16804_v5 }
 0x7aa   : > { %v11004_v52 = vpop.f32.mrb[69].mxu1  ;;  %v11054_v48 = vpop.f32.mrb[89].mxu0 }
 0x7ab   : > { %v11005_v11 = vadd.f32 %v11004_v52, %v11003_v6  ;;  %v11055_v55 = vadd.f32 %v11054_v48, %v11053_v47 }
 0x7ad   : > { %v11006_v53 = vpop.f32.mrb[70].mxu1  ;;  %v11056_v12 = vpop.f32.mrb[90].mxu0  ;;  %v5719_v16 = vadd.f32 %v11055_v55, %v5614_v41  ;;  %v5624_v31 = vadd.f32 %v11005_v11, %v16804_v5 }
 0x7ae   : > { %v11007_v61 = vpop.f32.mrb[71].mxu1  ;;  %v11057_v20 = vpop.f32.mrb[91].mxu0 }
 0x7af   : > { %v11008_v38 = vadd.f32 %v11007_v61, %v11006_v53  ;;  %v11058_v32 = vadd.f32 %v11057_v20, %v11056_v12 }
 0x7b1   : > { %v11009_v44 = vpop.f32.mrb[72].mxu1  ;;  %v11059_v58 = vpop.f32.mrb[92].mxu0  ;;  %v5724_v63 = vadd.f32 %v11058_v32, %v5619_v1  ;;  %v5629_v50 = vadd.f32 %v11008_v38, %v16804_v5 }
 0x7b2   : > { %v11010_v42 = vpop.f32.mrb[73].mxu1  ;;  %v11060_v9 = vpop.f32.mrb[93].mxu0 }
 0x7b3   : > { %v11011_v39 = vadd.f32 %v11010_v42, %v11009_v44  ;;  %v11061_v40 = vadd.f32 %v11060_v9, %v11059_v58 }
 0x7b5   : > { %v11012_v51 = vpop.f32.mrb[74].mxu1  ;;  %v11062_v57 = vpop.f32.mrb[94].mxu0  ;;  %v5729_v18 = vadd.f32 %v11061_v40, %v5624_v31  ;;  %v5634_v27 = vadd.f32 %v11011_v39, %v16804_v5 }
 0x7b6   : > { %v11013_v13 = vpop.f32.mrb[75].mxu1  ;;  %v11063_v34 = vpop.f32.mrb[95].mxu0 }
 0x7b7   : > { %v11014_v56 = vadd.f32 %v11013_v13, %v11012_v51  ;;  %v11064_v59 = vadd.f32 %v11063_v34, %v11062_v57 }
 0x7b9   : > { %v11015_v10 = vpop.f32.mrb[76].mxu1  ;;  %v11065_v19 = vpop.f32.mrb[96].mxu0  ;;  %v5734_v54 = vadd.f32 %v11064_v59, %v5629_v50  ;;  %v5639_v22 = vadd.f32 %v11014_v56, %v16804_v5 }
 0x7ba   : > { %v11016_v8 = vpop.f32.mrb[77].mxu1  ;;  %v11066_v37 = vpop.f32.mrb[97].mxu0 }
 0x7bb   : > { %v11017_v29 = vadd.f32 %v11016_v8, %v11015_v10  ;;  %v11067_v2 = vadd.f32 %v11066_v37, %v11065_v19 }
 0x7bd   : > { %v11018_v21 = vpop.f32.mrb[78].mxu1  ;;  %v11068_v14 = vpop.f32.mrb[98].mxu0  ;;  %v5739_v43 = vadd.f32 %v11067_v2, %v5634_v27  ;;  %v5644_v28 = vadd.f32 %v11017_v29, %v16804_v5 }
 0x7be   : > { %v11019_v4 = vpop.f32.mrb[79].mxu1  ;;  %v11069_v26 = vpop.f32.mrb[99].mxu0 }
 0x7bf   : > { %v11020_v30 = vadd.f32 %v11019_v4, %v11018_v21  ;;  %v11070_v33 = vadd.f32 %v11069_v26, %v11068_v14  ;;  %v6073_v21 = vld [vmem:[%s19103_s5 + $0x70] sm:$0xff]  ;;  %v6074_v14 = vld [vmem:[%s19103_s5 + $0x78] sm:$0xff]  ;;  %v6120_v26 = vld [vmem:[%s19103_s5 + $0x1e8] sm:$0xff] }
 0x7c0   : > { %v11990_v4 = vpack.c.bf16 %v6074_v14, %v6073_v21 }
 0x7c1   : > { %v11071_v36 = vpop.f32.mrb[100].mxu0  ;;  %v11649_v62 = vpop.f32.mrb[80].mxu1  ;;  %v5744_v7 = vadd.f32 %v11070_v33, %v5639_v22  ;;  %v5649_v52 = vadd.f32 %v11020_v30, %v16804_v5  ;;  %v6103_v22 = vld [vmem:[%s19103_s5 + $0x160] sm:$0xff]  ;;  %v6104_v30 = vld [vmem:[%s19103_s5 + $0x168] sm:$0xff] }
 0x7c2   : > { %v5829_v3 = vadd.f32 %v11649_v62, %v5724_v63  ;;  %v11072_v25 = vpop.f32.mrb[101].mxu0  ;;  %v5823_v24 = vpop.f32.mrb[81].mxu1  ;;  %11991 = vmatpush3.bf16.msra.mxu0 %v11990_v4 }
 0x7c3   : > { %v11073_v17 = vadd.f32 %v11072_v25, %v11071_v36  ;;  %v5824_v35 = vadd.f32 %v5823_v24, %v5719_v16 }
 0x7c4   : > { %v5863_v15 = vmax.f32 %v5829_v3, 0.0  ;;  %v12018_v3 = vpack.c.bf16 %v6104_v30, %v6103_v22 }
 0x7c5   : > { %v5862_v46 = vmax.f32 %v5824_v35, 0.0  ;;  %v11074_v23 = vpop.f32.mrb[102].mxu0  ;;  %v11652_v60 = vpop.f32.mrb[82].mxu1  ;;  %v5749_v49 = vadd.f32 %v11073_v17, %v5644_v28  ;;  %v6123_v35 = vld [vmem:[%s19103_s5 + $0x200] sm:$0xff] }
 0x7c6   : > { %5871 = vst.msk [vmem:[#allocation5 + $0x21] sm:$0xff] %vm522_vm14, %v5863_v15  ;;  %v5839_v45 = vadd.f32 %v11652_v60, %v5734_v54  ;;  %v11075_v6 = vpop.f32.mrb[103].mxu0  ;;  %v5833_v47 = vpop.f32.mrb[83].mxu1  ;;  %v6124_v15 = vld [vmem:[%s19103_s5 + $0x208] sm:$0xff] }
 0x7c7   : > { %5870 = vst.msk [vmem:[#allocation5 + $0x11] sm:$0xff] %vm522_vm14, %v5862_v46  ;;  %v11076_v48 = vadd.f32 %v11075_v6, %v11074_v23  ;;  %v5834_v41 = vadd.f32 %v5833_v47, %v5729_v18  ;;  %v12024_v23 = vpack.c.bf16 %v6124_v15, %v6123_v35  ;;  %v6552_v35 = vld [vmem:[%s19104_s6 + $0x110] sm:$0xff] }
 0x7c8   : > { %v5865_v11 = vmax.f32 %v5839_v45, 0.0  ;;  %v6122_v45 = vld [vmem:[%s19103_s5 + $0x1f8] sm:$0xff] }
 0x7c9   : > { %v5864_v55 = vmax.f32 %v5834_v41, 0.0  ;;  %v11655_v53 = vpop.f32.mrb[84].mxu1  ;;  %v5754_v12 = vadd.f32 %v11076_v48, %v5649_v52  ;;  %12025 = vmatprep.subr.bf16.mxu0 %v12024_v23  ;;  %v6105_v41 = vld [vmem:[%s19103_s5 + $0x170] sm:$0xff] }
 0x7ca   : > { %5873 = vst.msk [vmem:[#allocation5 + $0x41] sm:$0xff] %vm522_vm14, %v5865_v11  ;;  %v5849_v16 = vadd.f32 %v11655_v53, %v5744_v7  ;;  %v5843_v61 = vpop.f32.mrb[85].mxu1  ;;  %v6106_v11 = vld [vmem:[%s19103_s5 + $0x178] sm:$0xff] }
 0x7cb   : > { %5872 = vst.msk [vmem:[#allocation5 + $0x31] sm:$0xff] %vm522_vm14, %v5864_v55  ;;  %v5844_v20 = vadd.f32 %v5843_v61, %v5739_v43  ;;  %v6119_v43 = vld [vmem:[%s19103_s5 + $0x1e0] sm:$0xff]  ;;  %v12022_v53 = vpack.c.bf16 %v6106_v11, %v6105_v41  ;;  %v6520_v11 = vld [vmem:[%s19104_s6 + $0x10] sm:$0xff] }
 0x7cc   : > { %v5867_v1 = vmax.f32 %v5849_v16, 0.0  ;;  %v12016_v7 = vpack.c.bf16 %v6120_v26, %v6119_v43 }
 0x7cd   : > { %v5866_v38 = vmax.f32 %v5844_v20, 0.0  ;;  %v11658_v32 = vpop.f32.mrb[86].mxu1  ;;  %v5895_v44 = vld [vmem:[#allocation5 + $0x21] ss:$2 sm:$0xf] }
 0x7ce   : > { %5875 = vst.msk [vmem:[#allocation5 + $0x61] sm:$0xff] %vm522_vm14, %v5867_v1  ;;  %v5859_v5 = vadd.f32 %v11658_v32, %v5754_v12  ;;  %v5853_v58 = vpop.f32.mrb[87].mxu1  ;;  %v5879_v63 = vld [vmem:[#allocation5 + $0x11] ss:$2 sm:$0xf]  ;;  %12017 = vmatprep.subr.bf16.mxu1 %v12016_v7 }
 0x7cf   : > { %5874 = vst.msk [vmem:[#allocation5 + $0x51] sm:$0xff] %vm522_vm14, %v5866_v38  ;;  %v5854_v42 = vadd.f32 %v5853_v58, %v5749_v49  ;;  %v5887_v9 = vld [vmem:[#allocation5 + $0x12] ss:$2 sm:$0xf]  ;;  %12019 = vmatpush3.bf16.msra.mxu1 %v12018_v3 }
 0x7d0   : > { %v5903_v31 = vld [vmem:[#allocation5 + $0x22] ss:$2 sm:$0xf]  ;;  %v5869_v39 = vmax.f32 %v5859_v5, 0.0  ;;  %v5910_v40 = vmax.f32 %v5879_v63, %v5887_v9  ;;  %v6121_v49 = vld [vmem:[%s19103_s5 + $0x1f0] sm:$0xff]  ;;  %v6126_v58 = vld [vmem:[%s19103_s5 + $0x218] sm:$0xff] }
 0x7d1   : > { %v5914_v51 = vmax.f32 %v5895_v44, %v5903_v31  ;;  %v5868_v57 = vmax.f32 %v5854_v42, 0.0  ;;  %v5897_v18 = vld [vmem:[#allocation5 + $0x41] ss:$2 sm:$0xf]  ;;  %v12020_v47 = vpack.c.bf16 %v6122_v45, %v6121_v49  ;;  %v6125_v5 = vld [vmem:[%s19103_s5 + $0x210] sm:$0xff]  ;;  %v6535_v49 = vld [vmem:[%s19104_s6 + $0x88] sm:$0xff] }
 0x7d2   : > { %5877 = vst.msk [vmem:[#allocation5 + $0x81] sm:$0xff] %vm522_vm14, %v5869_v39  ;;  %v5881_v13 = vld [vmem:[#allocation5 + $0x31] ss:$2 sm:$0xf]  ;;  %v6518_v45 = vld [vmem:[%s19104_s6] sm:$0xff] }
 0x7d3   : > { %v5889_v34 = vld [vmem:[#allocation5 + $0x32] ss:$2 sm:$0xf]  ;;  %v5918_v50 = vmax.f32 %v5910_v40, %v5914_v51  ;;  %5876 = vst.msk [vmem:[#allocation5 + $0x71] sm:$0xff] %vm522_vm14, %v5868_v57  ;;  %12021 = vmatprep.subr.bf16.mxu1 %v12020_v47  ;;  %v6519_v47 = vld [vmem:[%s19104_s6 + $0x8] sm:$0xff] }
 0x7d4   : > { %v5905_v56 = vld [vmem:[#allocation5 + $0x42] ss:$2 sm:$0xf]  ;;  %v5911_v59 = vmax.f32 %v5881_v13, %v5889_v34  ;;  %12023 = vmatpush3.bf16.msra.mxu1 %v12022_v53 }
 0x7d5   : > { %v5915_v10 = vmax.f32 %v5897_v18, %v5905_v56  ;;  %5923 = vst.msk [vmem:[#allocation6 + $0x9] sm:$0xf] %vm5922_vm4, %v5918_v50  ;;  %v5899_v19 = vld [vmem:[#allocation5 + $0x61] ss:$2 sm:$0xf]  ;;  %v12028_v18 = vpack.c.bf16 %v6126_v58, %v6125_v5  ;;  %v6524_v58 = vld [vmem:[%s19104_s6 + $0x30] sm:$0xff] }
 0x7d6   : > { %v5907_v54 = vld [vmem:[#allocation5 + $0x62] ss:$2 sm:$0xf]  ;;  %v5883_v37 = vld [vmem:[#allocation5 + $0x51] ss:$2 sm:$0xf] }
 0x7d7   : > { %v5919_v8 = vmax.f32 %v5911_v59, %v5915_v10  ;;  %v5891_v27 = vld [vmem:[#allocation5 + $0x52] ss:$2 sm:$0xf]  ;;  %v5916_v29 = vmax.f32 %v5899_v19, %v5907_v54  ;;  %v6127_v56 = vld [vmem:[%s19103_s5 + $0x220] sm:$0xff]  ;;  %v6128_v59 = vld [vmem:[%s19103_s5 + $0x228] sm:$0xff] }
 0x7d8   : > { %v5912_v2 = vmax.f32 %v5883_v37, %v5891_v27  ;;  %v12032_v54 = vpack.c.bf16 %v6128_v59, %v6127_v56  ;;  %v6130_v37 = vld [vmem:[%s19103_s5 + $0x238] sm:$0xff]  ;;  %v6538_v53 = vld [vmem:[%s19104_s6 + $0xa0] sm:$0xff] }
 0x7d9   : > { %5924 = vst.msk [vmem:[#allocation6 + $0x11] sm:$0xf] %vm5922_vm4, %v5919_v8  ;;  %v5901_v36 = vld [vmem:[#allocation5 + $0x81] ss:$2 sm:$0xf]  ;;  %v6129_v8 = vld [vmem:[%s19103_s5 + $0x230] sm:$0xff] }
 0x7da   : > { %v5920_v33 = vmax.f32 %v5912_v2, %v5916_v29  ;;  %v5909_v62 = vld [vmem:[#allocation5 + $0x82] ss:$2 sm:$0xf]  ;;  %v5885_v25 = vld [vmem:[#allocation5 + $0x71] ss:$2 sm:$0xf] }
 0x7db   : > { %v5893_v24 = vld [vmem:[#allocation5 + $0x72] ss:$2 sm:$0xf]  ;;  %v5917_v28 = vmax.f32 %v5901_v36, %v5909_v62 }
 0x7dc   : > { %5925 = vst.msk [vmem:[#allocation6 + $0x19] sm:$0xf] %vm5922_vm4, %v5920_v33  ;;  %v5913_v17 = vmax.f32 %v5885_v25, %v5893_v24  ;;  %v13370_v60 = vld [vmem:[#allocation6 + $0x1] ss:$8 sps:$4 sm:$0xff]   ;;  %v12036_v33 = vpack.c.bf16 %v6130_v37, %v6129_v8  ;;  %v6529_v56 = vld [vmem:[%s19104_s6 + $0x58] sm:$0xff] }
 0x7dd   : > { %v13378_v9 = vld [vmem:[#allocation6 + $0x2] ss:$8 sps:$4 sm:$0xff]  }
 0x7de   : > { %v5921_v46 = vmax.f32 %v5913_v17, %v5917_v28  ;;  %v13379_v31 = vld [vmem:[#allocation6] ss:$8 sps:$4 sm:$0xff]  }
 0x7df   : > { %v6550_v28 = vld [vmem:[%s19104_s6 + $0x100] sm:$0xff]  ;;  %v6551_v17 = vld [vmem:[%s19104_s6 + $0x108] sm:$0xff] }
 0x7e0   : > { %v13371_v6 = vld [vmem:[#allocation6 + $0x8] ss:$8 sps:$4 sm:$0xff]   ;;  %5926 = vst.msk [vmem:[#allocation6 + $0x21] sm:$0xf] %vm5922_vm4, %v5921_v46  ;;  %v12072_v15 = vpack.c.bf16 %v6551_v17, %v6550_v28  ;;  %v6553_v46 = vld [vmem:[%s19104_s6 + $0x118] sm:$0xff]  ;;  %v6546_v17 = vld [vmem:[%s19104_s6 + $0xe0] sm:$0xff] }
 0x7e1   : > { %v13372_v52 = vld [vmem:[#allocation6 + $0xa] ss:$8 sps:$4 sm:$0xff]   ;;  %v12960_v48 = vpack.i.bf16 %v13370_v60, %v13371_v6  ;;  %v6534_v60 = vld [vmem:[%s19104_s6 + $0x80] sm:$0xff] }
 0x7e2   : > { %v13381_v50 = vld [vmem:[#allocation6 + $0x9] ss:$8 sps:$4 sm:$0xff]   ;;  %12073 = vmatprep.subr.bf16.mxu1 %v12072_v15  ;;  %v12040_v6 = vpack.c.bf16 %v6535_v49, %v6534_v60 }
 0x7e3   : > { %v13373_v55 = vld [vmem:[#allocation6 + $0x11] ss:$8 sps:$4 sm:$0xff]   ;;  %12961 = vrot.lane.b32.xlu0 %v12960_v48, %s13431_s19  ;;  %v12042_v48 = vpack.c.bf16 %v6519_v47, %v6518_v45 }
 0x7e4   : > { %v12965_v12 = vpack.i.bf16 %v13372_v52, %v13373_v55  ;;  %v13376_v16 = vld [vmem:[#allocation6 + $0x11] ss:$8 sps:$4 sm:$0xff]  }
 0x7e5   : > { %v13380_v57 = vld [vmem:[#allocation6 + $0x10] ss:$8 sps:$4 sm:$0xff]  }
 0x7e6   : > { %12966 = vrot.lane.b32.xlu1 %v12965_v12, %s13431_s19  ;;  %v13382_v2 = vld [vmem:[#allocation6 + $0x12] ss:$8 sps:$4 sm:$0xff]   ;;  %v6539_v12 = vld [vmem:[%s19104_s6 + $0xa8] sm:$0xff] }
 0x7e7   : > { %v13374_v61 = vld [vmem:[#allocation6 + $0x1a] ss:$8 sps:$4 sm:$0xff]   ;;  %v6548_v49 = vld [vmem:[%s19104_s6 + $0xf0] sm:$0xff] }
 0x7e8   : > { %v13375_v20 = vld [vmem:[#allocation6 + $0x21] ss:$8 sps:$4 sm:$0xff]   ;;  %v13384_v22 = vld [vmem:[#allocation6 + $0x10] ss:$8 sps:$4 sm:$0xff]  }
 0x7e9   : > { %v13377_v1 = vld [vmem:[#allocation6 + $0x18] ss:$8 sps:$4 sm:$0xff]   ;;  %v12975_v38 = vpack.i.bf16 %v13374_v61, %v13375_v20  ;;  %v12048_v61 = vpack.c.bf16 %v6539_v12, %v6538_v53 }
 0x7ea   : > { %v12970_v32 = vpack.i.bf16 %v13376_v16, %v13377_v1  ;;  %v13383_v26 = vld [vmem:[#allocation6 + $0x20] ss:$8 sps:$4 sm:$0xff]   ;;  %v13386_v25 = vld [vmem:[#allocation6 + $0x12] ss:$8 sps:$4 sm:$0xff]  }
 0x7eb   : > { %12976 = vrot.lane.b32.xlu1 %v12975_v38, %s13431_s19  ;;  %v13385_v30 = vld [vmem:[#allocation6 + $0x19] ss:$8 sps:$4 sm:$0xff]   ;;  %v6523_v1 = vld [vmem:[%s19104_s6 + $0x28] sm:$0xff]  ;;  %v6540_v38 = vld [vmem:[%s19104_s6 + $0xb0] sm:$0xff] }
 0x7ec   : > { %12971 = vrot.lane.b32.xlu0 %v12970_v32, %s13431_s19  ;;  %v13387_v24 = vld [vmem:[#allocation6 + $0x22] ss:$8 sps:$4 sm:$0xff]   ;;  %v6537_v52 = vld [vmem:[%s19104_s6 + $0x98] sm:$0xff] }
 0x7ed   : > { %v12044_v41 = vpack.c.bf16 %v6537_v52, %v6536_v0  ;;  %v6521_v55 = vld [vmem:[%s19104_s6 + $0x18] sm:$0xff]  ;;  %v6522_v20 = vld [vmem:[%s19104_s6 + $0x20] sm:$0xff] }
 0x7ee   : > { %v12046_v16 = vpack.c.bf16 %v6521_v55, %v6520_v11  ;;  %v6541_v32 = vld [vmem:[%s19104_s6 + $0xb8] sm:$0xff] }
 0x7ef   : > { %v12052_v5 = vpack.c.bf16 %v6541_v32, %v6540_v38  ;;  %v6549_v45 = vld [vmem:[%s19104_s6 + $0xf8] sm:$0xff] }
 0x7f0   : > { %v12068_v47 = vpack.c.bf16 %v6549_v45, %v6548_v49  ;;  %v6716_v49 = vld [vmem:[%s19105_s7 + $0x10] sm:$0xff] }
 0x855   : > { %v12962_v44 = vpop.permute.xlu0 %12961 }
 0x856   : > { %v12964_v63 = vunpack.i.h.bf16 %v12962_v44  ;;  %v12963_v42 = vunpack.i.l.bf16 %v12962_v44  ;;  %v12050_v44 = vpack.c.bf16 %v6523_v1, %v6522_v20  ;;  %v6532_v1 = vld [vmem:[%s19104_s6 + $0x70] sm:$0xff] }
 0x858   : > { %v12967_v39 = vpop.permute.xlu1 %12966  ;;  %v6053_v40 = vsel %vm522_vm14, %v13378_v9, %v12963_v42  ;;  %v6051_v51 = vsel %vm522_vm14, %v13379_v31, %v12964_v63  ;;  %v6525_v63 = vld [vmem:[%s19104_s6 + $0x38] sm:$0xff]  ;;  %v6542_v42 = vld [vmem:[%s19104_s6 + $0xc0] sm:$0xff]  ;;  %v6543_v9 = vld [vmem:[%s19104_s6 + $0xc8] sm:$0xff] }
 0x859   : > { %v12969_v13 = vunpack.i.h.bf16 %v12967_v39  ;;  %v12968_v34 = vunpack.i.l.bf16 %v12967_v39  ;;  %6203 = vmatprep.mubr.f32.mxu0 %v6053_v40  ;;  %v12054_v31 = vpack.c.bf16 %v6525_v63, %v6524_v58  ;;  %v12056_v39 = vpack.c.bf16 %v6543_v9, %v6542_v42  ;;  %v6526_v40 = vld [vmem:[%s19104_s6 + $0x40] sm:$0xff]  ;;  %v6533_v42 = vld [vmem:[%s19104_s6 + $0x78] sm:$0xff] }
 0x85a   : > { %6204 = vmatmul.mubr.f32.vlgmr.msra.gmra.mrb[104].mxu0 %v6051_v51  ;;  %v6527_v51 = vld [vmem:[%s19104_s6 + $0x48] sm:$0xff] }
 0x85b   : > { %12027 = vmatpush3.bf16.msra.mxu0 %v12024_v23  ;;  %v6057_v10 = vsel %vm522_vm14, %v13380_v57, %v12968_v34  ;;  %v6055_v19 = vsel %vm522_vm14, %v13381_v50, %v12969_v13  ;;  %v12076_v23 = vpack.c.bf16 %v6553_v46, %v6552_v35  ;;  %v6544_v57 = vld [vmem:[%s19104_s6 + $0xd0] sm:$0xff]  ;;  %v12058_v13 = vpack.c.bf16 %v6527_v51, %v6526_v40  ;;  %v6547_v35 = vld [vmem:[%s19104_s6 + $0xe8] sm:$0xff] }
 0x85c   : > { %6278 = vmatprep.mubr.f32.mxu1 %v6057_v10  ;;  %12029 = vmatprep.subr.bf16.mxu0 %v12028_v18  ;;  %v6528_v50 = vld [vmem:[%s19104_s6 + $0x50] sm:$0xff]  ;;  %v12064_v46 = vpack.c.bf16 %v6547_v35, %v6546_v17 }
 0x85d   : > { %v12977_v27 = vpop.permute.xlu1 %12976  ;;  %6279 = vmatmul.mubr.f32.vlgmr.msra.gmra.mrb[88].mxu1 %v6055_v19  ;;  %v12062_v59 = vpack.c.bf16 %v6529_v56, %v6528_v50 }
 0x85e   : > { %v12972_v29 = vpop.permute.xlu0 %12971  ;;  %v12979_v21 = vunpack.i.h.bf16 %v12977_v27  ;;  %v12978_v14 = vunpack.i.l.bf16 %v12977_v27  ;;  %12075 = vmatpush3.bf16.msra.mxu1 %v12072_v15  ;;  %v6530_v15 = vld [vmem:[%s19104_s6 + $0x60] sm:$0xff] }
 0x85f   : > { %v12974_v43 = vunpack.i.h.bf16 %v12972_v29  ;;  %v12973_v4 = vunpack.i.l.bf16 %v12972_v29  ;;  %12031 = vmatpush3.bf16.msra.mxu0 %v12028_v18  ;;  %12077 = vmatprep.subr.bf16.mxu1 %v12076_v23  ;;  %v6545_v18 = vld [vmem:[%s19104_s6 + $0xd8] sm:$0xff] }
 0x860   : > { %v6058_v62 = vsel %vm522_vm14, %v13383_v26, %v12978_v14  ;;  %12033 = vmatprep.subr.bf16.mxu0 %v12032_v54  ;;  %v6056_v3 = vsel %vm522_vm14, %v13385_v30, %v12979_v21  ;;  %v12060_v34 = vpack.c.bf16 %v6545_v18, %v6544_v57 }
 0x861   : > { %v6054_v36 = vsel %vm522_vm14, %v13382_v2, %v12973_v4  ;;  %v6052_v7 = vsel %vm522_vm14, %v13384_v22, %v12974_v43  ;;  %6283 = vmatprep.mubr.f32.mxu1 %v6058_v62 }
 0x862   : > { %6208 = vmatprep.mubr.f32.mxu0 %v6054_v36  ;;  %6284 = vmatmul.mubr.f32.gmra.mrb[90].mxu1 %v6056_v3 }
 0x863   : > { %6209 = vmatmul.mubr.f32.gmra.mrb[106].mxu0 %v6052_v7  ;;  %12079 = vmatpush3.bf16.msra.mxu1 %v12076_v23  ;;  %v6531_v23 = vld [vmem:[%s19104_s6 + $0x68] sm:$0xff] }
 0x864   : > { %12035 = vmatpush3.bf16.msra.mxu0 %v12032_v54  ;;  %11675 = vmatprep.mubr.msk.f32.mxu0 %vm522_vm14, %v13386_v25  ;;  %v10754_v54 = vld [vmem:[%s19109_s11 + $0x4] ss:$0 sm:$0xff]  ;;  %v12066_v60 = vpack.c.bf16 %v6531_v23, %v6530_v15 }
 0x865   : > { %12037 = vmatprep.subr.bf16.mxu0 %v12036_v33  ;;  %v6714_v23 = vld [vmem:[%s19105_s7] sm:$0xff] }
 0x868   : > { %12039 = vmatpush3.bf16.msra.mxu0 %v12036_v33 }
 0x869   : > { %12041 = vmatprep.subr.bf16.mxu0 %v12040_v6 }
 0x86b   : > { %11676 = vmatmul.mubr.msk.f32.vlgmr.msra.gmra.mrb[108].mxu0 %vm522_vm14, %v13387_v24 }
 0x86c   : > { %12043 = vmatpush3.bf16.msra.mxu0 %v12042_v48 }
 0x86d   : > { %12045 = vmatprep.subr.bf16.mxu0 %v12044_v41 }
 0x870   : > { %12047 = vmatpush3.bf16.msra.mxu0 %v12046_v16 }
 0x871   : > { %12049 = vmatprep.subr.bf16.mxu0 %v12048_v61 }
 0x874   : > { %12051 = vmatpush3.bf16.msra.mxu0 %v12050_v44 }
 0x875   : > { %12053 = vmatprep.subr.bf16.mxu0 %v12052_v5 }
 0x878   : > { %12055 = vmatpush3.bf16.msra.mxu0 %v12054_v31  ;;  %v12070_v31 = vpack.c.bf16 %v6533_v42, %v6532_v1  ;;  %v10760_v42 = vld [vmem:[%s19109_s11 + $0x6] ss:$0 sm:$0xff] }
 0x879   : > { %12057 = vmatprep.subr.bf16.mxu0 %v12056_v39 }
 0x87c   : > { %12059 = vmatpush3.bf16.msra.mxu0 %v12058_v13 }
 0x87d   : > { %12061 = vmatprep.subr.bf16.mxu0 %v12060_v34 }
 0x880   : > { %12063 = vmatpush3.bf16.msra.mxu0 %v12062_v59 }
 0x881   : > { %12065 = vmatprep.subr.bf16.mxu0 %v12064_v46 }
 0x884   : > { %12067 = vmatpush3.bf16.msra.mxu0 %v12066_v60  ;;  %v6715_v60 = vld [vmem:[%s19105_s7 + $0x8] sm:$0xff] }
 0x885   : > { %12069 = vmatprep.subr.bf16.mxu0 %v12068_v47  ;;  %v12080_v45 = vpack.c.bf16 %v6715_v60, %v6714_v23 }
 0x887   : > { %12081 = vmatprep.subr.bf16.mxu1 %v12080_v45 }
 0x888   : > { %12071 = vmatpush3.bf16.msra.mxu0 %v12070_v31 }
 0x92d   : > { %v11125_v10 = vpop.f32.mrb[104].mxu0 }
 0x92e   : > { %v11126_v19 = vpop.f32.mrb[105].mxu0 }
 0x92f   : > { %v11127_v8 = vadd.f32 %v11126_v19, %v11125_v10 }
 0x930   : > { %v11163_v37 = vpop.f32.mrb[88].mxu1 }
 0x931   : > { %v11164_v27 = vpop.f32.mrb[89].mxu1  ;;  %v6206_v29 = vadd.f32 %v11127_v8, %v10754_v54 }
 0x932   : > { %v11165_v2 = vadd.f32 %v11164_v27, %v11163_v37 }
 0x934   : > { %v6281_v21 = vadd.f32 %v11165_v2, %v6206_v29 }
 0x935   : > { %v11166_v43 = vpop.f32.mrb[90].mxu1 }
 0x936   : > { %v11128_v14 = vpop.f32.mrb[106].mxu0  ;;  %v11167_v26 = vpop.f32.mrb[91].mxu1 }
 0x937   : > { %v11129_v4 = vpop.f32.mrb[107].mxu0  ;;  %v11168_v30 = vadd.f32 %v11167_v26, %v11166_v43 }
 0x938   : > { %v11130_v22 = vadd.f32 %v11129_v4, %v11128_v14 }
 0x93a   : > { %v6211_v33 = vadd.f32 %v11130_v22, %v10754_v54 }
 0x93c   : > { %v6286_v36 = vadd.f32 %v11168_v30, %v6211_v33 }
 0x93e   : > { %v11677_v62 = vpop.f32.mrb[108].mxu0 }
 0x93f   : > { %v6361_v7 = vadd.f32 %v11677_v62, %v6286_v36  ;;  %v6355_v3 = vpop.f32.mrb[109].mxu0 }
 0x940   : > { %v6356_v25 = vadd.f32 %v6355_v3, %v6281_v21 }
 0x941   : > { %v6365_v24 = vmax.f32 %v6361_v7, 0.0 }
 0x942   : > { %v6364_v28 = vmax.f32 %v6356_v25, 0.0 }
 0x943   : > { %6372 = vst.msk [vmem:[#allocation7 + $0x19] sm:$0xf] %vm6366_vm6, %v6365_v24 }
 0x944   : > { %6374 = vst.msk [vmem:[#allocation7 + $0x1d] sm:$0xf0] %vm6369_vm7, %v6365_v24  ;;  %6370 = vst.msk [vmem:[#allocation7 + $0xd] sm:$0xf0] %vm6369_vm7, %v6364_v28 }
 0x945   : > { %6367 = vst.msk [vmem:[#allocation7 + $0x9] sm:$0xf] %vm6366_vm6, %v6364_v28 }
 0x94b   : > { %v13389_v6 = vld [vmem:[#allocation7 + $0x22] ss:$8 sps:$4 sm:$0xff]   ;;  %v13388_v0 = vld [vmem:[#allocation7 + $0x12] ss:$8 sps:$4 sm:$0xff]  }
 0x94c   : > { %v13390_v52 = vld [vmem:[#allocation7 + $0x1] ss:$8 sps:$4 sm:$0xff]   ;;  %11686 = vmatprep.mubr.msk.f32.mxu1 %vm457_vm3, %v13388_v0  ;;  %v13393_v11 = vld [vmem:[#allocation7 + $0x10] ss:$8 sps:$4 sm:$0xff]  }
 0x94d   : > { %v13391_v48 = vld [vmem:[#allocation7 + $0xa] ss:$8 sps:$4 sm:$0xff]   ;;  %11687 = vmatmul.mubr.msk.f32.vlgmr.msra.gmra.mrb[92].mxu1 %vm457_vm3, %v13389_v6  ;;  %v13397_v20 = vld [vmem:[#allocation7 + $0x1a] ss:$8 sps:$4 sm:$0xff]  }
 0x94e   : > { %v13392_v41 = vld [vmem:[#allocation7 + $0x2] ss:$8 sps:$4 sm:$0xff]   ;;  %v12980_v55 = vpack.i.bf16 %v13390_v52, %v13391_v48  ;;  %v13395_v16 = vld [vmem:[#allocation7 + $0x11] ss:$8 sps:$4 sm:$0xff]   ;;  %12083 = vmatpush3.bf16.msra.mxu1 %v12080_v45  ;;  %v10757_v52 = vld [vmem:[%s19109_s11 + $0x5] ss:$0 sm:$0xff] }
 0x94f   : > { %v12985_v53 = vpack.i.bf16 %v13392_v41, %v13393_v11  ;;  %v13394_v12 = vld [vmem:[#allocation7 + $0x8] ss:$8 sps:$4 sm:$0xff]   ;;  %v13400_v58 = vld [vmem:[#allocation7 + $0x18] ss:$8 sps:$4 sm:$0xff]  }
 0x950   : > { %12981 = vrot.lane.b32.xlu0 %v12980_v55, %s13429_s18  ;;  %v13396_v61 = vld [vmem:[#allocation7 + $0x11] ss:$8 sps:$4 sm:$0xff]   ;;  %v12990_v38 = vpack.i.bf16 %v13394_v12, %v13395_v16  ;;  %v13399_v5 = vld [vmem:[#allocation7 + $0x20] ss:$8 sps:$4 sm:$0xff]  }
 0x951   : > { %12986 = vrot.lane.b32.xlu1 %v12985_v53, %s13431_s19  ;;  %v12995_v32 = vpack.i.bf16 %v13396_v61, %v13397_v20  ;;  %v13398_v44 = vld [vmem:[#allocation7 + $0x12] ss:$8 sps:$4 sm:$0xff]   ;;  %v13401_v63 = vld [vmem:[#allocation7 + $0x21] ss:$8 sps:$4 sm:$0xff]  }
 0x952   : > { %v13000_v9 = vpack.i.bf16 %v13398_v44, %v13399_v5  ;;  %v13005_v39 = vpack.i.bf16 %v13400_v58, %v13401_v63  ;;  %v13402_v13 = vld [vmem:[#allocation7 + $0x9] ss:$8 sps:$4 sm:$0xff]   ;;  %v13404_v26 = vld [vmem:[#allocation7 + $0x19] ss:$8 sps:$4 sm:$0xff]   ;;  %v6808_v5 = vlaneseq }
 0x953   : > { %v13403_v34 = vld [vmem:[#allocation7] ss:$8 sps:$4 sm:$0xff]   ;;  %v13405_v22 = vld [vmem:[#allocation7 + $0x10] ss:$8 sps:$4 sm:$0xff]  }
 0x954   : > { %12991 = vrot.lane.b32.xlu0 %v12990_v38, %s13432_s15  ;;  %v6717_v6 = vld [vmem:[%s19105_s7 + $0x18] sm:$0xff]  ;;  %v17044_v63 = vshrl.u32 %v6808_v5, 7 }
 0x955   : > { %12996 = vrot.lane.b32.xlu1 %v12995_v32, %s13429_s18  ;;  %v12084_v47 = vpack.c.bf16 %v6717_v6, %v6716_v49  ;;  %v13433_v32 = vmov 1966171168  }
 0x956   : > { %v6806_v44 = vunpack.c.l.s4 %v13433_v32  ;;  %v7846_v32 = vld [vmem:[%s19106_s8 + $0x90] sm:$0xff] }
 0x957   : > { %12085 = vmatprep.subr.bf16.mxu1 %v12084_v47 }
 0x958   : > { %13001 = vrot.lane.b32.xlu0 %v13000_v9, %s13431_s19  ;;  %12087 = vmatpush3.bf16.msra.mxu1 %v12084_v47  ;;  %v6807_v58 = vunpack.c.0.s8 %v6806_v44  ;;  %v7847_v44 = vld [vmem:[%s19106_s8 + $0x98] sm:$0xff] }
 0x959   : > { %13006 = vrot.lane.b32.xlu1 %v13005_v39, %s13432_s15 }
 0x95a   : > { %v17050_v31 = vsub.s32 %v6807_v58, %v17044_v63 }
 0x95c   : > { %19134 = vst [vmem:[#allocation8_spill] sm:$0xff] %v17050_v31 }
 0x9c2   : > { %v12982_v40 = vpop.permute.xlu0 %12981 }
 0x9c3   : > { %v12984_v51 = vunpack.i.h.bf16 %v12982_v40  ;;  %v12983_v57 = vunpack.i.l.bf16 %v12982_v40  ;;  %v12987_v18 = vpop.permute.xlu1 %12986 }
 0x9c4   : > { %v12989_v50 = vunpack.i.h.bf16 %v12987_v18  ;;  %v12988_v56 = vunpack.i.l.bf16 %v12987_v18  ;;  %v17054_v18 = vsub.s32 0, %v17044_v63 }
 0x9c5   : > { %v6512_v59 = vsel %vm457_vm3, %v13402_v13, %v12983_v57  ;;  %v6506_v10 = vsel %vm457_vm3, %v13403_v34, %v12984_v51 }
 0x9c6   : > { %v12992_v19 = vpop.permute.xlu0 %12991  ;;  %v6514_v2 = vsel %vm522_vm14, %v6512_v59, %v12988_v56  ;;  %v6508_v21 = vsel %vm522_vm14, %v6506_v10, %v12989_v50  ;;  %19135 = vst [vmem:[#allocation9_spill] sm:$0xff] %v17054_v18 }
 0x9c7   : > { %v12994_v54 = vunpack.i.h.bf16 %v12992_v19  ;;  %v12993_v8 = vunpack.i.l.bf16 %v12992_v19  ;;  %v12997_v37 = vpop.permute.xlu1 %12996 }
 0x9c8   : > { %v12999_v27 = vunpack.i.h.bf16 %v12997_v37  ;;  %v12998_v29 = vunpack.i.l.bf16 %v12997_v37 }
 0x9c9   : > { %v6516_v14 = vsel %vm3734_vm15, %v6514_v2, %v12993_v8  ;;  %v6510_v43 = vsel %vm3734_vm15, %v6508_v21, %v12994_v54 }
 0x9ca   : > { %6626 = vmatprep.mubr.f32.mxu0 %v6516_v14  ;;  %v13002_v4 = vpop.permute.xlu0 %13001  ;;  %v6513_v3 = vsel %vm457_vm3, %v13404_v26, %v12998_v29  ;;  %v6507_v25 = vsel %vm457_vm3, %v13405_v22, %v12999_v27 }
 0x9cb   : > { %v13004_v30 = vunpack.i.h.bf16 %v13002_v4  ;;  %v13003_v33 = vunpack.i.l.bf16 %v13002_v4  ;;  %v13007_v36 = vpop.permute.xlu1 %13006  ;;  %6627 = vmatmul.mubr.f32.vlgmr.msra.gmra.mrb[110].mxu0 %v6510_v43 }
 0x9cc   : > { %v13009_v62 = vunpack.i.h.bf16 %v13007_v36  ;;  %v13008_v7 = vunpack.i.l.bf16 %v13007_v36 }
 0x9cd   : > { %v6515_v24 = vsel %vm522_vm14, %v6513_v3, %v13003_v33  ;;  %v6509_v28 = vsel %vm522_vm14, %v6507_v25, %v13004_v30 }
 0x9ce   : > { %v6517_v17 = vsel %vm3734_vm15, %v6515_v24, %v13008_v7  ;;  %v6511_v35 = vsel %vm3734_vm15, %v6509_v28, %v13009_v62 }
 0x9cf   : > { %6631 = vmatprep.mubr.f32.mxu0 %v6517_v17 }
 0x9d0   : > { %6632 = vmatmul.mubr.f32.gmra.mrb[112].mxu0 %v6511_v35 }
 0xa20   : > { %v11688_v15 = vpop.f32.mrb[92].mxu1 }
 0xa21   : > { %v6703_v46 = vpop.f32.mrb[93].mxu1 }
 0xa9e   : > { %v11211_v0 = vpop.f32.mrb[110].mxu0 }
 0xa9f   : > { %v11212_v48 = vpop.f32.mrb[111].mxu0 }
 0xaa0   : > { %v11213_v41 = vadd.f32 %v11212_v48, %v11211_v0 }
 0xaa2   : > { %v6629_v11 = vadd.f32 %v11213_v41, %v10757_v52  ;;  %v13434_v41 = vmov 1983009808  }
 0xaa3   : > { %v11214_v55 = vpop.f32.mrb[112].mxu0 }
 0xaa4   : > { %v6704_v53 = vadd.f32 %v6703_v46, %v6629_v11  ;;  %v11215_v12 = vpop.f32.mrb[113].mxu0  ;;  %v6873_v11 = vunpack.c.l.s4 %v13434_v41 }
 0xaa5   : > { %v11216_v16 = vadd.f32 %v11215_v12, %v11214_v55  ;;  %v7845_v12 = vld [vmem:[%s19106_s8 + $0x88] sm:$0xff] }
 0xaa6   : > { %v6712_v61 = vmax.f32 %v6704_v53, 0.0  ;;  %v7844_v53 = vld [vmem:[%s19106_s8 + $0x80] sm:$0xff] }
 0xaa7   : > { %v6634_v20 = vadd.f32 %v11216_v16, %v10757_v52  ;;  %v7828_v16 = vld [vmem:[%s19106_s8] sm:$0xff] }
 0xaa8   : > { %11697 = vmatprep.mubr.msk.f32.mxu1 %vm457_vm3, %v6712_v61  ;;  %v6874_v61 = vunpack.c.0.s8 %v6873_v11  ;;  %v7850_v11 = vld [vmem:[%s19106_s8 + $0xb0] sm:$0xff] }
 0xaa9   : > { %v6709_v1 = vadd.f32 %v11688_v15, %v6634_v20 }
 0xaab   : > { %v6713_v38 = vmax.f32 %v6709_v1, 0.0  ;;  %v12088_v1 = vpack.c.bf16 %v7845_v12, %v7844_v53 }
 0xaad   : > { %11698 = vmatmul.mubr.msk.f32.vlgmr.msra.gmra.mrb[94].mxu1 %vm457_vm3, %v6713_v38  ;;  %v7829_v38 = vld [vmem:[%s19106_s8 + $0x8] sm:$0xff]  ;;  %12089 = vmatprep.subr.bf16.mxu1 %v12088_v1 }
 0xaae   : > { %v12090_v58 = vpack.c.bf16 %v7829_v38, %v7828_v16  ;;  %v7835_v16 = vld [vmem:[%s19106_s8 + $0x38] sm:$0xff]  ;;  %v7852_v38 = vld [vmem:[%s19106_s8 + $0xc0] sm:$0xff] }
 0xab0   : > { %12091 = vmatpush3.bf16.msra.mxu1 %v12090_v58 }
 0xb80   : > { %v11699_v9 = vpop.f32.mrb[94].mxu1 }
 0xb81   : > { %v6795_v39 = vpop.f32.mrb[95].mxu1  ;;  %v6801_v19 = vadd.f32 %v11699_v9, %v10760_v42  ;;  %v7830_v9 = vld [vmem:[%s19106_s8 + $0x10] sm:$0xff] }
 0xb82   : > { %v6796_v40 = vadd.f32 %v10760_v42, %v6795_v39  ;;  %v12092_v42 = vpack.c.bf16 %v7847_v44, %v7846_v32  ;;  %v7831_v39 = vld [vmem:[%s19106_s8 + $0x18] sm:$0xff] }
 0xb83   : > { %v6990_v2 = vrot.slane %v6801_v19, %v17050_v31  ;;  %v7073_v22 = vcombine.high %v6801_v19, %v6801_v19 }
 0xb84   : > { %v6811_v51 = vrot.slane %v6796_v40, %v17050_v31  ;;  %v6893_v57 = vcombine.high %v6796_v40, %v6796_v40  ;;  %12093 = vmatprep.subr.bf16.mxu1 %v12092_v42  ;;  %v7837_v42 = vld [vmem:[%s19106_s8 + $0x48] sm:$0xff] }
 0xb85   : > { %v6991_v26 = vcombine.high %v6990_v2, %v6990_v2  ;;  %v17105_v36 = vrot.slane %v6990_v2, %v17050_v31  ;;  %v7080_v3 = vrot.slane %v7073_v22, %v17050_v31 }
 0xb86   : > { %v6812_v13 = vcombine.high %v6811_v51, %v6811_v51  ;;  %v17057_v34 = vrot.slane %v6811_v51, %v17050_v31  ;;  %v6900_v50 = vrot.slane %v6893_v57, %v17050_v31  ;;  %v12094_v57 = vpack.c.bf16 %v7831_v39, %v7830_v9  ;;  %v7180_v39 = vld [vmem:[#allocation4 + $0x1] sm:$0xff] }
 0xb87   : > { %v17110_v7 = vrot.slane %v6991_v26, %v17050_v31  ;;  %v17119_v24 = vcombine.high %v17105_v36, %v17105_v36  ;;  %v7015_v28 = vrot.slane %v17105_v36, %v17054_v18  ;;  %v7081_v17 = vcombine.high %v7080_v3, %v7080_v3 }
 0xb88   : > { %v17061_v56 = vrot.slane %v6812_v13, %v17050_v31  ;;  %v17065_v59 = vcombine.high %v17057_v34, %v17057_v34  ;;  %v6836_v10 = vrot.slane %v17057_v34, %v17054_v18  ;;  %v6901_v54 = vcombine.high %v6900_v50, %v6900_v50  ;;  %12095 = vmatpush3.bf16.msra.mxu1 %v12094_v57 }
 0xb89   : > { %v17078_v27 = vrot.slane %v6900_v50, %v17050_v31  ;;  %v7019_v35 = vrot.slane %v17110_v7, %v17054_v18  ;;  %v17127_v15 = vcombine.high %v17110_v7, %v17110_v7  ;;  %v17132_v46 = vrot.slane %v7080_v3, %v17050_v31 }
 0xb8a   : > { %v6840_v8 = vrot.slane %v17061_v56, %v17054_v18  ;;  %v17073_v37 = vcombine.high %v17061_v56, %v17061_v56  ;;  %6849 = vrot.lane.b32.xlu0 %v6836_v10, %s13432_s15  ;;  %v6844_v29 = vrot.slane %v17065_v59, %v17054_v18  ;;  %v17084_v21 = vrot.slane %v6901_v54, %v17050_v31 }
 0xb8b   : > { %v6925_v43 = vrot.slane %v17078_v27, %v17054_v18  ;;  %v17094_v4 = vcombine.high %v17078_v27, %v17078_v27  ;;  %v7023_v23 = vrot.slane %v17119_v24, %v17054_v18  ;;  %v17137_v60 = vrot.slane %v7081_v17, %v17050_v31 }
 0xb8c   : > { %6851 = vrot.lane.b32.xlu1 %v6840_v8, %s13432_s15  ;;  %v6848_v14 = vrot.slane %v17073_v37, %v17054_v18  ;;  %v6929_v30 = vrot.slane %v17084_v21, %v17054_v18  ;;  %v17100_v33 = vcombine.high %v17084_v21, %v17084_v21  ;;  %v7027_v49 = vrot.slane %v17127_v15, %v17054_v18 }
 0xb8d   : > { %v6933_v62 = vrot.slane %v17094_v4, %v17054_v18  ;;  %v7105_v45 = vrot.slane %v17132_v46, %v17054_v18  ;;  %v17147_v6 = vcombine.high %v17132_v46, %v17132_v46  ;;  %v7109_v47 = vrot.slane %v17137_v60, %v17054_v18 }
 0xb8e   : > { %6853 = vrot.lane.b32.xlu0 %v6844_v29, %s13432_s15  ;;  %v6937_v25 = vrot.slane %v17100_v33, %v17054_v18  ;;  %v17153_v0 = vcombine.high %v17137_v60, %v17137_v60  ;;  %v17192_v13 = vsub.s32 %v6874_v61, %v17044_v63 }
 0xb8f   : > { %v7113_v52 = vrot.slane %v17147_v6, %v17054_v18 }
 0xb90   : > { %6855 = vrot.lane.b32.xlu1 %v6848_v14, %s13432_s15  ;;  %v7117_v48 = vrot.slane %v17153_v0, %v17054_v18  ;;  %19136 = vst [vmem:[#allocation10_spill] sm:$0xff] %v17192_v13 }
 0xb92   : > { %6938 = vrot.lane.b32.xlu0 %v6925_v43, %s13432_s15 }
 0xb94   : > { %6940 = vrot.lane.b32.xlu1 %v6929_v30, %s13432_s15 }
 0xb96   : > { %6942 = vrot.lane.b32.xlu0 %v6933_v62, %s13432_s15 }
 0xb98   : > { %6944 = vrot.lane.b32.xlu1 %v6937_v25, %s13432_s15  ;;  %v7832_v25 = vld [vmem:[%s19106_s8 + $0x20] sm:$0xff] }
 0xb9a   : > { %7028 = vrot.lane.b32.xlu0 %v7015_v28, %s13432_s15 }
 0xb9c   : > { %7030 = vrot.lane.b32.xlu1 %v7019_v35, %s13432_s15  ;;  %v7833_v35 = vld [vmem:[%s19106_s8 + $0x28] sm:$0xff] }
 0xb9e   : > { %7032 = vrot.lane.b32.xlu0 %v7023_v23, %s13432_s15 }
 0xba0   : > { %7034 = vrot.lane.b32.xlu1 %v7027_v49, %s13432_s15  ;;  %v12098_v49 = vpack.c.bf16 %v7833_v35, %v7832_v25 }
 0xba2   : > { %7118 = vrot.lane.b32.xlu0 %v7105_v45, %s13432_s15 }
 0xba4   : > { %7120 = vrot.lane.b32.xlu1 %v7109_v47, %s13432_s15 }
 0xba6   : > { %7122 = vrot.lane.b32.xlu0 %v7113_v52, %s13432_s15 }
 0xba8   : > { %7124 = vrot.lane.b32.xlu1 %v7117_v48, %s13432_s15 }
 0xbfc   : > { %v6850_v55 = vpop.permute.xlu0 %6849 }
 0xbfd   : > { %v6862_v40 = vsel %vm6861_vm8, %v17057_v34, %v6850_v55  ;;  %v7834_v55 = vld [vmem:[%s19106_s8 + $0x30] sm:$0xff] }
 0xbfe   : > { %v6852_v20 = vpop.permute.xlu1 %6851 }
 0xbff   : > { %v6863_v5 = vsel %vm6861_vm8, %v17061_v56, %v6852_v20  ;;  %v12102_v20 = vpack.c.bf16 %v7835_v16, %v7834_v55  ;;  %v7174_v16 = vld [vmem:[#allocation5 + $0x20] sm:$0xff] }
 0xc00   : > { %v6854_v51 = vpop.permute.xlu0 %6853  ;;  %v6870_v50 = vcombine.low %v6862_v40, %v6863_v5  ;;  %v7204_v40 = vld [vmem:[#allocation5 + $0x2] sm:$0xff] }
 0xc01   : > { %v6864_v10 = vsel %vm6861_vm8, %v17065_v59, %v6854_v51 }
 0xc02   : > { %v6856_v56 = vpop.permute.xlu1 %6855  ;;  %v6878_v34 = vrot.slane %v6870_v50, %v17192_v13 }
 0xc03   : > { %v6865_v19 = vsel %vm6861_vm8, %v17073_v37, %v6856_v56 }
 0xc04   : > { %v6871_v54 = vcombine.low %v6864_v10, %v6865_v19  ;;  %v6939_v8 = vpop.permute.xlu0 %6938 }
 0xc05   : > { %v6950_v43 = vsel %vm6861_vm8, %v17078_v27, %v6939_v8  ;;  %v7849_v27 = vld [vmem:[%s19106_s8 + $0xa8] sm:$0xff]  ;;  %v7855_v8 = vld [vmem:[%s19106_s8 + $0xd8] sm:$0xff] }
 0xc06   : > { %v6885_v29 = vrot.slane %v6871_v54, %v17192_v13  ;;  %v6941_v2 = vpop.permute.xlu1 %6940  ;;  %v13015_v54 = vpack.i.bf16 %v7180_v39, %v7204_v40  ;;  %v17367_v40 = vld [vmem:[#allocation5 + $0x71] sm:$0xff] }
 0xc07   : > { %v6951_v63 = vsel %vm6861_vm8, %v17084_v21, %v6941_v2  ;;  %v7848_v21 = vld [vmem:[%s19106_s8 + $0xa0] sm:$0xff] }
 0xc08   : > { %v6886_v14 = vcombine.low %v6878_v34, %v6885_v29  ;;  %v6943_v26 = vpop.permute.xlu0 %6942  ;;  %v6958_v59 = vcombine.low %v6950_v43, %v6951_v63  ;;  %v7839_v63 = vld [vmem:[%s19106_s8 + $0x58] sm:$0xff]  ;;  %v17284_v43 = vld [vmem:[#allocation5 + $0x80] sm:$0xff] }
 0xc09   : > { %v6952_v22 = vsel %vm6861_vm8, %v17094_v4, %v6943_v26 }
 0xc0a   : > { %6888 = vst.msk [vmem:[#allocation4 + $0x11] sm:$0xff] %vm457_vm3, %v6886_v14  ;;  %6889 = vrot.lane.b32.xlu0 %v6886_v14, %s13431_s19  ;;  %v6945_v37 = vpop.permute.xlu1 %6944  ;;  %v6966_v28 = vrot.slane %v6958_v59, %v17192_v13  ;;  %v7856_v59 = vld [vmem:[%s19106_s8 + $0xe0] sm:$0xff] }
 0xc0b   : > { %v6953_v30 = vsel %vm6861_vm8, %v17100_v33, %v6945_v37  ;;  %v12096_v33 = vpack.c.bf16 %v7849_v27, %v7848_v21 }
 0xc0c   : > { %v6959_v62 = vcombine.low %v6952_v22, %v6953_v30  ;;  %v7029_v3 = vpop.permute.xlu0 %7028 }
 0xc0d   : > { %12097 = vmatprep.subr.bf16.mxu1 %v12096_v33  ;;  %v7040_v47 = vsel %vm6861_vm8, %v17105_v36, %v7029_v3  ;;  %v17301_v3 = vld [vmem:[#allocation5 + $0x21] sm:$0xff]  ;;  %v17316_v33 = vld [vmem:[#allocation5 + $0x51] sm:$0xff] }
 0xc0e   : > { %v6973_v4 = vrot.slane %v6959_v62, %v17192_v13  ;;  %v7031_v17 = vpop.permute.xlu1 %7030  ;;  %12099 = vmatpush3.bf16.msra.mxu1 %v12098_v49  ;;  %v7841_v62 = vld [vmem:[%s19106_s8 + $0x68] sm:$0xff]  ;;  %v13035_v25 = vpack.i.bf16 %v17284_v43, %v17301_v3  ;;  %v7843_v49 = vld [vmem:[%s19106_s8 + $0x78] sm:$0xff] }
 0xc0f   : > { %v7041_v23 = vsel %vm6861_vm8, %v17110_v7, %v7031_v17  ;;  %v7851_v7 = vld [vmem:[%s19106_s8 + $0xb8] sm:$0xff] }
 0xc10   : > { %v17226_v45 = vcombine.low %v6966_v28, %v6973_v4  ;;  %v7033_v52 = vpop.permute.xlu0 %7032  ;;  %v7048_v48 = vcombine.low %v7040_v47, %v7041_v23  ;;  %v12100_v12 = vpack.c.bf16 %v7851_v7, %v7850_v11  ;;  %v7858_v4 = vld [vmem:[%s19106_s8 + $0xf0] sm:$0xff]  ;;  %v7859_v17 = vld [vmem:[%s19106_s8 + $0xf8] sm:$0xff]  ;;  %v17331_v7 = vld [vmem:[#allocation5 + $0x62] sm:$0xff] }
 0xc11   : > { %v7042_v36 = vsel %vm6861_vm8, %v17119_v24, %v7033_v52  ;;  %v7853_v24 = vld [vmem:[%s19106_s8 + $0xc8] sm:$0xff]  ;;  %v12116_v35 = vpack.c.bf16 %v7859_v17, %v7858_v4  ;;  %v7842_v23 = vld [vmem:[%s19106_s8 + $0x70] sm:$0xff]  ;;  %v7860_v17 = vld [vmem:[%s19106_s8 + $0x100] sm:$0xff] }
 0xc12   : > { %6977 = vst.msk [vmem:[#allocation4 + $0x31] sm:$0xff] %vm457_vm3, %v17226_v45  ;;  %v7035_v41 = vpop.permute.xlu1 %7034  ;;  %12101 = vmatprep.subr.bf16.mxu1 %v12100_v12  ;;  %v7056_v32 = vrot.slane %v7048_v48, %v17192_v13  ;;  %v12104_v58 = vpack.c.bf16 %v7853_v24, %v7852_v38  ;;  %v12118_v52 = vpack.c.bf16 %v7843_v49, %v7842_v23  ;;  %v17326_v11 = vld [vmem:[#allocation5 + $0x10] sm:$0xff]  ;;  %v17342_v38 = vld [vmem:[#allocation5 + $0x41] sm:$0xff] }
 0xc13   : > { %v7043_v53 = vsel %vm6861_vm8, %v17127_v15, %v7035_v41  ;;  %v7836_v15 = vld [vmem:[%s19106_s8 + $0x40] sm:$0xff]  ;;  %12103 = vmatpush3.bf16.msra.mxu1 %v12102_v20  ;;  %v7197_v12 = vld [vmem:[#allocation4 + $0x12] sm:$0xff]  ;;  %v13020_v20 = vpack.i.bf16 %v17301_v3, %v7174_v16 }
 0xc14   : > { %v7049_v61 = vcombine.low %v7042_v36, %v7043_v53  ;;  %v7119_v1 = vpop.permute.xlu0 %7118  ;;  %v12106_v51 = vpack.c.bf16 %v7837_v42, %v7836_v15  ;;  %12105 = vmatprep.subr.bf16.mxu1 %v12104_v58  ;;  %v7172_v41 = vld [vmem:[#allocation5] sm:$0xff]  ;;  %v17346_v24 = vld [vmem:[#allocation5 + $0x11] sm:$0xff] }
 0xc15   : > { %v7130_v50 = vsel %vm6861_vm8, %v17132_v46, %v7119_v1  ;;  %v7838_v46 = vld [vmem:[%s19106_s8 + $0x50] sm:$0xff]  ;;  %v13010_v36 = vpack.i.bf16 %v17326_v11, %v7172_v41  ;;  %v7196_v53 = vld [vmem:[#allocation4 + $0x2] sm:$0xff] }
 0xc16   : > { %v7063_v44 = vrot.slane %v7049_v61, %v17192_v13  ;;  %v7121_v5 = vpop.permute.xlu1 %7120  ;;  %v12110_v26 = vpack.c.bf16 %v7839_v63, %v7838_v46  ;;  %v13060_v61 = vpack.i.bf16 %v7197_v12, %v7196_v53  ;;  %v17338_v1 = vld [vmem:[#allocation4 + $0x10] sm:$0xff]  ;;  %v17358_v58 = vld [vmem:[#allocation5 + $0x22] sm:$0xff] }
 0xc17   : > { %v7131_v9 = vsel %vm6861_vm8, %v17137_v60, %v7121_v5  ;;  %v7854_v60 = vld [vmem:[%s19106_s8 + $0xd0] sm:$0xff]  ;;  %12107 = vmatpush3.bf16.msra.mxu1 %v12106_v51  ;;  %v13070_v15 = vpack.i.bf16 %v17338_v1, %v17346_v24  ;;  %v17354_v5 = vld [vmem:[#allocation5 + $0x61] sm:$0xff]  ;;  %v13075_v42 = vpack.i.bf16 %v17358_v58, %v7197_v12 }
 0xc18   : > { %v7064_v57 = vcombine.low %v7056_v32, %v7063_v44  ;;  %v7123_v56 = vpop.permute.xlu0 %7122  ;;  %v7138_v10 = vcombine.low %v7130_v50, %v7131_v9  ;;  %v12108_v2 = vpack.c.bf16 %v7855_v8, %v7854_v60  ;;  %v17352_v44 = vld [vmem:[#allocation5 + $0x60] sm:$0xff]  ;;  %v17386_v8 = vld [vmem:[#allocation4 + $0x11] sm:$0xff] }
 0xc19   : > { %v7132_v34 = vsel %vm6861_vm8, %v17147_v6, %v7123_v56  ;;  %v7857_v6 = vld [vmem:[%s19106_s8 + $0xe8] sm:$0xff]  ;;  %v13030_v9 = vpack.i.bf16 %v17354_v5, %v17352_v44  ;;  %v17374_v56 = vld [vmem:[#allocation4 + $0x30] sm:$0xff] }
 0xc1a   : > { %7067 = vst.msk [vmem:[#allocation4 + $0x51] sm:$0xff] %vm457_vm3, %v7064_v57  ;;  %7068 = vrot.lane.b32.xlu0 %v7064_v57, %s13431_s19  ;;  %v7125_v19 = vpop.permute.xlu1 %7124  ;;  %12109 = vmatprep.subr.bf16.mxu1 %v12108_v2  ;;  %v7146_v37 = vrot.slane %v7138_v10, %v17192_v13  ;;  %v12112_v30 = vpack.c.bf16 %v7857_v6, %v7856_v59  ;;  %v17378_v10 = vld [vmem:[#allocation5 + $0x52] sm:$0xff] }
 0xc1b   : > { %v7133_v29 = vsel %vm6861_vm8, %v17153_v0, %v7125_v19  ;;  %v7840_v0 = vld [vmem:[%s19106_s8 + $0x60] sm:$0xff]  ;;  %12111 = vmatpush3.bf16.msra.mxu1 %v12110_v26  ;;  %v17380_v19 = vld [vmem:[#allocation5 + $0x31] sm:$0xff] }
 0xc1c   : > { %v7139_v14 = vcombine.low %v7132_v34, %v7133_v29  ;;  %v12114_v21 = vpack.c.bf16 %v7841_v62, %v7840_v0  ;;  %12113 = vmatprep.subr.bf16.mxu1 %v12112_v30  ;;  %v13110_v60 = vpack.i.bf16 %v17374_v56, %v17380_v19  ;;  %v7246_v46 = vld [vmem:[#allocation4 + $0x32] sm:$0xff]  ;;  %v17390_v29 = vld [vmem:[#allocation5 + $0x42] sm:$0xff] }
 0xc1d   : > { %v7205_v34 = vld [vmem:[#allocation5 + $0x12] sm:$0xff]  ;;  %v13115_v63 = vpack.i.bf16 %v17390_v29, %v7246_v46 }
 0xc1e   : > { %v7153_v22 = vrot.slane %v7139_v14, %v17192_v13  ;;  %13016 = vrot.lane.b32.xlu0 %v13015_v54, %s13432_s15  ;;  %v13065_v2 = vpack.i.bf16 %v17386_v8, %v7205_v34  ;;  %v17400_v6 = vld [vmem:[#allocation5 + $0x72] sm:$0xff]  ;;  %v7868_v34 = vld [vmem:[%s19106_s8 + $0x140] sm:$0xff] }
 0xc1f   : > { %12115 = vmatpush3.bf16.msra.mxu1 %v12114_v21  ;;  %v17406_v30 = vld [vmem:[#allocation4 + $0x31] sm:$0xff] }
 0xc20   : > { %v7154_v27 = vcombine.low %v7146_v37, %v7153_v22  ;;  %12117 = vmatprep.subr.bf16.mxu1 %v12116_v35  ;;  %v13100_v22 = vpack.i.bf16 %v7174_v16, %v7246_v46  ;;  %v17409_v62 = vld [vmem:[#allocation5 + $0x32] sm:$0xff]  ;;  %v7861_v35 = vld [vmem:[%s19106_s8 + $0x108] sm:$0xff] }
 0xc21   : > { %v17305_v28 = vld [vmem:[#allocation4 + $0x50] sm:$0xff]  ;;  %v13105_v21 = vpack.i.bf16 %v17406_v30, %v17409_v62  ;;  %v12122_v49 = vpack.c.bf16 %v7861_v35, %v7860_v17  ;;  %v7872_v35 = vld [vmem:[%s19106_s8 + $0x160] sm:$0xff] }
 0xc22   : > { %7157 = vst.msk [vmem:[#allocation4 + $0x71] sm:$0xff] %vm457_vm3, %v7154_v27  ;;  %13036 = vrot.lane.b32.xlu0 %v13035_v25, %s13431_s19  ;;  %7158 = vrot.lane.b32.xlu1 %v7154_v27, %s13431_s19  ;;  %v13050_v47 = vpack.i.bf16 %v17305_v28, %v17316_v33  ;;  %v7248_v48 = vld [vmem:[#allocation4 + $0x52] sm:$0xff]  ;;  %v7876_v27 = vld [vmem:[%s19106_s8 + $0x180] sm:$0xff]  ;;  %v7877_v25 = vld [vmem:[%s19106_s8 + $0x188] sm:$0xff] }
 0xc23   : > { %12119 = vmatpush3.bf16.msra.mxu1 %v12118_v52  ;;  %v13055_v55 = vpack.i.bf16 %v17331_v7, %v7248_v48  ;;  %v17372_v50 = vld [vmem:[#allocation4 + $0x51] sm:$0xff]  ;;  %v12120_v4 = vpack.c.bf16 %v7877_v25, %v7876_v27  ;;  %v7889_v27 = vld [vmem:[%s19106_s8 + $0x1e8] sm:$0xff] }
 0xc24   : > { %v13045_v54 = vpack.i.bf16 %v17372_v50, %v17378_v10  ;;  %v7878_v23 = vld [vmem:[%s19106_s8 + $0x190] sm:$0xff] }
 0xc25   : > { %v7862_v52 = vld [vmem:[%s19106_s8 + $0x110] sm:$0xff]  ;;  %12121 = vmatprep.subr.bf16.mxu0 %v12120_v4 }
 0xc26   : > { %13051 = vrot.lane.b32.xlu0 %v13050_v47, %s13429_s18  ;;  %6978 = vrot.lane.b32.xlu1 %v17226_v45, %s13431_s19  ;;  %v17340_v45 = vld [vmem:[#allocation5 + $0x40] sm:$0xff]  ;;  %v7879_v47 = vld [vmem:[%s19106_s8 + $0x198] sm:$0xff] }
 0xc27   : > { %v13025_v32 = vpack.i.bf16 %v17342_v38, %v17340_v45  ;;  %v13040_v51 = vpack.i.bf16 %v17340_v45, %v7248_v48  ;;  %v7863_v48 = vld [vmem:[%s19106_s8 + $0x118] sm:$0xff]  ;;  %v12124_v41 = vpack.c.bf16 %v7879_v47, %v7878_v23  ;;  %12123 = vmatpush3.bf16.msra.mxu0 %v12122_v49  ;;  %v7873_v23 = vld [vmem:[%s19106_s8 + $0x168] sm:$0xff]  ;;  %v7890_v49 = vld [vmem:[%s19106_s8 + $0x1f0] sm:$0xff] }
 0xc28   : > { %v12126_v53 = vpack.c.bf16 %v7863_v48, %v7862_v52  ;;  %v12146_v47 = vpack.c.bf16 %v7873_v23, %v7872_v35  ;;  %v7891_v52 = vld [vmem:[%s19106_s8 + $0x1f8] sm:$0xff]  ;;  %v17570_v23 = vld [vmem:[#allocation5 + $0x30] sm:$0xff] }
 0xc29   : > { %v17363_v39 = vld [vmem:[#allocation4 + $0x70] sm:$0xff]  ;;  %12125 = vmatprep.subr.bf16.mxu0 %v12124_v41  ;;  %v12148_v41 = vpack.c.bf16 %v7891_v52, %v7890_v49  ;;  %v7188_v49 = vld [vmem:[#allocation5 + $0x1] sm:$0xff] }
 0xc2a   : > { %13056 = vrot.lane.b32.xlu0 %v13055_v55, %s13432_s15  ;;  %13011 = vrot.lane.b32.xlu1 %v13010_v36, %s13429_s18  ;;  %v13090_v57 = vpack.i.bf16 %v17363_v39, %v17367_v40  ;;  %v7203_v14 = vld [vmem:[#allocation4 + $0x72] sm:$0xff]  ;;  %v7880_v55 = vld [vmem:[%s19106_s8 + $0x1a0] sm:$0xff]  ;;  %v7881_v36 = vld [vmem:[%s19106_s8 + $0x1a8] sm:$0xff] }
 0xc2b   : > { %v13080_v26 = vpack.i.bf16 %v17352_v44, %v7203_v14  ;;  %v17397_v59 = vld [vmem:[#allocation4 + $0x71] sm:$0xff]  ;;  %v13095_v37 = vpack.i.bf16 %v7174_v16, %v7203_v14  ;;  %v12128_v12 = vpack.c.bf16 %v7881_v36, %v7880_v55  ;;  %v7864_v16 = vld [vmem:[%s19106_s8 + $0x120] sm:$0xff]  ;;  %12127 = vmatpush3.bf16.msra.mxu0 %v12126_v53 }
 0xc2c   : > { %v13085_v0 = vpack.i.bf16 %v17397_v59, %v17400_v6  ;;  %v7887_v14 = vld [vmem:[%s19106_s8 + $0x1d8] sm:$0xff]  ;;  %v7874_v55 = vld [vmem:[%s19106_s8 + $0x170] sm:$0xff] }
 0xc2d   : > { %12129 = vmatprep.subr.bf16.mxu0 %v12128_v12  ;;  %v7875_v36 = vld [vmem:[%s19106_s8 + $0x178] sm:$0xff] }
 0xc2e   : > { %13061 = vrot.lane.b32.xlu0 %v13060_v61, %s13431_s19  ;;  %13021 = vrot.lane.b32.xlu1 %v13020_v20, %s13429_s18  ;;  %v7865_v61 = vld [vmem:[%s19106_s8 + $0x128] sm:$0xff]  ;;  %v7882_v20 = vld [vmem:[%s19106_s8 + $0x1b0] sm:$0xff]  ;;  %v12150_v53 = vpack.c.bf16 %v7875_v36, %v7874_v55 }
 0xc2f   : > { %v7892_v36 = vld [vmem:[%s19106_s8 + $0x200] sm:$0xff] }
 0xc32   : > { %13071 = vrot.lane.b32.xlu0 %v13070_v15, %s13429_s18  ;;  %13026 = vrot.lane.b32.xlu1 %v13025_v32, %s13429_s18  ;;  %v7883_v15 = vld [vmem:[%s19106_s8 + $0x1b8] sm:$0xff]  ;;  %v12130_v32 = vpack.c.bf16 %v7865_v61, %v7864_v16  ;;  %v7908_v16 = vld [vmem:[%s19106_s8 + $0x280] sm:$0xff] }
 0xc33   : > { %v7909_v61 = vld [vmem:[%s19106_s8 + $0x288] sm:$0xff] }
 0xc34   : > { %12131 = vmatpush3.bf16.msra.mxu0 %v12130_v32 }
 0xc36   : > { %13076 = vrot.lane.b32.xlu0 %v13075_v42, %s13432_s15  ;;  %13031 = vrot.lane.b32.xlu1 %v13030_v9, %s13429_s18  ;;  %v12132_v42 = vpack.c.bf16 %v7883_v15, %v7882_v20  ;;  %v7866_v9 = vld [vmem:[%s19106_s8 + $0x130] sm:$0xff]  ;;  %v12152_v20 = vpack.c.bf16 %v7909_v61, %v7908_v16 }
 0xc38   : > { %12133 = vmatprep.subr.bf16.mxu0 %v12132_v42  ;;  %12153 = vmatprep.subr.bf16.mxu1 %v12152_v20 }
 0xc3a   : > { %13041 = vrot.lane.b32.xlu1 %v13040_v51, %s13431_s19  ;;  %13091 = vrot.lane.b32.xlu0 %v13090_v57, %s13429_s18  ;;  %v7867_v51 = vld [vmem:[%s19106_s8 + $0x138] sm:$0xff]  ;;  %v7884_v57 = vld [vmem:[%s19106_s8 + $0x1c0] sm:$0xff] }
 0xc3e   : > { %13046 = vrot.lane.b32.xlu1 %v13045_v54, %s13432_s15  ;;  %13111 = vrot.lane.b32.xlu0 %v13110_v60, %s13429_s18  ;;  %v7885_v54 = vld [vmem:[%s19106_s8 + $0x1c8] sm:$0xff]  ;;  %v12134_v60 = vpack.c.bf16 %v7867_v51, %v7866_v9  ;;  %v17524_v51 = vld [vmem:[#allocation5 + $0x50] sm:$0xff] }
 0xc3f   : > { %v12136_v46 = vpack.c.bf16 %v7885_v54, %v7884_v57 }
 0xc40   : > { %12135 = vmatpush3.bf16.msra.mxu0 %v12134_v60 }
 0xc41   : > { %12137 = vmatprep.subr.bf16.mxu0 %v12136_v46 }
 0xc42   : > { %13066 = vrot.lane.b32.xlu1 %v13065_v2, %s13432_s15  ;;  %13116 = vrot.lane.b32.xlu0 %v13115_v63, %s13432_s15  ;;  %v7869_v2 = vld [vmem:[%s19106_s8 + $0x148] sm:$0xff]  ;;  %v7886_v63 = vld [vmem:[%s19106_s8 + $0x1d0] sm:$0xff] }
 0xc46   : > { %13081 = vrot.lane.b32.xlu1 %v13080_v26, %s13431_s19  ;;  %v12138_v26 = vpack.c.bf16 %v7869_v2, %v7868_v34 }
 0xc48   : > { %12139 = vmatpush3.bf16.msra.mxu0 %v12138_v26 }
 0xc4a   : > { %13086 = vrot.lane.b32.xlu1 %v13085_v0, %s13432_s15  ;;  %v12140_v0 = vpack.c.bf16 %v7887_v14, %v7886_v63  ;;  %v17537_v63 = vld [vmem:[#allocation5 + $0x70] sm:$0xff]  ;;  %v7924_v14 = vld [vmem:[%s19106_s8 + $0x300] sm:$0xff] }
 0xc4c   : > { %12141 = vmatprep.subr.bf16.mxu0 %v12140_v0 }
 0xc4e   : > { %13096 = vrot.lane.b32.xlu1 %v13095_v37, %s13432_s15  ;;  %v7870_v37 = vld [vmem:[%s19106_s8 + $0x150] sm:$0xff] }
 0xc52   : > { %13101 = vrot.lane.b32.xlu1 %v13100_v22, %s13431_s19  ;;  %v7871_v22 = vld [vmem:[%s19106_s8 + $0x158] sm:$0xff] }
 0xc53   : > { %v12142_v25 = vpack.c.bf16 %v7871_v22, %v7870_v37  ;;  %v7925_v37 = vld [vmem:[%s19106_s8 + $0x308] sm:$0xff] }
 0xc55   : > { %12143 = vmatpush3.bf16.msra.mxu0 %v12142_v25 }
 0xc56   : > { %13106 = vrot.lane.b32.xlu1 %v13105_v21, %s13432_s15  ;;  %v7888_v21 = vld [vmem:[%s19106_s8 + $0x1e0] sm:$0xff] }
 0xc57   : > { %v12144_v4 = vpack.c.bf16 %v7889_v27, %v7888_v21  ;;  %v17554_v27 = vpack.c.bf16 %v7925_v37, %v7924_v14 }
 0xc59   : > { %12145 = vmatprep.subr.bf16.mxu0 %v12144_v4 }
 0xc5a   : > { %12147 = vmatpush3.bf16.msra.mxu0 %v12146_v47  ;;  %v7164_v47 = vld [vmem:[#allocation4] sm:$0xff] }
 0xc5b   : > { %12149 = vmatprep.subr.bf16.mxu0 %v12148_v41 }
 0xc5e   : > { %12151 = vmatpush3.bf16.msra.mxu0 %v12150_v53  ;;  %v7893_v53 = vld [vmem:[%s19106_s8 + $0x208] sm:$0xff] }
 0xc5f   : > { %12185 = vmatprep.subr.bf16.mxu0 %v17554_v27 }
 0xc7c   : > { %v6890_v17 = vpop.permute.xlu0 %6889 }
 0xc7d   : > { %6892 = vst.msk [vmem:[#allocation4 + $0x21] sm:$0xff] %vm457_vm3, %v6890_v17 }
 0xc84   : > { %v17531_v46 = vld [vmem:[#allocation4 + $0x22] sm:$0xff] }
 0xc85   : > { %v13135_v0 = vpack.i.bf16 %v17326_v11, %v17531_v46  ;;  %v17550_v22 = vld [vmem:[#allocation4 + $0x21] sm:$0xff] }
 0xc86   : > { %v17552_v21 = vld [vmem:[#allocation4 + $0x20] sm:$0xff]  ;;  %v13140_v11 = vpack.i.bf16 %v17531_v46, %v17550_v22 }
 0xc87   : > { %v13155_v17 = vpack.i.bf16 %v17552_v21, %v17537_v63  ;;  %v13145_v20 = vpack.i.bf16 %v17570_v23, %v17552_v21 }
 0xc8c   : > { %v7069_v48 = vpop.permute.xlu0 %7068 }
 0xc8d   : > { %7072 = vst.msk [vmem:[#allocation4 + $0x61] sm:$0xff] %vm457_vm3, %v7069_v48 }
 0xc90   : > { %v17512_v12 = vpop.permute.xlu0 %13016 }
 0xc91   : > { %v19111_v52 = vunpack.i.l.bf16 %v17512_v12  ;;  %v13019_v16 = vunpack.i.h.bf16 %v17512_v12 }
 0xc94   : > { %v17520_v15 = vpop.permute.xlu0 %13036  ;;  %v7159_v32 = vpop.permute.xlu1 %7158  ;;  %v17522_v42 = vld [vmem:[#allocation4 + $0x61] sm:$0xff] }
 0xc95   : > { %v7249_v9 = vld [vmem:[#allocation4 + $0x62] sm:$0xff]  ;;  %7162 = vst.msk [vmem:[#allocation4 + $0x81] sm:$0xff] %vm457_vm3, %v7159_v32  ;;  %v7910_v32 = vld [vmem:[%s19106_s8 + $0x290] sm:$0xff] }
 0xc96   : > { %v13125_v57 = vpack.i.bf16 %v7249_v9, %v17522_v42  ;;  %v13120_v54 = vpack.i.bf16 %v17524_v51, %v7249_v9  ;;  %v17529_v60 = vld [vmem:[#allocation4 + $0x60] sm:$0xff]  ;;  %v7911_v9 = vld [vmem:[%s19106_s8 + $0x298] sm:$0xff] }
 0xc97   : > { %v13130_v26 = vpack.i.bf16 %v17537_v63, %v17529_v60 }
 0xc98   : > { %13126 = vrot.lane.b32.xlu0 %v13125_v57, %s13432_s15  ;;  %13121 = vrot.lane.b32.xlu1 %v13120_v54, %s13431_s19  ;;  %v17535_v34 = vpop.permute.xlu0 %13051  ;;  %v6979_v2 = vpop.permute.xlu1 %6978 }
 0xc99   : > { %6982 = vst.msk [vmem:[#allocation4 + $0x41] sm:$0xff] %vm457_vm3, %v6979_v2 }
 0xc9c   : > { %13131 = vrot.lane.b32.xlu0 %v13130_v26, %s13429_s18  ;;  %13136 = vrot.lane.b32.xlu1 %v13135_v0, %s13431_s19  ;;  %v17558_v25 = vpop.permute.xlu0 %13056  ;;  %v17560_v4 = vpop.permute.xlu1 %13011  ;;  %v17600_v14 = vld [vmem:[#allocation4 + $0x80] sm:$0xff]  ;;  %v12154_v26 = vpack.c.bf16 %v7893_v53, %v7892_v36 }
 0xc9d   : > { %v13013_v35 = vunpack.i.l.bf16 %v17560_v4 }
 0xc9f   : > { %v7692_v54 = vsel %vm457_vm3, %v7164_v47, %v13013_v35  ;;  %v12156_v35 = vpack.c.bf16 %v7911_v9, %v7910_v32  ;;  %v7895_v47 = vld [vmem:[%s19106_s8 + $0x218] sm:$0xff]  ;;  %v7912_v9 = vld [vmem:[%s19106_s8 + $0x2a0] sm:$0xff] }
 0xca0   : > { %13141 = vrot.lane.b32.xlu0 %v13140_v11, %s13432_s15  ;;  %13156 = vrot.lane.b32.xlu1 %v13155_v17, %s13431_s19  ;;  %v17573_v48 = vpop.permute.xlu0 %13061  ;;  %v17575_v41 = vpop.permute.xlu1 %13021  ;;  %v17577_v55 = vld [vmem:[#allocation4 + $0x42] sm:$0xff]  ;;  %v7700_v36 = vsel %vm3734_vm15, %v7692_v54, %v13019_v16 }
 0xca1   : > { %19137 = vst [vmem:[#allocation11_spill] sm:$0xff] %v17577_v55  ;;  %v13063_v61 = vunpack.i.l.bf16 %v17573_v48  ;;  %v13160_v57 = vpack.i.bf16 %v17570_v23, %v17577_v55  ;;  %v17610_v17 = vld [vmem:[#allocation5 + $0x81] sm:$0xff] }
 0xca2   : > { %v13150_v53 = vpack.i.bf16 %v17610_v17, %v17550_v22  ;;  %v17624_v32 = vld [vmem:[#allocation4 + $0x41] sm:$0xff] }
 0xca3   : > { %v7708_v2 = vsel %vm522_vm14, %v7188_v49, %v13063_v61  ;;  %v7894_v49 = vld [vmem:[%s19106_s8 + $0x210] sm:$0xff]  ;;  %v17657_v13 = vld [vmem:[#allocation4 + $0x40] sm:$0xff] }
 0xca4   : > { %13146 = vrot.lane.b32.xlu0 %v13145_v20, %s13429_s18  ;;  %13161 = vrot.lane.b32.xlu1 %v13160_v57, %s13431_s19  ;;  %v17603_v0 = vpop.permute.xlu0 %13071  ;;  %v17605_v37 = vpop.permute.xlu1 %13026  ;;  %v7716_v11 = vsel %vm3734_vm15, %v7708_v2, %v19111_v52  ;;  %v13165_v20 = vpack.i.bf16 %v17406_v30, %v17600_v14  ;;  %v7913_v57 = vld [vmem:[%s19106_s8 + $0x2a8] sm:$0xff]  ;;  %v12158_v16 = vpack.c.bf16 %v7895_v47, %v7894_v49  ;;  %v7914_v47 = vld [vmem:[%s19106_s8 + $0x2b0] sm:$0xff] }
 0xca5   : > { %8028 = vmatprep.mubr.f32.mxu1 %v7716_v11  ;;  %v13073_v61 = vunpack.i.l.bf16 %v17603_v0  ;;  %v7896_v11 = vld [vmem:[%s19106_s8 + $0x220] sm:$0xff]  ;;  %v12160_v49 = vpack.c.bf16 %v7913_v57, %v7912_v9 }
 0xca6   : > { %8029 = vmatmul.mubr.f32.vlgmr.msra.gmra.mrb[96].mxu1 %v7700_v36  ;;  %v7897_v36 = vld [vmem:[%s19106_s8 + $0x228] sm:$0xff] }
 0xca7   : > { %12155 = vmatpush3.bf16.msra.mxu1 %v12154_v26  ;;  %v13170_v26 = vpack.i.bf16 %v17577_v55, %v17624_v32  ;;  %v12162_v57 = vpack.c.bf16 %v7897_v36, %v7896_v11  ;;  %v7898_v55 = vld [vmem:[%s19106_s8 + $0x230] sm:$0xff]  ;;  %v13195_v11 = vpack.i.bf16 %v17316_v33, %v17305_v28  ;;  %v17680_v36 = vld [vmem:[#allocation4 + $0x82] sm:$0xff] }
 0xca8   : > { %13151 = vrot.lane.b32.xlu0 %v13150_v53, %s13429_s18  ;;  %13166 = vrot.lane.b32.xlu1 %v13165_v20, %s13429_s18  ;;  %v17634_v54 = vpop.permute.xlu0 %13076  ;;  %v17636_v2 = vpop.permute.xlu1 %13031  ;;  %v13185_v53 = vpack.i.bf16 %v17380_v19, %v17374_v56  ;;  %v7740_v20 = vsel %vm457_vm3, %v17386_v8, %v13073_v61  ;;  %v7899_v8 = vld [vmem:[%s19106_s8 + $0x238] sm:$0xff]  ;;  %v13175_v61 = vpack.i.bf16 %v17524_v51, %v17657_v13  ;;  %v7901_v28 = vld [vmem:[%s19106_s8 + $0x248] sm:$0xff] }
 0xca9   : > { %12157 = vmatprep.subr.bf16.mxu1 %v12156_v35  ;;  %v13078_v52 = vunpack.i.l.bf16 %v17634_v54  ;;  %v7915_v35 = vld [vmem:[%s19106_s8 + $0x2b8] sm:$0xff]  ;;  %v13180_v33 = vpack.i.bf16 %v17570_v23, %v17680_v36 }
 0xcaa   : > { %v12164_v31 = vpack.c.bf16 %v7915_v35, %v7914_v47  ;;  %v7900_v35 = vld [vmem:[%s19106_s8 + $0x240] sm:$0xff] }
 0xcab   : > { %v7748_v9 = vsel %vm3734_vm15, %v7740_v20, %v13078_v52  ;;  %12159 = vmatpush3.bf16.msra.mxu1 %v12158_v16  ;;  %v7916_v52 = vld [vmem:[%s19106_s8 + $0x2c0] sm:$0xff]  ;;  %v7917_v16 = vld [vmem:[%s19106_s8 + $0x2c8] sm:$0xff]  ;;  %v7919_v20 = vld [vmem:[%s19106_s8 + $0x2d8] sm:$0xff] }
 0xcac   : > { %13171 = vrot.lane.b32.xlu0 %v13170_v26, %s13432_s15  ;;  %13186 = vrot.lane.b32.xlu1 %v13185_v53, %s13431_s19  ;;  %v17662_v18 = vpop.permute.xlu1 %13041  ;;  %v12166_v26 = vpack.c.bf16 %v7899_v8, %v7898_v55  ;;  %v12168_v47 = vpack.c.bf16 %v7917_v16, %v7916_v52  ;;  %v13014_v53 = vunpack.i.h.bf16 %v17560_v4  ;;  %v13064_v55 = vunpack.i.h.bf16 %v17573_v48  ;;  %v7902_v4 = vld [vmem:[%s19106_s8 + $0x250] sm:$0xff]  ;;  %v7903_v48 = vld [vmem:[%s19106_s8 + $0x258] sm:$0xff] }
 0xcad   : > { %8133 = vmatprep.mubr.f32.mxu0 %v7748_v9  ;;  %12161 = vmatprep.subr.bf16.mxu1 %v12160_v49  ;;  %v12170_v9 = vpack.c.bf16 %v7901_v28, %v7900_v35  ;;  %v7921_v16 = vld [vmem:[%s19106_s8 + $0x2e8] sm:$0xff]  ;;  %v12174_v35 = vpack.c.bf16 %v7903_v48, %v7902_v4  ;;  %v7922_v28 = vld [vmem:[%s19106_s8 + $0x2f0] sm:$0xff]  ;;  %v13215_v4 = vpack.i.bf16 %v17397_v59, %v17522_v42 }
 0xcae   : > { %v13225_v48 = vpack.i.bf16 %v17367_v40, %v17363_v39  ;;  %v13200_v59 = vpack.i.bf16 %v17537_v63, %v17352_v44  ;;  %v13220_v39 = vpack.i.bf16 %v17354_v5, %v17529_v60  ;;  %v7267_v40 = vld [vmem:[#allocation4 + $0x90] sm:$0xff]  ;;  %v13240_v5 = vpack.i.bf16 %v17610_v17, %v17600_v14 }
 0xcaf   : > { %12163 = vmatpush3.bf16.msra.mxu1 %v12162_v57  ;;  %v7275_v63 = vld [vmem:[#allocation5 + $0x90] sm:$0xff] }
 0xcb0   : > { %13176 = vrot.lane.b32.xlu0 %v13175_v61, %s13429_s18  ;;  %13196 = vrot.lane.b32.xlu1 %v13195_v11, %s13431_s19  ;;  %v17684_v49 = vpop.permute.xlu1 %13046  ;;  %v13190_v61 = vpack.i.bf16 %v17524_v51, %v17340_v45  ;;  %v13205_v11 = vpack.i.bf16 %v17372_v50, %v17624_v32 }
 0xcb1   : > { %12165 = vmatprep.subr.bf16.mxu1 %v12164_v31  ;;  %v7918_v31 = vld [vmem:[%s19106_s8 + $0x2d0] sm:$0xff] }
 0xcb2   : > { %v12172_v52 = vpack.c.bf16 %v7919_v20, %v7918_v31  ;;  %v7906_v20 = vld [vmem:[%s19106_s8 + $0x270] sm:$0xff] }
 0xcb3   : > { %12167 = vmatpush3.bf16.msra.mxu1 %v12166_v26  ;;  %v7709_v26 = vsel %vm522_vm14, %v17346_v24, %v13064_v55  ;;  %v7904_v24 = vld [vmem:[%s19106_s8 + $0x260] sm:$0xff] }
 0xcb4   : > { %13181 = vrot.lane.b32.xlu0 %v13180_v33, %s13432_s15  ;;  %7802 = vrot.lane.b32.xlu1 %v17378_v10, %s13429_s18  ;;  %v17705_v23 = vpop.permute.xlu1 %13066  ;;  %v7920_v10 = vld [vmem:[%s19106_s8 + $0x2e0] sm:$0xff]  ;;  %v7923_v33 = vld [vmem:[%s19106_s8 + $0x2f8] sm:$0xff] }
 0xcb5   : > { %12169 = vmatprep.subr.bf16.mxu1 %v12168_v47  ;;  %v13069_v57 = vunpack.i.h.bf16 %v17705_v23  ;;  %v13068_v8 = vunpack.i.l.bf16 %v17705_v23  ;;  %v7693_v47 = vsel %vm457_vm3, %v17338_v1, %v13014_v53  ;;  %v12176_v50 = vpack.c.bf16 %v7921_v16, %v7920_v10  ;;  %v7905_v1 = vld [vmem:[%s19106_s8 + $0x268] sm:$0xff] }
 0xcb6   : > { %v13210_v53 = vpack.i.bf16 %v17342_v38, %v17657_v13  ;;  %v12178_v55 = vpack.c.bf16 %v7905_v1, %v7904_v24  ;;  %v12180_v31 = vpack.c.bf16 %v7923_v33, %v7922_v28  ;;  %v17789_v10 = vld [vmem:[#allocation5 + $0x82] sm:$0xff]  ;;  %v7927_v24 = vld [vmem:[%s19106_s8 + $0x318] sm:$0xff]  ;;  %v13024_v33 = vunpack.i.h.bf16 %v17575_v41 }
 0xcb7   : > { %v7717_v45 = vsel %vm3734_vm15, %v7709_v26, %v13068_v8  ;;  %v7701_v51 = vsel %vm3734_vm15, %v7693_v47, %v13069_v57  ;;  %12171 = vmatpush3.bf16.msra.mxu1 %v12170_v9  ;;  %v7907_v9 = vld [vmem:[%s19106_s8 + $0x278] sm:$0xff]  ;;  %v13029_v23 = vunpack.i.h.bf16 %v17605_v37 }
 0xcb8   : > { %13191 = vrot.lane.b32.xlu0 %v13190_v61, %s13432_s15  ;;  %13206 = vrot.lane.b32.xlu1 %v13205_v11, %s13429_s18  ;;  %v7283_v57 = vld [vmem:[#allocation4 + $0x91] sm:$0xff] }
 0xcb9   : > { %8033 = vmatprep.mubr.f32.mxu1 %v7717_v45  ;;  %12173 = vmatprep.subr.bf16.mxu1 %v12172_v52  ;;  %v7291_v61 = vld [vmem:[#allocation5 + $0x91] sm:$0xff] }
 0xcba   : > { %8034 = vmatmul.mubr.f32.gmra.mrb[98].mxu1 %v7701_v51  ;;  %v13245_v44 = vpack.i.bf16 %v7291_v61, %v7267_v40  ;;  %v7307_v52 = vld [vmem:[#allocation5 + $0x92] sm:$0xff] }
 0xcbb   : > { %12175 = vmatpush3.bf16.msra.mxu1 %v12174_v35  ;;  %v13074_v35 = vunpack.i.h.bf16 %v17603_v0  ;;  %v19138_v0 = vunpack.i.l.bf16 %v17512_v12 }
 0xcbc   : > { %7796 = vrot.lane.b32.xlu0 %v17358_v58, %s13429_s18  ;;  %13211 = vrot.lane.b32.xlu1 %v13210_v53, %s13431_s19  ;;  %v12182_v58 = vpack.c.bf16 %v7907_v9, %v7906_v20  ;;  %v13079_v20 = vunpack.i.h.bf16 %v17634_v54  ;;  %v7934_v54 = vld [vmem:[%s19106_s8 + $0x350] sm:$0xff] }
 0xcbd   : > { %12177 = vmatprep.subr.bf16.mxu1 %v12176_v50  ;;  %v7926_v50 = vld [vmem:[%s19106_s8 + $0x310] sm:$0xff]  ;;  %v7724_v9 = vsel %vm457_vm3, %v19138_v0, %v13074_v35 }
 0xcbf   : > { %12179 = vmatpush3.bf16.msra.mxu1 %v12178_v55 }
 0xcc0   : > { %7798 = vrot.lane.b32.xlu0 %v17409_v62, %s13429_s18  ;;  %13216 = vrot.lane.b32.xlu1 %v13215_v4, %s13429_s18  ;;  %v17771_v62 = vld [vmem:[#allocation4 + $0x81] sm:$0xff]  ;;  %v12188_v4 = vpack.c.bf16 %v7927_v24, %v7926_v50 }
 0xcc1   : > { %12181 = vmatprep.subr.bf16.mxu1 %v12180_v31  ;;  %v13023_v31 = vunpack.i.l.bf16 %v17575_v41  ;;  %v7929_v41 = vld [vmem:[%s19106_s8 + $0x328] sm:$0xff] }
 0xcc3   : > { %12183 = vmatpush3.bf16.msra.mxu1 %v12182_v58 }
 0xcc4   : > { %7800 = vrot.lane.b32.xlu0 %v17390_v29, %s13429_s18  ;;  %13226 = vrot.lane.b32.xlu1 %v13225_v48, %s13431_s19  ;;  %v13235_v29 = vpack.i.bf16 %v7283_v57, %v17771_v62  ;;  %v7928_v57 = vld [vmem:[%s19106_s8 + $0x320] sm:$0xff] }
 0xcc8   : > { %13201 = vrot.lane.b32.xlu0 %v13200_v59, %s13432_s15  ;;  %7806 = vrot.lane.b32.xlu1 %v17400_v6, %s13429_s18  ;;  %v13230_v6 = vpack.i.bf16 %v7275_v63, %v17284_v43  ;;  %v17797_v43 = vpop.permute.xlu0 %13091  ;;  %v7741_v63 = vsel %vm457_vm3, %v17550_v22, %v13024_v33 }
 0xccc   : > { %13221 = vrot.lane.b32.xlu0 %v13220_v39, %s13431_s19  ;;  %13236 = vrot.lane.b32.xlu1 %v13235_v29, %s13429_s18  ;;  %v17801_v26 = vpop.permute.xlu0 %13111 }
 0xccd   : > { %v13113_v35 = vunpack.i.l.bf16 %v17801_v26  ;;  %v13114_v0 = vunpack.i.h.bf16 %v17801_v26 }
 0xcd0   : > { %7804 = vrot.lane.b32.xlu0 %v17331_v7, %s13429_s18  ;;  %13246 = vrot.lane.b32.xlu1 %v13245_v44, %s13431_s19  ;;  %v17793_v7 = vpop.permute.xlu1 %13081  ;;  %v17805_v14 = vpop.permute.xlu0 %13116  ;;  %v7694_v44 = vsel %vm457_vm3, %v17552_v21, %v13023_v31 }
 0xcd4   : > { %13231 = vrot.lane.b32.xlu0 %v13230_v6, %s13432_s15  ;;  %7810 = vrot.lane.b32.xlu1 %v7307_v52, %s13429_s18  ;;  %v17795_v16 = vpop.permute.xlu1 %13086  ;;  %v12192_v6 = vpack.c.bf16 %v7929_v41, %v7928_v57  ;;  %v7930_v52 = vld [vmem:[%s19106_s8 + $0x330] sm:$0xff] }
 0xcd8   : > { %13241 = vrot.lane.b32.xlu0 %v13240_v5, %s13431_s19  ;;  %v17799_v11 = vpop.permute.xlu1 %13096  ;;  %v7931_v5 = vld [vmem:[%s19106_s8 + $0x338] sm:$0xff] }
 0xcd9   : > { %v12196_v31 = vpack.c.bf16 %v7931_v5, %v7930_v52  ;;  %v7726_v52 = vsel %vm457_vm3, %v13079_v20, %v13114_v0  ;;  %v13048_v5 = vunpack.i.l.bf16 %v17684_v49  ;;  %v7232_v0 = vld [vmem:[#allocation4 + $0x51] sm:$0xff] }
 0xcdc   : > { %7808 = vrot.lane.b32.xlu0 %v17789_v10, %s13429_s18  ;;  %v17803_v47 = vpop.permute.xlu1 %13101 }
 0xcdd   : > { %v13103_v58 = vunpack.i.l.bf16 %v17803_v47 }
 0xcdf   : > { %v7711_v21 = vsel %vm522_vm14, %v17380_v19, %v13103_v58 }
 0xce0   : > { %v17807_v17 = vpop.permute.xlu1 %13106 }
 0xce1   : > { %v13108_v12 = vunpack.i.l.bf16 %v17807_v17  ;;  %v13109_v19 = vunpack.i.h.bf16 %v17807_v17 }
 0xce3   : > { %v7719_v24 = vsel %vm3734_vm15, %v7711_v21, %v13108_v12 }
 0xd0a   : > { %v17809_v45 = vpop.permute.xlu0 %13126  ;;  %v17811_v51 = vpop.permute.xlu1 %13121 }
 0xd0e   : > { %v17820_v1 = vpop.permute.xlu0 %13131  ;;  %v13137_v28 = vpop.permute.xlu1 %13136 }
 0xd0f   : > { %v13139_v53 = vunpack.i.h.bf16 %v13137_v28  ;;  %v13138_v55 = vunpack.i.l.bf16 %v13137_v28  ;;  %v13118_v28 = vunpack.i.l.bf16 %v17805_v14 }
 0xd11   : > { %v7732_v48 = vsel %vm522_vm14, %v7724_v9, %v13139_v53  ;;  %v7710_v59 = vsel %vm522_vm14, %v17301_v3, %v13138_v55  ;;  %v13104_v9 = vunpack.i.h.bf16 %v17803_v47 }
 0xd12   : > { %v13142_v39 = vpop.permute.xlu0 %13141  ;;  %v17839_v40 = vpop.permute.xlu1 %13156  ;;  %8134 = vmatmul.mubr.f32.vlgmr.msra.gmra.mrb[114].mxu0 %v7732_v48  ;;  %v7718_v61 = vsel %vm3734_vm15, %v7710_v59, %v13079_v20  ;;  %v13119_v48 = vunpack.i.h.bf16 %v17805_v14  ;;  %v7935_v20 = vld [vmem:[%s19106_s8 + $0x358] sm:$0xff] }
 0xd13   : > { %v13144_v29 = vunpack.i.h.bf16 %v13142_v39  ;;  %v13143_v3 = vunpack.i.l.bf16 %v13142_v39  ;;  %8038 = vmatprep.mubr.f32.mxu1 %v7718_v61  ;;  %12187 = vmatpush3.bf16.msra.mxu0 %v17554_v27 }
 0xd14   : > { %12189 = vmatprep.subr.bf16.mxu0 %v12188_v4 }
 0xd15   : > { %v7702_v27 = vsel %vm3734_vm15, %v7694_v44, %v13143_v3  ;;  %v7749_v50 = vsel %vm3734_vm15, %v7741_v63, %v13144_v29  ;;  %v7933_v3 = vld [vmem:[%s19106_s8 + $0x348] sm:$0xff]  ;;  %v13053_v44 = vunpack.i.l.bf16 %v17535_v34  ;;  %v13043_v63 = vunpack.i.l.bf16 %v17662_v18 }
 0xd16   : > { %v13147_v22 = vpop.permute.xlu0 %13146  ;;  %8039 = vmatmul.mubr.f32.gmra.mrb[100].mxu1 %v7702_v27  ;;  %8138 = vmatprep.mubr.f32.mxu0 %v7749_v50  ;;  %v13162_v55 = vpop.permute.xlu1 %13161 }
 0xd17   : > { %v13149_v33 = vunpack.i.h.bf16 %v13147_v22  ;;  %v13148_v53 = vunpack.i.l.bf16 %v13147_v22  ;;  %8043 = vmatprep.mubr.f32.mxu1 %v7719_v24  ;;  %12191 = vmatpush3.bf16.msra.mxu0 %v12188_v4  ;;  %v13163_v58 = vunpack.i.l.bf16 %v13162_v55  ;;  %v7742_v4 = vsel %vm457_vm3, %v17406_v30, %v13113_v35 }
 0xd18   : > { %12193 = vmatprep.subr.bf16.mxu0 %v12192_v6  ;;  %v13164_v41 = vunpack.i.h.bf16 %v13162_v55  ;;  %v7750_v30 = vsel %vm3734_vm15, %v7742_v4, %v13118_v28  ;;  %v13123_v28 = vunpack.i.l.bf16 %v17811_v51  ;;  %v7193_v55 = vld [vmem:[#allocation5 + $0x51] sm:$0xff]  ;;  %v12204_v4 = vpack.c.bf16 %v7935_v20, %v7934_v54 }
 0xd19   : > { %v7695_v59 = vsel %vm457_vm3, %v17374_v56, %v13149_v33  ;;  %v7725_v57 = vsel %vm457_vm3, %v13068_v8, %v13148_v53  ;;  %v7712_v61 = vsel %vm522_vm14, %v17342_v38, %v13163_v58  ;;  %v13028_v8 = vunpack.i.l.bf16 %v17605_v37  ;;  %v7932_v38 = vld [vmem:[%s19106_s8 + $0x340] sm:$0xff]  ;;  %v7195_v20 = vld [vmem:[#allocation5 + $0x71] sm:$0xff] }
 0xd1a   : > { %v17875_v26 = vpop.permute.xlu0 %13151  ;;  %v7703_v47 = vsel %vm3734_vm15, %v7695_v59, %v13109_v19  ;;  %v7733_v39 = vsel %vm522_vm14, %v7725_v57, %v13104_v9  ;;  %v17881_v29 = vpop.permute.xlu1 %13166  ;;  %v7720_v56 = vsel %vm3734_vm15, %v7712_v61, %v13119_v48  ;;  %v13058_v37 = vunpack.i.l.bf16 %v17558_v25 }
 0xd1b   : > { %8044 = vmatmul.mubr.f32.gmra.mrb[102].mxu1 %v7703_v47  ;;  %8139 = vmatmul.mubr.f32.gmra.mrb[116].mxu0 %v7733_v39  ;;  %v7734_v27 = vsel %vm522_vm14, %v7726_v52, %v13164_v41  ;;  %v12200_v24 = vpack.c.bf16 %v7933_v3, %v7932_v38  ;;  %v7696_v33 = vsel %vm457_vm3, %v17657_v13, %v13028_v8  ;;  %v13034_v41 = vunpack.i.h.bf16 %v17636_v2  ;;  %v7169_v38 = vld [vmem:[#allocation4 + $0x50] sm:$0xff] }
 0xd1c   : > { %8048 = vmatprep.mubr.f32.mxu1 %v7720_v56  ;;  %8143 = vmatprep.mubr.f32.mxu0 %v7750_v30  ;;  %v7743_v53 = vsel %vm457_vm3, %v17624_v32, %v13029_v23  ;;  %v7713_v58 = vsel %vm522_vm14, %v7193_v55, %v13043_v63  ;;  %v7744_v59 = vsel %vm457_vm3, %v7232_v0, %v13053_v44  ;;  %v13033_v47 = vunpack.i.l.bf16 %v17636_v2  ;;  %v7171_v0 = vld [vmem:[#allocation4 + $0x70] sm:$0xff] }
 0xd1d   : > { %12195 = vmatpush3.bf16.msra.mxu0 %v12192_v6  ;;  %v13054_v6 = vunpack.i.h.bf16 %v17535_v34  ;;  %v13059_v34 = vunpack.i.h.bf16 %v17558_v25  ;;  %v7721_v13 = vsel %vm3734_vm15, %v7713_v58, %v13048_v5  ;;  %v7752_v32 = vsel %vm3734_vm15, %v7744_v59, %v13058_v37 }
 0xd1e   : > { %v13172_v35 = vpop.permute.xlu0 %13171  ;;  %12197 = vmatprep.subr.bf16.mxu0 %v12196_v31  ;;  %v17903_v22 = vpop.permute.xlu1 %13186  ;;  %v13044_v30 = vunpack.i.h.bf16 %v17662_v18  ;;  %v13049_v23 = vunpack.i.h.bf16 %v17684_v49  ;;  %v13083_v8 = vunpack.i.l.bf16 %v17793_v7  ;;  %v13128_v44 = vunpack.i.l.bf16 %v17809_v45 }
 0xd1f   : > { %v13174_v50 = vunpack.i.h.bf16 %v13172_v35  ;;  %v13173_v21 = vunpack.i.l.bf16 %v13172_v35  ;;  %8144 = vmatmul.mubr.f32.gmra.mrb[118].mxu0 %v7734_v27  ;;  %v13124_v2 = vunpack.i.h.bf16 %v17811_v51  ;;  %v13134_v18 = vunpack.i.h.bf16 %v17820_v1 }
 0xd20   : > { %v13133_v37 = vunpack.i.l.bf16 %v17820_v1  ;;  %v13088_v51 = vunpack.i.l.bf16 %v17795_v16  ;;  %v7698_v1 = vsel %vm457_vm3, %v17529_v60, %v13033_v47  ;;  %v7715_v55 = vsel %vm522_vm14, %v7195_v20, %v13083_v8 }
 0xd21   : > { %v7704_v9 = vsel %vm3734_vm15, %v7696_v33, %v13173_v21  ;;  %v7751_v19 = vsel %vm3734_vm15, %v7743_v53, %v13174_v50  ;;  %12199 = vmatpush3.bf16.msra.mxu0 %v12196_v31  ;;  %v7194_v31 = vld [vmem:[#allocation5 + $0x61] sm:$0xff]  ;;  %v13129_v21 = vunpack.i.h.bf16 %v17809_v45  ;;  %v7728_v45 = vsel %vm457_vm3, %v13119_v48, %v13054_v6 }
 0xd22   : > { %v13177_v57 = vpop.permute.xlu0 %13176  ;;  %8049 = vmatmul.mubr.f32.gmra.mrb[104].mxu1 %v7704_v9  ;;  %8148 = vmatprep.mubr.f32.mxu0 %v7751_v19  ;;  %v17928_v56 = vpop.permute.xlu1 %13196  ;;  %v7714_v3 = vsel %vm522_vm14, %v7194_v31, %v13123_v28  ;;  %v7745_v28 = vsel %vm457_vm3, %v17522_v42, %v13034_v41  ;;  %v13084_v33 = vunpack.i.h.bf16 %v17793_v7  ;;  %v13099_v53 = vunpack.i.h.bf16 %v17799_v11 }
 0xd23   : > { %v13179_v39 = vunpack.i.h.bf16 %v13177_v57  ;;  %v13178_v61 = vunpack.i.l.bf16 %v13177_v57  ;;  %8053 = vmatprep.mubr.f32.mxu1 %v7721_v13  ;;  %12201 = vmatprep.subr.bf16.mxu0 %v12200_v24  ;;  %v7722_v17 = vsel %vm3734_vm15, %v7714_v3, %v13059_v34  ;;  %v7706_v60 = vsel %vm3734_vm15, %v7698_v1, %v13128_v44 }
 0xd24   : > { %v13159_v9 = vunpack.i.h.bf16 %v17839_v40  ;;  %v7736_v14 = vsel %vm522_vm14, %v7728_v45, %v13124_v2  ;;  %v7699_v48 = vsel %vm457_vm3, %v7171_v0, %v13134_v18  ;;  %v7729_v42 = vsel %vm457_vm3, %v13048_v5, %v13133_v37 }
 0xd25   : > { %v7697_v63 = vsel %vm457_vm3, %v7169_v38, %v13179_v39  ;;  %v7727_v52 = vsel %vm457_vm3, %v13108_v12, %v13178_v61  ;;  %12203 = vmatpush3.bf16.msra.mxu0 %v12200_v24  ;;  %v13093_v12 = vunpack.i.l.bf16 %v17797_v43  ;;  %v13153_v24 = vunpack.i.l.bf16 %v17875_v26  ;;  %v7252_v61 = vld [vmem:[#allocation5 + $0x12] sm:$0xff] }
 0xd26   : > { %v17942_v35 = vpop.permute.xlu0 %13181  ;;  %v7705_v27 = vsel %vm3734_vm15, %v7697_v63, %v13049_v23  ;;  %v7735_v50 = vsel %vm522_vm14, %v7727_v52, %v13044_v30  ;;  %12205 = vmatprep.subr.bf16.mxu0 %v12204_v4  ;;  %v17948_v54 = vpop.permute.xlu1 %7802  ;;  %v13089_v7 = vunpack.i.h.bf16 %v17795_v16  ;;  %v13098_v6 = vunpack.i.l.bf16 %v17799_v11 }
 0xd27   : > { %8054 = vmatmul.mubr.f32.gmra.mrb[106].mxu1 %v7705_v27  ;;  %8149 = vmatmul.mubr.f32.gmra.mrb[120].mxu0 %v7735_v50  ;;  %v7723_v59 = vsel %vm3734_vm15, %v7715_v55, %v13088_v51  ;;  %v7753_v57 = vsel %vm3734_vm15, %v7745_v28, %v13129_v21  ;;  %v13038_v13 = vunpack.i.l.bf16 %v17520_v15  ;;  %v13094_v49 = vunpack.i.h.bf16 %v17797_v43 }
 0xd28   : > { %8058 = vmatprep.mubr.f32.mxu1 %v7722_v17  ;;  %8153 = vmatprep.mubr.f32.mxu0 %v7752_v32  ;;  %v13184_v5 = vunpack.i.h.bf16 %v17942_v35  ;;  %v7234_v32 = vld [vmem:[#allocation4 + $0x71] sm:$0xff]  ;;  %v7772_v11 = vsel %vm457_vm3, %v13099_v53, %v13153_v24  ;;  %v7707_v41 = vsel %vm3734_vm15, %v7699_v48, %v13089_v7  ;;  %v7737_v47 = vsel %vm522_vm14, %v7729_v42, %v13084_v33 }
 0xd29   : > { %12207 = vmatpush3.bf16.msra.mxu0 %v12204_v4  ;;  %v13158_v4 = vunpack.i.l.bf16 %v17839_v40  ;;  %v7746_v39 = vsel %vm457_vm3, %v7234_v32, %v13093_v12  ;;  %v13154_v31 = vunpack.i.h.bf16 %v17875_v26  ;;  %v13169_v43 = vunpack.i.h.bf16 %v17881_v29  ;;  %v7293_v48 = vld [vmem:[#allocation4 + $0x32] sm:$0xff] }
 0xd2a   : > { %v17967_v19 = vpop.permute.xlu0 %13191  ;;  %v17976_v58 = vpop.permute.xlu1 %13206  ;;  %v13168_v30 = vunpack.i.l.bf16 %v17881_v29  ;;  %v7756_v8 = vsel %vm522_vm14, %v7252_v61, %v13159_v9  ;;  %v13183_v38 = vunpack.i.l.bf16 %v17942_v35  ;;  %v7754_v40 = vsel %vm3734_vm15, %v7746_v39, %v13098_v6  ;;  %v19139_v6 = vld [vmem:[#allocation11_spill] sm:$0xff] }
 0xd2b   : > { %8059 = vmatmul.mubr.f32.gmra.mrb[108].mxu1 %v7706_v60  ;;  %8154 = vmatmul.mubr.f32.gmra.mrb[122].mxu0 %v7736_v14  ;;  %v7780_v44 = vsel %vm522_vm14, %v7772_v11, %v13038_v13  ;;  %v7730_v26 = vsel %vm457_vm3, %v13059_v34, %v13094_v49  ;;  %v7773_v29 = vsel %vm457_vm3, %v13184_v5, %v13169_v43  ;;  %v13189_v2 = vunpack.i.h.bf16 %v17903_v22 }
 0xd2c   : > { %8063 = vmatprep.mubr.f32.mxu1 %v7723_v59  ;;  %8158 = vmatprep.mubr.f32.mxu0 %v7753_v57  ;;  %v13188_v63 = vunpack.i.l.bf16 %v17903_v22  ;;  %v7738_v52 = vsel %vm522_vm14, %v7730_v26, %v13158_v4  ;;  %v7764_v18 = vsel %vm3734_vm15, %v7756_v8, %v13099_v53  ;;  %v13193_v37 = vunpack.i.l.bf16 %v17967_v19  ;;  %v7254_v53 = vld [vmem:[#allocation5 + $0x32] sm:$0xff] }
 0xd2d   : > { %v13208_v35 = vunpack.i.l.bf16 %v17976_v58  ;;  %v7747_v25 = vsel %vm457_vm3, %v17771_v62, %v13154_v31  ;;  %v7731_v34 = vsel %vm457_vm3, %v13088_v51, %v13168_v30  ;;  %v7781_v1 = vsel %vm522_vm14, %v7773_v29, %v13189_v2  ;;  %v7253_v62 = vld [vmem:[#allocation5 + $0x22] sm:$0xff]  ;;  %v7256_v30 = vld [vmem:[#allocation5 + $0x52] sm:$0xff] }
 0xd2e   : > { %v7797_v23 = vpop.permute.xlu0 %7796  ;;  %v13212_v3 = vpop.permute.xlu1 %13211  ;;  %v7755_v22 = vsel %vm3734_vm15, %v7747_v25, %v13183_v38  ;;  %v13039_v12 = vunpack.i.h.bf16 %v17520_v15  ;;  %v13194_v24 = vunpack.i.h.bf16 %v17967_v19  ;;  %v13209_v45 = vunpack.i.h.bf16 %v17976_v58  ;;  %v7297_v2 = vld [vmem:[#allocation4 + $0x72] sm:$0xff] }
 0xd2f   : > { %8064 = vmatmul.mubr.f32.gmra.mrb[110].mxu1 %v7707_v41  ;;  %8159 = vmatmul.mubr.f32.gmra.mrb[124].mxu0 %v7737_v47  ;;  %v13214_v50 = vunpack.i.h.bf16 %v13212_v3  ;;  %v13213_v21 = vunpack.i.l.bf16 %v13212_v3  ;;  %v7757_v16 = vsel %vm522_vm14, %v7253_v62, %v13188_v63  ;;  %v7774_v33 = vsel %vm457_vm3, %v13193_v37, %v13208_v35  ;;  %v18053_v62 = vld [vmem:[#allocation4 + $0x92] sm:$0xff] }
 0xd30   : > { %8163 = vmatprep.mubr.f32.mxu0 %v7754_v40  ;;  %8238 = vmatprep.mubr.f32.mxu1 %v7780_v44  ;;  %v7739_v20 = vsel %vm522_vm14, %v7731_v34, %v13039_v12  ;;  %v7765_v28 = vsel %vm3734_vm15, %v7757_v16, %v13184_v5  ;;  %v7820_v15 = vsel %vm457_vm3, %v17531_v46, %v7797_v23  ;;  %v13199_v19 = vunpack.i.h.bf16 %v17928_v56  ;;  %v7295_v5 = vld [vmem:[#allocation4 + $0x52] sm:$0xff]  ;;  %v7296_v44 = vld [vmem:[#allocation4 + $0x62] sm:$0xff] }
 0xd31   : > { %v7782_v55 = vsel %vm522_vm14, %v7774_v33, %v13214_v50  ;;  %v7758_v0 = vsel %vm522_vm14, %v7254_v53, %v13213_v21  ;;  %v7775_v9 = vsel %vm457_vm3, %v13194_v24, %v13209_v45  ;;  %v13198_v14 = vunpack.i.l.bf16 %v17928_v56  ;;  %v7255_v56 = vld [vmem:[#allocation5 + $0x42] sm:$0xff] }
 0xd32   : > { %v7799_v27 = vpop.permute.xlu0 %7798  ;;  %v13217_v17 = vpop.permute.xlu1 %13216  ;;  %v7766_v7 = vsel %vm3734_vm15, %v7758_v0, %v13193_v37  ;;  %v7783_v57 = vsel %vm522_vm14, %v7775_v9, %v13199_v19  ;;  %v7823_v11 = vsel %vm457_vm3, %v7295_v5, %v17948_v54  ;;  %v7257_v37 = vld [vmem:[#allocation5 + $0x62] sm:$0xff] }
 0xd33   : > { %8164 = vmatmul.mubr.f32.gmra.mrb[126].mxu0 %v7738_v52  ;;  %8239 = vmatmul.mubr.f32.vlgmr.msra.gmra.mrb[112].mxu1 %v7764_v18  ;;  %v7821_v42 = vsel %vm457_vm3, %v7293_v48, %v7799_v27  ;;  %v7759_v32 = vsel %vm522_vm14, %v7255_v56, %v13198_v14  ;;  %v13219_v4 = vunpack.i.h.bf16 %v13217_v17  ;;  %v13218_v41 = vunpack.i.l.bf16 %v13217_v17  ;;  %v8729_v5 = vld [vmem:[%s19107_s9 + $0x80] sm:$0xff] }
 0xd34   : > { %8168 = vmatprep.mubr.f32.mxu0 %v7755_v22  ;;  %8243 = vmatprep.mubr.f32.mxu1 %v7781_v1  ;;  %v7767_v39 = vsel %vm3734_vm15, %v7759_v32, %v13194_v24  ;;  %v8730_v32 = vld [vmem:[%s19107_s9 + $0x88] sm:$0xff] }
 0xd36   : > { %v7801_v51 = vpop.permute.xlu0 %7800  ;;  %v13227_v60 = vpop.permute.xlu1 %13226 }
 0xd37   : > { %8169 = vmatmul.mubr.f32.gmra.mrb[128].mxu0 %v7739_v20  ;;  %8244 = vmatmul.mubr.f32.gmra.mrb[114].mxu1 %v7765_v28  ;;  %v7822_v58 = vsel %vm457_vm3, %v19139_v6, %v7801_v51  ;;  %v13229_v8 = vunpack.i.h.bf16 %v13227_v60  ;;  %v13228_v38 = vunpack.i.l.bf16 %v13227_v60  ;;  %v7258_v20 = vld [vmem:[#allocation5 + $0x72] sm:$0xff] }
 0xd38   : > { %8248 = vmatprep.mubr.f32.mxu1 %v7782_v55  ;;  %11724 = vmatprep.mubr.msk.f32.mxu0 %vm3734_vm15, %v7820_v15 }
 0xd39   : > { %v7761_v35 = vsel %vm522_vm14, %v7257_v37, %v13228_v38  ;;  %v8738_v37 = vld [vmem:[%s19107_s9 + $0xc8] sm:$0xff] }
 0xd3a   : > { %v13202_v46 = vpop.permute.xlu0 %13201  ;;  %v7807_v59 = vpop.permute.xlu1 %7806 }
 0xd3b   : > { %8249 = vmatmul.mubr.f32.gmra.mrb[116].mxu1 %v7766_v7  ;;  %11725 = vmatmul.mubr.msk.f32.vlgmr.msra.gmra.mrb[130].mxu0 %vm3734_vm15, %v7821_v42  ;;  %v13204_v13 = vunpack.i.h.bf16 %v13202_v46  ;;  %v13203_v49 = vunpack.i.l.bf16 %v13202_v46  ;;  %v7825_v18 = vsel %vm457_vm3, %v7297_v2, %v7807_v59  ;;  %v8745_v59 = vld [vmem:[%s19107_s9 + $0x100] sm:$0xff] }
 0xd3c   : > { %8253 = vmatprep.mubr.f32.mxu1 %v7783_v57  ;;  %11727 = vmatprep.mubr.msk.f32.mxu0 %vm3734_vm15, %v7822_v58 }
 0xd3d   : > { %v7776_v43 = vsel %vm457_vm3, %v13203_v49, %v13218_v41  ;;  %v7777_v23 = vsel %vm457_vm3, %v13204_v13, %v13219_v4  ;;  %v7769_v25 = vsel %vm3734_vm15, %v7761_v35, %v13204_v13  ;;  %v8747_v13 = vld [vmem:[%s19107_s9 + $0x110] sm:$0xff]  ;;  %v8713_v4 = vld [vmem:[%s19107_s9] sm:$0xff]  ;;  %v8714_v41 = vld [vmem:[%s19107_s9 + $0x8] sm:$0xff] }
 0xd3e   : > { %v13222_v47 = vpop.permute.xlu0 %13221  ;;  %v13237_v3 = vpop.permute.xlu1 %13236  ;;  %v7785_v52 = vsel %vm522_vm14, %v7777_v23, %v13229_v8  ;;  %v8733_v23 = vld [vmem:[%s19107_s9 + $0xa0] sm:$0xff]  ;;  %v8734_v8 = vld [vmem:[%s19107_s9 + $0xa8] sm:$0xff] }
 0xd3f   : > { %v13224_v61 = vunpack.i.h.bf16 %v13222_v47  ;;  %v13223_v31 = vunpack.i.l.bf16 %v13222_v47  ;;  %8254 = vmatmul.mubr.f32.gmra.mrb[118].mxu1 %v7767_v39  ;;  %11728 = vmatmul.mubr.msk.f32.gmra.mrb[132].mxu0 %vm3734_vm15, %v7823_v11  ;;  %v13239_v17 = vunpack.i.h.bf16 %v13237_v3  ;;  %v13238_v22 = vunpack.i.l.bf16 %v13237_v3  ;;  %v8731_v47 = vld [vmem:[%s19107_s9 + $0x90] sm:$0xff] }
 0xd40   : > { %v12208_v11 = vpack.c.bf16 %v8730_v32, %v8729_v5  ;;  %v12210_v39 = vpack.c.bf16 %v8714_v41, %v8713_v4  ;;  %v12216_v3 = vpack.c.bf16 %v8734_v8, %v8733_v23 }
 0xd41   : > { %v7784_v54 = vsel %vm522_vm14, %v7776_v43, %v13224_v61  ;;  %v7760_v40 = vsel %vm522_vm14, %v7256_v30, %v13223_v31  ;;  %v8732_v61 = vld [vmem:[%s19107_s9 + $0x98] sm:$0xff]  ;;  %v8715_v31 = vld [vmem:[%s19107_s9 + $0x10] sm:$0xff] }
 0xd42   : > { %v7805_v26 = vpop.permute.xlu0 %7804  ;;  %8258 = vmatprep.mubr.f32.mxu1 %v7784_v54  ;;  %v7768_v29 = vsel %vm3734_vm15, %v7760_v40, %v13203_v49  ;;  %v13247_v34 = vpop.permute.xlu1 %13246  ;;  %v8748_v49 = vld [vmem:[%s19107_s9 + $0x118] sm:$0xff]  ;;  %12209 = vmatprep.subr.bf16.mxu1 %v12208_v11  ;;  %v12212_v30 = vpack.c.bf16 %v8732_v61, %v8731_v47  ;;  %v8717_v54 = vld [vmem:[%s19107_s9 + $0x20] sm:$0xff]  ;;  %v8718_v40 = vld [vmem:[%s19107_s9 + $0x28] sm:$0xff] }
 0xd43   : > { %v7824_v63 = vsel %vm457_vm3, %v7296_v44, %v7805_v26  ;;  %8259 = vmatmul.mubr.f32.gmra.mrb[120].mxu1 %v7768_v29  ;;  %v13249_v12 = vunpack.i.h.bf16 %v13247_v34  ;;  %v13248_v33 = vunpack.i.l.bf16 %v13247_v34  ;;  %v12244_v56 = vpack.c.bf16 %v8748_v49, %v8747_v13  ;;  %v8716_v43 = vld [vmem:[%s19107_s9 + $0x18] sm:$0xff]  ;;  %v8735_v44 = vld [vmem:[%s19107_s9 + $0xb0] sm:$0xff]  ;;  %v8722_v34 = vld [vmem:[%s19107_s9 + $0x48] sm:$0xff] }
 0xd44   : > { %8263 = vmatprep.mubr.f32.mxu1 %v7785_v52  ;;  %11730 = vmatprep.mubr.msk.f32.mxu0 %vm3734_vm15, %v7824_v63  ;;  %v12214_v38 = vpack.c.bf16 %v8716_v43, %v8715_v31  ;;  %v8736_v26 = vld [vmem:[%s19107_s9 + $0xb8] sm:$0xff]  ;;  %v12218_v29 = vpack.c.bf16 %v8718_v40, %v8717_v54  ;;  %v8719_v63 = vld [vmem:[%s19107_s9 + $0x30] sm:$0xff] }
 0xd45   : > { %11731 = vmatmul.mubr.msk.f32.gmra.mrb[134].mxu0 %vm3734_vm15, %v7825_v18  ;;  %v7763_v14 = vsel %vm522_vm14, %v17789_v10, %v13248_v33  ;;  %v8746_v10 = vld [vmem:[%s19107_s9 + $0x108] sm:$0xff]  ;;  %12211 = vmatpush3.bf16.msra.mxu1 %v12210_v39  ;;  %v12220_v2 = vpack.c.bf16 %v8736_v26, %v8735_v44  ;;  %v8720_v52 = vld [vmem:[%s19107_s9 + $0x38] sm:$0xff]  ;;  %v8737_v18 = vld [vmem:[%s19107_s9 + $0xc0] sm:$0xff] }
 0xd46   : > { %v13232_v27 = vpop.permute.xlu0 %13231  ;;  %v7811_v16 = vpop.permute.xlu1 %7810  ;;  %v12240_v57 = vpack.c.bf16 %v8746_v10, %v8745_v59  ;;  %12213 = vmatprep.subr.bf16.mxu1 %v12212_v30  ;;  %v12222_v35 = vpack.c.bf16 %v8720_v52, %v8719_v63 }
 0xd47   : > { %8264 = vmatmul.mubr.f32.gmra.mrb[122].mxu1 %v7769_v25  ;;  %v13234_v50 = vunpack.i.h.bf16 %v13232_v27  ;;  %v13233_v21 = vunpack.i.l.bf16 %v13232_v27  ;;  %v7827_v0 = vsel %vm457_vm3, %v18053_v62, %v7811_v16  ;;  %v12224_v27 = vpack.c.bf16 %v8738_v37, %v8737_v18  ;;  %v8721_v25 = vld [vmem:[%s19107_s9 + $0x40] sm:$0xff] }
 0xd48   : > { %12241 = vmatprep.subr.bf16.mxu0 %v12240_v57 }
 0xd49   : > { %v7778_v51 = vsel %vm457_vm3, %v13233_v21, %v13238_v22  ;;  %v7779_v28 = vsel %vm457_vm3, %v13234_v50, %v13239_v17  ;;  %v7771_v48 = vsel %vm3734_vm15, %v7763_v14, %v13234_v50  ;;  %12243 = vmatpush3.bf16.msra.mxu0 %v12240_v57  ;;  %12215 = vmatpush3.bf16.msra.mxu1 %v12214_v38  ;;  %v8739_v50 = vld [vmem:[%s19107_s9 + $0xd0] sm:$0xff] }
 0xd4a   : > { %v13242_v1 = vpop.permute.xlu0 %13241  ;;  %v7787_v19 = vsel %vm522_vm14, %v7779_v28, %v13249_v12  ;;  %12245 = vmatprep.subr.bf16.mxu0 %v12244_v56  ;;  %12217 = vmatprep.subr.bf16.mxu1 %v12216_v3  ;;  %v12226_v17 = vpack.c.bf16 %v8722_v34, %v8721_v25  ;;  %v8724_v12 = vld [vmem:[%s19107_s9 + $0x58] sm:$0xff] }
 0xd4b   : > { %v13244_v24 = vunpack.i.h.bf16 %v13242_v1  ;;  %v13243_v45 = vunpack.i.l.bf16 %v13242_v1  ;;  %v8723_v1 = vld [vmem:[%s19107_s9 + $0x50] sm:$0xff] }
 0xd4d   : > { %v7786_v53 = vsel %vm522_vm14, %v7778_v51, %v13244_v24  ;;  %v7762_v15 = vsel %vm522_vm14, %v7258_v20, %v13243_v45  ;;  %12247 = vmatpush3.bf16.msra.mxu0 %v12244_v56  ;;  %12219 = vmatpush3.bf16.msra.mxu1 %v12218_v29  ;;  %v12230_v24 = vpack.c.bf16 %v8724_v12, %v8723_v1  ;;  %v10763_v45 = vld [vmem:[%s19109_s11 + $0x7] ss:$0 sm:$0xff] }
 0xd4e   : > { %v7809_v60 = vpop.permute.xlu0 %7808  ;;  %8268 = vmatprep.mubr.f32.mxu1 %v7786_v53  ;;  %v7770_v55 = vsel %vm3734_vm15, %v7762_v15, %v13233_v21  ;;  %12221 = vmatprep.subr.bf16.mxu1 %v12220_v2  ;;  %v8740_v21 = vld [vmem:[%s19107_s9 + $0xd8] sm:$0xff] }
 0xd4f   : > { %v7826_v9 = vsel %vm457_vm3, %v17680_v36, %v7809_v60  ;;  %8269 = vmatmul.mubr.f32.gmra.mrb[124].mxu1 %v7770_v55  ;;  %v12228_v22 = vpack.c.bf16 %v8740_v21, %v8739_v50 }
 0xd50   : > { %8273 = vmatprep.mubr.f32.mxu1 %v7787_v19  ;;  %11733 = vmatprep.mubr.msk.f32.mxu0 %vm3734_vm15, %v7826_v9 }
 0xd51   : > { %11734 = vmatmul.mubr.msk.f32.gmra.mrb[136].mxu0 %vm3734_vm15, %v7827_v0  ;;  %12223 = vmatpush3.bf16.msra.mxu1 %v12222_v35 }
 0xd52   : > { %12225 = vmatprep.subr.bf16.mxu1 %v12224_v27 }
 0xd53   : > { %8274 = vmatmul.mubr.f32.gmra.mrb[126].mxu1 %v7771_v48 }
 0xd55   : > { %12227 = vmatpush3.bf16.msra.mxu1 %v12226_v17 }
 0xd56   : > { %12229 = vmatprep.subr.bf16.mxu1 %v12228_v22 }
 0xd59   : > { %12231 = vmatpush3.bf16.msra.mxu1 %v12230_v24 }
 0xd79   : > { %v11261_v42 = vpop.f32.mrb[96].mxu1 }
 0xd7a   : > { %v11262_v46 = vpop.f32.mrb[97].mxu1 }
 0xd7b   : > { %v18070_v7 = vadd.f32 %v11262_v46, %v11261_v42 }
 0xd7d   : > { %v8031_v20 = vadd.f32 %v18070_v7, %v10763_v45 }
 0xd8d   : > { %v11264_v6 = vpop.f32.mrb[98].mxu1 }
 0xd8e   : > { %v11265_v36 = vpop.f32.mrb[99].mxu1 }
 0xd8f   : > { %v18072_v58 = vadd.f32 %v11265_v36, %v11264_v6 }
 0xd91   : > { %v8036_v14 = vadd.f32 %v18072_v58, %v10763_v45 }
 0xde5   : > { %v11317_v16 = vpop.f32.mrb[114].mxu0 }
 0xde6   : > { %v11318_v51 = vpop.f32.mrb[115].mxu0 }
 0xde7   : > { %v11319_v28 = vadd.f32 %v11318_v51, %v11317_v16 }
 0xde9   : > { %v8136_v33 = vadd.f32 %v11319_v28, %v8031_v20  ;;  %v11267_v53 = vpop.f32.mrb[100].mxu1 }
 0xdea   : > { %v11268_v15 = vpop.f32.mrb[101].mxu1 }
 0xdeb   : > { %v11269_v60 = vadd.f32 %v11268_v15, %v11267_v53 }
 0xded   : > { %v8041_v59 = vadd.f32 %v11269_v60, %v10763_v45 }
 0xdee   : > { %v11270_v55 = vpop.f32.mrb[102].mxu1  ;;  %v11320_v0 = vpop.f32.mrb[116].mxu0 }
 0xdef   : > { %v11271_v9 = vpop.f32.mrb[103].mxu1  ;;  %v11321_v19 = vpop.f32.mrb[117].mxu0 }
 0xdf0   : > { %v11272_v48 = vadd.f32 %v11271_v9, %v11270_v55  ;;  %v11322_v42 = vadd.f32 %v11321_v19, %v11320_v0 }
 0xdf2   : > { %v8141_v46 = vadd.f32 %v11322_v42, %v8036_v14  ;;  %v11323_v6 = vpop.f32.mrb[118].mxu0  ;;  %v8046_v4 = vadd.f32 %v11272_v48, %v10763_v45 }
 0xdf3   : > { %v11324_v36 = vpop.f32.mrb[119].mxu0 }
 0xdf4   : > { %v11325_v10 = vadd.f32 %v11324_v36, %v11323_v6 }
 0xdf5   : > { %v11273_v57 = vpop.f32.mrb[104].mxu1 }
 0xdf6   : > { %v8146_v7 = vadd.f32 %v11325_v10, %v8041_v59  ;;  %v11274_v13 = vpop.f32.mrb[105].mxu1  ;;  %v8725_v10 = vld [vmem:[%s19107_s9 + $0x60] sm:$0xff] }
 0xdf7   : > { %v11275_v49 = vadd.f32 %v11274_v13, %v11273_v57 }
 0xdf9   : > { %v8051_v30 = vadd.f32 %v11275_v49, %v10763_v45  ;;  %v8726_v49 = vld [vmem:[%s19107_s9 + $0x68] sm:$0xff] }
 0xdfa   : > { %v11276_v56 = vpop.f32.mrb[106].mxu1  ;;  %v11326_v5 = vpop.f32.mrb[120].mxu0 }
 0xdfb   : > { %v11277_v32 = vpop.f32.mrb[107].mxu1  ;;  %v11327_v11 = vpop.f32.mrb[121].mxu0 }
 0xdfc   : > { %v11278_v41 = vadd.f32 %v11277_v32, %v11276_v56  ;;  %v11328_v47 = vadd.f32 %v11327_v11, %v11326_v5  ;;  %v12234_v56 = vpack.c.bf16 %v8726_v49, %v8725_v10  ;;  %v8743_v5 = vld [vmem:[%s19107_s9 + $0xf0] sm:$0xff]  ;;  %v8744_v32 = vld [vmem:[%s19107_s9 + $0xf8] sm:$0xff] }
 0xdfd   : > { %v8727_v11 = vld [vmem:[%s19107_s9 + $0x70] sm:$0xff] }
 0xdfe   : > { %v8151_v39 = vadd.f32 %v11328_v47, %v8046_v4  ;;  %v11279_v58 = vpop.f32.mrb[108].mxu1  ;;  %v11329_v61 = vpop.f32.mrb[122].mxu0  ;;  %v8056_v26 = vadd.f32 %v11278_v41, %v10763_v45 }
 0xdff   : > { %v11280_v31 = vpop.f32.mrb[109].mxu1  ;;  %v11330_v43 = vpop.f32.mrb[123].mxu0 }
 0xe00   : > { %v11281_v23 = vadd.f32 %v11280_v31, %v11279_v58  ;;  %v11331_v8 = vadd.f32 %v11330_v43, %v11329_v61  ;;  %v12236_v58 = vpack.c.bf16 %v8744_v32, %v8743_v5  ;;  %v8728_v61 = vld [vmem:[%s19107_s9 + $0x78] sm:$0xff] }
 0xe01   : > { %v12238_v43 = vpack.c.bf16 %v8728_v61, %v8727_v11 }
 0xe02   : > { %v18163_v38 = vadd.f32 %v11331_v8, %v8051_v30  ;;  %v11282_v3 = vpop.f32.mrb[110].mxu1  ;;  %v11332_v54 = vpop.f32.mrb[124].mxu0  ;;  %v8061_v27 = vadd.f32 %v11281_v23, %v10763_v45 }
 0xe03   : > { %v11283_v40 = vpop.f32.mrb[111].mxu1  ;;  %v11333_v44 = vpop.f32.mrb[125].mxu0 }
 0xe04   : > { %v11284_v29 = vadd.f32 %v11283_v40, %v11282_v3  ;;  %v11334_v2 = vadd.f32 %v11333_v44, %v11332_v54  ;;  %v8417_v54 = vld [vmem:[#allocation4 + $0x2] sm:$0xff] }
 0xe06   : > { %v18165_v63 = vadd.f32 %v11334_v2, %v8056_v26  ;;  %v11335_v52 = vpop.f32.mrb[126].mxu0  ;;  %v11373_v18 = vpop.f32.mrb[112].mxu1  ;;  %v8066_v24 = vadd.f32 %v11284_v29, %v10763_v45  ;;  %v8741_v45 = vld [vmem:[%s19107_s9 + $0xe0] sm:$0xff] }
 0xe07   : > { %v11336_v37 = vpop.f32.mrb[127].mxu0  ;;  %v11374_v35 = vpop.f32.mrb[113].mxu1 }
 0xe08   : > { %v11337_v25 = vadd.f32 %v11336_v37, %v11335_v52  ;;  %v11375_v34 = vadd.f32 %v11374_v35, %v11373_v18 }
 0xe0a   : > { %v18167_v50 = vadd.f32 %v11337_v25, %v8061_v27  ;;  %v11338_v21 = vpop.f32.mrb[128].mxu0  ;;  %v11376_v17 = vpop.f32.mrb[114].mxu1  ;;  %v8241_v22 = vadd.f32 %v11375_v34, %v8136_v33 }
 0xe0b   : > { %v11339_v1 = vpop.f32.mrb[129].mxu0  ;;  %v11377_v12 = vpop.f32.mrb[115].mxu1 }
 0xe0c   : > { %v11340_v16 = vadd.f32 %v11339_v1, %v11338_v21  ;;  %v11378_v51 = vadd.f32 %v11377_v12, %v11376_v17 }
 0xe0e   : > { %v18169_v20 = vadd.f32 %v11340_v16, %v8066_v24  ;;  %v11379_v28 = vpop.f32.mrb[116].mxu1  ;;  %v8246_v53 = vadd.f32 %v11378_v51, %v8141_v46  ;;  %v11726_v15 = vpop.f32.mrb[130].mxu0  ;;  %v8742_v46 = vld [vmem:[%s19107_s9 + $0xe8] sm:$0xff] }
 0xe0f   : > { %v11380_v60 = vpop.f32.mrb[117].mxu1  ;;  %v8345_v55 = vpop.f32.mrb[131].mxu0  ;;  %v12232_v13 = vpack.c.bf16 %v8742_v46, %v8741_v45 }
 0xe10   : > { %v8351_v0 = vadd.f32 %v11726_v15, %v8246_v53  ;;  %v11381_v9 = vadd.f32 %v11380_v60, %v11379_v28  ;;  %v8346_v19 = vadd.f32 %v8345_v55, %v8241_v22 }
 0xe11   : > { %12233 = vmatprep.subr.bf16.mxu1 %v12232_v13 }
 0xe12   : > { %v8385_v14 = vmax.f32 %v8351_v0, 0.0  ;;  %v8384_v48 = vmax.f32 %v8346_v19, 0.0  ;;  %v11382_v42 = vpop.f32.mrb[118].mxu1  ;;  %v11729_v6 = vpop.f32.mrb[132].mxu0  ;;  %v8251_v33 = vadd.f32 %v11381_v9, %v8146_v7  ;;  %12235 = vmatpush3.bf16.msra.mxu1 %v12234_v56 }
 0xe13   : > { %v11383_v36 = vpop.f32.mrb[119].mxu1  ;;  %v8355_v59 = vpop.f32.mrb[133].mxu0  ;;  %12237 = vmatprep.subr.bf16.mxu1 %v12236_v58 }
 0xe14   : > { %8393 = vst.msk [vmem:[#allocation4 + $0x21] sm:$0xff] %vm457_vm3, %v8385_v14  ;;  %8392 = vst.msk [vmem:[#allocation4 + $0x11] sm:$0xff] %vm457_vm3, %v8384_v48  ;;  %v11384_v57 = vadd.f32 %v11383_v36, %v11382_v42  ;;  %v8356_v7 = vadd.f32 %v8355_v59, %v8251_v33 }
 0xe16   : > { %v8256_v4 = vadd.f32 %v11384_v57, %v8151_v39  ;;  %v8386_v41 = vmax.f32 %v8356_v7, 0.0  ;;  %v11385_v47 = vpop.f32.mrb[120].mxu1  ;;  %v8409_v39 = vld [vmem:[#allocation4 + $0x1] sm:$0xff]  ;;  %12239 = vmatpush3.bf16.msra.mxu1 %v12238_v43 }
 0xe17   : > { %v11386_v31 = vpop.f32.mrb[121].mxu1 }
 0xe18   : > { %v8361_v30 = vadd.f32 %v11729_v6, %v8256_v4  ;;  %8394 = vst.msk [vmem:[#allocation4 + $0x31] sm:$0xff] %vm457_vm3, %v8386_v41  ;;  %v11387_v23 = vadd.f32 %v11386_v31, %v11385_v47  ;;  %v11732_v8 = vpop.f32.mrb[134].mxu0 }
 0xe19   : > { %v8365_v3 = vpop.f32.mrb[135].mxu0 }
 0xe1a   : > { %v8387_v40 = vmax.f32 %v8361_v30, 0.0  ;;  %v8261_v44 = vadd.f32 %v11387_v23, %v18163_v38  ;;  %v11388_v26 = vpop.f32.mrb[122].mxu1 }
 0xe1b   : > { %v11389_v29 = vpop.f32.mrb[123].mxu1  ;;  %v8465_v2 = vld [vmem:[#allocation4 + $0x22] sm:$0xff]  ;;  %v8441_v18 = vld [vmem:[#allocation4 + $0x12] sm:$0xff] }
 0xe1c   : > { %v18199_v52 = vld [vmem:[#allocation4 + $0x20] sm:$0xff]  ;;  %8395 = vst.msk [vmem:[#allocation4 + $0x41] sm:$0xff] %vm457_vm3, %v8387_v40  ;;  %v8366_v37 = vadd.f32 %v8365_v3, %v8261_v44  ;;  %v11390_v35 = vadd.f32 %v11389_v29, %v11388_v26  ;;  %11744 = vmatprep.mubr.msk.f32.mxu0 %vm457_vm3, %v8465_v2  ;;  %v13250_v25 = vpack.i.bf16 %v8409_v39, %v8441_v18  ;;  %v18204_v34 = vld [vmem:[#allocation4 + $0x10] sm:$0xff] }
 0xe1d   : > { %v13255_v27 = vpack.i.bf16 %v8417_v54, %v18199_v52  ;;  %v18206_v21 = vld [vmem:[#allocation4 + $0x21] sm:$0xff]  ;;  %v18208_v38 = vld [vmem:[#allocation4 + $0x11] sm:$0xff] }
 0xe1e   : > { %v8388_v17 = vmax.f32 %v8366_v37, 0.0  ;;  %v8266_v22 = vadd.f32 %v11390_v35, %v18165_v63  ;;  %13251 = vrot.lane.b32.xlu0 %v13250_v25, %s13429_s18  ;;  %v13260_v24 = vpack.i.bf16 %v18204_v34, %v18206_v21  ;;  %v13265_v16 = vpack.i.bf16 %v18208_v38, %v8465_v2  ;;  %v8456_v37 = vld [vmem:[#allocation4 + $0x90] sm:$0xff] }
 0xe1f   : > { %13256 = vrot.lane.b32.xlu1 %v13255_v27, %s13431_s19  ;;  %v8466_v1 = vld [vmem:[#allocation4 + $0x32] sm:$0xff] }
 0xe20   : > { %8396 = vst.msk [vmem:[#allocation4 + $0x51] sm:$0xff] %vm457_vm3, %v8388_v17  ;;  %v8371_v12 = vadd.f32 %v11732_v8, %v8266_v22  ;;  %11745 = vmatmul.mubr.msk.f32.vlgmr.msra.gmra.mrb[138].mxu0 %vm457_vm3, %v8466_v1  ;;  %v18218_v51 = vld [vmem:[#allocation4 + $0x30] sm:$0xff]  ;;  %v13280_v46 = vpack.i.bf16 %v18206_v21, %v8466_v1  ;;  %v8995_v17 = vld [vmem:[%s19108_s10] sm:$0xff]  ;;  %v8996_v22 = vld [vmem:[%s19108_s10 + $0x8] sm:$0xff] }
 0xe21   : > { %v18220_v28 = vld [vmem:[#allocation4 + $0x31] sm:$0xff]  ;;  %v13270_v9 = vpack.i.bf16 %v8441_v18, %v18218_v51 }
 0xe22   : > { %v8389_v63 = vmax.f32 %v8371_v12, 0.0  ;;  %v11391_v53 = vpop.f32.mrb[124].mxu1  ;;  %13261 = vrot.lane.b32.xlu0 %v13260_v24, %s13432_s15  ;;  %v13275_v19 = vpack.i.bf16 %v18199_v52, %v18220_v28  ;;  %v8464_v35 = vld [vmem:[#allocation4 + $0x91] sm:$0xff]  ;;  %v8401_v24 = vld [vmem:[#allocation4] sm:$0xff] }
 0xe23   : > { %13266 = vrot.lane.b32.xlu1 %v13265_v16, %s13429_s18  ;;  %v11392_v15 = vpop.f32.mrb[125].mxu1  ;;  %v8467_v60 = vld [vmem:[#allocation4 + $0x42] sm:$0xff] }
 0xe24   : > { %8397 = vst.msk [vmem:[#allocation4 + $0x61] sm:$0xff] %vm457_vm3, %v8389_v63  ;;  %v11393_v55 = vadd.f32 %v11392_v15, %v11391_v53  ;;  %11747 = vmatprep.mubr.msk.f32.mxu0 %vm457_vm3, %v8467_v60  ;;  %v11735_v0 = vpop.f32.mrb[136].mxu0  ;;  %v18229_v48 = vld [vmem:[#allocation4 + $0x40] sm:$0xff]  ;;  %v13295_v5 = vpack.i.bf16 %v18220_v28, %v8467_v60 }
 0xe25   : > { %v8375_v14 = vpop.f32.mrb[137].mxu0  ;;  %v13285_v10 = vpack.i.bf16 %v8465_v2, %v18229_v48  ;;  %v18237_v57 = vld [vmem:[#allocation4 + $0x41] sm:$0xff] }
 0xe26   : > { %v11394_v42 = vpop.f32.mrb[126].mxu1  ;;  %13271 = vrot.lane.b32.xlu0 %v13270_v9, %s13431_s19  ;;  %v8271_v6 = vadd.f32 %v11393_v55, %v18167_v50  ;;  %v13290_v56 = vpack.i.bf16 %v18218_v51, %v18237_v57 }
 0xe27   : > { %13276 = vrot.lane.b32.xlu1 %v13275_v19, %s13432_s15  ;;  %v11395_v33 = vpop.f32.mrb[127].mxu1  ;;  %v8468_v36 = vld [vmem:[#allocation4 + $0x52] sm:$0xff] }
 0xe28   : > { %v11396_v59 = vadd.f32 %v11395_v33, %v11394_v42  ;;  %v8376_v45 = vadd.f32 %v8375_v14, %v8271_v6  ;;  %11748 = vmatmul.mubr.msk.f32.gmra.mrb[140].mxu0 %vm457_vm3, %v8468_v36  ;;  %v18247_v32 = vld [vmem:[#allocation4 + $0x50] sm:$0xff]  ;;  %v13310_v61 = vpack.i.bf16 %v18237_v57, %v8468_v36 }
 0xe29   : > { %v18249_v11 = vld [vmem:[#allocation4 + $0x51] sm:$0xff]  ;;  %v13300_v4 = vpack.i.bf16 %v8466_v1, %v18247_v32  ;;  %v12248_v1 = vpack.c.bf16 %v8996_v22, %v8995_v17 }
 0xe2a   : > { %v8276_v7 = vadd.f32 %v11396_v59, %v18169_v20  ;;  %v8390_v13 = vmax.f32 %v8376_v45, 0.0  ;;  %13281 = vrot.lane.b32.xlu0 %v13280_v46, %s13429_s18  ;;  %v13305_v41 = vpack.i.bf16 %v18229_v48, %v18249_v11 }
 0xe2b   : > { %13286 = vrot.lane.b32.xlu1 %v13285_v10, %s13431_s19  ;;  %v8469_v50 = vld [vmem:[#allocation4 + $0x62] sm:$0xff]  ;;  %12249 = vmatprep.subr.bf16.mxu0 %v12248_v1 }
 0xe2c   : > { %v8381_v49 = vadd.f32 %v11735_v0, %v8276_v7  ;;  %8398 = vst.msk [vmem:[#allocation4 + $0x71] sm:$0xff] %vm457_vm3, %v8390_v13  ;;  %11750 = vmatprep.mubr.msk.f32.mxu0 %vm457_vm3, %v8469_v50  ;;  %v18257_v47 = vld [vmem:[#allocation4 + $0x60] sm:$0xff]  ;;  %v13325_v8 = vpack.i.bf16 %v18249_v11, %v8469_v50  ;;  %12251 = vmatpush3.bf16.msra.mxu0 %v12248_v1 }
 0xe2d   : > { %v13315_v31 = vpack.i.bf16 %v8467_v60, %v18257_v47  ;;  %v18264_v43 = vld [vmem:[#allocation4 + $0x61] sm:$0xff] }
 0xe2e   : > { %v8391_v20 = vmax.f32 %v8381_v49, 0.0  ;;  %13291 = vrot.lane.b32.xlu0 %v13290_v56, %s13432_s15  ;;  %v13320_v23 = vpack.i.bf16 %v18247_v32, %v18264_v43 }
 0xe2f   : > { %13296 = vrot.lane.b32.xlu1 %v13295_v5, %s13429_s18 }
 0xe30   : > { %8399 = vst.msk [vmem:[#allocation4 + $0x81] sm:$0xff] %vm457_vm3, %v8391_v20 }
 0xe32   : > { %13301 = vrot.lane.b32.xlu0 %v13300_v4, %s13431_s19 }
 0xe33   : > { %13306 = vrot.lane.b32.xlu1 %v13305_v41, %s13432_s15  ;;  %v8470_v58 = vld [vmem:[#allocation4 + $0x72] sm:$0xff] }
 0xe34   : > { %11751 = vmatmul.mubr.msk.f32.gmra.mrb[142].mxu0 %vm457_vm3, %v8470_v58  ;;  %v18272_v3 = vld [vmem:[#allocation4 + $0x70] sm:$0xff]  ;;  %v13340_v26 = vpack.i.bf16 %v18264_v43, %v8470_v58  ;;  %v13355_v27 = vpack.i.bf16 %v8470_v58, %v8456_v37 }
 0xe35   : > { %v18274_v54 = vld [vmem:[#allocation4 + $0x71] sm:$0xff]  ;;  %v13330_v39 = vpack.i.bf16 %v8468_v36, %v18272_v3 }
 0xe36   : > { %13311 = vrot.lane.b32.xlu0 %v13310_v61, %s13429_s18  ;;  %v13335_v40 = vpack.i.bf16 %v18257_v47, %v18274_v54 }
 0xe37   : > { %13316 = vrot.lane.b32.xlu1 %v13315_v31, %s13431_s19  ;;  %v8471_v30 = vld [vmem:[#allocation4 + $0x82] sm:$0xff] }
 0xe38   : > { %11753 = vmatprep.mubr.msk.f32.mxu0 %vm457_vm3, %v8471_v30  ;;  %v8455_v44 = vld [vmem:[#allocation4 + $0x80] sm:$0xff]  ;;  %v13360_v18 = vpack.i.bf16 %v18274_v54, %v8471_v30 }
 0xe39   : > { %11754 = vmatmul.mubr.msk.f32.gmra.mrb[144].mxu0 %vm457_vm3, %v18053_v62  ;;  %v13345_v29 = vpack.i.bf16 %v8469_v50, %v8455_v44  ;;  %v18286_v2 = vld [vmem:[#allocation4 + $0x81] sm:$0xff]  ;;  %v13365_v25 = vpack.i.bf16 %v8455_v44, %v8464_v35 }
 0xe3a   : > { %13321 = vrot.lane.b32.xlu0 %v13320_v23, %s13432_s15  ;;  %v13350_v62 = vpack.i.bf16 %v18272_v3, %v18286_v2 }
 0xe3b   : > { %13326 = vrot.lane.b32.xlu1 %v13325_v8, %s13429_s18 }
 0xe3e   : > { %13331 = vrot.lane.b32.xlu0 %v13330_v39, %s13431_s19 }
 0xe3f   : > { %13336 = vrot.lane.b32.xlu1 %v13335_v40, %s13432_s15 }
 0xe42   : > { %13341 = vrot.lane.b32.xlu0 %v13340_v26, %s13429_s18 }
 0xe43   : > { %13346 = vrot.lane.b32.xlu1 %v13345_v29, %s13431_s19 }
 0xe46   : > { %13351 = vrot.lane.b32.xlu0 %v13350_v62, %s13432_s15 }
 0xe47   : > { %13361 = vrot.lane.b32.xlu1 %v13360_v18, %s13429_s18 }
 0xe4a   : > { %13356 = vrot.lane.b32.xlu0 %v13355_v27, %s13431_s19 }
 0xe4b   : > { %13366 = vrot.lane.b32.xlu1 %v13365_v25, %s13432_s15 }
 0xe90   : > { %v13252_v16 = vpop.permute.xlu0 %13251 }
 0xe91   : > { %v13257_v12 = vpop.permute.xlu1 %13256  ;;  %v13254_v63 = vunpack.i.h.bf16 %v13252_v16  ;;  %v13253_v53 = vunpack.i.l.bf16 %v13252_v16 }
 0xe92   : > { %v13259_v15 = vunpack.i.h.bf16 %v13257_v12  ;;  %v13258_v60 = vunpack.i.l.bf16 %v13257_v12 }
 0xe93   : > { %v8665_v55 = vsel %vm457_vm3, %v8401_v24, %v13254_v63  ;;  %v8689_v0 = vsel %vm457_vm3, %v18208_v38, %v13253_v53 }
 0xe94   : > { %v13262_v9 = vpop.permute.xlu0 %13261  ;;  %v8697_v36 = vsel %vm522_vm14, %v8689_v0, %v13258_v60  ;;  %v8673_v59 = vsel %vm522_vm14, %v8665_v55, %v13259_v15 }
 0xe95   : > { %v13267_v19 = vpop.permute.xlu1 %13266  ;;  %v13264_v14 = vunpack.i.h.bf16 %v13262_v9  ;;  %v13263_v42 = vunpack.i.l.bf16 %v13262_v9 }
 0xe96   : > { %v13269_v6 = vunpack.i.h.bf16 %v13267_v19  ;;  %v13268_v33 = vunpack.i.l.bf16 %v13267_v19 }
 0xe97   : > { %v8705_v45 = vsel %vm3734_vm15, %v8697_v36, %v13263_v42  ;;  %v8681_v46 = vsel %vm3734_vm15, %v8673_v59, %v13264_v14 }
 0xe98   : > { %8841 = vmatprep.mubr.f32.mxu1 %v8705_v45  ;;  %v13272_v10 = vpop.permute.xlu0 %13271  ;;  %v8690_v56 = vsel %vm457_vm3, %v18206_v21, %v13268_v33  ;;  %v8666_v5 = vsel %vm457_vm3, %v18204_v34, %v13269_v6 }
 0xe99   : > { %v13277_v7 = vpop.permute.xlu1 %13276  ;;  %v13274_v13 = vunpack.i.h.bf16 %v13272_v10  ;;  %v13273_v50 = vunpack.i.l.bf16 %v13272_v10  ;;  %8842 = vmatmul.mubr.f32.vlgmr.msra.gmra.mrb[128].mxu1 %v8681_v46 }
 0xe9a   : > { %v13279_v38 = vunpack.i.h.bf16 %v13277_v7  ;;  %v13278_v49 = vunpack.i.l.bf16 %v13277_v7 }
 0xe9b   : > { %v8698_v20 = vsel %vm522_vm14, %v8690_v56, %v13273_v50  ;;  %v8674_v4 = vsel %vm522_vm14, %v8666_v5, %v13274_v13 }
 0xe9c   : > { %v13282_v41 = vpop.permute.xlu0 %13281  ;;  %v8706_v61 = vsel %vm3734_vm15, %v8698_v20, %v13278_v49  ;;  %v8682_v31 = vsel %vm3734_vm15, %v8674_v4, %v13279_v38 }
 0xe9d   : > { %v13287_v58 = vpop.permute.xlu1 %13286  ;;  %v13284_v30 = vunpack.i.h.bf16 %v13282_v41  ;;  %v13283_v23 = vunpack.i.l.bf16 %v13282_v41  ;;  %8846 = vmatprep.mubr.f32.mxu1 %v8706_v61 }
 0xe9e   : > { %v13289_v8 = vunpack.i.h.bf16 %v13287_v58  ;;  %v13288_v39 = vunpack.i.l.bf16 %v13287_v58  ;;  %8847 = vmatmul.mubr.f32.gmra.mrb[130].mxu1 %v8682_v31 }
 0xe9f   : > { %v8691_v21 = vsel %vm457_vm3, %v18220_v28, %v13283_v23  ;;  %v8667_v34 = vsel %vm457_vm3, %v18199_v52, %v13284_v30 }
 0xea0   : > { %v13292_v40 = vpop.permute.xlu0 %13291  ;;  %v8699_v37 = vsel %vm522_vm14, %v8691_v21, %v13288_v39  ;;  %v8675_v35 = vsel %vm522_vm14, %v8667_v34, %v13289_v8 }
 0xea1   : > { %v13297_v44 = vpop.permute.xlu1 %13296  ;;  %v13294_v26 = vunpack.i.h.bf16 %v13292_v40  ;;  %v13293_v29 = vunpack.i.l.bf16 %v13292_v40 }
 0xea2   : > { %v13299_v62 = vunpack.i.h.bf16 %v13297_v44  ;;  %v13298_v18 = vunpack.i.l.bf16 %v13297_v44 }
 0xea3   : > { %v8707_v27 = vsel %vm3734_vm15, %v8699_v37, %v13293_v29  ;;  %v8683_v25 = vsel %vm3734_vm15, %v8675_v35, %v13294_v26 }
 0xea4   : > { %v13302_v17 = vpop.permute.xlu0 %13301  ;;  %8851 = vmatprep.mubr.f32.mxu1 %v8707_v27  ;;  %v8692_v24 = vsel %vm457_vm3, %v18237_v57, %v13298_v18  ;;  %v8668_v16 = vsel %vm457_vm3, %v18218_v51, %v13299_v62 }
 0xea5   : > { %v13307_v22 = vpop.permute.xlu1 %13306  ;;  %v13304_v28 = vunpack.i.h.bf16 %v13302_v17  ;;  %v13303_v1 = vunpack.i.l.bf16 %v13302_v17  ;;  %8852 = vmatmul.mubr.f32.gmra.mrb[132].mxu1 %v8683_v25 }
 0xea6   : > { %v13309_v52 = vunpack.i.h.bf16 %v13307_v22  ;;  %v13308_v12 = vunpack.i.l.bf16 %v13307_v22 }
 0xea7   : > { %v8700_v63 = vsel %vm522_vm14, %v8692_v24, %v13303_v1  ;;  %v8676_v53 = vsel %vm522_vm14, %v8668_v16, %v13304_v28 }
 0xea8   : > { %v13312_v15 = vpop.permute.xlu0 %13311  ;;  %v8708_v55 = vsel %vm3734_vm15, %v8700_v63, %v13308_v12  ;;  %v8684_v0 = vsel %vm3734_vm15, %v8676_v53, %v13309_v52 }
 0xea9   : > { %v13317_v60 = vpop.permute.xlu1 %13316  ;;  %v13314_v9 = vunpack.i.h.bf16 %v13312_v15  ;;  %v13313_v19 = vunpack.i.l.bf16 %v13312_v15  ;;  %8856 = vmatprep.mubr.f32.mxu1 %v8708_v55  ;;  %v8997_v55 = vld [vmem:[%s19108_s10 + $0x10] sm:$0xff] }
 0xeaa   : > { %v13319_v14 = vunpack.i.h.bf16 %v13317_v60  ;;  %v13318_v42 = vunpack.i.l.bf16 %v13317_v60  ;;  %8857 = vmatmul.mubr.f32.gmra.mrb[134].mxu1 %v8684_v0 }
 0xeab   : > { %v8693_v57 = vsel %vm457_vm3, %v18249_v11, %v13313_v19  ;;  %v8669_v51 = vsel %vm457_vm3, %v18229_v48, %v13314_v9 }
 0xeac   : > { %v13322_v6 = vpop.permute.xlu0 %13321  ;;  %v8701_v10 = vsel %vm522_vm14, %v8693_v57, %v13318_v42  ;;  %v8677_v7 = vsel %vm522_vm14, %v8669_v51, %v13319_v14 }
 0xead   : > { %v13327_v33 = vpop.permute.xlu1 %13326  ;;  %v13324_v36 = vunpack.i.h.bf16 %v13322_v6  ;;  %v13323_v59 = vunpack.i.l.bf16 %v13322_v6  ;;  %v10772_v6 = vld [vmem:[%s19109_s11 + $0x8] ss:$0 sm:$0xff] }
 0xeae   : > { %v13329_v45 = vunpack.i.h.bf16 %v13327_v33  ;;  %v13328_v46 = vunpack.i.l.bf16 %v13327_v33 }
 0xeaf   : > { %v8709_v13 = vsel %vm3734_vm15, %v8701_v10, %v13323_v59  ;;  %v8685_v50 = vsel %vm3734_vm15, %v8677_v7, %v13324_v36 }
 0xeb0   : > { %v13332_v38 = vpop.permute.xlu0 %13331  ;;  %8861 = vmatprep.mubr.f32.mxu1 %v8709_v13  ;;  %v8694_v20 = vsel %vm457_vm3, %v18264_v43, %v13328_v46  ;;  %v8670_v4 = vsel %vm457_vm3, %v18247_v32, %v13329_v45 }
 0xeb1   : > { %v13337_v49 = vpop.permute.xlu1 %13336  ;;  %v13334_v11 = vunpack.i.h.bf16 %v13332_v38  ;;  %v13333_v56 = vunpack.i.l.bf16 %v13332_v38  ;;  %8862 = vmatmul.mubr.f32.gmra.mrb[136].mxu1 %v8685_v50 }
 0xeb2   : > { %v13339_v48 = vunpack.i.h.bf16 %v13337_v49  ;;  %v13338_v5 = vunpack.i.l.bf16 %v13337_v49 }
 0xeb3   : > { %v8702_v41 = vsel %vm522_vm14, %v8694_v20, %v13333_v56  ;;  %v8678_v58 = vsel %vm522_vm14, %v8670_v4, %v13334_v11 }
 0xeb4   : > { %v13342_v61 = vpop.permute.xlu0 %13341  ;;  %v8710_v30 = vsel %vm3734_vm15, %v8702_v41, %v13338_v5  ;;  %v8686_v23 = vsel %vm3734_vm15, %v8678_v58, %v13339_v48 }
 0xeb5   : > { %v13347_v31 = vpop.permute.xlu1 %13346  ;;  %v13344_v8 = vunpack.i.h.bf16 %v13342_v61  ;;  %v13343_v39 = vunpack.i.l.bf16 %v13342_v61  ;;  %8866 = vmatprep.mubr.f32.mxu1 %v8710_v30 }
 0xeb6   : > { %v13349_v21 = vunpack.i.h.bf16 %v13347_v31  ;;  %v13348_v34 = vunpack.i.l.bf16 %v13347_v31  ;;  %8867 = vmatmul.mubr.f32.gmra.mrb[138].mxu1 %v8686_v23 }
 0xeb7   : > { %v8695_v43 = vsel %vm457_vm3, %v18274_v54, %v13343_v39  ;;  %v8671_v32 = vsel %vm457_vm3, %v18257_v47, %v13344_v8 }
 0xeb8   : > { %v13352_v40 = vpop.permute.xlu0 %13351  ;;  %v8703_v37 = vsel %vm522_vm14, %v8695_v43, %v13348_v34  ;;  %v8679_v35 = vsel %vm522_vm14, %v8671_v32, %v13349_v21 }
 0xeb9   : > { %v13362_v44 = vpop.permute.xlu1 %13361  ;;  %v13354_v26 = vunpack.i.h.bf16 %v13352_v40  ;;  %v13353_v29 = vunpack.i.l.bf16 %v13352_v40 }
 0xeba   : > { %v13364_v62 = vunpack.i.h.bf16 %v13362_v44  ;;  %v13363_v18 = vunpack.i.l.bf16 %v13362_v44 }
 0xebb   : > { %v8711_v27 = vsel %vm3734_vm15, %v8703_v37, %v13353_v29  ;;  %v8687_v25 = vsel %vm3734_vm15, %v8679_v35, %v13354_v26 }
 0xebc   : > { %v13357_v17 = vpop.permute.xlu0 %13356  ;;  %8871 = vmatprep.mubr.f32.mxu1 %v8711_v27  ;;  %v8696_v52 = vsel %vm457_vm3, %v18286_v2, %v13363_v18  ;;  %v8672_v12 = vsel %vm457_vm3, %v18272_v3, %v13364_v62  ;;  %v8998_v3 = vld [vmem:[%s19108_s10 + $0x18] sm:$0xff] }
 0xebd   : > { %v13367_v54 = vpop.permute.xlu1 %13366  ;;  %v13359_v22 = vunpack.i.h.bf16 %v13357_v17  ;;  %v13358_v28 = vunpack.i.l.bf16 %v13357_v17  ;;  %8872 = vmatmul.mubr.f32.gmra.mrb[140].mxu1 %v8687_v25  ;;  %v12252_v2 = vpack.c.bf16 %v8998_v3, %v8997_v55 }
 0xebe   : > { %v13369_v47 = vunpack.i.h.bf16 %v13367_v54  ;;  %v13368_v1 = vunpack.i.l.bf16 %v13367_v54 }
 0xebf   : > { %v8704_v24 = vsel %vm522_vm14, %v8696_v52, %v13358_v28  ;;  %v8680_v16 = vsel %vm522_vm14, %v8672_v12, %v13359_v22  ;;  %12253 = vmatprep.subr.bf16.mxu0 %v12252_v2 }
 0xec0   : > { %v8712_v63 = vsel %vm3734_vm15, %v8704_v24, %v13368_v1  ;;  %v8688_v53 = vsel %vm3734_vm15, %v8680_v16, %v13369_v47  ;;  %12255 = vmatpush3.bf16.msra.mxu0 %v12252_v2  ;;  %v18386_v24 = vld [vmem:[%s19109_s11 + $0x9] ss:$0 sm:$0xff] }
 0xec1   : > { %8876 = vmatprep.mubr.f32.mxu1 %v8712_v63 }
 0xec2   : > { %8877 = vmatmul.mubr.f32.gmra.mrb[142].mxu1 %v8688_v53 }
 0xef3   : > { %v11746_v15 = vpop.f32.mrb[138].mxu0 }
 0xef4   : > { %v8948_v60 = vpop.f32.mrb[139].mxu0 }
 0xefb   : > { %v11749_v0 = vpop.f32.mrb[140].mxu0 }
 0xefc   : > { %v8958_v9 = vpop.f32.mrb[141].mxu0 }
 0xf07   : > { %v11752_v19 = vpop.f32.mrb[142].mxu0 }
 0xf08   : > { %v8968_v14 = vpop.f32.mrb[143].mxu0 }
 0xf0c   : > { %v11755_v42 = vpop.f32.mrb[144].mxu0 }
 0xf0d   : > { %v8978_v57 = vpop.f32.mrb[145].mxu0 }
 0xf6c   : > { %v11449_v51 = vpop.f32.mrb[128].mxu1 }
 0xf6d   : > { %v11450_v33 = vpop.f32.mrb[129].mxu1 }
 0xf6e   : > { %v11451_v36 = vadd.f32 %v11450_v33, %v11449_v51  ;;  %v19141_v51 = vld [vmem:[#allocation9_spill] sm:$0xff] }
 0xf70   : > { %v8844_v59 = vadd.f32 %v11451_v36, %v10772_v6 }
 0xf71   : > { %v11452_v45 = vpop.f32.mrb[130].mxu1 }
 0xf72   : > { %v8949_v46 = vadd.f32 %v8948_v60, %v8844_v59  ;;  %v11453_v10 = vpop.f32.mrb[131].mxu1  ;;  %v19140_v60 = vld [vmem:[#allocation8_spill] sm:$0xff] }
 0xf73   : > { %v11454_v7 = vadd.f32 %v11453_v10, %v11452_v45 }
 0xf74   : > { %v8987_v13 = vmax.f32 %v8949_v46, 0.0 }
 0xf75   : > { %v8849_v50 = vadd.f32 %v11454_v7, %v10772_v6 }
 0xf76   : > { %11764 = vmatprep.mubr.msk.f32.mxu0 %vm457_vm3, %v8987_v13 }
 0xf77   : > { %v8954_v38 = vadd.f32 %v11746_v15, %v8849_v50 }
 0xf78   : > { %v11455_v49 = vpop.f32.mrb[132].mxu1 }
 0xf79   : > { %v8988_v11 = vmax.f32 %v8954_v38, 0.0  ;;  %v11456_v56 = vpop.f32.mrb[133].mxu1 }
 0xf7a   : > { %v11457_v48 = vadd.f32 %v11456_v56, %v11455_v49 }
 0xf7b   : > { %11765 = vmatmul.mubr.msk.f32.vlgmr.msra.gmra.mrb[146].mxu0 %vm457_vm3, %v8988_v11 }
 0xf7c   : > { %v8854_v5 = vadd.f32 %v11457_v48, %v10772_v6 }
 0xf7d   : > { %v11458_v20 = vpop.f32.mrb[134].mxu1 }
 0xf7e   : > { %v8959_v4 = vadd.f32 %v8958_v9, %v8854_v5  ;;  %v11459_v41 = vpop.f32.mrb[135].mxu1 }
 0xf7f   : > { %v11460_v58 = vadd.f32 %v11459_v41, %v11458_v20 }
 0xf80   : > { %v8989_v61 = vmax.f32 %v8959_v4, 0.0 }
 0xf81   : > { %v8859_v31 = vadd.f32 %v11460_v58, %v10772_v6 }
 0xf82   : > { %11767 = vmatprep.mubr.msk.f32.mxu0 %vm457_vm3, %v8989_v61 }
 0xf83   : > { %v8964_v30 = vadd.f32 %v11749_v0, %v8859_v31 }
 0xf84   : > { %v11461_v23 = vpop.f32.mrb[136].mxu1 }
 0xf85   : > { %v8990_v8 = vmax.f32 %v8964_v30, 0.0  ;;  %v11462_v39 = vpop.f32.mrb[137].mxu1 }
 0xf86   : > { %v11463_v21 = vadd.f32 %v11462_v39, %v11461_v23 }
 0xf87   : > { %11768 = vmatmul.mubr.msk.f32.gmra.mrb[148].mxu0 %vm457_vm3, %v8990_v8 }
 0xf88   : > { %v8864_v34 = vadd.f32 %v11463_v21, %v10772_v6 }
 0xf89   : > { %v11464_v43 = vpop.f32.mrb[138].mxu1 }
 0xf8a   : > { %v8969_v32 = vadd.f32 %v8968_v14, %v8864_v34  ;;  %v11465_v40 = vpop.f32.mrb[139].mxu1 }
 0xf8b   : > { %v11466_v44 = vadd.f32 %v11465_v40, %v11464_v43 }
 0xf8c   : > { %v8991_v26 = vmax.f32 %v8969_v32, 0.0 }
 0xf8d   : > { %v8869_v29 = vadd.f32 %v11466_v44, %v10772_v6 }
 0xf8e   : > { %11770 = vmatprep.mubr.msk.f32.mxu0 %vm457_vm3, %v8991_v26 }
 0xf8f   : > { %v8974_v62 = vadd.f32 %v11752_v19, %v8869_v29 }
 0xf90   : > { %v11467_v18 = vpop.f32.mrb[140].mxu1 }
 0xf91   : > { %v8992_v37 = vmax.f32 %v8974_v62, 0.0  ;;  %v11468_v35 = vpop.f32.mrb[141].mxu1 }
 0xf92   : > { %v11469_v27 = vadd.f32 %v11468_v35, %v11467_v18 }
 0xf93   : > { %11771 = vmatmul.mubr.msk.f32.gmra.mrb[150].mxu0 %vm457_vm3, %v8992_v37 }
 0xf94   : > { %v8874_v25 = vadd.f32 %v11469_v27, %v10772_v6 }
 0xf95   : > { %v11470_v17 = vpop.f32.mrb[142].mxu1 }
 0xf96   : > { %v8979_v54 = vadd.f32 %v8978_v57, %v8874_v25  ;;  %v11471_v22 = vpop.f32.mrb[143].mxu1 }
 0xf97   : > { %v11472_v28 = vadd.f32 %v11471_v22, %v11470_v17 }
 0xf98   : > { %v8993_v47 = vmax.f32 %v8979_v54, 0.0 }
 0xf99   : > { %v8879_v1 = vadd.f32 %v11472_v28, %v10772_v6 }
 0xf9a   : > { %11773 = vmatprep.mubr.msk.f32.mxu0 %vm457_vm3, %v8993_v47 }
 0xf9b   : > { %v8984_v52 = vadd.f32 %v11755_v42, %v8879_v1 }
 0xf9d   : > { %v8994_v12 = vmax.f32 %v8984_v52, 0.0 }
 0xf9f   : > { %11774 = vmatmul.mubr.msk.f32.gmra.mrb[152].mxu0 %vm457_vm3, %v8994_v12  ;;  %vm9299_vm3 = vcmask 23552  }
0x104e   : > { %v11766_v16 = vpop.f32.mrb[146].mxu0 }
0x104f   : > { %v9100_v63 = vadd.f32 %v11766_v16, %v18386_v24  ;;  %v9094_v53 = vpop.f32.mrb[147].mxu0 }
0x1050   : > { %v9095_v15 = vadd.f32 %v18386_v24, %v9094_v53 }
0x1051   : > { %v9319_v55 = vrot.slane %v9100_v63, %v19140_v60  ;;  %v9312_v9 = vcombine.high %v9100_v63, %v9100_v63 }
0x1052   : > { %v9141_v3 = vrot.slane %v9095_v15, %v19140_v60  ;;  %v9134_v50 = vcombine.high %v9095_v15, %v9095_v15 }
0x1053   : > { %v9327_v2 = vcombine.high %v9319_v55, %v9319_v55  ;;  %v18393_v0 = vrot.slane %v9319_v55, %v19140_v60  ;;  %v9326_v36 = vrot.slane %v9312_v9, %v19140_v60 }
0x1054   : > { %v9149_v19 = vcombine.high %v9141_v3, %v9141_v3  ;;  %v18399_v42 = vrot.slane %v9141_v3, %v19140_v60  ;;  %v9148_v48 = vrot.slane %v9134_v50, %v19140_v60 }
0x1055   : > { %v18396_v14 = vrot.slane %v9327_v2, %v19140_v60  ;;  %v9372_v6 = vrot.slane %v18393_v0, %v19141_v51  ;;  %v18413_v45 = vcombine.high %v18393_v0, %v18393_v0  ;;  %v9328_v13 = vcombine.high %v9326_v36, %v9326_v36 }
0x1056   : > { %v18402_v57 = vrot.slane %v9149_v19, %v19140_v60  ;;  %v9194_v10 = vrot.slane %v18399_v42, %v19141_v51  ;;  %v18426_v49 = vrot.slane %v9326_v36, %v19140_v60  ;;  %v18440_v20 = vcombine.high %v18399_v42, %v18399_v42 }
0x1057   : > { %v9376_v33 = vrot.slane %v18396_v14, %v19141_v51  ;;  %9401 = vrot.lane.b32.xlu0 %v9372_v6, %s13435_s27  ;;  %v18421_v38 = vcombine.high %v18396_v14, %v18396_v14  ;;  %v9380_v11 = vrot.slane %v18413_v45, %v19141_v51  ;;  %v18431_v56 = vrot.slane %v9328_v13, %v19140_v60 }
0x1058   : > { %v9198_v7 = vrot.slane %v18402_v57, %v19141_v51  ;;  %v9388_v4 = vrot.slane %v18426_v49, %v19141_v51  ;;  %v9150_v41 = vcombine.high %v9148_v48, %v9148_v48  ;;  %v18448_v61 = vcombine.high %v18402_v57, %v18402_v57 }
0x1059   : > { %9403 = vrot.lane.b32.xlu1 %v9376_v33, %s13435_s27  ;;  %v9384_v5 = vrot.slane %v18421_v38, %v19141_v51  ;;  %v9392_v58 = vrot.slane %v18431_v56, %v19141_v51  ;;  %v18453_v30 = vrot.slane %v9148_v48, %v19140_v60  ;;  %v9202_v21 = vrot.slane %v18440_v20, %v19141_v51 }
0x105a   : > { %v11769_v59 = vpop.f32.mrb[148].mxu0  ;;  %v18462_v34 = vrot.slane %v9150_v41, %v19140_v60  ;;  %v9206_v32 = vrot.slane %v18448_v61, %v19141_v51  ;;  %v18477_v29 = vcombine.high %v18426_v49, %v18426_v49  ;;  %v18483_v18 = vcombine.high %v18431_v56, %v18431_v56 }
0x105b   : > { %v9104_v46 = vpop.f32.mrb[149].mxu0  ;;  %9223 = vrot.lane.b32.xlu0 %v9194_v10, %s13435_s27  ;;  %v9110_v23 = vadd.f32 %v11769_v59, %v18386_v24  ;;  %v9210_v26 = vrot.slane %v18453_v30, %v19141_v51  ;;  %v18492_v25 = vcombine.high %v18453_v30, %v18453_v30 }
0x105c   : > { %v9105_v44 = vadd.f32 %v18386_v24, %v9104_v46  ;;  %v9214_v62 = vrot.slane %v18462_v34, %v19141_v51  ;;  %v9396_v27 = vrot.slane %v18477_v29, %v19141_v51  ;;  %v9400_v17 = vrot.slane %v18483_v18, %v19141_v51 }
0x105d   : > { %9225 = vrot.lane.b32.xlu1 %v9198_v7, %s13435_s27  ;;  %v9675_v40 = vrot.slane %v9110_v23, %v19140_v60  ;;  %v18498_v54 = vcombine.high %v18462_v34, %v18462_v34  ;;  %v9668_v22 = vcombine.high %v9110_v23, %v9110_v23  ;;  %v9218_v12 = vrot.slane %v18492_v25, %v19141_v51 }
0x105e   : > { %v9497_v35 = vrot.slane %v9105_v44, %v19140_v60  ;;  %v9490_v6 = vcombine.high %v9105_v44, %v9105_v44 }
0x105f   : > { %9405 = vrot.lane.b32.xlu0 %v9380_v11, %s13435_s27  ;;  %v9683_v37 = vcombine.high %v9675_v40, %v9675_v40  ;;  %v18511_v63 = vrot.slane %v9675_v40, %v19140_v60  ;;  %v9222_v15 = vrot.slane %v18498_v54, %v19141_v51  ;;  %v9682_v55 = vrot.slane %v9668_v22, %v19140_v60 }
0x1060   : > { %v9505_v1 = vcombine.high %v9497_v35, %v9497_v35  ;;  %v18527_v9 = vrot.slane %v9497_v35, %v19140_v60  ;;  %v9504_v7 = vrot.slane %v9490_v6, %v19140_v60 }
0x1061   : > { %9407 = vrot.lane.b32.xlu1 %v9384_v5, %s13435_s27  ;;  %v18503_v47 = vrot.slane %v9683_v37, %v19140_v60  ;;  %v9684_v19 = vcombine.high %v9682_v55, %v9682_v55  ;;  %v18541_v59 = vcombine.high %v18511_v63, %v18511_v63  ;;  %v18554_v50 = vrot.slane %v9682_v55, %v19140_v60 }
0x1062   : > { %v18522_v3 = vrot.slane %v9505_v1, %v19140_v60  ;;  %v9550_v46 = vrot.slane %v18527_v9, %v19141_v51  ;;  %v9506_v48 = vcombine.high %v9504_v7, %v9504_v7  ;;  %v18568_v41 = vcombine.high %v18527_v9, %v18527_v9 }
0x1063   : > { %9409 = vrot.lane.b32.xlu0 %v9388_v4, %s13435_s27  ;;  %v9732_v2 = vrot.slane %v18503_v47, %v19141_v51  ;;  %v18537_v36 = vcombine.high %v18503_v47, %v18503_v47  ;;  %v18548_v10 = vrot.slane %v9684_v19, %v19140_v60  ;;  %v9736_v11 = vrot.slane %v18541_v59, %v19141_v51 }
0x1064   : > { %v9554_v33 = vrot.slane %v18522_v3, %v19141_v51  ;;  %v18564_v4 = vcombine.high %v18522_v3, %v18522_v3 }
0x1065   : > { %9411 = vrot.lane.b32.xlu1 %v9392_v58, %s13435_s27  ;;  %v9740_v13 = vrot.slane %v18537_v36, %v19141_v51  ;;  %v9748_v5 = vrot.slane %v18548_v10, %v19141_v51  ;;  %v9744_v58 = vrot.slane %v18554_v50, %v19141_v51  ;;  %v18592_v44 = vcombine.high %v18548_v10, %v18548_v10 }
0x1066   : > { %v11772_v31 = vpop.f32.mrb[150].mxu0  ;;  %v9562_v23 = vrot.slane %v18564_v4, %v19141_v51 }
0x1067   : > { %v18457_v8 = vadd.f32 %v11772_v31, %v18386_v24  ;;  %v9114_v39 = vpop.f32.mrb[151].mxu0  ;;  %9227 = vrot.lane.b32.xlu0 %v9202_v21, %s13435_s27  ;;  %v18575_v31 = vrot.slane %v9506_v48, %v19140_v60  ;;  %v9558_v21 = vrot.slane %v18568_v41, %v19141_v51 }
0x1068   : > { %v18465_v43 = vadd.f32 %v18386_v24, %v9114_v39  ;;  %v18580_v39 = vrot.slane %v9504_v7, %v19140_v60 }
0x1069   : > { %9229 = vrot.lane.b32.xlu1 %v9206_v32, %s13435_s27  ;;  %v10031_v32 = vrot.slane %v18457_v8, %v19140_v60  ;;  %v9570_v40 = vrot.slane %v18575_v31, %v19141_v51  ;;  %v10024_v1 = vcombine.high %v18457_v8, %v18457_v8 }
0x106a   : > { %v9853_v35 = vrot.slane %v18465_v43, %v19140_v60  ;;  %v9846_v7 = vcombine.high %v18465_v43, %v18465_v43 }
0x106b   : > { %9231 = vrot.lane.b32.xlu0 %v9210_v26, %s13435_s27  ;;  %v9566_v26 = vrot.slane %v18580_v39, %v19141_v51  ;;  %v10039_v37 = vcombine.high %v10031_v32, %v10031_v32  ;;  %v18626_v55 = vrot.slane %v10031_v32, %v19140_v60 }
0x106c   : > { %v18639_v6 = vrot.slane %v9853_v35, %v19140_v60 }
0x106d   : > { %9233 = vrot.lane.b32.xlu1 %v9214_v62, %s13435_s27  ;;  %v18598_v62 = vcombine.high %v18554_v50, %v18554_v50  ;;  %v18655_v48 = vcombine.high %v18626_v55, %v18626_v55 }
0x106f   : > { %9413 = vrot.lane.b32.xlu0 %v9396_v27, %s13435_s27  ;;  %v9756_v27 = vrot.slane %v18592_v44, %v19141_v51  ;;  %v9752_v22 = vrot.slane %v18598_v62, %v19141_v51  ;;  %v10092_v32 = vrot.slane %v18655_v48, %v19141_v51 }
0x1071   : > { %9415 = vrot.lane.b32.xlu1 %v9400_v17, %s13435_s27  ;;  %v18608_v17 = vcombine.high %v18575_v31, %v18575_v31 }
0x1072   : > { %v11775_v28 = vpop.f32.mrb[152].mxu0 }
0x1073   : > { %v18506_v52 = vadd.f32 %v11775_v28, %v18386_v24  ;;  %v9124_v16 = vpop.f32.mrb[153].mxu0  ;;  %9235 = vrot.lane.b32.xlu0 %v9218_v12, %s13435_s27  ;;  %v18614_v28 = vcombine.high %v18580_v39, %v18580_v39  ;;  %v18621_v12 = vrot.slane %v10039_v37, %v19140_v60 }
0x1074   : > { %v18514_v53 = vadd.f32 %v18386_v24, %v9124_v16  ;;  %v9728_v24 = vrot.slane %v18511_v63, %v19141_v51  ;;  %v9861_v16 = vcombine.high %v9853_v35, %v9853_v35  ;;  %v18682_v35 = vcombine.high %v18639_v6, %v18639_v6 }
0x1075   : > { %9237 = vrot.lane.b32.xlu1 %v9222_v15, %s13435_s27  ;;  %v9578_v15 = vrot.slane %v18608_v17, %v19141_v51  ;;  %v10088_v19 = vrot.slane %v18621_v12, %v19141_v51 }
0x1076   : > { %v18634_v8 = vrot.slane %v9861_v16, %v19140_v60 }
0x1077   : > { %9759 = vrot.lane.b32.xlu0 %v9732_v2, %s13435_s27  ;;  %v9574_v2 = vrot.slane %v18614_v28, %v19141_v51 }
0x1078   : > { %v18678_v37 = vcombine.high %v18634_v8, %v18634_v8 }
0x1079   : > { %9757 = vrot.lane.b32.xlu1 %v9728_v24, %s13435_s27  ;;  %v10038_v24 = vrot.slane %v10024_v1, %v19140_v60 }
0x107a   : > { %v9918_v1 = vrot.slane %v18678_v37, %v19141_v51 }
0x107b   : > { %9581 = vrot.lane.b32.xlu0 %v9554_v33, %s13435_s27  ;;  %v10084_v33 = vrot.slane %v18626_v55, %v19141_v51 }
0x107d   : > { %9579 = vrot.lane.b32.xlu1 %v9550_v46, %s13435_s27  ;;  %v10040_v46 = vcombine.high %v10038_v24, %v10038_v24 }
0x107f   : > { %9763 = vrot.lane.b32.xlu0 %v9740_v13, %s13435_s27  ;;  %v9910_v13 = vrot.slane %v18634_v8, %v19141_v51  ;;  %v18662_v43 = vrot.slane %v10040_v46, %v19140_v60 }
0x1081   : > { %9761 = vrot.lane.b32.xlu1 %v9736_v11, %s13435_s27  ;;  %v18651_v11 = vcombine.high %v18621_v12, %v18621_v12 }
0x1083   : > { %9767 = vrot.lane.b32.xlu0 %v9748_v5, %s13435_s27  ;;  %v9906_v5 = vrot.slane %v18639_v6, %v19141_v51 }
0x1085   : > { %9765 = vrot.lane.b32.xlu1 %v9744_v58, %s13435_s27  ;;  %v9860_v58 = vrot.slane %v9846_v7, %v19140_v60 }
0x1087   : > { %9585 = vrot.lane.b32.xlu0 %v9562_v23, %s13435_s27  ;;  %v10096_v23 = vrot.slane %v18651_v11, %v19141_v51  ;;  %v18694_v16 = vrot.slane %v9860_v58, %v19140_v60 }
0x1089   : > { %9583 = vrot.lane.b32.xlu1 %v9558_v21, %s13435_s27  ;;  %v18668_v21 = vrot.slane %v10038_v24, %v19140_v60 }
0x108b   : > { %9589 = vrot.lane.b32.xlu0 %v9570_v40, %s13435_s27  ;;  %v9862_v40 = vcombine.high %v9860_v58, %v9860_v58  ;;  %v18712_v46 = vcombine.high %v18668_v21, %v18668_v21 }
0x108d   : > { %9587 = vrot.lane.b32.xlu1 %v9566_v26, %s13435_s27  ;;  %v10104_v26 = vrot.slane %v18662_v43, %v19141_v51 }
0x108f   : > { %9771 = vrot.lane.b32.xlu0 %v9756_v27, %s13435_s27  ;;  %v10100_v27 = vrot.slane %v18668_v21, %v19141_v51 }
0x1091   : > { %9769 = vrot.lane.b32.xlu1 %v9752_v22, %s13435_s27  ;;  %v18689_v22 = vrot.slane %v9862_v40, %v19140_v60  ;;  %v10380_v40 = vcombine.high %v18506_v52, %v18506_v52 }
0x1093   : > { %9593 = vrot.lane.b32.xlu0 %v9578_v15, %s13435_s27  ;;  %v9914_v15 = vrot.slane %v18682_v35, %v19141_v51  ;;  %v9926_v24 = vrot.slane %v18689_v22, %v19141_v51  ;;  %v18722_v58 = vcombine.high %v18689_v22, %v18689_v22 }
0x1095   : > { %9591 = vrot.lane.b32.xlu1 %v9574_v2, %s13435_s27  ;;  %v10387_v2 = vrot.slane %v18506_v52, %v19140_v60 }
0x1097   : > { %10115 = vrot.lane.b32.xlu0 %v10088_v19, %s13435_s27  ;;  %v18706_v19 = vcombine.high %v18662_v43, %v18662_v43  ;;  %v10395_v7 = vcombine.high %v10387_v2, %v10387_v2 }
0x1099   : > { %10113 = vrot.lane.b32.xlu1 %v10084_v33, %s13435_s27  ;;  %v9922_v33 = vrot.slane %v18694_v16, %v19141_v51 }
0x109b   : > { %9937 = vrot.lane.b32.xlu0 %v9910_v13, %s13435_s27  ;;  %v10209_v13 = vrot.slane %v18514_v53, %v19140_v60 }
0x109d   : > { %9935 = vrot.lane.b32.xlu1 %v9906_v5, %s13435_s27  ;;  %v10112_v5 = vrot.slane %v18706_v19, %v19141_v51 }
0x109f   : > { %10119 = vrot.lane.b32.xlu0 %v10096_v23, %s13435_s27  ;;  %v10108_v23 = vrot.slane %v18712_v46, %v19141_v51 }
0x10a1   : > { %10117 = vrot.lane.b32.xlu1 %v10092_v32, %s13435_s27  ;;  %v18728_v32 = vcombine.high %v18694_v16, %v18694_v16 }
0x10a3   : > { %10123 = vrot.lane.b32.xlu0 %v10104_v26, %s13435_s27  ;;  %v18735_v26 = vrot.slane %v10395_v7, %v19140_v60 }
0x10a5   : > { %10121 = vrot.lane.b32.xlu1 %v10100_v27, %s13435_s27  ;;  %19142 = vst [vmem:[#allocation11_spill] sm:$0xff] %v18735_v26  ;;  %v10217_v27 = vcombine.high %v10209_v13, %v10209_v13  ;;  %v10444_v7 = vrot.slane %v18735_v26, %v19141_v51 }
0x10a7   : > { %9941 = vrot.lane.b32.xlu0 %v9918_v1, %s13435_s27  ;;  %v9934_v1 = vrot.slane %v18722_v58, %v19141_v51  ;;  %v18748_v52 = vrot.slane %v10217_v27, %v19140_v60 }
0x10a9   : > { %9939 = vrot.lane.b32.xlu1 %v9914_v15, %s13435_s27  ;;  %v18740_v15 = vrot.slane %v10387_v2, %v19140_v60  ;;  %19144 = vst [vmem:[#allocation9_spill] sm:$0xff] %v18748_v52  ;;  %v10266_v27 = vrot.slane %v18748_v52, %v19141_v51 }
0x10ab   : > { %9945 = vrot.lane.b32.xlu0 %v9926_v24, %s13435_s27  ;;  %19143 = vst [vmem:[#allocation8_spill] sm:$0xff] %v18740_v15  ;;  %v9930_v24 = vrot.slane %v18728_v32, %v19141_v51  ;;  %v10440_v2 = vrot.slane %v18740_v15, %v19141_v51 }
0x10ad   : > { %9943 = vrot.lane.b32.xlu1 %v9922_v33, %s13435_s27  ;;  %v10394_v33 = vrot.slane %v10380_v40, %v19140_v60  ;;  %v10202_v40 = vcombine.high %v18514_v53, %v18514_v53 }
0x10af   : > { %10127 = vrot.lane.b32.xlu0 %v10112_v5, %s13435_s27  ;;  %v18753_v5 = vrot.slane %v10209_v13, %v19140_v60  ;;  %v18769_v13 = vcombine.high %v18740_v15, %v18740_v15 }
0x10b1   : > { %10125 = vrot.lane.b32.xlu1 %v10108_v23, %s13435_s27  ;;  %19145 = vst [vmem:[#allocation12_spill] sm:$0xff] %v18753_v5  ;;  %v10396_v23 = vcombine.high %v10394_v33, %v10394_v33  ;;  %19147 = vst [vmem:[#allocation14_spill] sm:$0xff] %v18769_v13  ;;  %v10448_v15 = vrot.slane %v18769_v13, %v19141_v51 }
0x10b3   : > { %9949 = vrot.lane.b32.xlu0 %v9934_v1, %s13435_s27  ;;  %v18765_v1 = vcombine.high %v18735_v26, %v18735_v26  ;;  %v18776_v53 = vrot.slane %v10396_v23, %v19140_v60  ;;  %v18782_v26 = vrot.slane %v10394_v33, %v19140_v60 }
0x10b5   : > { %9947 = vrot.lane.b32.xlu1 %v9930_v24, %s13435_s27  ;;  %19146 = vst [vmem:[#allocation13_spill] sm:$0xff] %v18765_v1  ;;  %v10262_v24 = vrot.slane %v18753_v5, %v19141_v51  ;;  %19148 = vst [vmem:[#allocation15_spill] sm:$0xff] %v18776_v53  ;;  %v10460_v23 = vrot.slane %v18776_v53, %v19141_v51  ;;  %v10456_v33 = vrot.slane %v18782_v26, %v19141_v51 }
0x10b6   : > { %19149 = vst [vmem:[#allocation16_spill] sm:$0xff] %v18782_v26 }
0x10b7   : > { %10471 = vrot.lane.b32.xlu0 %v10444_v7, %s13435_s27  ;;  %v10216_v7 = vrot.slane %v10202_v40, %v19140_v60  ;;  %v18792_v40 = vcombine.high %v18748_v52, %v18748_v52 }
0x10b9   : > { %10469 = vrot.lane.b32.xlu1 %v10440_v2, %s13435_s27  ;;  %v10452_v2 = vrot.slane %v18765_v1, %v19141_v51  ;;  %19150 = vst [vmem:[#allocation17_spill] sm:$0xff] %v18792_v40  ;;  %v18808_v52 = vrot.slane %v10216_v7, %v19140_v60 }
0x10bb   : > { %10293 = vrot.lane.b32.xlu0 %v10266_v27, %s13435_s27  ;;  %v10218_v27 = vcombine.high %v10216_v7, %v10216_v7  ;;  %19153 = vst [vmem:[#allocation20_spill] sm:$0xff] %v18808_v52  ;;  %v18824_v7 = vcombine.high %v18808_v52, %v18808_v52 }
0x10bd   : > { %10291 = vrot.lane.b32.xlu1 %v10262_v24, %s13435_s27  ;;  %v18796_v24 = vcombine.high %v18753_v5, %v18753_v5  ;;  %19155 = vst [vmem:[#allocation22_spill] sm:$0xff] %v18824_v7 }
0x10bf   : > { %10475 = vrot.lane.b32.xlu0 %v10452_v2, %s13435_s27  ;;  %19151 = vst [vmem:[#allocation18_spill] sm:$0xff] %v18796_v24  ;;  %v10274_v2 = vrot.slane %v18792_v40, %v19141_v51  ;;  %v10270_v5 = vrot.slane %v18796_v24, %v19141_v51  ;;  %v10286_v40 = vrot.slane %v18824_v7, %v19141_v51 }
0x10c1   : > { %10473 = vrot.lane.b32.xlu1 %v10448_v15, %s13435_s27  ;;  %v18803_v15 = vrot.slane %v10218_v27, %v19140_v60  ;;  %v10278_v60 = vrot.slane %v18808_v52, %v19141_v51  ;;  %v18838_v52 = vcombine.high %v18782_v26, %v18782_v26 }
0x10c3   : > { %10479 = vrot.lane.b32.xlu0 %v10460_v23, %s13435_s27  ;;  %19152 = vst [vmem:[#allocation19_spill] sm:$0xff] %v18803_v15  ;;  %v18818_v27 = vcombine.high %v18803_v15, %v18803_v15  ;;  %v10464_v26 = vrot.slane %v18838_v52, %v19141_v51 }
0x10c5   : > { %10477 = vrot.lane.b32.xlu1 %v10456_v33, %s13435_s27  ;;  %v10282_v33 = vrot.slane %v18803_v15, %v19141_v51  ;;  %19154 = vst [vmem:[#allocation21_spill] sm:$0xff] %v18818_v27  ;;  %v10290_v24 = vrot.slane %v18818_v27, %v19141_v51  ;;  %v18832_v15 = vcombine.high %v18776_v53, %v18776_v53 }
0x10c7   : > { %10297 = vrot.lane.b32.xlu0 %v10274_v2, %s13435_s27  ;;  %v10468_v27 = vrot.slane %v18832_v15, %v19141_v51 }
0x10c9   : > { %10295 = vrot.lane.b32.xlu1 %v10270_v5, %s13435_s27  ;;  %v9402_v13 = vpop.permute.xlu0 %9401 }
0x10cb   : > { %v9404_v23 = vpop.permute.xlu1 %9403  ;;  %10301 = vrot.lane.b32.xlu0 %v10282_v33, %s13435_s27 }
0x10cc   : > { %v9426_v33 = vsel %vm6861_vm8, %v18396_v14, %v9404_v23 }
0x10cd   : > { %10299 = vrot.lane.b32.xlu1 %v10278_v60, %s13435_s27  ;;  %v9224_v5 = vpop.permute.xlu0 %9223  ;;  %v9425_v60 = vsel %vm6861_vm8, %v18393_v0, %v9402_v13  ;;  %v19156_v13 = vld [vmem:[#allocation10_spill] sm:$0xff] }
0x10ce   : > { %v9441_v7 = vcombine.low %v9425_v60, %v9426_v33 }
0x10cf   : > { %v9226_v2 = vpop.permute.xlu1 %9225  ;;  %10305 = vrot.lane.b32.xlu0 %v10290_v24, %s13435_s27 }
0x10d0   : > { %v9449_v23 = vrot.slane %v9441_v7, %v19156_v13  ;;  %v9248_v51 = vsel %vm6861_vm8, %v18402_v57, %v9226_v2 }
0x10d1   : > { %10303 = vrot.lane.b32.xlu1 %v10286_v40, %s13435_s27  ;;  %v9406_v53 = vpop.permute.xlu0 %9405 }
0x10d2   : > { %v9427_v14 = vsel %vm6861_vm8, %v18413_v45, %v9406_v53 }
0x10d3   : > { %v9408_v1 = vpop.permute.xlu1 %9407  ;;  %10483 = vrot.lane.b32.xlu0 %v10468_v27, %s13435_s27 }
0x10d4   : > { %v9428_v24 = vsel %vm6861_vm8, %v18421_v38, %v9408_v1  ;;  %v9247_v38 = vsel %vm6861_vm8, %v18399_v42, %v9224_v5 }
0x10d5   : > { %v9442_v40 = vcombine.low %v9427_v14, %v9428_v24  ;;  %10481 = vrot.lane.b32.xlu1 %v10464_v26, %s13435_s27  ;;  %v9410_v0 = vpop.permute.xlu0 %9409  ;;  %v9263_v1 = vcombine.low %v9247_v38, %v9248_v51 }
0x10d7   : > { %v9456_v33 = vrot.slane %v9442_v40, %v19156_v13  ;;  %v9412_v60 = vpop.permute.xlu1 %9411  ;;  %v9271_v14 = vrot.slane %v9263_v1, %v19156_v13 }
0x10d8   : > { %v9430_v24 = vsel %vm6861_vm8, %v18431_v56, %v9412_v60 }
0x10d9   : > { %v9457_v45 = vcombine.low %v9449_v23, %v9456_v33  ;;  %v9228_v26 = vpop.permute.xlu0 %9227  ;;  %v9429_v23 = vsel %vm6861_vm8, %v18426_v49, %v9410_v0 }
0x10da   : > { %v9249_v57 = vsel %vm6861_vm8, %v18440_v20, %v9228_v26  ;;  %v9458_v51 = vcombine.low %v9429_v23, %v9430_v24 }
0x10db   : > { %10792 = vst.msk [vmem:[%s18865_s14 + $0x20] sm:$0xff] %vm9299_vm3, %v9457_v45  ;;  %v9230_v53 = vpop.permute.xlu1 %9229  ;;  %9480 = vrot.lane.b32.xlu0 %v9457_v45, %s13436_s25 }
0x10dc   : > { %v9250_v27 = vsel %vm6861_vm8, %v18448_v61, %v9230_v53  ;;  %v9466_v38 = vrot.slane %v9458_v51, %v19156_v13 }
0x10dd   : > { %v9264_v7 = vcombine.low %v9249_v57, %v9250_v27  ;;  %v9232_v2 = vpop.permute.xlu0 %9231 }
0x10de   : > { %v9251_v49 = vsel %vm6861_vm8, %v18453_v30, %v9232_v2 }
0x10df   : > { %v9278_v42 = vrot.slane %v9264_v7, %v19156_v13  ;;  %v9234_v5 = vpop.permute.xlu1 %9233 }
0x10e0   : > { %v9252_v61 = vsel %vm6861_vm8, %v18462_v34, %v9234_v5 }
0x10e1   : > { %v9279_v40 = vcombine.low %v9271_v14, %v9278_v42  ;;  %v9414_v33 = vpop.permute.xlu0 %9413  ;;  %v9280_v26 = vcombine.low %v9251_v49, %v9252_v61 }
0x10e2   : > { %v9431_v45 = vsel %vm6861_vm8, %v18477_v29, %v9414_v33 }
0x10e3   : > { %9300 = vst.msk [vmem:[%s18865_s14] sm:$0xff] %vm9299_vm3, %v9279_v40  ;;  %v9416_v20 = vpop.permute.xlu1 %9415  ;;  %9302 = vrot.lane.b32.xlu0 %v9279_v40, %s13436_s25  ;;  %v9288_v7 = vrot.slane %v9280_v26, %v19156_v13 }
0x10e4   : > { %v9432_v56 = vsel %vm6861_vm8, %v18483_v18, %v9416_v20 }
0x10e5   : > { %v9459_v60 = vcombine.low %v9431_v45, %v9432_v56  ;;  %v9236_v0 = vpop.permute.xlu0 %9235 }
0x10e6   : > { %v9253_v34 = vsel %vm6861_vm8, %v18492_v25, %v9236_v0 }
0x10e7   : > { %v9473_v1 = vrot.slane %v9459_v60, %v19156_v13  ;;  %v9238_v53 = vpop.permute.xlu1 %9237 }
0x10e8   : > { %v9254_v29 = vsel %vm6861_vm8, %v18498_v54, %v9238_v53 }
0x10e9   : > { %v9474_v57 = vcombine.low %v9466_v38, %v9473_v1  ;;  %v9281_v18 = vcombine.low %v9253_v34, %v9254_v29  ;;  %v9760_v27 = vpop.permute.xlu0 %9759 }
0x10ea   : > { %v9782_v5 = vsel %vm6861_vm8, %v18503_v47, %v9760_v27 }
0x10eb   : > { %10793 = vst.msk [vmem:[%s18865_s14 + $0x28] sm:$0xff] %vm9299_vm3, %v9474_v57  ;;  %v9295_v30 = vrot.slane %v9281_v18, %v19156_v13  ;;  %v9758_v2 = vpop.permute.xlu1 %9757  ;;  %9482 = vrot.lane.b32.xlu1 %v9474_v57, %s13436_s25 }
0x10ec   : > { %v9781_v54 = vsel %vm6861_vm8, %v18511_v63, %v9758_v2 }
0x10ed   : > { %v9296_v14 = vcombine.low %v9288_v7, %v9295_v30  ;;  %v9582_v42 = vpop.permute.xlu0 %9581  ;;  %v9797_v40 = vcombine.low %v9781_v54, %v9782_v5 }
0x10ee   : > { %v9604_v49 = vsel %vm6861_vm8, %v18522_v3, %v9582_v42 }
0x10ef   : > { %9301 = vst.msk [vmem:[%s18865_s14 + $0x8] sm:$0xff] %vm9299_vm3, %v9296_v14  ;;  %v9580_v25 = vpop.permute.xlu1 %9579  ;;  %9304 = vrot.lane.b32.xlu1 %v9296_v14, %s13436_s25  ;;  %v9805_v45 = vrot.slane %v9797_v40, %v19156_v13 }
0x10f0   : > { %v9603_v47 = vsel %vm6861_vm8, %v18527_v9, %v9580_v25 }
0x10f1   : > { %v9764_v24 = vpop.permute.xlu0 %9763  ;;  %v9619_v38 = vcombine.low %v9603_v47, %v9604_v49 }
0x10f2   : > { %v9784_v33 = vsel %vm6861_vm8, %v18537_v36, %v9764_v24 }
0x10f3   : > { %v9762_v23 = vpop.permute.xlu1 %9761  ;;  %v9627_v53 = vrot.slane %v9619_v38, %v19156_v13 }
0x10f4   : > { %v9783_v51 = vsel %vm6861_vm8, %v18541_v59, %v9762_v23 }
0x10f5   : > { %v9798_v20 = vcombine.low %v9783_v51, %v9784_v33  ;;  %v9768_v61 = vpop.permute.xlu0 %9767 }
0x10f6   : > { %v9786_v18 = vsel %vm6861_vm8, %v18548_v10, %v9768_v61 }
0x10f7   : > { %v9812_v56 = vrot.slane %v9798_v20, %v19156_v13  ;;  %v9766_v63 = vpop.permute.xlu1 %9765 }
0x10f8   : > { %v9785_v29 = vsel %vm6861_vm8, %v18554_v50, %v9766_v63 }
0x10f9   : > { %v9813_v60 = vcombine.low %v9805_v45, %v9812_v56  ;;  %v9586_v0 = vpop.permute.xlu0 %9585  ;;  %v9814_v7 = vcombine.low %v9785_v29, %v9786_v18 }
0x10fa   : > { %v9606_v59 = vsel %vm6861_vm8, %v18564_v4, %v9586_v0 }
0x10fb   : > { %10800 = vst.msk [vmem:[%s18865_s14 + $0x60] sm:$0xff] %vm9299_vm3, %v9813_v60  ;;  %v9584_v36 = vpop.permute.xlu1 %9583  ;;  %9836 = vrot.lane.b32.xlu0 %v9813_v60, %s13436_s25  ;;  %v9822_v42 = vrot.slane %v9814_v7, %v19156_v13 }
0x10fc   : > { %v9605_v26 = vsel %vm6861_vm8, %v18568_v41, %v9584_v36 }
0x10fd   : > { %v9620_v1 = vcombine.low %v9605_v26, %v9606_v59  ;;  %v9590_v9 = vpop.permute.xlu0 %9589 }
0x10fe   : > { %v9608_v10 = vsel %vm6861_vm8, %v18575_v31, %v9590_v9 }
0x10ff   : > { %v9634_v3 = vrot.slane %v9620_v1, %v19156_v13  ;;  %v9588_v34 = vpop.permute.xlu1 %9587 }
0x1100   : > { %v9607_v41 = vsel %vm6861_vm8, %v18580_v39, %v9588_v34 }
0x1101   : > { %v9635_v57 = vcombine.low %v9627_v53, %v9634_v3  ;;  %v9772_v27 = vpop.permute.xlu0 %9771  ;;  %v9636_v25 = vcombine.low %v9607_v41, %v9608_v10 }
0x1102   : > { %v9788_v30 = vsel %vm6861_vm8, %v18592_v44, %v9772_v27 }
0x1103   : > { %10796 = vst.msk [vmem:[%s18865_s14 + $0x40] sm:$0xff] %vm9299_vm3, %v9635_v57  ;;  %v9770_v4 = vpop.permute.xlu1 %9769  ;;  %9658 = vrot.lane.b32.xlu0 %v9635_v57, %s13436_s25  ;;  %v9644_v23 = vrot.slane %v9636_v25, %v19156_v13 }
0x1104   : > { %v9787_v50 = vsel %vm6861_vm8, %v18598_v62, %v9770_v4 }
0x1105   : > { %v9815_v2 = vcombine.low %v9787_v50, %v9788_v30  ;;  %v9594_v14 = vpop.permute.xlu0 %9593 }
0x1106   : > { %v9610_v39 = vsel %vm6861_vm8, %v18608_v17, %v9594_v14 }
0x1107   : > { %v9829_v54 = vrot.slane %v9815_v2, %v19156_v13  ;;  %v9592_v5 = vpop.permute.xlu1 %9591 }
0x1108   : > { %v9609_v44 = vsel %vm6861_vm8, %v18614_v28, %v9592_v5 }
0x1109   : > { %v9830_v24 = vcombine.low %v9822_v42, %v9829_v54  ;;  %v9637_v62 = vcombine.low %v9609_v44, %v9610_v39  ;;  %v10116_v40 = vpop.permute.xlu0 %10115 }
0x110a   : > { %v10138_v61 = vsel %vm6861_vm8, %v18621_v12, %v10116_v40  ;;  %v19158_v40 = vld [vmem:[#allocation11_spill] sm:$0xff] }
0x110b   : > { %10801 = vst.msk [vmem:[%s18865_s14 + $0x68] sm:$0xff] %vm9299_vm3, %v9830_v24  ;;  %v9651_v31 = vrot.slane %v9637_v62, %v19156_v13  ;;  %v10114_v33 = vpop.permute.xlu1 %10113  ;;  %9838 = vrot.lane.b32.xlu1 %v9830_v24, %s13436_s25 }
0x110c   : > { %v10137_v28 = vsel %vm6861_vm8, %v18626_v55, %v10114_v33 }
0x110d   : > { %v9652_v51 = vcombine.low %v9644_v23, %v9651_v31  ;;  %v9938_v20 = vpop.permute.xlu0 %9937  ;;  %v10153_v56 = vcombine.low %v10137_v28, %v10138_v61  ;;  %v19160_v28 = vld [vmem:[#allocation14_spill] sm:$0xff] }
0x110e   : > { %v9960_v26 = vsel %vm6861_vm8, %v18634_v8, %v9938_v20  ;;  %v19159_v20 = vld [vmem:[#allocation13_spill] sm:$0xff] }
0x110f   : > { %10797 = vst.msk [vmem:[%s18865_s14 + $0x48] sm:$0xff] %vm9299_vm3, %v9652_v51  ;;  %v9936_v17 = vpop.permute.xlu1 %9935  ;;  %9660 = vrot.lane.b32.xlu1 %v9652_v51, %s13436_s25  ;;  %v10161_v38 = vrot.slane %v10153_v56, %v19156_v13 }
0x1110   : > { %v9959_v12 = vsel %vm6861_vm8, %v18639_v6, %v9936_v17 }
0x1111   : > { %v10120_v45 = vpop.permute.xlu0 %10119  ;;  %v9975_v9 = vcombine.low %v9959_v12, %v9960_v26 }
0x1112   : > { %v10140_v47 = vsel %vm6861_vm8, %v18651_v11, %v10120_v45 }
0x1113   : > { %v10118_v63 = vpop.permute.xlu1 %10117  ;;  %v9983_v34 = vrot.slane %v9975_v9, %v19156_v13 }
0x1114   : > { %v10139_v60 = vsel %vm6861_vm8, %v18655_v48, %v10118_v63 }
0x1115   : > { %v10154_v49 = vcombine.low %v10139_v60, %v10140_v47  ;;  %v10124_v0 = vpop.permute.xlu0 %10123 }
0x1116   : > { %v10142_v27 = vsel %vm6861_vm8, %v18662_v43, %v10124_v0 }
0x1117   : > { %v10168_v36 = vrot.slane %v10154_v49, %v19156_v13  ;;  %v10122_v55 = vpop.permute.xlu1 %10121  ;;  %v19161_v49 = vld [vmem:[#allocation12_spill] sm:$0xff] }
0x1118   : > { %v10141_v57 = vsel %vm6861_vm8, %v18668_v21, %v10122_v55 }
0x1119   : > { %v10169_v59 = vcombine.low %v10161_v38, %v10168_v36  ;;  %v9942_v1 = vpop.permute.xlu0 %9941  ;;  %v10170_v4 = vcombine.low %v10141_v57, %v10142_v27  ;;  %v19162_v36 = vld [vmem:[#allocation9_spill] sm:$0xff]  ;;  %v19166_v27 = vld [vmem:[#allocation19_spill] sm:$0xff] }
0x111a   : > { %v9962_v48 = vsel %vm6861_vm8, %v18678_v37, %v9942_v1  ;;  %v19163_v1 = vld [vmem:[#allocation17_spill] sm:$0xff] }
0x111b   : > { %10808 = vst.msk [vmem:[%s18865_s14 + $0xa0] sm:$0xff] %vm9299_vm3, %v10169_v59  ;;  %v9940_v11 = vpop.permute.xlu1 %9939  ;;  %10192 = vrot.lane.b32.xlu0 %v10169_v59, %s13436_s25  ;;  %v10178_v2 = vrot.slane %v10170_v4, %v19156_v13 }
0x111c   : > { %v9961_v53 = vsel %vm6861_vm8, %v18682_v35, %v9940_v11  ;;  %v19164_v11 = vld [vmem:[#allocation18_spill] sm:$0xff] }
0x111d   : > { %v9976_v3 = vcombine.low %v9961_v53, %v9962_v48  ;;  %v9946_v6 = vpop.permute.xlu0 %9945 }
0x111e   : > { %v9964_v43 = vsel %vm6861_vm8, %v18689_v22, %v9946_v6 }
0x111f   : > { %v9990_v8 = vrot.slane %v9976_v3, %v19156_v13  ;;  %v9944_v29 = vpop.permute.xlu1 %9943 }
0x1120   : > { %v9963_v35 = vsel %vm6861_vm8, %v18694_v16, %v9944_v29  ;;  %v19165_v29 = vld [vmem:[#allocation20_spill] sm:$0xff] }
0x1121   : > { %v9991_v18 = vcombine.low %v9983_v34, %v9990_v8  ;;  %v10128_v7 = vpop.permute.xlu0 %10127  ;;  %v9992_v10 = vcombine.low %v9963_v35, %v9964_v43 }
0x1122   : > { %v10144_v41 = vsel %vm6861_vm8, %v18706_v19, %v10128_v7 }
0x1123   : > { %10804 = vst.msk [vmem:[%s18865_s14 + $0x80] sm:$0xff] %vm9299_vm3, %v9991_v18  ;;  %v10126_v37 = vpop.permute.xlu1 %10125  ;;  %10014 = vrot.lane.b32.xlu0 %v9991_v18, %s13436_s25  ;;  %v10000_v5 = vrot.slane %v9992_v10, %v19156_v13 }
0x1124   : > { %v10143_v21 = vsel %vm6861_vm8, %v18712_v46, %v10126_v37 }
0x1125   : > { %v10171_v30 = vcombine.low %v10143_v21, %v10144_v41  ;;  %v9950_v50 = vpop.permute.xlu0 %9949  ;;  %v19167_v41 = vld [vmem:[#allocation16_spill] sm:$0xff] }
0x1126   : > { %v9966_v16 = vsel %vm6861_vm8, %v18722_v58, %v9950_v50  ;;  %v19169_v50 = vld [vmem:[#allocation22_spill] sm:$0xff] }
0x1127   : > { %v10185_v14 = vrot.slane %v10171_v30, %v19156_v13  ;;  %v9948_v42 = vpop.permute.xlu1 %9947  ;;  %v19168_v30 = vld [vmem:[#allocation21_spill] sm:$0xff] }
0x1128   : > { %v9965_v19 = vsel %vm6861_vm8, %v18728_v32, %v9948_v42  ;;  %v19157_v32 = vld [vmem:[#allocation8_spill] sm:$0xff] }
0x1129   : > { %v10186_v25 = vcombine.low %v10178_v2, %v10185_v14  ;;  %v9993_v46 = vcombine.low %v9965_v19, %v9966_v16  ;;  %v10472_v54 = vpop.permute.xlu0 %10471  ;;  %v19170_v14 = vld [vmem:[#allocation15_spill] sm:$0xff] }
0x112a   : > { %v10494_v23 = vsel %vm6861_vm8, %v19158_v40, %v10472_v54 }
0x112b   : > { %10809 = vst.msk [vmem:[%s18865_s14 + $0xa8] sm:$0xff] %vm9299_vm3, %v10186_v25  ;;  %v10007_v22 = vrot.slane %v9993_v46, %v19156_v13  ;;  %v10470_v39 = vpop.permute.xlu1 %10469  ;;  %10194 = vrot.lane.b32.xlu1 %v10186_v25, %s13436_s25 }
0x112c   : > { %v10493_v62 = vsel %vm6861_vm8, %v19157_v32, %v10470_v39 }
0x112d   : > { %v10008_v44 = vcombine.low %v10000_v5, %v10007_v22  ;;  %v10294_v24 = vpop.permute.xlu0 %10293  ;;  %v10509_v33 = vcombine.low %v10493_v62, %v10494_v23 }
0x112e   : > { %v10316_v55 = vsel %vm6861_vm8, %v19162_v36, %v10294_v24 }
0x112f   : > { %10805 = vst.msk [vmem:[%s18865_s14 + $0x88] sm:$0xff] %vm9299_vm3, %v10008_v44  ;;  %v10292_v58 = vpop.permute.xlu1 %10291  ;;  %10016 = vrot.lane.b32.xlu1 %v10008_v44, %s13436_s25  ;;  %v10517_v63 = vrot.slane %v10509_v33, %v19156_v13 }
0x1130   : > { %v10315_v0 = vsel %vm6861_vm8, %v19161_v49, %v10292_v58 }
0x1131   : > { %v10476_v31 = vpop.permute.xlu0 %10475  ;;  %v10331_v59 = vcombine.low %v10315_v0, %v10316_v55 }
0x1132   : > { %v10496_v17 = vsel %vm6861_vm8, %v19159_v20, %v10476_v31 }
0x1133   : > { %v10474_v51 = vpop.permute.xlu1 %10473  ;;  %v10339_v6 = vrot.slane %v10331_v59, %v19156_v13 }
0x1134   : > { %v10495_v61 = vsel %vm6861_vm8, %v19160_v28, %v10474_v51 }
0x1135   : > { %v10510_v45 = vcombine.low %v10495_v61, %v10496_v17  ;;  %v10480_v56 = vpop.permute.xlu0 %10479 }
0x1136   : > { %v10498_v42 = vsel %vm6861_vm8, %v19170_v14, %v10480_v56 }
0x1137   : > { %v10524_v47 = vrot.slane %v10510_v45, %v19156_v13  ;;  %v10478_v60 = vpop.permute.xlu1 %10477 }
0x1138   : > { %v10497_v21 = vsel %vm6861_vm8, %v19167_v41, %v10478_v60 }
0x1139   : > { %v10525_v38 = vcombine.low %v10517_v63, %v10524_v47  ;;  %v10298_v12 = vpop.permute.xlu0 %10297  ;;  %v10526_v19 = vcombine.low %v10497_v21, %v10498_v42 }
0x113a   : > { %v10318_v9 = vsel %vm6861_vm8, %v19163_v1, %v10298_v12 }
0x113b   : > { %10816 = vst.msk [vmem:[%s18865_s14 + $0xe0] sm:$0xff] %vm9299_vm3, %v10525_v38  ;;  %v10296_v26 = vpop.permute.xlu1 %10295  ;;  %v10534_v24 = vrot.slane %v10526_v19, %v19156_v13 }
0x113c   : > { %v10317_v48 = vsel %vm6861_vm8, %v19164_v11, %v10296_v26 }
0x113d   : > { %v10332_v53 = vcombine.low %v10317_v48, %v10318_v9  ;;  %v10302_v3 = vpop.permute.xlu0 %10301 }
0x113e   : > { %v10320_v7 = vsel %vm6861_vm8, %v19166_v27, %v10302_v3 }
0x113f   : > { %v10346_v34 = vrot.slane %v10332_v53, %v19156_v13  ;;  %v10300_v8 = vpop.permute.xlu1 %10299 }
0x1140   : > { %v10319_v57 = vsel %vm6861_vm8, %v19165_v29, %v10300_v8 }
0x1141   : > { %v10347_v18 = vcombine.low %v10339_v6, %v10346_v34  ;;  %v10306_v4 = vpop.permute.xlu0 %10305  ;;  %v10348_v37 = vcombine.low %v10319_v57, %v10320_v7 }
0x1142   : > { %v10322_v43 = vsel %vm6861_vm8, %v19168_v30, %v10306_v4 }
0x1143   : > { %10812 = vst.msk [vmem:[%s18865_s14 + $0xc0] sm:$0xff] %vm9299_vm3, %v10347_v18  ;;  %v10304_v35 = vpop.permute.xlu1 %10303  ;;  %10370 = vrot.lane.b32.xlu0 %v10347_v18, %s13436_s25  ;;  %v10356_v25 = vrot.slane %v10348_v37, %v19156_v13 }
0x1144   : > { %v10321_v2 = vsel %vm6861_vm8, %v19169_v50, %v10304_v35 }
0x1145   : > { %v10349_v10 = vcombine.low %v10321_v2, %v10322_v43  ;;  %v10484_v16 = vpop.permute.xlu0 %10483 }
0x1146   : > { %v10500_v5 = vsel %vm6861_vm8, %v18832_v15, %v10484_v16 }
0x1147   : > { %v10363_v46 = vrot.slane %v10349_v10, %v19156_v13  ;;  %v10482_v54 = vpop.permute.xlu1 %10481  ;;  %10548 = vrot.lane.b32.xlu0 %v10525_v38, %s13436_s25 }
0x1148   : > { %v10499_v22 = vsel %vm6861_vm8, %v18838_v52, %v10482_v54 }
0x1149   : > { %v10364_v39 = vcombine.low %v10356_v25, %v10363_v46  ;;  %v10527_v44 = vcombine.low %v10499_v22, %v10500_v5 }
0x114b   : > { %10813 = vst.msk [vmem:[%s18865_s14 + $0xc8] sm:$0xff] %vm9299_vm3, %v10364_v39  ;;  %v10541_v58 = vrot.slane %v10527_v44, %v19156_v13  ;;  %10372 = vrot.lane.b32.xlu1 %v10364_v39, %s13436_s25 }
0x114d   : > { %v10542_v32 = vcombine.low %v10534_v24, %v10541_v58  ;;  %v9481_v15 = vpop.permute.xlu0 %9480 }
0x114e   : > { %10794 = vst.msk [vmem:[%s18865_s14 + $0x30] sm:$0xff] %vm9299_vm3, %v9481_v15 }
0x114f   : > { %10817 = vst.msk [vmem:[%s18865_s14 + $0xe8] sm:$0xff] %vm9299_vm3, %v10542_v32  ;;  %10550 = vrot.lane.b32.xlu1 %v10542_v32, %s13436_s25 }
0x1155   : > { %v9303_v52 = vpop.permute.xlu0 %9302 }
0x1156   : > { %10790 = vst.msk [vmem:[%s18865_s14 + $0x10] sm:$0xff] %vm9299_vm3, %v9303_v52 }
0x115d   : > { %v9483_v62 = vpop.permute.xlu1 %9482 }
0x115e   : > { %10795 = vst.msk [vmem:[%s18865_s14 + $0x38] sm:$0xff] %vm9299_vm3, %v9483_v62 }
0x1161   : > { %v9305_v13 = vpop.permute.xlu1 %9304 }
0x1162   : > { %10791 = vst.msk [vmem:[%s18865_s14 + $0x18] sm:$0xff] %vm9299_vm3, %v9305_v13 }
0x116d   : > { %v9837_v40 = vpop.permute.xlu0 %9836 }
0x116e   : > { %10802 = vst.msk [vmem:[%s18865_s14 + $0x70] sm:$0xff] %vm9299_vm3, %v9837_v40 }
0x1175   : > { %v9659_v23 = vpop.permute.xlu0 %9658 }
0x1176   : > { %10798 = vst.msk [vmem:[%s18865_s14 + $0x50] sm:$0xff] %vm9299_vm3, %v9659_v23 }
0x117d   : > { %v9839_v31 = vpop.permute.xlu1 %9838 }
0x117e   : > { %10803 = vst.msk [vmem:[%s18865_s14 + $0x78] sm:$0xff] %vm9299_vm3, %v9839_v31 }
0x1181   : > { %v9661_v33 = vpop.permute.xlu1 %9660 }
0x1182   : > { %10799 = vst.msk [vmem:[%s18865_s14 + $0x58] sm:$0xff] %vm9299_vm3, %v9661_v33 }
0x118d   : > { %v10193_v51 = vpop.permute.xlu0 %10192 }
0x118e   : > { %10810 = vst.msk [vmem:[%s18865_s14 + $0xb0] sm:$0xff] %vm9299_vm3, %v10193_v51 }
0x1195   : > { %v10015_v20 = vpop.permute.xlu0 %10014 }
0x1196   : > { %10806 = vst.msk [vmem:[%s18865_s14 + $0x90] sm:$0xff] %vm9299_vm3, %v10015_v20 }
0x119d   : > { %v10195_v17 = vpop.permute.xlu1 %10194 }
0x119e   : > { %10811 = vst.msk [vmem:[%s18865_s14 + $0xb8] sm:$0xff] %vm9299_vm3, %v10195_v17 }
0x11a1   : > { %v10017_v28 = vpop.permute.xlu1 %10016 }
0x11a2   : > { %10807 = vst.msk [vmem:[%s18865_s14 + $0x98] sm:$0xff] %vm9299_vm3, %v10017_v28 }
0x11b5   : > { %v10371_v61 = vpop.permute.xlu0 %10370 }
0x11b6   : > { %10814 = vst.msk [vmem:[%s18865_s14 + $0xd0] sm:$0xff] %vm9299_vm3, %v10371_v61 }
0x11b9   : > { %v10549_v45 = vpop.permute.xlu0 %10548 }
0x11ba   : > { %10818 = vst.msk [vmem:[%s18865_s14 + $0xf0] sm:$0xff] %vm9299_vm3, %v10549_v45 }
0x11bd   : > { %v10373_v56 = vpop.permute.xlu1 %10372 }
0x11be   : > { %10815 = vst.msk [vmem:[%s18865_s14 + $0xd8] sm:$0xff] %vm9299_vm3, %v10373_v56 }
0x11c1   : > { %v10551_v63 = vpop.permute.xlu1 %10550 }
0x11c2   : > { %10819 = vst.msk [vmem:[%s18865_s14 + $0xf8] sm:$0xff] %vm9299_vm3, %v10551_v63 }
0x11c3 PF: > { %s22_s21 = sadd.s32 1, %s13419_s21  }
0x11c4   : > { %p19_p4 = scmp.ge.s32.totalorder %s22_s21, 4  }
0x11c6   :  { %21 = sbr.rel (!%p19_p4) target bundleno = 1 (0x1), region = 187 }

</bundles_post_ra>
